<compile_context>
chip_gen: v7x
topology: tpu7x:2x2x1
jax: 0.10.0
libtpu: 0.0.40
codegen_flags: <defaults>
</compile_context>

<pallas_src>
import functools

import jax
import jax.numpy as jnp
import numpy as np
from jax.experimental import pallas as pl
from jax.experimental.pallas import tpu as pltpu

_HP = jax.lax.Precision.HIGHEST
_SQRT_1_3 = float(np.sqrt(1.0 / 3.0))
_INF = 1e5
_LN_EPS = 1e-5
_VMEM_LIMIT = 64 * 1024 * 1024


# ----------------------------------------------------------------------------
# Shared (wrapper + reference) helpers -- identical math on both paths.
# ----------------------------------------------------------------------------
def _linear(x, w):
    return jnp.einsum('...d,df->...f', x, w, precision=_HP)


def local2global(R, t, p):
    # R: (N,L,3,3), t: (N,L,3), p: (N,L,K,3) -> (N,L,K,3)
    return jnp.einsum('nlab,nlkb->nlka', R, p, precision=_HP) + t[:, :, None, :]


def global2local(R, t, q):
    # R^T (q - t)
    return jnp.einsum('nlba,nlkb->nlka', R, q - t[:, :, None, :], precision=_HP)


def _pick_tile(L, cap=128):
    """Largest multiple-of-8 divisor of L that is <= cap (or L itself)."""
    if L <= cap:
        return L
    t = cap - (cap % 8)
    while t >= 8:
        if L % t == 0:
            return t
        t -= 8
    return L


# ----------------------------------------------------------------------------
# Kernel A: fused logits + pair bias + masked softmax + aggregations.
#   Grid: (batch, query-tile).  All MXU dots are batched over heads with the
#   head axis leading ('hqd,hkd->hqk'); per-head epilogue works on dense
#   (TI, L) tiles and writes lane-dense (TI, H*X) output slices.
# ----------------------------------------------------------------------------
def _core_attention_kernel(q_ref, k_ref, v_ref, qp_ref, kps_ref, qns_ref,
                           kns_ref, vp_ref, pair_ref, wb_ref, mrow_ref,
                           acol_ref, onode_ref, opair_ref, opts_ref,
                           *, H, VD, C, PV3):
    # node logits (q pre-scaled by 1/sqrt(qd) * sqrt(1/3))
    ln = jnp.einsum('hqd,hkd->hqk', q_ref[0], k_ref[0],
                    preferred_element_type=jnp.float32)            # (H, TI, L)
    # spatial logits: gamma * ||qp - kp||^2 with gamma folded into the
    # precomputed qns / kns / kps operands.
    cross = jnp.einsum('hqp,hkp->hqk', qp_ref[0], kps_ref[0],
                       preferred_element_type=jnp.float32)          # (H, TI, L)
    base = ln + (qns_ref[0] + kns_ref[0] - 2.0 * cross) + acol_ref[0]

    pair_v = pair_ref[0]          # (TI, L, C)   resident pair tile
    wb = wb_ref[...]              # (H, 1, C)    pair-bias weights (pre-scaled)
    mrow = mrow_ref[0]            # (TI, 1)      query-row mask

    for h in range(H):            # static unroll; each step is dense (TI, L)
        # pair bias from the already-resident pair tile (lane contraction).
        bias_h = jnp.sum(pair_v * wb[h], axis=-1)                   # (TI, L)
        logit = base[h] + bias_h
        logit = logit - jnp.max(logit, axis=-1, keepdims=True)
        p = jnp.exp(logit)
        inv = pl.reciprocal(jnp.sum(p, axis=-1, keepdims=True), approx=True)
        alpha = p * inv * mrow                                      # (TI, L)

        onode_ref[0, :, h * VD:(h + 1) * VD] = jnp.dot(
            alpha, v_ref[0, h], preferred_element_type=jnp.float32)
        opts_ref[0, :, h * PV3:(h + 1) * PV3] = jnp.dot(
            alpha, vp_ref[0, h], preferred_element_type=jnp.float32)
        opair_ref[0, :, h * C:(h + 1) * C] = jnp.sum(
            alpha[:, :, None] * pair_v, axis=1)                     # (TI, C)


# ----------------------------------------------------------------------------
# Kernel B: fused out_transform + mask + residual LN + MLP + residual LN.
# ----------------------------------------------------------------------------
def _post_transform_kernel(feat_ref, x_ref, m_ref, wo_ref, bo_ref,
                           g1_ref, be1_ref, w1_ref, c1_ref, w2_ref, c2_ref,
                           w3_ref, c3_ref, g2_ref, be2_ref, o_ref):
    y = (jnp.dot(feat_ref[...], wo_ref[...],
                 preferred_element_type=jnp.float32) + bo_ref[...]) * m_ref[...]
    h = x_ref[...] + y

    mu = jnp.mean(h, axis=-1, keepdims=True)
    var = jnp.mean((h - mu) ** 2, axis=-1, keepdims=True)
    h1 = (h - mu) * jax.lax.rsqrt(var + _LN_EPS) * g1_ref[...] + be1_ref[...]

    z = jnp.maximum(jnp.dot(h1, w1_ref[...],
                            preferred_element_type=jnp.float32) + c1_ref[...], 0.0)
    z = jnp.maximum(jnp.dot(z, w2_ref[...],
                            preferred_element_type=jnp.float32) + c2_ref[...], 0.0)
    z = jnp.dot(z, w3_ref[...],
                preferred_element_type=jnp.float32) + c3_ref[...]
    h2 = h1 + z

    mu2 = jnp.mean(h2, axis=-1, keepdims=True)
    var2 = jnp.mean((h2 - mu2) ** 2, axis=-1, keepdims=True)
    o_ref[...] = (h2 - mu2) * jax.lax.rsqrt(var2 + _LN_EPS) * g2_ref[...] + be2_ref[...]


# ----------------------------------------------------------------------------
# Pallas-backed forward
# ----------------------------------------------------------------------------
def respair_block_pallas(params, R, coord, x, pair, mask):
    N, L, D = x.shape
    C = pair.shape[-1]
    H = params['Wbias'].shape[1]
    qd = params['Wq'].shape[1] // H
    vd = params['Wv'].shape[1] // H
    P = params['Wqp'].shape[1] // (H * 3)
    Pv = params['Wvp'].shape[1] // (H * 3)
    P3, Pv3 = P * 3, Pv * 3
    maskf = mask.astype(jnp.float32)

    # --- projections + frame transforms (plain JAX; tiny matmuls) ----------
    node_scale = _SQRT_1_3 / np.sqrt(qd)
    q = (_linear(x, params['Wq']).reshape(N, L, H, qd)
         .transpose(0, 2, 1, 3) * node_scale)                       # (N,H,L,qd)
    k = _linear(x, params['Wk']).reshape(N, L, H, qd).transpose(0, 2, 1, 3)
    v = _linear(x, params['Wv']).reshape(N, L, H, vd).transpose(0, 2, 1, 3)

    qp = local2global(R, coord, _linear(x, params['Wqp']).reshape(N, L, H * P, 3))
    qp = qp.reshape(N, L, H, P3).transpose(0, 2, 1, 3)               # (N,H,L,P3)
    kp = local2global(R, coord, _linear(x, params['Wkp']).reshape(N, L, H * P, 3))
    kp = kp.reshape(N, L, H, P3).transpose(0, 2, 1, 3)
    vp = local2global(R, coord, _linear(x, params['Wvp']).reshape(N, L, H * Pv, 3))
    vp = vp.reshape(N, L, H, Pv3).transpose(0, 2, 1, 3)              # (N,H,L,Pv3)

    # fold gamma * sqrt(2/(9P))/2 * sqrt(1/3) into the spatial-logit operands
    gamma = jax.nn.softplus(params['coef'])
    gs = (-gamma * np.sqrt(2.0 / (9.0 * P)) / 2.0 * _SQRT_1_3).astype(jnp.float32)
    gs4 = gs.reshape(1, H, 1, 1)
    kp_s = kp * gs4                                                  # (N,H,L,P3)
    qn_s = jnp.sum(qp * qp, axis=-1, keepdims=True) * gs4            # (N,H,L,1)
    kn_s = jnp.sum(kp * kp, axis=-1)[:, :, None, :] * gs4            # (N,H,1,L)

    wbt = (params['Wbias'].T * _SQRT_1_3).reshape(H, 1, C)           # (H,1,C)
    mrow = maskf[:, :, None]                                         # (N,L,1)
    acol = ((maskf - 1.0) * _INF)[:, None, :]                        # (N,1,L)

    TI = _pick_tile(L)
    n_it = L // TI
    kern_a = functools.partial(_core_attention_kernel, H=H, VD=vd, C=C, PV3=Pv3)
    o_node, o_pair, o_pts = pl.pallas_call(
        kern_a,
        out_shape=(
            jax.ShapeDtypeStruct((N, L, H * vd), jnp.float32),
            jax.ShapeDtypeStruct((N, L, H * C), jnp.float32),
            jax.ShapeDtypeStruct((N, L, H * Pv3), jnp.float32),
        ),
        grid=(N, n_it),
        in_specs=[
            pl.BlockSpec((1, H, TI, qd), lambda n, i: (n, 0, i, 0)),    # q (scaled)
            pl.BlockSpec((1, H, L, qd), lambda n, i: (n, 0, 0, 0)),     # k
            pl.BlockSpec((1, H, L, vd), lambda n, i: (n, 0, 0, 0)),     # v
            pl.BlockSpec((1, H, TI, P3), lambda n, i: (n, 0, i, 0)),    # q points
            pl.BlockSpec((1, H, L, P3), lambda n, i: (n, 0, 0, 0)),     # k points*g
            pl.BlockSpec((1, H, TI, 1), lambda n, i: (n, 0, i, 0)),     # |qp|^2 *g
            pl.BlockSpec((1, H, 1, L), lambda n, i: (n, 0, 0, 0)),      # |kp|^2 *g
            pl.BlockSpec((1, H, L, Pv3), lambda n, i: (n, 0, 0, 0)),    # v points
            pl.BlockSpec((1, TI, L, C), lambda n, i: (n, i, 0, 0)),     # pair feat
            pl.BlockSpec((H, 1, C), lambda n, i: (0, 0, 0)),            # pair-bias W
            pl.BlockSpec((1, TI, 1), lambda n, i: (n, i, 0)),           # row mask
            pl.BlockSpec((1, 1, L), lambda n, i: (n, 0, 0)),            # col mask bias
        ],
        out_specs=(
            pl.BlockSpec((1, TI, H * vd), lambda n, i: (n, i, 0)),
            pl.BlockSpec((1, TI, H * C), lambda n, i: (n, i, 0)),
            pl.BlockSpec((1, TI, H * Pv3), lambda n, i: (n, i, 0)),
        ),
        compiler_params=pltpu.CompilerParams(
            dimension_semantics=("parallel", "parallel"),
            vmem_limit_bytes=_VMEM_LIMIT),
    )(q, k, v, qp, kp_s, qn_s, kn_s, vp, pair, wbt, mrow, acol)

    # back to local frame + distance/direction features (O(N*L) plain JAX)
    agg_pts = o_pts.reshape(N, L, H * Pv, 3)
    featp = global2local(R, coord, agg_pts)                           # (N,L,H*Pv,3)
    dist = jnp.sqrt(jnp.sum(featp * featp, axis=-1))                  # (N,L,H*Pv)
    dirn = featp / (dist[..., None] + 1e-4)
    feat_all = jnp.concatenate(
        [o_pair, o_node, featp.reshape(N, L, -1), dist,
         dirn.reshape(N, L, -1)], axis=-1)
    Fin = feat_all.shape[-1]

    # --- kernel B over flattened residue rows (big row tiles) --------------
    NR = N * L
    TR = min(128, ((NR + 7) // 8) * 8)
    NRp = ((NR + TR - 1) // TR) * TR
    fa = feat_all.reshape(NR, Fin)
    xr = x.reshape(NR, D)
    mr = maskf.reshape(NR, 1)
    if NRp != NR:
        fa = jnp.pad(fa, ((0, NRp - NR), (0, 0)))
        xr = jnp.pad(xr, ((0, NRp - NR), (0, 0)))
        mr = jnp.pad(mr, ((0, NRp - NR), (0, 0)))

    row = lambda a: a.reshape(1, -1)
    out = pl.pallas_call(
        _post_transform_kernel,
        out_shape=jax.ShapeDtypeStruct((NRp, D), jnp.float32),
        grid=(NRp // TR,),
        in_specs=[
            pl.BlockSpec((TR, Fin), lambda r: (r, 0)),
            pl.BlockSpec((TR, D), lambda r: (r, 0)),
            pl.BlockSpec((TR, 1), lambda r: (r, 0)),
            pl.BlockSpec((Fin, D), lambda r: (0, 0)),   # W_out
            pl.BlockSpec((1, D), lambda r: (0, 0)),     # b_out
            pl.BlockSpec((1, D), lambda r: (0, 0)),     # ln1 gamma
            pl.BlockSpec((1, D), lambda r: (0, 0)),     # ln1 beta
            pl.BlockSpec((D, D), lambda r: (0, 0)),     # W1
            pl.BlockSpec((1, D), lambda r: (0, 0)),     # b1
            pl.BlockSpec((D, D), lambda r: (0, 0)),     # W2
            pl.BlockSpec((1, D), lambda r: (0, 0)),     # b2
            pl.BlockSpec((D, D), lambda r: (0, 0)),     # W3
            pl.BlockSpec((1, D), lambda r: (0, 0)),     # b3
            pl.BlockSpec((1, D), lambda r: (0, 0)),     # ln2 gamma
            pl.BlockSpec((1, D), lambda r: (0, 0)),     # ln2 beta
        ],
        out_specs=pl.BlockSpec((TR, D), lambda r: (r, 0)),
        compiler_params=pltpu.CompilerParams(
            dimension_semantics=("parallel",),
            vmem_limit_bytes=_VMEM_LIMIT),
    )(fa, xr, mr, params['Wo'], row(params['bo']), row(params['g1']),
      row(params['b1']), params['W1'], row(params['c1']), params['W2'],
      row(params['c2']), params['W3'], row(params['c3']),
      row(params['g2']), row(params['b2']))

    return out[:NR].reshape(N, L, D)


# ----------------------------------------------------------------------------
# Pure-JAX reference (mirrors the PyTorch forward)
# ----------------------------------------------------------------------------
def respair_block_reference(params, R, coord, x, pair, mask):
    N, L, D = x.shape
    C = pair.shape[-1]
    H = params['Wbias'].shape[1]
    qd = params['Wq'].shape[1] // H
    vd = params['Wv'].shape[1] // H
    P = params['Wqp'].shape[1] // (H * 3)
    Pv = params['Wvp'].shape[1] // (H * 3)
    maskb = mask.astype(bool)

    q = _linear(x, params['Wq']).reshape(N, L, H, qd)
    k = _linear(x, params['Wk']).reshape(N, L, H, qd)
    logits_node = jnp.einsum('nihd,njhd->nijh', q, k, precision=_HP) / np.sqrt(qd)
    logits_pair = _linear(pair, params['Wbias'])

    def qk_points(W):
        h_ = local2global(R, coord, _linear(x, W).reshape(N, L, H * P, 3))
        return h_.reshape(N, L, H, P * 3)

    qpt, kpt = qk_points(params['Wqp']), qk_points(params['Wkp'])
    sum_sq = jnp.sum((qpt[:, :, None, :, :] - kpt[:, None, :, :, :]) ** 2, axis=-1)
    gamma = jax.nn.softplus(params['coef'])
    logits_sp = sum_sq * (-gamma * np.sqrt(2.0 / (9.0 * P)) / 2.0)

    logits = (logits_node + logits_pair + logits_sp) * _SQRT_1_3
    mrow = maskb[:, :, None, None]
    mcol = maskb[:, None, :, None]
    logits = jnp.where(mrow & mcol, logits, logits - _INF)
    alpha = jax.nn.softmax(logits, axis=2)
    alpha = jnp.where(mrow, alpha, 0.0)

    v = _linear(x, params['Wv']).reshape(N, L, H, vd)
    feat_node = jnp.einsum('nijh,njhd->nihd', alpha, v, precision=_HP).reshape(N, L, H * vd)
    feat_pair = jnp.einsum('nijh,nijc->nihc', alpha, pair, precision=_HP).reshape(N, L, H * C)

    vpt = local2global(R, coord, _linear(x, params['Wvp']).reshape(N, L, H * Pv, 3))
    vpt = vpt.reshape(N, L, H, Pv, 3)
    agg = jnp.einsum('nijh,njhpa->nihpa', alpha, vpt, precision=_HP)
    featp = global2local(R, coord, agg.reshape(N, L, H * Pv, 3))
    dist = jnp.sqrt(jnp.sum(featp ** 2, axis=-1))
    dirn = featp / (dist[..., None] + 1e-4)
    feat_spatial = jnp.concatenate(
        [featp.reshape(N, L, -1), dist, dirn.reshape(N, L, -1)], axis=-1)

    feat_all = jnp.concatenate([feat_pair, feat_node, feat_spatial], axis=-1)
    y = _linear(feat_all, params['Wo']) + params['bo']
    y = jnp.where(maskb[:, :, None], y, 0.0)

    def layer_norm(h, g, b):
        mu = jnp.mean(h, axis=-1, keepdims=True)
        var = jnp.mean((h - mu) ** 2, axis=-1, keepdims=True)
        return (h - mu) * jax.lax.rsqrt(var + _LN_EPS) * g + b

    h1 = layer_norm(x + y, params['g1'], params['b1'])
    z = jnp.maximum(_linear(h1, params['W1']) + params['c1'], 0.0)
    z = jnp.maximum(_linear(z, params['W2']) + params['c2'], 0.0)
    z = _linear(z, params['W3']) + params['c3']
    return layer_norm(h1 + z, params['g2'], params['b2'])


# ----------------------------------------------------------------------------
# Parameter / input construction
# ----------------------------------------------------------------------------
def init_params(key, D, C, H, qd, vd, P, Pv):
    ks = jax.random.split(key, 12)

    def lin(k_, fin, fout):
        return jax.random.normal(k_, (fin, fout), jnp.float32) / np.sqrt(fin)

    Fin = H * C + H * vd + H * Pv * 7
    return dict(
        Wq=lin(ks[0], D, H * qd), Wk=lin(ks[1], D, H * qd), Wv=lin(ks[2], D, H * vd),
        Wbias=lin(ks[3], C, H),
        coef=jnp.full((H,), float(np.log(np.e - 1.0)), jnp.float32),
        Wqp=lin(ks[4], D, H * P * 3), Wkp=lin(ks[5], D, H * P * 3),
        Wvp=lin(ks[6], D, H * Pv * 3),
        Wo=lin(ks[7], Fin, D),
        bo=0.02 * jax.random.normal(ks[8], (D,), jnp.float32),
        W1=lin(ks[9], D, D), c1=jnp.zeros((D,), jnp.float32),
        W2=lin(ks[10], D, D), c2=jnp.zeros((D,), jnp.float32),
        W3=lin(ks[11], D, D), c3=jnp.zeros((D,), jnp.float32),
        g1=jnp.ones((D,), jnp.float32), b1=jnp.zeros((D,), jnp.float32),
        g2=jnp.ones((D,), jnp.float32), b2=jnp.zeros((D,), jnp.float32),
    )


def random_rotations(key, shape):
    qv = jax.random.normal(key, shape + (4,), dtype=jnp.float32)
    qv = qv / jnp.linalg.norm(qv, axis=-1, keepdims=True)
    w, x, y, z = qv[..., 0], qv[..., 1], qv[..., 2], qv[..., 3]
    r0 = jnp.stack([1 - 2 * (y * y + z * z), 2 * (x * y - z * w), 2 * (x * z + y * w)], -1)
    r1 = jnp.stack([2 * (x * y + z * w), 1 - 2 * (x * x + z * z), 2 * (y * z - x * w)], -1)
    r2 = jnp.stack([2 * (x * z - y * w), 2 * (y * z + x * w), 1 - 2 * (x * x + y * y)], -1)
    return jnp.stack([r0, r1, r2], axis=-2)


if __name__ == "__main__":
    N, L = 2, 16                      # batch, sequence length
    D, C = 32, 16                     # residue_dim, pair_dim
    H, qd, vd, P, Pv = 4, 8, 8, 4, 4  # heads, q_dim, v_dim, num_q_points, num_v_points

    root = jax.random.PRNGKey(0)
    kparam, kR, kt, kx, kpair = jax.random.split(root, 5)

    params = init_params(kparam, D, C, H, qd, vd, P, Pv)
    R = random_rotations(kR, (N, L))                                   # (N,L,3,3)
    coord = 2.0 * jax.random.normal(kt, (N, L, 3), dtype=jnp.float32)  # (N,L,3)
    residue_feat = jax.random.normal(kx, (N, L, D), dtype=jnp.float32) # (N,L,D)
    pair_feat = jax.random.normal(kpair, (N, L, L, C), dtype=jnp.float32)
    mask = jnp.ones((N, L), dtype=bool).at[0, L - 3:].set(False)       # (N,L)

    out = jax.jit(respair_block_pallas)(params, R, coord, residue_feat,
                                        pair_feat, mask)
    out = jax.block_until_ready(out)

    ref = jax.jit(respair_block_reference)(params, R, coord, residue_feat,
                                           pair_feat, mask)
    ref = jax.block_until_ready(ref)

    assert out.shape == (N, L, D)
    np.testing.assert_allclose(np.asarray(out), np.asarray(ref),
                               rtol=2e-2, atol=2e-2)
    print("KERNEL_OK")
</pallas_src>

<mosaic_0001>
module attributes {stable_mosaic.version = 11 : i64} {
  func.func @_core_attention_kernel(%arg0: i32, %arg1: i32, %arg2: memref<1x4x16x8xf32, #tpu.memory_space<vmem>>, %arg3: memref<1x4x16x8xf32, #tpu.memory_space<vmem>>, %arg4: memref<1x4x16x8xf32, #tpu.memory_space<vmem>>, %arg5: memref<1x4x16x12xf32, #tpu.memory_space<vmem>>, %arg6: memref<1x4x16x12xf32, #tpu.memory_space<vmem>>, %arg7: memref<1x4x16x1xf32, #tpu.memory_space<vmem>>, %arg8: memref<1x4x1x16xf32, #tpu.memory_space<vmem>>, %arg9: memref<1x4x16x12xf32, #tpu.memory_space<vmem>>, %arg10: memref<1x16x16x16xf32, #tpu.memory_space<vmem>>, %arg11: memref<4x1x16xf32, #tpu.memory_space<vmem>>, %arg12: memref<1x16x1xf32, #tpu.memory_space<vmem>>, %arg13: memref<1x1x16xf32, #tpu.memory_space<vmem>>, %arg14: memref<1x16x32xf32, #tpu.memory_space<vmem>>, %arg15: memref<1x16x64xf32, #tpu.memory_space<vmem>>, %arg16: memref<1x16x48xf32, #tpu.memory_space<vmem>>) attributes {dimension_semantics = [#tpu.dimension_semantics<parallel>, #tpu.dimension_semantics<parallel>], iteration_bounds = array<i64: 2, 1>, scalar_prefetch = 0 : i64, scratch_operands = 0 : i64, tpu.core_type = #tpu.core_type<tc>, window_params = [{transform_indices = @transform_0, window_bounds = array<i64: 1, 4, 16, 8>}, {transform_indices = @transform_1, window_bounds = array<i64: 1, 4, 16, 8>}, {transform_indices = @transform_2, window_bounds = array<i64: 1, 4, 16, 8>}, {transform_indices = @transform_3, window_bounds = array<i64: 1, 4, 16, 12>}, {transform_indices = @transform_4, window_bounds = array<i64: 1, 4, 16, 12>}, {transform_indices = @transform_5, window_bounds = array<i64: 1, 4, 16, 1>}, {transform_indices = @transform_6, window_bounds = array<i64: 1, 4, 1, 16>}, {transform_indices = @transform_7, window_bounds = array<i64: 1, 4, 16, 12>}, {transform_indices = @transform_8, window_bounds = array<i64: 1, 16, 16, 16>}, {pipeline_mode = #tpu.pipeline_mode<synchronous>, transform_indices = @transform_9, window_bounds = array<i64: 4, 1, 16>}, {transform_indices = @transform_10, window_bounds = array<i64: 1, 16, 1>}, {transform_indices = @transform_11, window_bounds = array<i64: 1, 1, 16>}, {transform_indices = @transform_12, window_bounds = array<i64: 1, 16, 32>}, {transform_indices = @transform_13, window_bounds = array<i64: 1, 16, 64>}, {transform_indices = @transform_14, window_bounds = array<i64: 1, 16, 48>}]} {
    %c0 = arith.constant 0 : index
    %c0_0 = arith.constant 0 : index
    %c0_1 = arith.constant 0 : index
    %c0_2 = arith.constant 0 : index
    %0 = vector.load %arg2[%c0, %c0_0, %c0_1, %c0_2] : memref<1x4x16x8xf32, #tpu.memory_space<vmem>>, vector<1x4x16x8xf32>
    %1 = vector.shape_cast %0 : vector<1x4x16x8xf32> to vector<4x16x8xf32>
    %c0_3 = arith.constant 0 : index
    %c0_4 = arith.constant 0 : index
    %c0_5 = arith.constant 0 : index
    %c0_6 = arith.constant 0 : index
    %2 = vector.load %arg3[%c0_3, %c0_4, %c0_5, %c0_6] : memref<1x4x16x8xf32, #tpu.memory_space<vmem>>, vector<1x4x16x8xf32>
    %3 = vector.shape_cast %2 : vector<1x4x16x8xf32> to vector<4x16x8xf32>
    "tpu.trace_start"() <{level = 10 : i32, message = "hqd,hkd->hqk"}> : () -> ()
    %cst = arith.constant dense<0.000000e+00> : vector<4x16x16xf32>
    %4 = tpu.matmul %1, %3, %cst {dimension_numbers = #tpu.dot_dimension_numbers<[2], [2], [1], [1], [0, 0, 0, 1, 1, 1], [0], [0]>} : vector<4x16x8xf32>, vector<4x16x8xf32>, vector<4x16x16xf32> -> vector<4x16x16xf32>
    "tpu.trace_stop"() : () -> ()
    %c0_7 = arith.constant 0 : index
    %c0_8 = arith.constant 0 : index
    %c0_9 = arith.constant 0 : index
    %c0_10 = arith.constant 0 : index
    %5 = vector.load %arg5[%c0_7, %c0_8, %c0_9, %c0_10] : memref<1x4x16x12xf32, #tpu.memory_space<vmem>>, vector<1x4x16x12xf32>
    %6 = vector.shape_cast %5 : vector<1x4x16x12xf32> to vector<4x16x12xf32>
    %c0_11 = arith.constant 0 : index
    %c0_12 = arith.constant 0 : index
    %c0_13 = arith.constant 0 : index
    %c0_14 = arith.constant 0 : index
    %7 = vector.load %arg6[%c0_11, %c0_12, %c0_13, %c0_14] : memref<1x4x16x12xf32, #tpu.memory_space<vmem>>, vector<1x4x16x12xf32>
    %8 = vector.shape_cast %7 : vector<1x4x16x12xf32> to vector<4x16x12xf32>
    "tpu.trace_start"() <{level = 10 : i32, message = "hqp,hkp->hqk"}> : () -> ()
    %cst_15 = arith.constant dense<0.000000e+00> : vector<4x16x16xf32>
    %9 = tpu.matmul %6, %8, %cst_15 {dimension_numbers = #tpu.dot_dimension_numbers<[2], [2], [1], [1], [0, 0, 0, 1, 1, 1], [0], [0]>} : vector<4x16x12xf32>, vector<4x16x12xf32>, vector<4x16x16xf32> -> vector<4x16x16xf32>
    "tpu.trace_stop"() : () -> ()
    %c0_16 = arith.constant 0 : index
    %c0_17 = arith.constant 0 : index
    %c0_18 = arith.constant 0 : index
    %c0_19 = arith.constant 0 : index
    %10 = vector.load %arg7[%c0_16, %c0_17, %c0_18, %c0_19] : memref<1x4x16x1xf32, #tpu.memory_space<vmem>>, vector<1x4x16x1xf32>
    %11 = vector.shape_cast %10 : vector<1x4x16x1xf32> to vector<4x16x1xf32>
    %c0_20 = arith.constant 0 : index
    %c0_21 = arith.constant 0 : index
    %c0_22 = arith.constant 0 : index
    %c0_23 = arith.constant 0 : index
    %12 = vector.load %arg8[%c0_20, %c0_21, %c0_22, %c0_23] : memref<1x4x1x16xf32, #tpu.memory_space<vmem>>, vector<1x4x1x16xf32>
    %13 = vector.shape_cast %12 : vector<1x4x1x16xf32> to vector<4x1x16xf32>
    %14 = vector.broadcast %11 : vector<4x16x1xf32> to vector<4x16x16xf32>
    %15 = vector.broadcast %13 : vector<4x1x16xf32> to vector<4x16x16xf32>
    %16 = arith.addf %14, %15 : vector<4x16x16xf32>
    %cst_24 = arith.constant 2.000000e+00 : f32
    %17 = vector.broadcast %cst_24 : f32 to vector<4x16x16xf32>
    %18 = arith.mulf %17, %9 : vector<4x16x16xf32>
    %19 = arith.subf %16, %18 : vector<4x16x16xf32>
    %20 = arith.addf %4, %19 : vector<4x16x16xf32>
    %c0_25 = arith.constant 0 : index
    %c0_26 = arith.constant 0 : index
    %c0_27 = arith.constant 0 : index
    %21 = vector.load %arg13[%c0_25, %c0_26, %c0_27] : memref<1x1x16xf32, #tpu.memory_space<vmem>>, vector<1x1x16xf32>
    %22 = vector.shape_cast %21 : vector<1x1x16xf32> to vector<1x16xf32>
    %23 = vector.shape_cast %22 : vector<1x16xf32> to vector<1x1x16xf32>
    %24 = vector.broadcast %23 : vector<1x1x16xf32> to vector<4x16x16xf32>
    %25 = arith.addf %20, %24 : vector<4x16x16xf32>
    %c0_28 = arith.constant 0 : index
    %c0_29 = arith.constant 0 : index
    %c0_30 = arith.constant 0 : index
    %c0_31 = arith.constant 0 : index
    %26 = vector.load %arg10[%c0_28, %c0_29, %c0_30, %c0_31] : memref<1x16x16x16xf32, #tpu.memory_space<vmem>>, vector<1x16x16x16xf32>
    %27 = vector.shape_cast %26 : vector<1x16x16x16xf32> to vector<16x16x16xf32>
    %c0_32 = arith.constant 0 : index
    %c0_33 = arith.constant 0 : index
    %c0_34 = arith.constant 0 : index
    %28 = vector.load %arg11[%c0_32, %c0_33, %c0_34] : memref<4x1x16xf32, #tpu.memory_space<vmem>>, vector<4x1x16xf32>
    %c0_35 = arith.constant 0 : index
    %c0_36 = arith.constant 0 : index
    %c0_37 = arith.constant 0 : index
    %29 = vector.load %arg12[%c0_35, %c0_36, %c0_37] : memref<1x16x1xf32, #tpu.memory_space<vmem>>, vector<1x16x1xf32>
    %30 = vector.shape_cast %29 : vector<1x16x1xf32> to vector<16x1xf32>
    %31 = vector.extract_strided_slice %28 {offsets = [0, 0, 0], sizes = [1, 1, 16], strides = [1, 1, 1]} : vector<4x1x16xf32> to vector<1x1x16xf32>
    %32 = vector.shape_cast %31 : vector<1x1x16xf32> to vector<1x16xf32>
    %33 = vector.shape_cast %32 : vector<1x16xf32> to vector<1x1x16xf32>
    %34 = vector.broadcast %33 : vector<1x1x16xf32> to vector<16x16x16xf32>
    %35 = arith.mulf %27, %34 : vector<16x16x16xf32>
    %cst_38 = arith.constant dense<0.000000e+00> : vector<16x16xf32>
    %36 = vector.multi_reduction <add>, %35, %cst_38 [2] : vector<16x16x16xf32> to vector<16x16xf32>
    %37 = vector.extract_strided_slice %25 {offsets = [0, 0, 0], sizes = [1, 16, 16], strides = [1, 1, 1]} : vector<4x16x16xf32> to vector<1x16x16xf32>
    %38 = vector.shape_cast %37 : vector<1x16x16xf32> to vector<16x16xf32>
    %39 = arith.addf %38, %36 : vector<16x16xf32>
    %cst_39 = arith.constant dense<0xFF800000> : vector<16xf32>
    %40 = vector.multi_reduction <maximumf>, %39, %cst_39 [1] : vector<16x16xf32> to vector<16xf32>
    %41 = vector.shape_cast %40 : vector<16xf32> to vector<16x1xf32>
    %42 = vector.broadcast %41 : vector<16x1xf32> to vector<16x16xf32>
    %43 = arith.subf %39, %42 : vector<16x16xf32>
    %44 = math.exp %43 : vector<16x16xf32>
    %cst_40 = arith.constant dense<0.000000e+00> : vector<16xf32>
    %45 = vector.multi_reduction <add>, %44, %cst_40 [1] : vector<16x16xf32> to vector<16xf32>
    %46 = vector.shape_cast %45 : vector<16xf32> to vector<16x1xf32>
    %47 = tpu.reciprocal %46 {approx = true} : vector<16x1xf32> -> vector<16x1xf32>
    %48 = vector.broadcast %47 : vector<16x1xf32> to vector<16x16xf32>
    %49 = arith.mulf %44, %48 : vector<16x16xf32>
    %50 = vector.broadcast %30 : vector<16x1xf32> to vector<16x16xf32>
    %51 = arith.mulf %49, %50 : vector<16x16xf32>
    %c0_41 = arith.constant 0 : index
    %c0_42 = arith.constant 0 : index
    %c0_43 = arith.constant 0 : index
    %c0_44 = arith.constant 0 : index
    %52 = vector.load %arg4[%c0_41, %c0_42, %c0_43, %c0_44] : memref<1x4x16x8xf32, #tpu.memory_space<vmem>>, vector<1x1x16x8xf32>
    %53 = vector.shape_cast %52 : vector<1x1x16x8xf32> to vector<16x8xf32>
    %cst_45 = arith.constant dense<0.000000e+00> : vector<16x8xf32>
    %54 = tpu.matmul %51, %53, %cst_45 {dimension_numbers = #tpu.dot_dimension_numbers<[1], [0], [0], [1], [0, 0, 1, 1], [], []>} : vector<16x16xf32>, vector<16x8xf32>, vector<16x8xf32> -> vector<16x8xf32>
    %c0_46 = arith.constant 0 : index
    %c0_47 = arith.constant 0 : index
    %c0_48 = arith.constant 0 : index
    %55 = vector.load %arg14[%c0_46, %c0_47, %c0_48] : memref<1x16x32xf32, #tpu.memory_space<vmem>>, vector<1x16x8xf32>
    %56 = vector.shape_cast %55 : vector<1x16x8xf32> to vector<16x8xf32>
    %57 = vector.shape_cast %54 : vector<16x8xf32> to vector<1x16x8xf32>
    tpu.vector_store %arg14[%c0_46, %c0_47, %c0_48], %57 {strides = array<i32>} : memref<1x16x32xf32, #tpu.memory_space<vmem>>, vector<1x16x8xf32>,
    %c0_49 = arith.constant 0 : index
    %c0_50 = arith.constant 0 : index
    %c0_51 = arith.constant 0 : index
    %c0_52 = arith.constant 0 : index
    %58 = vector.load %arg9[%c0_49, %c0_50, %c0_51, %c0_52] : memref<1x4x16x12xf32, #tpu.memory_space<vmem>>, vector<1x1x16x12xf32>
    %59 = vector.shape_cast %58 : vector<1x1x16x12xf32> to vector<16x12xf32>
    %cst_53 = arith.constant dense<0.000000e+00> : vector<16x12xf32>
    %60 = tpu.matmul %51, %59, %cst_53 {dimension_numbers = #tpu.dot_dimension_numbers<[1], [0], [0], [1], [0, 0, 1, 1], [], []>} : vector<16x16xf32>, vector<16x12xf32>, vector<16x12xf32> -> vector<16x12xf32>
    %c0_54 = arith.constant 0 : index
    %c0_55 = arith.constant 0 : index
    %c0_56 = arith.constant 0 : index
    %61 = vector.load %arg16[%c0_54, %c0_55, %c0_56] : memref<1x16x48xf32, #tpu.memory_space<vmem>>, vector<1x16x12xf32>
    %62 = vector.shape_cast %61 : vector<1x16x12xf32> to vector<16x12xf32>
    %63 = vector.shape_cast %60 : vector<16x12xf32> to vector<1x16x12xf32>
    tpu.vector_store %arg16[%c0_54, %c0_55, %c0_56], %63 {strides = array<i32>} : memref<1x16x48xf32, #tpu.memory_space<vmem>>, vector<1x16x12xf32>,
    %64 = vector.shape_cast %51 : vector<16x16xf32> to vector<16x16x1xf32>
    %65 = vector.broadcast %64 : vector<16x16x1xf32> to vector<16x16x16xf32>
    %66 = arith.mulf %65, %27 : vector<16x16x16xf32>
    %cst_57 = arith.constant dense<0.000000e+00> : vector<16x16xf32>
    %67 = vector.multi_reduction <add>, %66, %cst_57 [1] : vector<16x16x16xf32> to vector<16x16xf32>
    %c0_58 = arith.constant 0 : index
    %c0_59 = arith.constant 0 : index
    %c0_60 = arith.constant 0 : index
    %68 = vector.load %arg15[%c0_58, %c0_59, %c0_60] : memref<1x16x64xf32, #tpu.memory_space<vmem>>, vector<1x16x16xf32>
    %69 = vector.shape_cast %68 : vector<1x16x16xf32> to vector<16x16xf32>
    %70 = vector.shape_cast %67 : vector<16x16xf32> to vector<1x16x16xf32>
    tpu.vector_store %arg15[%c0_58, %c0_59, %c0_60], %70 {strides = array<i32>} : memref<1x16x64xf32, #tpu.memory_space<vmem>>, vector<1x16x16xf32>,
    %71 = vector.extract_strided_slice %28 {offsets = [1, 0, 0], sizes = [1, 1, 16], strides = [1, 1, 1]} : vector<4x1x16xf32> to vector<1x1x16xf32>
    %72 = vector.shape_cast %71 : vector<1x1x16xf32> to vector<1x16xf32>
    %73 = vector.shape_cast %72 : vector<1x16xf32> to vector<1x1x16xf32>
    %74 = vector.broadcast %73 : vector<1x1x16xf32> to vector<16x16x16xf32>
    %75 = arith.mulf %27, %74 : vector<16x16x16xf32>
    %cst_61 = arith.constant dense<0.000000e+00> : vector<16x16xf32>
    %76 = vector.multi_reduction <add>, %75, %cst_61 [2] : vector<16x16x16xf32> to vector<16x16xf32>
    %77 = vector.extract_strided_slice %25 {offsets = [1, 0, 0], sizes = [1, 16, 16], strides = [1, 1, 1]} : vector<4x16x16xf32> to vector<1x16x16xf32>
    %78 = vector.shape_cast %77 : vector<1x16x16xf32> to vector<16x16xf32>
    %79 = arith.addf %78, %76 : vector<16x16xf32>
    %cst_62 = arith.constant dense<0xFF800000> : vector<16xf32>
    %80 = vector.multi_reduction <maximumf>, %79, %cst_62 [1] : vector<16x16xf32> to vector<16xf32>
    %81 = vector.shape_cast %80 : vector<16xf32> to vector<16x1xf32>
    %82 = vector.broadcast %81 : vector<16x1xf32> to vector<16x16xf32>
    %83 = arith.subf %79, %82 : vector<16x16xf32>
    %84 = math.exp %83 : vector<16x16xf32>
    %cst_63 = arith.constant dense<0.000000e+00> : vector<16xf32>
    %85 = vector.multi_reduction <add>, %84, %cst_63 [1] : vector<16x16xf32> to vector<16xf32>
    %86 = vector.shape_cast %85 : vector<16xf32> to vector<16x1xf32>
    %87 = tpu.reciprocal %86 {approx = true} : vector<16x1xf32> -> vector<16x1xf32>
    %88 = vector.broadcast %87 : vector<16x1xf32> to vector<16x16xf32>
    %89 = arith.mulf %84, %88 : vector<16x16xf32>
    %90 = vector.broadcast %30 : vector<16x1xf32> to vector<16x16xf32>
    %91 = arith.mulf %89, %90 : vector<16x16xf32>
    %c0_64 = arith.constant 0 : index
    %c1 = arith.constant 1 : index
    %c0_65 = arith.constant 0 : index
    %c0_66 = arith.constant 0 : index
    %92 = vector.load %arg4[%c0_64, %c1, %c0_65, %c0_66] : memref<1x4x16x8xf32, #tpu.memory_space<vmem>>, vector<1x1x16x8xf32>
    %93 = vector.shape_cast %92 : vector<1x1x16x8xf32> to vector<16x8xf32>
    %cst_67 = arith.constant dense<0.000000e+00> : vector<16x8xf32>
    %94 = tpu.matmul %91, %93, %cst_67 {dimension_numbers = #tpu.dot_dimension_numbers<[1], [0], [0], [1], [0, 0, 1, 1], [], []>} : vector<16x16xf32>, vector<16x8xf32>, vector<16x8xf32> -> vector<16x8xf32>
    %c0_68 = arith.constant 0 : index
    %c0_69 = arith.constant 0 : index
    %c8 = arith.constant 8 : index
    %95 = vector.load %arg14[%c0_68, %c0_69, %c8] : memref<1x16x32xf32, #tpu.memory_space<vmem>>, vector<1x16x8xf32>
    %96 = vector.shape_cast %95 : vector<1x16x8xf32> to vector<16x8xf32>
    %97 = vector.shape_cast %94 : vector<16x8xf32> to vector<1x16x8xf32>
    tpu.vector_store %arg14[%c0_68, %c0_69, %c8], %97 {strides = array<i32>} : memref<1x16x32xf32, #tpu.memory_space<vmem>>, vector<1x16x8xf32>,
    %c0_70 = arith.constant 0 : index
    %c1_71 = arith.constant 1 : index
    %c0_72 = arith.constant 0 : index
    %c0_73 = arith.constant 0 : index
    %98 = vector.load %arg9[%c0_70, %c1_71, %c0_72, %c0_73] : memref<1x4x16x12xf32, #tpu.memory_space<vmem>>, vector<1x1x16x12xf32>
    %99 = vector.shape_cast %98 : vector<1x1x16x12xf32> to vector<16x12xf32>
    %cst_74 = arith.constant dense<0.000000e+00> : vector<16x12xf32>
    %100 = tpu.matmul %91, %99, %cst_74 {dimension_numbers = #tpu.dot_dimension_numbers<[1], [0], [0], [1], [0, 0, 1, 1], [], []>} : vector<16x16xf32>, vector<16x12xf32>, vector<16x12xf32> -> vector<16x12xf32>
    %c0_75 = arith.constant 0 : index
    %c0_76 = arith.constant 0 : index
    %c12 = arith.constant 12 : index
    %101 = vector.load %arg16[%c0_75, %c0_76, %c12] : memref<1x16x48xf32, #tpu.memory_space<vmem>>, vector<1x16x12xf32>
    %102 = vector.shape_cast %101 : vector<1x16x12xf32> to vector<16x12xf32>
    %103 = vector.shape_cast %100 : vector<16x12xf32> to vector<1x16x12xf32>
    tpu.vector_store %arg16[%c0_75, %c0_76, %c12], %103 {strides = array<i32>} : memref<1x16x48xf32, #tpu.memory_space<vmem>>, vector<1x16x12xf32>,
    %104 = vector.shape_cast %91 : vector<16x16xf32> to vector<16x16x1xf32>
    %105 = vector.broadcast %104 : vector<16x16x1xf32> to vector<16x16x16xf32>
    %106 = arith.mulf %105, %27 : vector<16x16x16xf32>
    %cst_77 = arith.constant dense<0.000000e+00> : vector<16x16xf32>
    %107 = vector.multi_reduction <add>, %106, %cst_77 [1] : vector<16x16x16xf32> to vector<16x16xf32>
    %c0_78 = arith.constant 0 : index
    %c0_79 = arith.constant 0 : index
    %c16 = arith.constant 16 : index
    %108 = vector.load %arg15[%c0_78, %c0_79, %c16] : memref<1x16x64xf32, #tpu.memory_space<vmem>>, vector<1x16x16xf32>
    %109 = vector.shape_cast %108 : vector<1x16x16xf32> to vector<16x16xf32>
    %110 = vector.shape_cast %107 : vector<16x16xf32> to vector<1x16x16xf32>
    tpu.vector_store %arg15[%c0_78, %c0_79, %c16], %110 {strides = array<i32>} : memref<1x16x64xf32, #tpu.memory_space<vmem>>, vector<1x16x16xf32>,
    %111 = vector.extract_strided_slice %28 {offsets = [2, 0, 0], sizes = [1, 1, 16], strides = [1, 1, 1]} : vector<4x1x16xf32> to vector<1x1x16xf32>
    %112 = vector.shape_cast %111 : vector<1x1x16xf32> to vector<1x16xf32>
    %113 = vector.shape_cast %112 : vector<1x16xf32> to vector<1x1x16xf32>
    %114 = vector.broadcast %113 : vector<1x1x16xf32> to vector<16x16x16xf32>
    %115 = arith.mulf %27, %114 : vector<16x16x16xf32>
    %cst_80 = arith.constant dense<0.000000e+00> : vector<16x16xf32>
    %116 = vector.multi_reduction <add>, %115, %cst_80 [2] : vector<16x16x16xf32> to vector<16x16xf32>
    %117 = vector.extract_strided_slice %25 {offsets = [2, 0, 0], sizes = [1, 16, 16], strides = [1, 1, 1]} : vector<4x16x16xf32> to vector<1x16x16xf32>
    %118 = vector.shape_cast %117 : vector<1x16x16xf32> to vector<16x16xf32>
    %119 = arith.addf %118, %116 : vector<16x16xf32>
    %cst_81 = arith.constant dense<0xFF800000> : vector<16xf32>
    %120 = vector.multi_reduction <maximumf>, %119, %cst_81 [1] : vector<16x16xf32> to vector<16xf32>
    %121 = vector.shape_cast %120 : vector<16xf32> to vector<16x1xf32>
    %122 = vector.broadcast %121 : vector<16x1xf32> to vector<16x16xf32>
    %123 = arith.subf %119, %122 : vector<16x16xf32>
    %124 = math.exp %123 : vector<16x16xf32>
    %cst_82 = arith.constant dense<0.000000e+00> : vector<16xf32>
    %125 = vector.multi_reduction <add>, %124, %cst_82 [1] : vector<16x16xf32> to vector<16xf32>
    %126 = vector.shape_cast %125 : vector<16xf32> to vector<16x1xf32>
    %127 = tpu.reciprocal %126 {approx = true} : vector<16x1xf32> -> vector<16x1xf32>
    %128 = vector.broadcast %127 : vector<16x1xf32> to vector<16x16xf32>
    %129 = arith.mulf %124, %128 : vector<16x16xf32>
    %130 = vector.broadcast %30 : vector<16x1xf32> to vector<16x16xf32>
    %131 = arith.mulf %129, %130 : vector<16x16xf32>
    %c0_83 = arith.constant 0 : index
    %c2 = arith.constant 2 : index
    %c0_84 = arith.constant 0 : index
    %c0_85 = arith.constant 0 : index
    %132 = vector.load %arg4[%c0_83, %c2, %c0_84, %c0_85] : memref<1x4x16x8xf32, #tpu.memory_space<vmem>>, vector<1x1x16x8xf32>
    %133 = vector.shape_cast %132 : vector<1x1x16x8xf32> to vector<16x8xf32>
    %cst_86 = arith.constant dense<0.000000e+00> : vector<16x8xf32>
    %134 = tpu.matmul %131, %133, %cst_86 {dimension_numbers = #tpu.dot_dimension_numbers<[1], [0], [0], [1], [0, 0, 1, 1], [], []>} : vector<16x16xf32>, vector<16x8xf32>, vector<16x8xf32> -> vector<16x8xf32>
    %c0_87 = arith.constant 0 : index
    %c0_88 = arith.constant 0 : index
    %c16_89 = arith.constant 16 : index
    %135 = vector.load %arg14[%c0_87, %c0_88, %c16_89] : memref<1x16x32xf32, #tpu.memory_space<vmem>>, vector<1x16x8xf32>
    %136 = vector.shape_cast %135 : vector<1x16x8xf32> to vector<16x8xf32>
    %137 = vector.shape_cast %134 : vector<16x8xf32> to vector<1x16x8xf32>
    tpu.vector_store %arg14[%c0_87, %c0_88, %c16_89], %137 {strides = array<i32>} : memref<1x16x32xf32, #tpu.memory_space<vmem>>, vector<1x16x8xf32>,
    %c0_90 = arith.constant 0 : index
    %c2_91 = arith.constant 2 : index
    %c0_92 = arith.constant 0 : index
    %c0_93 = arith.constant 0 : index
    %138 = vector.load %arg9[%c0_90, %c2_91, %c0_92, %c0_93] : memref<1x4x16x12xf32, #tpu.memory_space<vmem>>, vector<1x1x16x12xf32>
    %139 = vector.shape_cast %138 : vector<1x1x16x12xf32> to vector<16x12xf32>
    %cst_94 = arith.constant dense<0.000000e+00> : vector<16x12xf32>
    %140 = tpu.matmul %131, %139, %cst_94 {dimension_numbers = #tpu.dot_dimension_numbers<[1], [0], [0], [1], [0, 0, 1, 1], [], []>} : vector<16x16xf32>, vector<16x12xf32>, vector<16x12xf32> -> vector<16x12xf32>
    %c0_95 = arith.constant 0 : index
    %c0_96 = arith.constant 0 : index
    %c24 = arith.constant 24 : index
    %141 = vector.load %arg16[%c0_95, %c0_96, %c24] : memref<1x16x48xf32, #tpu.memory_space<vmem>>, vector<1x16x12xf32>
    %142 = vector.shape_cast %141 : vector<1x16x12xf32> to vector<16x12xf32>
    %143 = vector.shape_cast %140 : vector<16x12xf32> to vector<1x16x12xf32>
    tpu.vector_store %arg16[%c0_95, %c0_96, %c24], %143 {strides = array<i32>} : memref<1x16x48xf32, #tpu.memory_space<vmem>>, vector<1x16x12xf32>,
    %144 = vector.shape_cast %131 : vector<16x16xf32> to vector<16x16x1xf32>
    %145 = vector.broadcast %144 : vector<16x16x1xf32> to vector<16x16x16xf32>
    %146 = arith.mulf %145, %27 : vector<16x16x16xf32>
    %cst_97 = arith.constant dense<0.000000e+00> : vector<16x16xf32>
    %147 = vector.multi_reduction <add>, %146, %cst_97 [1] : vector<16x16x16xf32> to vector<16x16xf32>
    %c0_98 = arith.constant 0 : index
    %c0_99 = arith.constant 0 : index
    %c32 = arith.constant 32 : index
    %148 = vector.load %arg15[%c0_98, %c0_99, %c32] : memref<1x16x64xf32, #tpu.memory_space<vmem>>, vector<1x16x16xf32>
    %149 = vector.shape_cast %148 : vector<1x16x16xf32> to vector<16x16xf32>
    %150 = vector.shape_cast %147 : vector<16x16xf32> to vector<1x16x16xf32>
    tpu.vector_store %arg15[%c0_98, %c0_99, %c32], %150 {strides = array<i32>} : memref<1x16x64xf32, #tpu.memory_space<vmem>>, vector<1x16x16xf32>,
    %151 = vector.extract_strided_slice %28 {offsets = [3, 0, 0], sizes = [1, 1, 16], strides = [1, 1, 1]} : vector<4x1x16xf32> to vector<1x1x16xf32>
    %152 = vector.shape_cast %151 : vector<1x1x16xf32> to vector<1x16xf32>
    %153 = vector.shape_cast %152 : vector<1x16xf32> to vector<1x1x16xf32>
    %154 = vector.broadcast %153 : vector<1x1x16xf32> to vector<16x16x16xf32>
    %155 = arith.mulf %27, %154 : vector<16x16x16xf32>
    %cst_100 = arith.constant dense<0.000000e+00> : vector<16x16xf32>
    %156 = vector.multi_reduction <add>, %155, %cst_100 [2] : vector<16x16x16xf32> to vector<16x16xf32>
    %157 = vector.extract_strided_slice %25 {offsets = [3, 0, 0], sizes = [1, 16, 16], strides = [1, 1, 1]} : vector<4x16x16xf32> to vector<1x16x16xf32>
    %158 = vector.shape_cast %157 : vector<1x16x16xf32> to vector<16x16xf32>
    %159 = arith.addf %158, %156 : vector<16x16xf32>
    %cst_101 = arith.constant dense<0xFF800000> : vector<16xf32>
    %160 = vector.multi_reduction <maximumf>, %159, %cst_101 [1] : vector<16x16xf32> to vector<16xf32>
    %161 = vector.shape_cast %160 : vector<16xf32> to vector<16x1xf32>
    %162 = vector.broadcast %161 : vector<16x1xf32> to vector<16x16xf32>
    %163 = arith.subf %159, %162 : vector<16x16xf32>
    %164 = math.exp %163 : vector<16x16xf32>
    %cst_102 = arith.constant dense<0.000000e+00> : vector<16xf32>
    %165 = vector.multi_reduction <add>, %164, %cst_102 [1] : vector<16x16xf32> to vector<16xf32>
    %166 = vector.shape_cast %165 : vector<16xf32> to vector<16x1xf32>
    %167 = tpu.reciprocal %166 {approx = true} : vector<16x1xf32> -> vector<16x1xf32>
    %168 = vector.broadcast %167 : vector<16x1xf32> to vector<16x16xf32>
    %169 = arith.mulf %164, %168 : vector<16x16xf32>
    %170 = vector.broadcast %30 : vector<16x1xf32> to vector<16x16xf32>
    %171 = arith.mulf %169, %170 : vector<16x16xf32>
    %c0_103 = arith.constant 0 : index
    %c3 = arith.constant 3 : index
    %c0_104 = arith.constant 0 : index
    %c0_105 = arith.constant 0 : index
    %172 = vector.load %arg4[%c0_103, %c3, %c0_104, %c0_105] : memref<1x4x16x8xf32, #tpu.memory_space<vmem>>, vector<1x1x16x8xf32>
    %173 = vector.shape_cast %172 : vector<1x1x16x8xf32> to vector<16x8xf32>
    %cst_106 = arith.constant dense<0.000000e+00> : vector<16x8xf32>
    %174 = tpu.matmul %171, %173, %cst_106 {dimension_numbers = #tpu.dot_dimension_numbers<[1], [0], [0], [1], [0, 0, 1, 1], [], []>} : vector<16x16xf32>, vector<16x8xf32>, vector<16x8xf32> -> vector<16x8xf32>
    %c0_107 = arith.constant 0 : index
    %c0_108 = arith.constant 0 : index
    %c24_109 = arith.constant 24 : index
    %175 = vector.load %arg14[%c0_107, %c0_108, %c24_109] : memref<1x16x32xf32, #tpu.memory_space<vmem>>, vector<1x16x8xf32>
    %176 = vector.shape_cast %175 : vector<1x16x8xf32> to vector<16x8xf32>
    %177 = vector.shape_cast %174 : vector<16x8xf32> to vector<1x16x8xf32>
    tpu.vector_store %arg14[%c0_107, %c0_108, %c24_109], %177 {strides = array<i32>} : memref<1x16x32xf32, #tpu.memory_space<vmem>>, vector<1x16x8xf32>,
    %c0_110 = arith.constant 0 : index
    %c3_111 = arith.constant 3 : index
    %c0_112 = arith.constant 0 : index
    %c0_113 = arith.constant 0 : index
    %178 = vector.load %arg9[%c0_110, %c3_111, %c0_112, %c0_113] : memref<1x4x16x12xf32, #tpu.memory_space<vmem>>, vector<1x1x16x12xf32>
    %179 = vector.shape_cast %178 : vector<1x1x16x12xf32> to vector<16x12xf32>
    %cst_114 = arith.constant dense<0.000000e+00> : vector<16x12xf32>
    %180 = tpu.matmul %171, %179, %cst_114 {dimension_numbers = #tpu.dot_dimension_numbers<[1], [0], [0], [1], [0, 0, 1, 1], [], []>} : vector<16x16xf32>, vector<16x12xf32>, vector<16x12xf32> -> vector<16x12xf32>
    %c0_115 = arith.constant 0 : index
    %c0_116 = arith.constant 0 : index
    %c36 = arith.constant 36 : index
    %181 = vector.load %arg16[%c0_115, %c0_116, %c36] : memref<1x16x48xf32, #tpu.memory_space<vmem>>, vector<1x16x12xf32>
    %182 = vector.shape_cast %181 : vector<1x16x12xf32> to vector<16x12xf32>
    %183 = vector.shape_cast %180 : vector<16x12xf32> to vector<1x16x12xf32>
    tpu.vector_store %arg16[%c0_115, %c0_116, %c36], %183 {strides = array<i32>} : memref<1x16x48xf32, #tpu.memory_space<vmem>>, vector<1x16x12xf32>,
    %184 = vector.shape_cast %171 : vector<16x16xf32> to vector<16x16x1xf32>
    %185 = vector.broadcast %184 : vector<16x16x1xf32> to vector<16x16x16xf32>
    %186 = arith.mulf %185, %27 : vector<16x16x16xf32>
    %cst_117 = arith.constant dense<0.000000e+00> : vector<16x16xf32>
    %187 = vector.multi_reduction <add>, %186, %cst_117 [1] : vector<16x16x16xf32> to vector<16x16xf32>
    %c0_118 = arith.constant 0 : index
    %c0_119 = arith.constant 0 : index
    %c48 = arith.constant 48 : index
    %188 = vector.load %arg15[%c0_118, %c0_119, %c48] : memref<1x16x64xf32, #tpu.memory_space<vmem>>, vector<1x16x16xf32>
    %189 = vector.shape_cast %188 : vector<1x16x16xf32> to vector<16x16xf32>
    %190 = vector.shape_cast %187 : vector<16x16xf32> to vector<1x16x16xf32>
    tpu.vector_store %arg15[%c0_118, %c0_119, %c48], %190 {strides = array<i32>} : memref<1x16x64xf32, #tpu.memory_space<vmem>>, vector<1x16x16xf32>,
    return
  }
  func.func @transform_0(%arg0: i32, %arg1: i32) -> (i32, i32, i32, i32) {
    %c0_i32 = arith.constant 0 : i32
    %c0_i32_0 = arith.constant 0 : i32
    %c0_i32_1 = arith.constant 0 : i32
    return %arg0, %c0_i32, %arg1, %c0_i32_0 : i32, i32, i32, i32
  }
  func.func @transform_1(%arg0: i32, %arg1: i32) -> (i32, i32, i32, i32) {
    %c0_i32 = arith.constant 0 : i32
    %c0_i32_0 = arith.constant 0 : i32
    %c0_i32_1 = arith.constant 0 : i32
    %c0_i32_2 = arith.constant 0 : i32
    return %arg0, %c0_i32, %c0_i32_0, %c0_i32_1 : i32, i32, i32, i32
  }
  func.func @transform_2(%arg0: i32, %arg1: i32) -> (i32, i32, i32, i32) {
    %c0_i32 = arith.constant 0 : i32
    %c0_i32_0 = arith.constant 0 : i32
    %c0_i32_1 = arith.constant 0 : i32
    %c0_i32_2 = arith.constant 0 : i32
    return %arg0, %c0_i32, %c0_i32_0, %c0_i32_1 : i32, i32, i32, i32
  }
  func.func @transform_3(%arg0: i32, %arg1: i32) -> (i32, i32, i32, i32) {
    %c0_i32 = arith.constant 0 : i32
    %c0_i32_0 = arith.constant 0 : i32
    %c0_i32_1 = arith.constant 0 : i32
    return %arg0, %c0_i32, %arg1, %c0_i32_0 : i32, i32, i32, i32
  }
  func.func @transform_4(%arg0: i32, %arg1: i32) -> (i32, i32, i32, i32) {
    %c0_i32 = arith.constant 0 : i32
    %c0_i32_0 = arith.constant 0 : i32
    %c0_i32_1 = arith.constant 0 : i32
    %c0_i32_2 = arith.constant 0 : i32
    return %arg0, %c0_i32, %c0_i32_0, %c0_i32_1 : i32, i32, i32, i32
  }
  func.func @transform_5(%arg0: i32, %arg1: i32) -> (i32, i32, i32, i32) {
    %c0_i32 = arith.constant 0 : i32
    %c0_i32_0 = arith.constant 0 : i32
    %c0_i32_1 = arith.constant 0 : i32
    return %arg0, %c0_i32, %arg1, %c0_i32_0 : i32, i32, i32, i32
  }
  func.func @transform_6(%arg0: i32, %arg1: i32) -> (i32, i32, i32, i32) {
    %c0_i32 = arith.constant 0 : i32
    %c0_i32_0 = arith.constant 0 : i32
    %c0_i32_1 = arith.constant 0 : i32
    %c0_i32_2 = arith.constant 0 : i32
    return %arg0, %c0_i32, %c0_i32_0, %c0_i32_1 : i32, i32, i32, i32
  }
  func.func @transform_7(%arg0: i32, %arg1: i32) -> (i32, i32, i32, i32) {
    %c0_i32 = arith.constant 0 : i32
    %c0_i32_0 = arith.constant 0 : i32
    %c0_i32_1 = arith.constant 0 : i32
    %c0_i32_2 = arith.constant 0 : i32
    return %arg0, %c0_i32, %c0_i32_0, %c0_i32_1 : i32, i32, i32, i32
  }
  func.func @transform_8(%arg0: i32, %arg1: i32) -> (i32, i32, i32, i32) {
    %c0_i32 = arith.constant 0 : i32
    %c0_i32_0 = arith.constant 0 : i32
    %c0_i32_1 = arith.constant 0 : i32
    return %arg0, %arg1, %c0_i32, %c0_i32_0 : i32, i32, i32, i32
  }
  func.func @transform_9(%arg0: i32, %arg1: i32) -> (i32, i32, i32) {
    %c0_i32 = arith.constant 0 : i32
    %c0_i32_0 = arith.constant 0 : i32
    %c0_i32_1 = arith.constant 0 : i32
    %c0_i32_2 = arith.constant 0 : i32
    return %c0_i32, %c0_i32_0, %c0_i32_1 : i32, i32, i32
  }
  func.func @transform_10(%arg0: i32, %arg1: i32) -> (i32, i32, i32) {
    %c0_i32 = arith.constant 0 : i32
    %c0_i32_0 = arith.constant 0 : i32
    return %arg0, %arg1, %c0_i32 : i32, i32, i32
  }
  func.func @transform_11(%arg0: i32, %arg1: i32) -> (i32, i32, i32) {
    %c0_i32 = arith.constant 0 : i32
    %c0_i32_0 = arith.constant 0 : i32
    %c0_i32_1 = arith.constant 0 : i32
    return %arg0, %c0_i32, %c0_i32_0 : i32, i32, i32
  }
  func.func @transform_12(%arg0: i32, %arg1: i32) -> (i32, i32, i32) {
    %c0_i32 = arith.constant 0 : i32
    %c0_i32_0 = arith.constant 0 : i32
    return %arg0, %arg1, %c0_i32 : i32, i32, i32
  }
  func.func @transform_13(%arg0: i32, %arg1: i32) -> (i32, i32, i32) {
    %c0_i32 = arith.constant 0 : i32
    %c0_i32_0 = arith.constant 0 : i32
    return %arg0, %arg1, %c0_i32 : i32, i32, i32
  }
  func.func @transform_14(%arg0: i32, %arg1: i32) -> (i32, i32, i32) {
    %c0_i32 = arith.constant 0 : i32
    %c0_i32_0 = arith.constant 0 : i32
    return %arg0, %arg1, %c0_i32 : i32, i32, i32
  }
}

module attributes {stable_mosaic.version = 11 : i64} {
  func.func @_post_transform_kernel(%arg0: i32, %arg1: memref<32x208xf32, #tpu.memory_space<vmem>>, %arg2: memref<32x32xf32, #tpu.memory_space<vmem>>, %arg3: memref<32x1xf32, #tpu.memory_space<vmem>>, %arg4: memref<208x32xf32, #tpu.memory_space<vmem>>, %arg5: memref<1x32xf32, #tpu.memory_space<vmem>>, %arg6: memref<1x32xf32, #tpu.memory_space<vmem>>, %arg7: memref<1x32xf32, #tpu.memory_space<vmem>>, %arg8: memref<32x32xf32, #tpu.memory_space<vmem>>, %arg9: memref<1x32xf32, #tpu.memory_space<vmem>>, %arg10: memref<32x32xf32, #tpu.memory_space<vmem>>, %arg11: memref<1x32xf32, #tpu.memory_space<vmem>>, %arg12: memref<32x32xf32, #tpu.memory_space<vmem>>, %arg13: memref<1x32xf32, #tpu.memory_space<vmem>>, %arg14: memref<1x32xf32, #tpu.memory_space<vmem>>, %arg15: memref<1x32xf32, #tpu.memory_space<vmem>>, %arg16: memref<32x32xf32, #tpu.memory_space<vmem>>) attributes {dimension_semantics = [#tpu.dimension_semantics<parallel>], iteration_bounds = array<i64: 1>, scalar_prefetch = 0 : i64, scratch_operands = 0 : i64, tpu.core_type = #tpu.core_type<tc>, window_params = [{transform_indices = @transform_0, window_bounds = array<i64: 32, 208>}, {transform_indices = @transform_1, window_bounds = array<i64: 32, 32>}, {transform_indices = @transform_2, window_bounds = array<i64: 32, 1>}, {pipeline_mode = #tpu.pipeline_mode<synchronous>, transform_indices = @transform_3, window_bounds = array<i64: 208, 32>}, {pipeline_mode = #tpu.pipeline_mode<synchronous>, transform_indices = @transform_4, window_bounds = array<i64: 1, 32>}, {pipeline_mode = #tpu.pipeline_mode<synchronous>, transform_indices = @transform_5, window_bounds = array<i64: 1, 32>}, {pipeline_mode = #tpu.pipeline_mode<synchronous>, transform_indices = @transform_6, window_bounds = array<i64: 1, 32>}, {pipeline_mode = #tpu.pipeline_mode<synchronous>, transform_indices = @transform_7, window_bounds = array<i64: 32, 32>}, {pipeline_mode = #tpu.pipeline_mode<synchronous>, transform_indices = @transform_8, window_bounds = array<i64: 1, 32>}, {pipeline_mode = #tpu.pipeline_mode<synchronous>, transform_indices = @transform_9, window_bounds = array<i64: 32, 32>}, {pipeline_mode = #tpu.pipeline_mode<synchronous>, transform_indices = @transform_10, window_bounds = array<i64: 1, 32>}, {pipeline_mode = #tpu.pipeline_mode<synchronous>, transform_indices = @transform_11, window_bounds = array<i64: 32, 32>}, {pipeline_mode = #tpu.pipeline_mode<synchronous>, transform_indices = @transform_12, window_bounds = array<i64: 1, 32>}, {pipeline_mode = #tpu.pipeline_mode<synchronous>, transform_indices = @transform_13, window_bounds = array<i64: 1, 32>}, {pipeline_mode = #tpu.pipeline_mode<synchronous>, transform_indices = @transform_14, window_bounds = array<i64: 1, 32>}, {transform_indices = @transform_15, window_bounds = array<i64: 32, 32>}]} {
    %c0 = arith.constant 0 : index
    %c0_0 = arith.constant 0 : index
    %0 = vector.load %arg1[%c0, %c0_0] : memref<32x208xf32, #tpu.memory_space<vmem>>, vector<32x208xf32>
    %c0_1 = arith.constant 0 : index
    %c0_2 = arith.constant 0 : index
    %1 = vector.load %arg4[%c0_1, %c0_2] : memref<208x32xf32, #tpu.memory_space<vmem>>, vector<208x32xf32>
    %cst = arith.constant dense<0.000000e+00> : vector<32x32xf32>
    %2 = tpu.matmul %0, %1, %cst {dimension_numbers = #tpu.dot_dimension_numbers<[1], [0], [0], [1], [0, 0, 1, 1], [], []>} : vector<32x208xf32>, vector<208x32xf32>, vector<32x32xf32> -> vector<32x32xf32>
    %c0_3 = arith.constant 0 : index
    %c0_4 = arith.constant 0 : index
    %3 = vector.load %arg5[%c0_3, %c0_4] : memref<1x32xf32, #tpu.memory_space<vmem>>, vector<1x32xf32>
    %4 = vector.broadcast %3 : vector<1x32xf32> to vector<32x32xf32>
    %5 = arith.addf %2, %4 : vector<32x32xf32>
    %c0_5 = arith.constant 0 : index
    %c0_6 = arith.constant 0 : index
    %6 = vector.load %arg3[%c0_5, %c0_6] : memref<32x1xf32, #tpu.memory_space<vmem>>, vector<32x1xf32>
    %7 = vector.broadcast %6 : vector<32x1xf32> to vector<32x32xf32>
    %8 = arith.mulf %5, %7 : vector<32x32xf32>
    %c0_7 = arith.constant 0 : index
    %c0_8 = arith.constant 0 : index
    %9 = vector.load %arg2[%c0_7, %c0_8] : memref<32x32xf32, #tpu.memory_space<vmem>>, vector<32x32xf32>
    %10 = arith.addf %9, %8 : vector<32x32xf32>
    %cst_9 = arith.constant dense<0.000000e+00> : vector<32xf32>
    %11 = vector.multi_reduction <add>, %10, %cst_9 [1] : vector<32x32xf32> to vector<32xf32>
    %12 = vector.shape_cast %11 : vector<32xf32> to vector<32x1xf32>
    %cst_10 = arith.constant 3.200000e+01 : f32
    %13 = vector.broadcast %cst_10 : f32 to vector<32x1xf32>
    %14 = arith.divf %12, %13 : vector<32x1xf32>
    %15 = vector.broadcast %14 : vector<32x1xf32> to vector<32x32xf32>
    %16 = arith.subf %10, %15 : vector<32x32xf32>
    %17 = arith.mulf %16, %16 : vector<32x32xf32>
    %cst_11 = arith.constant dense<0.000000e+00> : vector<32xf32>
    %18 = vector.multi_reduction <add>, %17, %cst_11 [1] : vector<32x32xf32> to vector<32xf32>
    %19 = vector.shape_cast %18 : vector<32xf32> to vector<32x1xf32>
    %cst_12 = arith.constant 3.200000e+01 : f32
    %20 = vector.broadcast %cst_12 : f32 to vector<32x1xf32>
    %21 = arith.divf %19, %20 : vector<32x1xf32>
    %22 = vector.broadcast %14 : vector<32x1xf32> to vector<32x32xf32>
    %23 = arith.subf %10, %22 : vector<32x32xf32>
    %cst_13 = arith.constant 9.99999974E-6 : f32
    %24 = vector.broadcast %cst_13 : f32 to vector<32x1xf32>
    %25 = arith.addf %21, %24 : vector<32x1xf32>
    %26 = math.rsqrt %25 : vector<32x1xf32>
    %27 = vector.broadcast %26 : vector<32x1xf32> to vector<32x32xf32>
    %28 = arith.mulf %23, %27 : vector<32x32xf32>
    %c0_14 = arith.constant 0 : index
    %c0_15 = arith.constant 0 : index
    %29 = vector.load %arg6[%c0_14, %c0_15] : memref<1x32xf32, #tpu.memory_space<vmem>>, vector<1x32xf32>
    %30 = vector.broadcast %29 : vector<1x32xf32> to vector<32x32xf32>
    %31 = arith.mulf %28, %30 : vector<32x32xf32>
    %c0_16 = arith.constant 0 : index
    %c0_17 = arith.constant 0 : index
    %32 = vector.load %arg7[%c0_16, %c0_17] : memref<1x32xf32, #tpu.memory_space<vmem>>, vector<1x32xf32>
    %33 = vector.broadcast %32 : vector<1x32xf32> to vector<32x32xf32>
    %34 = arith.addf %31, %33 : vector<32x32xf32>
    %c0_18 = arith.constant 0 : index
    %c0_19 = arith.constant 0 : index
    %35 = vector.load %arg8[%c0_18, %c0_19] : memref<32x32xf32, #tpu.memory_space<vmem>>, vector<32x32xf32>
    %cst_20 = arith.constant dense<0.000000e+00> : vector<32x32xf32>
    %36 = tpu.matmul %34, %35, %cst_20 {dimension_numbers = #tpu.dot_dimension_numbers<[1], [0], [0], [1], [0, 0, 1, 1], [], []>} : vector<32x32xf32>, vector<32x32xf32>, vector<32x32xf32> -> vector<32x32xf32>
    %c0_21 = arith.constant 0 : index
    %c0_22 = arith.constant 0 : index
    %37 = vector.load %arg9[%c0_21, %c0_22] : memref<1x32xf32, #tpu.memory_space<vmem>>, vector<1x32xf32>
    %38 = vector.broadcast %37 : vector<1x32xf32> to vector<32x32xf32>
    %39 = arith.addf %36, %38 : vector<32x32xf32>
    %cst_23 = arith.constant 0.000000e+00 : f32
    %40 = vector.broadcast %cst_23 : f32 to vector<32x32xf32>
    %41 = arith.maximumf %39, %40 : vector<32x32xf32>
    %c0_24 = arith.constant 0 : index
    %c0_25 = arith.constant 0 : index
    %42 = vector.load %arg10[%c0_24, %c0_25] : memref<32x32xf32, #tpu.memory_space<vmem>>, vector<32x32xf32>
    %cst_26 = arith.constant dense<0.000000e+00> : vector<32x32xf32>
    %43 = tpu.matmul %41, %42, %cst_26 {dimension_numbers = #tpu.dot_dimension_numbers<[1], [0], [0], [1], [0, 0, 1, 1], [], []>} : vector<32x32xf32>, vector<32x32xf32>, vector<32x32xf32> -> vector<32x32xf32>
    %c0_27 = arith.constant 0 : index
    %c0_28 = arith.constant 0 : index
    %44 = vector.load %arg11[%c0_27, %c0_28] : memref<1x32xf32, #tpu.memory_space<vmem>>, vector<1x32xf32>
    %45 = vector.broadcast %44 : vector<1x32xf32> to vector<32x32xf32>
    %46 = arith.addf %43, %45 : vector<32x32xf32>
    %cst_29 = arith.constant 0.000000e+00 : f32
    %47 = vector.broadcast %cst_29 : f32 to vector<32x32xf32>
    %48 = arith.maximumf %46, %47 : vector<32x32xf32>
    %c0_30 = arith.constant 0 : index
    %c0_31 = arith.constant 0 : index
    %49 = vector.load %arg12[%c0_30, %c0_31] : memref<32x32xf32, #tpu.memory_space<vmem>>, vector<32x32xf32>
    %cst_32 = arith.constant dense<0.000000e+00> : vector<32x32xf32>
    %50 = tpu.matmul %48, %49, %cst_32 {dimension_numbers = #tpu.dot_dimension_numbers<[1], [0], [0], [1], [0, 0, 1, 1], [], []>} : vector<32x32xf32>, vector<32x32xf32>, vector<32x32xf32> -> vector<32x32xf32>
    %c0_33 = arith.constant 0 : index
    %c0_34 = arith.constant 0 : index
    %51 = vector.load %arg13[%c0_33, %c0_34] : memref<1x32xf32, #tpu.memory_space<vmem>>, vector<1x32xf32>
    %52 = vector.broadcast %51 : vector<1x32xf32> to vector<32x32xf32>
    %53 = arith.addf %50, %52 : vector<32x32xf32>
    %54 = arith.addf %34, %53 : vector<32x32xf32>
    %cst_35 = arith.constant dense<0.000000e+00> : vector<32xf32>
    %55 = vector.multi_reduction <add>, %54, %cst_35 [1] : vector<32x32xf32> to vector<32xf32>
    %56 = vector.shape_cast %55 : vector<32xf32> to vector<32x1xf32>
    %cst_36 = arith.constant 3.200000e+01 : f32
    %57 = vector.broadcast %cst_36 : f32 to vector<32x1xf32>
    %58 = arith.divf %56, %57 : vector<32x1xf32>
    %59 = vector.broadcast %58 : vector<32x1xf32> to vector<32x32xf32>
    %60 = arith.subf %54, %59 : vector<32x32xf32>
    %61 = arith.mulf %60, %60 : vector<32x32xf32>
    %cst_37 = arith.constant dense<0.000000e+00> : vector<32xf32>
    %62 = vector.multi_reduction <add>, %61, %cst_37 [1] : vector<32x32xf32> to vector<32xf32>
    %63 = vector.shape_cast %62 : vector<32xf32> to vector<32x1xf32>
    %cst_38 = arith.constant 3.200000e+01 : f32
    %64 = vector.broadcast %cst_38 : f32 to vector<32x1xf32>
    %65 = arith.divf %63, %64 : vector<32x1xf32>
    %66 = vector.broadcast %58 : vector<32x1xf32> to vector<32x32xf32>
    %67 = arith.subf %54, %66 : vector<32x32xf32>
    %cst_39 = arith.constant 9.99999974E-6 : f32
    %68 = vector.broadcast %cst_39 : f32 to vector<32x1xf32>
    %69 = arith.addf %65, %68 : vector<32x1xf32>
    %70 = math.rsqrt %69 : vector<32x1xf32>
    %71 = vector.broadcast %70 : vector<32x1xf32> to vector<32x32xf32>
    %72 = arith.mulf %67, %71 : vector<32x32xf32>
    %c0_40 = arith.constant 0 : index
    %c0_41 = arith.constant 0 : index
    %73 = vector.load %arg14[%c0_40, %c0_41] : memref<1x32xf32, #tpu.memory_space<vmem>>, vector<1x32xf32>
    %74 = vector.broadcast %73 : vector<1x32xf32> to vector<32x32xf32>
    %75 = arith.mulf %72, %74 : vector<32x32xf32>
    %c0_42 = arith.constant 0 : index
    %c0_43 = arith.constant 0 : index
    %76 = vector.load %arg15[%c0_42, %c0_43] : memref<1x32xf32, #tpu.memory_space<vmem>>, vector<1x32xf32>
    %77 = vector.broadcast %76 : vector<1x32xf32> to vector<32x32xf32>
    %78 = arith.addf %75, %77 : vector<32x32xf32>
    %c0_44 = arith.constant 0 : index
    %c0_45 = arith.constant 0 : index
    %79 = vector.load %arg16[%c0_44, %c0_45] : memref<32x32xf32, #tpu.memory_space<vmem>>, vector<32x32xf32>
    tpu.vector_store %arg16[%c0_44, %c0_45], %78 {strides = array<i32>} : memref<32x32xf32, #tpu.memory_space<vmem>>, vector<32x32xf32>,
    return
  }
  func.func @transform_0(%arg0: i32) -> (i32, i32) {
    %c0_i32 = arith.constant 0 : i32
    %c0_i32_0 = arith.constant 0 : i32
    return %arg0, %c0_i32 : i32, i32
  }
  func.func @transform_1(%arg0: i32) -> (i32, i32) {
    %c0_i32 = arith.constant 0 : i32
    %c0_i32_0 = arith.constant 0 : i32
    return %arg0, %c0_i32 : i32, i32
  }
  func.func @transform_2(%arg0: i32) -> (i32, i32) {
    %c0_i32 = arith.constant 0 : i32
    %c0_i32_0 = arith.constant 0 : i32
    return %arg0, %c0_i32 : i32, i32
  }
  func.func @transform_3(%arg0: i32) -> (i32, i32) {
    %c0_i32 = arith.constant 0 : i32
    %c0_i32_0 = arith.constant 0 : i32
    %c0_i32_1 = arith.constant 0 : i32
    return %c0_i32, %c0_i32_0 : i32, i32
  }
  func.func @transform_4(%arg0: i32) -> (i32, i32) {
    %c0_i32 = arith.constant 0 : i32
    %c0_i32_0 = arith.constant 0 : i32
    %c0_i32_1 = arith.constant 0 : i32
    return %c0_i32, %c0_i32_0 : i32, i32
  }
  func.func @transform_5(%arg0: i32) -> (i32, i32) {
    %c0_i32 = arith.constant 0 : i32
    %c0_i32_0 = arith.constant 0 : i32
    %c0_i32_1 = arith.constant 0 : i32
    return %c0_i32, %c0_i32_0 : i32, i32
  }
  func.func @transform_6(%arg0: i32) -> (i32, i32) {
    %c0_i32 = arith.constant 0 : i32
    %c0_i32_0 = arith.constant 0 : i32
    %c0_i32_1 = arith.constant 0 : i32
    return %c0_i32, %c0_i32_0 : i32, i32
  }
  func.func @transform_7(%arg0: i32) -> (i32, i32) {
    %c0_i32 = arith.constant 0 : i32
    %c0_i32_0 = arith.constant 0 : i32
    %c0_i32_1 = arith.constant 0 : i32
    return %c0_i32, %c0_i32_0 : i32, i32
  }
  func.func @transform_8(%arg0: i32) -> (i32, i32) {
    %c0_i32 = arith.constant 0 : i32
    %c0_i32_0 = arith.constant 0 : i32
    %c0_i32_1 = arith.constant 0 : i32
    return %c0_i32, %c0_i32_0 : i32, i32
  }
  func.func @transform_9(%arg0: i32) -> (i32, i32) {
    %c0_i32 = arith.constant 0 : i32
    %c0_i32_0 = arith.constant 0 : i32
    %c0_i32_1 = arith.constant 0 : i32
    return %c0_i32, %c0_i32_0 : i32, i32
  }
  func.func @transform_10(%arg0: i32) -> (i32, i32) {
    %c0_i32 = arith.constant 0 : i32
    %c0_i32_0 = arith.constant 0 : i32
    %c0_i32_1 = arith.constant 0 : i32
    return %c0_i32, %c0_i32_0 : i32, i32
  }
  func.func @transform_11(%arg0: i32) -> (i32, i32) {
    %c0_i32 = arith.constant 0 : i32
    %c0_i32_0 = arith.constant 0 : i32
    %c0_i32_1 = arith.constant 0 : i32
    return %c0_i32, %c0_i32_0 : i32, i32
  }
  func.func @transform_12(%arg0: i32) -> (i32, i32) {
    %c0_i32 = arith.constant 0 : i32
    %c0_i32_0 = arith.constant 0 : i32
    %c0_i32_1 = arith.constant 0 : i32
    return %c0_i32, %c0_i32_0 : i32, i32
  }
  func.func @transform_13(%arg0: i32) -> (i32, i32) {
    %c0_i32 = arith.constant 0 : i32
    %c0_i32_0 = arith.constant 0 : i32
    %c0_i32_1 = arith.constant 0 : i32
    return %c0_i32, %c0_i32_0 : i32, i32
  }
  func.func @transform_14(%arg0: i32) -> (i32, i32) {
    %c0_i32 = arith.constant 0 : i32
    %c0_i32_0 = arith.constant 0 : i32
    %c0_i32_1 = arith.constant 0 : i32
    return %c0_i32, %c0_i32_0 : i32, i32
  }
  func.func @transform_15(%arg0: i32) -> (i32, i32) {
    %c0_i32 = arith.constant 0 : i32
    %c0_i32_0 = arith.constant 0 : i32
    return %arg0, %c0_i32 : i32, i32
  }
}

</mosaic_0001>

<bundles_post_ra>
// kernel: respair_block_pallas.3
= control target key start
LH: loop header
LB: loop body
LE: loop exit
PB: predicated region body
PF: predicated region fallthrough
CT: control target
= control target key end

     0   :  { %s1870_s0 = inlined_call_operand.hbm [shape: f32[32,208], index: 0, kind: input, shape index: {}]   ;;  %s1871_s1 = inlined_call_operand.hbm [shape: f32[32,32], index: 1, kind: input, shape index: {}]   ;;  %s1872_s2 = inlined_call_operand.hbm [shape: f32[32,1], index: 2, kind: input, shape index: {}]   ;;  %s1873_s3 = inlined_call_operand.hbm [shape: f32[208,32], index: 3, kind: input, shape index: {}]   ;;  %s1874_s4 = inlined_call_operand.hbm [shape: f32[1,32], index: 4, kind: input, shape index: {}]   ;;  %s1875_s5 = inlined_call_operand.hbm [shape: f32[1,32], index: 5, kind: input, shape index: {}]   ;;  %s1876_s6 = inlined_call_operand.hbm [shape: f32[1,32], index: 6, kind: input, shape index: {}]   ;;  %s1877_s7 = inlined_call_operand.hbm [shape: f32[32,32], index: 7, kind: input, shape index: {}]   ;;  %s1878_s8 = inlined_call_operand.hbm [shape: f32[1,32], index: 8, kind: input, shape index: {}]   ;;  %s1879_s9 = inlined_call_operand.hbm [shape: f32[32,32], index: 9, kind: input, shape index: {}]   ;;  %s1880_s10 = inlined_call_operand.hbm [shape: f32[1,32], index: 10, kind: input, shape index: {}]   ;;  %s1881_s11 = inlined_call_operand.hbm [shape: f32[32,32], index: 11, kind: input, shape index: {}]   ;;  %s1882_s12 = inlined_call_operand.hbm [shape: f32[1,32], index: 12, kind: input, shape index: {}]   ;;  %s1883_s13 = inlined_call_operand.hbm [shape: f32[1,32], index: 13, kind: input, shape index: {}]   ;;  %s1884_s14 = inlined_call_operand.hbm [shape: f32[1,32], index: 14, kind: input, shape index: {}]   ;;  %s1885_s15 = inlined_call_operand.hbm [shape: f32[32,32], index: 15, kind: output, shape index: {}]  }
   0x1   :  { %1887 = sst [smem:[#allocation36_spill]] %s1885_s15 }
   0x2   :  { %20 = vsyncpa [#allocation3], 0 }
   0x3   :  { %21 = vsyncpa [#allocation6], 0 }
   0x4   :  { %22 = vsyncpa [#allocation9], 0 }
   0x5   :  { %23 = vsyncpa [#allocation12], 0 }
   0x6   :  { %24 = vsyncpa [#allocation15], 0 }
   0x7   :  { %25 = vsyncpa [#allocation18], 0 }
   0x8   :  { %26 = vsyncpa [#allocation21], 0 }
   0x9   :  { %27 = vsyncpa [#allocation24], 0 }
   0xa   :  { %28 = vsyncpa [#allocation4], 0  ;;  %s1490_s18 = smov [#allocation5]   ;;  %s1120_s22 = scalar_lea.hbm %s1871_s1, 512 }
   0xb   :  { %s46_s19 = sshll.u32 %s1490_s18, 4  ;;  %p1121_p0 = scmp.ne.s32.totalorder %s1871_s1, %s1120_s22  ;;  %s47_s19 = int_to_ptr.vmem [resolvable:$true] %s46_s19 }
   0xc   :  { %p1124_p1 = scmp.lt.u32.totalorder %s1120_s22, %s1871_s1 }
   0xe   :  { %p1126_p2 = pnand %p1124_p1, %p1121_p0 }
  0x10   :  { %1129 = shalt.err (!%p1126_p2)
}
  0x11   :  { %s1130_s27 = scalar_lea.vmem %s47_s19, 512  ;;  %p1135_p4 = scmp.lt.s32.totalorder %s47_s19, %s47_s19 }
  0x12   :  { %p1131_p3 = scmp.ne.s32.totalorder %s47_s19, %s1130_s27  ;;  %p1136_p5 = scmp.lt.s32.totalorder %s1130_s27, %s1130_s27 }
  0x14   :  { %p1137_p6 = por %p1136_p5, %p1135_p4 }
  0x16   :  { %p1138_p7 = pnand %p1137_p6, %p1131_p3 }
  0x18   :  { %1141 = shalt.err (!%p1138_p7)
}
  0x19   :  { %s1491_s28 = smov 128   ;;  %s1492_s29 = smov 8  }
  0x1a   :  { %52 = dma.hbm_to_vmem [thread:$0]  %s1871_s1, 512, %s47_s19, [#allocation6], %s1491_s28, %s1491_s28, %s1492_s29  }
  0x1b   :  { %s1493_s17 = smov [#allocation8]   ;;  %s1494_s20 = smov [#allocation11]  }
  0x1c   :  { %s70_s18 = sshll.u32 %s1493_s17, 4  ;;  %s93_s21 = sshll.u32 %s1494_s20, 4  ;;  %s71_s18 = int_to_ptr.vmem [resolvable:$true] %s70_s18  ;;  %s94_s21 = int_to_ptr.vmem [resolvable:$true] %s93_s21 }
  0x1d   :  { %s1142_s24 = scalar_lea.hbm %s1873_s3, 3328 }
  0x1e   :  { %p1143_p8 = scmp.ne.s32.totalorder %s1873_s3, %s1142_s24  ;;  %p1146_p9 = scmp.lt.u32.totalorder %s1142_s24, %s1873_s3 }
  0x20   :  { %p1148_p10 = pnand %p1146_p9, %p1143_p8 }
  0x22   :  { %1151 = shalt.err (!%p1148_p10)
}
  0x23   :  { %s1152_s1 = scalar_lea.vmem %s71_s18, 3328  ;;  %p1157_p12 = scmp.lt.s32.totalorder %s71_s18, %s71_s18 }
  0x24   :  { %p1153_p11 = scmp.ne.s32.totalorder %s71_s18, %s1152_s1  ;;  %p1158_p13 = scmp.lt.s32.totalorder %s1152_s1, %s1152_s1 }
  0x26   :  { %p1159_p0 = por %p1158_p13, %p1157_p12 }
  0x28   :  { %p1160_p1 = pnand %p1159_p0, %p1153_p11 }
  0x2a   :  { %1163 = shalt.err (!%p1160_p1)
}
  0x2b   :  { %76 = dma.hbm_to_vmem [thread:$0]  %s1873_s3, 3328, %s71_s18, [#allocation9], %s1491_s28, %s1491_s28, %s1492_s29  }
  0x2c   :  { %s1164_s17 = scalar_lea.hbm %s1875_s5, 16 }
  0x2d   :  { %p1165_p2 = scmp.ne.s32.totalorder %s1875_s5, %s1164_s17  ;;  %p1168_p3 = scmp.lt.u32.totalorder %s1164_s17, %s1875_s5 }
  0x2f   :  { %p1170_p4 = pnand %p1168_p3, %p1165_p2 }
  0x31   :  { %1173 = shalt.err (!%p1170_p4)
}
  0x32   :  { %s1174_s25 = scalar_lea.vmem %s94_s21, 16  ;;  %s1178_s26 = scalar_lea.vmem %s94_s21, 32 }
  0x33   :  { %p1175_p5 = scmp.ne.s32.totalorder %s94_s21, %s1174_s25  ;;  %p1179_p6 = scmp.lt.s32.totalorder %s94_s21, %s94_s21 }
  0x34   :  { %p1180_p7 = scmp.lt.s32.totalorder %s1178_s26, %s1174_s25 }
  0x36   :  { %p1181_p8 = por %p1180_p7, %p1179_p6 }
  0x38   :  { %p1182_p9 = pnand %p1181_p8, %p1175_p5 }
  0x3a   :  { %1185 = shalt.err (!%p1182_p9)
}
  0x3b   :  { %96 = dma.hbm_to_vmem [thread:$0]  %s1875_s5, 16, %s94_s21, [#allocation12]  }
  0x3c   :  { %s1495_s27 = smov [#allocation14]   ;;  %s1496_s19 = smov [#allocation17]  }
  0x3d   :  { %s112_s1 = sshll.u32 %s1495_s27, 4  ;;  %s134_s30 = sshll.u32 %s1496_s19, 4  ;;  %s113_s1 = int_to_ptr.vmem [resolvable:$true] %s112_s1  ;;  %s135_s30 = int_to_ptr.vmem [resolvable:$true] %s134_s30 }
  0x3e   :  { %s1186_s17 = scalar_lea.hbm %s1877_s7, 512 }
  0x3f   :  { %p1187_p10 = scmp.ne.s32.totalorder %s1877_s7, %s1186_s17  ;;  %p1190_p11 = scmp.lt.u32.totalorder %s1186_s17, %s1877_s7 }
  0x41   :  { %p1192_p12 = pnand %p1190_p11, %p1187_p10 }
  0x43   :  { %1195 = shalt.err (!%p1192_p12)
}
  0x44   :  { %s1196_s5 = scalar_lea.vmem %s113_s1, 512  ;;  %p1201_p0 = scmp.lt.s32.totalorder %s113_s1, %s113_s1 }
  0x45   :  { %p1197_p13 = scmp.ne.s32.totalorder %s113_s1, %s1196_s5  ;;  %p1202_p1 = scmp.lt.s32.totalorder %s1196_s5, %s1196_s5 }
  0x47   :  { %p1203_p2 = por %p1202_p1, %p1201_p0 }
  0x49   :  { %p1204_p3 = pnand %p1203_p2, %p1197_p13 }
  0x4b   :  { %1207 = shalt.err (!%p1204_p3)
}
  0x4c   :  { %118 = dma.hbm_to_vmem [thread:$0]  %s1877_s7, 512, %s113_s1, [#allocation15], %s1491_s28, %s1491_s28, %s1492_s29  }
  0x4d   :  { %s1208_s18 = scalar_lea.hbm %s1879_s9, 512 }
  0x4e   :  { %p1209_p4 = scmp.ne.s32.totalorder %s1879_s9, %s1208_s18  ;;  %p1212_p5 = scmp.lt.u32.totalorder %s1208_s18, %s1879_s9 }
  0x50   :  { %p1214_p6 = pnand %p1212_p5, %p1209_p4 }
  0x52   :  { %1217 = shalt.err (!%p1214_p6)
}
  0x53   :  { %s1218_s17 = scalar_lea.vmem %s135_s30, 512  ;;  %p1223_p8 = scmp.lt.s32.totalorder %s135_s30, %s135_s30 }
  0x54   :  { %p1219_p7 = scmp.ne.s32.totalorder %s135_s30, %s1218_s17  ;;  %p1224_p9 = scmp.lt.s32.totalorder %s1218_s17, %s1218_s17 }
  0x56   :  { %p1225_p10 = por %p1224_p9, %p1223_p8 }
  0x58   :  { %p1226_p11 = pnand %p1225_p10, %p1219_p7 }
  0x5a   :  { %1229 = shalt.err (!%p1226_p11)
}
  0x5b   :  { %140 = dma.hbm_to_vmem [thread:$0]  %s1879_s9, 512, %s135_s30, [#allocation18], %s1491_s28, %s1491_s28, %s1492_s29  }
  0x5c   :  { %s1497_s20 = smov [#allocation20]   ;;  %s1498_s23 = smov [#allocation23]  }
  0x5d   :  { %s156_s22 = sshll.u32 %s1497_s20, 4  ;;  %s179_s24 = sshll.u32 %s1498_s23, 4  ;;  %s157_s22 = int_to_ptr.vmem [resolvable:$true] %s156_s22  ;;  %s180_s24 = int_to_ptr.vmem [resolvable:$true] %s179_s24 }
  0x5e   :  { %s1230_s25 = scalar_lea.hbm %s1881_s11, 512 }
  0x5f   :  { %p1231_p12 = scmp.ne.s32.totalorder %s1881_s11, %s1230_s25  ;;  %p1234_p13 = scmp.lt.u32.totalorder %s1230_s25, %s1881_s11 }
  0x61   :  { %p1236_p0 = pnand %p1234_p13, %p1231_p12 }
  0x63   :  { %1239 = shalt.err (!%p1236_p0)
}
  0x64   :  { %s1240_s9 = scalar_lea.vmem %s157_s22, 512  ;;  %p1245_p2 = scmp.lt.s32.totalorder %s157_s22, %s157_s22 }
  0x65   :  { %p1241_p1 = scmp.ne.s32.totalorder %s157_s22, %s1240_s9  ;;  %p1246_p3 = scmp.lt.s32.totalorder %s1240_s9, %s1240_s9 }
  0x67   :  { %p1247_p4 = por %p1246_p3, %p1245_p2 }
  0x69   :  { %p1248_p5 = pnand %p1247_p4, %p1241_p1 }
  0x6b   :  { %1251 = shalt.err (!%p1248_p5)
}
  0x6c   :  { %162 = dma.hbm_to_vmem [thread:$0]  %s1881_s11, 512, %s157_s22, [#allocation21], %s1491_s28, %s1491_s28, %s1492_s29  }
  0x6d   :  { %s1252_s17 = scalar_lea.hbm %s1883_s13, 16 }
  0x6e   :  { %p1253_p6 = scmp.ne.s32.totalorder %s1883_s13, %s1252_s17  ;;  %p1256_p7 = scmp.lt.u32.totalorder %s1252_s17, %s1883_s13 }
  0x70   :  { %p1258_p8 = pnand %p1256_p7, %p1253_p6 }
  0x72   :  { %1261 = shalt.err (!%p1258_p8)
}
  0x73   :  { %s1262_s5 = scalar_lea.vmem %s180_s24, 16  ;;  %s1266_s21 = scalar_lea.vmem %s180_s24, 32 }
  0x74   :  { %p1263_p9 = scmp.ne.s32.totalorder %s180_s24, %s1262_s5  ;;  %p1267_p10 = scmp.lt.s32.totalorder %s180_s24, %s180_s24 }
  0x75   :  { %p1268_p11 = scmp.lt.s32.totalorder %s1266_s21, %s1262_s5 }
  0x77   :  { %p1269_p12 = por %p1268_p11, %p1267_p10 }
  0x79   :  { %p1270_p13 = pnand %p1269_p12, %p1263_p9 }
  0x7b   :  { %1273 = shalt.err (!%p1270_p13)
}
  0x7c   :  { %182 = dma.hbm_to_vmem [thread:$0]  %s1883_s13, 16, %s180_s24, [#allocation24]  }
  0x7d   :  { %s1499_s25 = smov [#allocation2]   ;;  %s1274_s27 = scalar_lea.hbm %s1870_s0, 1024 }
  0x7e   :  { %s34_s26 = sshll.u32 %s1499_s25, 4  ;;  %p1275_p0 = scmp.ne.s32.totalorder %s1870_s0, %s1274_s27  ;;  %s35_s26 = int_to_ptr.vmem [resolvable:$true] %s34_s26 }
  0x7f   :  { %p1278_p1 = scmp.lt.u32.totalorder %s1274_s27, %s1870_s0 }
  0x81   :  { %p1280_p2 = pnand %p1278_p1, %p1275_p0 }
  0x83   :  { %1283 = shalt.err (!%p1280_p2)
}
  0x84   :  { %s1284_s15 = scalar_lea.vmem %s35_s26, 1024  ;;  %p1289_p4 = scmp.lt.s32.totalorder %s35_s26, %s35_s26 }
  0x85   :  { %p1285_p3 = scmp.ne.s32.totalorder %s35_s26, %s1284_s15  ;;  %p1290_p5 = scmp.lt.s32.totalorder %s1284_s15, %s1284_s15 }
  0x87   :  { %p1291_p6 = por %p1290_p5, %p1289_p4 }
  0x89   :  { %p1292_p7 = pnand %p1291_p6, %p1285_p3 }
  0x8b   :  { %1295 = shalt.err (!%p1292_p7)
}
  0x8c   :  { %s1500_s13 = smov 256   ;;  %s1501_s24 = smov 16  }
  0x8d   :  { %40 = dma.hbm_to_vmem [thread:$0]  %s1870_s0, 1024, %s35_s26, [#allocation3], %s1500_s13, %s1500_s13, %s1501_s24  }
  0x8e   :  { %s1502_s1 = smov [#allocation7]   ;;  %s1503_s23 = smov [#allocation10]  }
  0x8f   :  { %s58_s20 = sshll.u32 %s1502_s1, 4  ;;  %s83_s5 = sshll.u32 %s1503_s23, 4  ;;  %s59_s20 = int_to_ptr.vmem [resolvable:$true] %s58_s20  ;;  %s84_s5 = int_to_ptr.vmem [resolvable:$true] %s83_s5 }
  0x90   :  { %s1296_s22 = scalar_lea.hbm %s1872_s2, 512 }
  0x91   :  { %p1297_p8 = scmp.ne.s32.totalorder %s1872_s2, %s1296_s22  ;;  %p1300_p9 = scmp.lt.u32.totalorder %s1296_s22, %s1872_s2 }
  0x93   :  { %p1302_p10 = pnand %p1300_p9, %p1297_p8 }
  0x95   :  { %1305 = shalt.err (!%p1302_p10)
}
  0x96   :  { %s1306_s0 = scalar_lea.vmem %s59_s20, 512  ;;  %p1311_p12 = scmp.lt.s32.totalorder %s59_s20, %s59_s20 }
  0x97   :  { %p1307_p11 = scmp.ne.s32.totalorder %s59_s20, %s1306_s0  ;;  %p1312_p13 = scmp.lt.s32.totalorder %s1306_s0, %s1306_s0 }
  0x99   :  { %p1313_p0 = por %p1312_p13, %p1311_p12 }
  0x9b   :  { %p1314_p1 = pnand %p1313_p0, %p1307_p11 }
  0x9d   :  { %1317 = shalt.err (!%p1314_p1)
}
  0x9e   :  { %64 = dma.hbm_to_vmem [thread:$0]  %s1872_s2, 512, %s59_s20, [#allocation6], %s1491_s28, %s1491_s28, %s1492_s29  }
  0x9f   :  { %s1318_s16 = scalar_lea.hbm %s1874_s4, 16 }
  0xa0   :  { %p1319_p2 = scmp.ne.s32.totalorder %s1874_s4, %s1318_s16  ;;  %p1322_p3 = scmp.lt.u32.totalorder %s1318_s16, %s1874_s4 }
  0xa2   :  { %p1324_p4 = pnand %p1322_p3, %p1319_p2 }
  0xa4   :  { %1327 = shalt.err (!%p1324_p4)
}
  0xa5   :  { %s1328_s7 = scalar_lea.vmem %s84_s5, 16  ;;  %s1332_s1 = scalar_lea.vmem %s84_s5, 32 }
  0xa6   :  { %p1329_p5 = scmp.ne.s32.totalorder %s84_s5, %s1328_s7  ;;  %p1333_p6 = scmp.lt.s32.totalorder %s84_s5, %s84_s5 }
  0xa7   :  { %p1334_p7 = scmp.lt.s32.totalorder %s1332_s1, %s1328_s7 }
  0xa9   :  { %p1335_p8 = por %p1334_p7, %p1333_p6 }
  0xab   :  { %p1336_p9 = pnand %p1335_p8, %p1329_p5 }
  0xad   :  { %1339 = shalt.err (!%p1336_p9)
}
  0xae   :  { %86 = dma.hbm_to_vmem [thread:$0]  %s1874_s4, 16, %s84_s5, [#allocation9]  }
  0xaf   :  { %s1504_s23 = smov [#allocation13]   ;;  %s1505_s11 = smov [#allocation16]  }
  0xb0   :  { %s103_s21 = sshll.u32 %s1504_s23, 4  ;;  %s125_s22 = sshll.u32 %s1505_s11, 4  ;;  %s104_s21 = int_to_ptr.vmem [resolvable:$true] %s103_s21  ;;  %s126_s22 = int_to_ptr.vmem [resolvable:$true] %s125_s22 }
  0xb1   :  { %s1340_s18 = scalar_lea.hbm %s1876_s6, 16 }
  0xb2   :  { %p1341_p10 = scmp.ne.s32.totalorder %s1876_s6, %s1340_s18  ;;  %p1344_p11 = scmp.lt.u32.totalorder %s1340_s18, %s1876_s6 }
  0xb4   :  { %p1346_p12 = pnand %p1344_p11, %p1341_p10 }
  0xb6   :  { %1349 = shalt.err (!%p1346_p12)
}
  0xb7   :  { %s1350_s4 = scalar_lea.vmem %s104_s21, 16  ;;  %s1354_s5 = scalar_lea.vmem %s104_s21, 32 }
  0xb8   :  { %p1351_p13 = scmp.ne.s32.totalorder %s104_s21, %s1350_s4  ;;  %p1355_p0 = scmp.lt.s32.totalorder %s104_s21, %s104_s21 }
  0xb9   :  { %p1356_p1 = scmp.lt.s32.totalorder %s1354_s5, %s1350_s4 }
  0xbb   :  { %p1357_p2 = por %p1356_p1, %p1355_p0 }
  0xbd   :  { %p1358_p3 = pnand %p1357_p2, %p1351_p13 }
  0xbf   :  { %1361 = shalt.err (!%p1358_p3)
}
  0xc0   :  { %106 = dma.hbm_to_vmem [thread:$0]  %s1876_s6, 16, %s104_s21, [#allocation12]  }
  0xc1   :  { %s1362_s13 = scalar_lea.hbm %s1878_s8, 16 }
  0xc2   :  { %p1363_p4 = scmp.ne.s32.totalorder %s1878_s8, %s1362_s13  ;;  %p1366_p5 = scmp.lt.u32.totalorder %s1362_s13, %s1878_s8 }
  0xc4   :  { %p1368_p6 = pnand %p1366_p5, %p1363_p4 }
  0xc6   :  { %1371 = shalt.err (!%p1368_p6)
}
  0xc7   :  { %s1372_s2 = scalar_lea.vmem %s126_s22, 16  ;;  %s1376_s20 = scalar_lea.vmem %s126_s22, 32 }
  0xc8   :  { %p1373_p7 = scmp.ne.s32.totalorder %s126_s22, %s1372_s2  ;;  %p1377_p8 = scmp.lt.s32.totalorder %s126_s22, %s126_s22 }
  0xc9   :  { %p1378_p9 = scmp.lt.s32.totalorder %s1376_s20, %s1372_s2 }
  0xcb   :  { %p1379_p10 = por %p1378_p9, %p1377_p8 }
  0xcd   :  { %p1380_p11 = pnand %p1379_p10, %p1373_p7 }
  0xcf   :  { %1383 = shalt.err (!%p1380_p11)
}
  0xd0   :  { %128 = dma.hbm_to_vmem [thread:$0]  %s1878_s8, 16, %s126_s22, [#allocation15]  }
  0xd1   :  { %s1506_s21 = smov [#allocation19]   ;;  %s1507_s25 = smov [#allocation22]  }
  0xd2   :  { %s147_s11 = sshll.u32 %s1506_s21, 4  ;;  %s169_s3 = sshll.u32 %s1507_s25, 4  ;;  %s148_s11 = int_to_ptr.vmem [resolvable:$true] %s147_s11  ;;  %s170_s3 = int_to_ptr.vmem [resolvable:$true] %s169_s3 }
  0xd3   :  { %s1384_s0 = scalar_lea.hbm %s1880_s10, 16 }
  0xd4   :  { %p1385_p12 = scmp.ne.s32.totalorder %s1880_s10, %s1384_s0  ;;  %p1388_p13 = scmp.lt.u32.totalorder %s1384_s0, %s1880_s10 }
  0xd6   :  { %p1390_p0 = pnand %p1388_p13, %p1385_p12 }
  0xd8   :  { %1393 = shalt.err (!%p1390_p0)
}
  0xd9   :  { %s1394_s8 = scalar_lea.vmem %s148_s11, 16  ;;  %s1398_s22 = scalar_lea.vmem %s148_s11, 32 }
  0xda   :  { %p1395_p1 = scmp.ne.s32.totalorder %s148_s11, %s1394_s8  ;;  %p1399_p2 = scmp.lt.s32.totalorder %s148_s11, %s148_s11 }
  0xdb   :  { %p1400_p3 = scmp.lt.s32.totalorder %s1398_s22, %s1394_s8 }
  0xdd   :  { %p1401_p4 = por %p1400_p3, %p1399_p2 }
  0xdf   :  { %p1402_p5 = pnand %p1401_p4, %p1395_p1 }
  0xe1   :  { %1405 = shalt.err (!%p1402_p5)
}
  0xe2   :  { %150 = dma.hbm_to_vmem [thread:$0]  %s1880_s10, 16, %s148_s11, [#allocation18]  }
  0xe3   :  { %s1406_s13 = scalar_lea.hbm %s1882_s12, 16 }
  0xe4   :  { %p1407_p6 = scmp.ne.s32.totalorder %s1882_s12, %s1406_s13  ;;  %p1410_p7 = scmp.lt.u32.totalorder %s1406_s13, %s1882_s12 }
  0xe6   :  { %p1412_p8 = pnand %p1410_p7, %p1407_p6 }
  0xe8   :  { %1415 = shalt.err (!%p1412_p8)
}
  0xe9   :  { %s1416_s2 = scalar_lea.vmem %s170_s3, 16  ;;  %s1420_s20 = scalar_lea.vmem %s170_s3, 32 }
  0xea   :  { %p1417_p9 = scmp.ne.s32.totalorder %s170_s3, %s1416_s2  ;;  %p1421_p10 = scmp.lt.s32.totalorder %s170_s3, %s170_s3 }
  0xeb   :  { %p1422_p11 = scmp.lt.s32.totalorder %s1420_s20, %s1416_s2 }
  0xed   :  { %p1423_p12 = por %p1422_p11, %p1421_p10 }
  0xef   :  { %p1424_p13 = pnand %p1423_p12, %p1417_p9 }
  0xf1   :  { %1427 = shalt.err (!%p1424_p13)
}
  0xf2   :  { %172 = dma.hbm_to_vmem [thread:$0]  %s1882_s12, 16, %s170_s3, [#allocation21]  }
  0xf3   :  { %s1508_s23 = smov [#allocation25]   ;;  %s1428_s18 = scalar_lea.hbm %s1884_s14, 16 }
  0xf4   :  { %s189_s21 = sshll.u32 %s1508_s23, 4  ;;  %p1429_p0 = scmp.ne.s32.totalorder %s1884_s14, %s1428_s18  ;;  %s190_s21 = int_to_ptr.vmem [resolvable:$true] %s189_s21 }
  0xf5   :  { %p1432_p1 = scmp.lt.u32.totalorder %s1428_s18, %s1884_s14 }
  0xf7   :  { %p1434_p2 = pnand %p1432_p1, %p1429_p0 }
  0xf9   :  { %1437 = shalt.err (!%p1434_p2)
}
  0xfa   :  { %s1438_s4 = scalar_lea.vmem %s190_s21, 16  ;;  %s1442_s12 = scalar_lea.vmem %s190_s21, 32 }
  0xfb   :  { %p1439_p3 = scmp.ne.s32.totalorder %s190_s21, %s1438_s4  ;;  %p1443_p4 = scmp.lt.s32.totalorder %s190_s21, %s190_s21 }
  0xfc   :  { %p1444_p5 = scmp.lt.s32.totalorder %s1442_s12, %s1438_s4 }
  0xfe   :  { %p1445_p6 = por %p1444_p5, %p1443_p4 }
 0x100   :  { %p1446_p7 = pnand %p1445_p6, %p1439_p3 }
 0x102   :  { %1449 = shalt.err (!%p1446_p7)
}
 0x103   :  { %192 = dma.hbm_to_vmem [thread:$0]  %s1884_s14, 16, %s190_s21, [#allocation24]  }
 0x104   :  { %1472 = dma.done.wait [#allocation3], 1024  }
 0x105   :  { %1473 = vsyncadd [#allocation3], 4294966272 }
 0x106   :  { %1474 = dma.done.wait [#allocation6], 1024  }
 0x107   :  { %1475 = vsyncadd [#allocation6], 4294966272 }
 0x108   :  { %1476 = dma.done.wait [#allocation9], 3344  }
 0x109   :  { %1477 = vsyncadd [#allocation9], 4294963952 }
 0x10a   :  { %1478 = dma.done.wait [#allocation12], 32  }
 0x10b   :  { %1479 = vsyncadd [#allocation12], 4294967264 }
 0x10c   :  { %1480 = dma.done.wait [#allocation15], 528  }
 0x10d   :  { %1481 = vsyncadd [#allocation15], 4294966768 }
 0x10e   :  { %1482 = dma.done.wait [#allocation18], 528  }
 0x10f   :  { %1483 = vsyncadd [#allocation18], 4294966768 }
 0x110   :  { %1484 = dma.done.wait [#allocation21], 528  }
 0x111   :  { %1485 = vsyncadd [#allocation21], 4294966768 }
 0x112   :  { %1486 = dma.done.wait [#allocation24], 32  }
 0x113   :  { %1487 = vsyncadd [#allocation24], 4294967264  ;;  %v1509_v0 = vmov 0.0|0.0   ;;  %v1510_v1 = vmov 0   ;;  %v246_v2 = vld [vmem:[#allocation8] sm:$0xff]  ;;  %v247_v3 = vld [vmem:[#allocation8 + $0x8] sm:$0xff] }
 0x114   :  { %1017 = vmatprep.subr.bf16.mxu0 %v1509_v0  ;;  %1102 = vset.pattern.permute.xlu0 %v1510_v1  ;;  %v248_v4 = vld [vmem:[#allocation8 + $0x10] sm:$0xff]  ;;  %v1018_v5 = vpack.c.bf16 %v247_v3, %v246_v2  ;;  %v249_v6 = vld [vmem:[#allocation8 + $0x18] sm:$0xff]  ;;  %v250_v8 = vld [vmem:[#allocation8 + $0x20] sm:$0xff]  ;;  %vm279_vm0 = vcmask 654336   ;;  %vm413_vm1 = vcmask 261120   ;;  %s1511_s14 = smov [#allocation26]  }
 0x115   :  { %1103 = vset.pattern.permute.xlu1 %v1510_v1  ;;  %v1021_v7 = vpack.c.bf16 %v249_v6, %v248_v4  ;;  %v251_v9 = vld [vmem:[#allocation8 + $0x28] sm:$0xff]  ;;  %v252_v11 = vld [vmem:[#allocation8 + $0x30] sm:$0xff]  ;;  %v253_v12 = vld [vmem:[#allocation8 + $0x38] sm:$0xff]  ;;  %s908_s8 = sshll.u32 %s1511_s14, 4  ;;  %s909_s8 = int_to_ptr.vmem [resolvable:$true] %s908_s8 }
 0x116   :  { %1019 = vmatpush1.bf16.msra.mxu0 %v1018_v5  ;;  %v1024_v10 = vpack.c.bf16 %v251_v9, %v250_v8  ;;  %v239_v13 = vld [vmem:[#allocation2 + $0x8] sm:$0xff]  ;;  %v1027_v14 = vpack.c.bf16 %v253_v12, %v252_v11  ;;  %v377_v15 = vld [vmem:[#allocation7] sm:$0xff]  ;;  %v379_v16 = vld [vmem:[#allocation7 + $0x10] sm:$0xff]  ;;  %s1450_s22 = scalar_lea.vmem %s909_s8, 512  ;;  %p1455_p9 = scmp.lt.s32.totalorder %s909_s8, %s909_s8 }
 0x117   :  { %1020 = vmatprep.subr.bf16.mxu0 %v1509_v0  ;;  %928 = vmatprep.mubr.msk.f32.mxu0 %vm279_vm0, %v239_v13  ;;  %v254_v17 = vld [vmem:[#allocation8 + $0x40] sm:$0xff]  ;;  %v255_v18 = vld [vmem:[#allocation8 + $0x48] sm:$0xff]  ;;  %v380_v20 = vld [vmem:[#allocation7 + $0x18] sm:$0xff]  ;;  %p1451_p8 = scmp.ne.s32.totalorder %s909_s8, %s1450_s22  ;;  %p1456_p10 = scmp.lt.s32.totalorder %s1450_s22, %s1450_s22 }
 0x118   :  { %383 = vperm.xlu0 %1102, %v377_v15   ;;  %393 = vperm.xlu1 %1103, %v379_v16   ;;  %v378_v19 = vld [vmem:[#allocation7 + $0x8] sm:$0xff]  ;;  %v1030_v21 = vpack.c.bf16 %v255_v18, %v254_v17  ;;  %v256_v22 = vld [vmem:[#allocation8 + $0x50] sm:$0xff]  ;;  %v257_v23 = vld [vmem:[#allocation8 + $0x58] sm:$0xff] }
 0x119   :  { %v1033_v24 = vpack.c.bf16 %v257_v23, %v256_v22  ;;  %v258_v25 = vld [vmem:[#allocation8 + $0x60] sm:$0xff]  ;;  %v259_v26 = vld [vmem:[#allocation8 + $0x68] sm:$0xff]  ;;  %v260_v28 = vld [vmem:[#allocation8 + $0x70] sm:$0xff]  ;;  %p1457_p11 = por %p1456_p10, %p1455_p9 }
 0x11a   :  { %1022 = vmatpush1.bf16.msra.mxu0 %v1021_v7  ;;  %v1036_v27 = vpack.c.bf16 %v259_v26, %v258_v25  ;;  %v261_v29 = vld [vmem:[#allocation8 + $0x78] sm:$0xff]  ;;  %v262_v31 = vld [vmem:[#allocation8 + $0x80] sm:$0xff]  ;;  %v263_v32 = vld [vmem:[#allocation8 + $0x88] sm:$0xff] }
 0x11b   :  { %1023 = vmatprep.subr.bf16.mxu0 %v1509_v0  ;;  %v1039_v30 = vpack.c.bf16 %v261_v29, %v260_v28  ;;  %v1042_v33 = vpack.c.bf16 %v263_v32, %v262_v31  ;;  %v264_v34 = vld [vmem:[#allocation8 + $0x90] sm:$0xff]  ;;  %v265_v35 = vld [vmem:[#allocation8 + $0x98] sm:$0xff]  ;;  %v266_v37 = vld [vmem:[#allocation8 + $0xa0] sm:$0xff]  ;;  %p1458_p12 = pnand %p1457_p11, %p1451_p8 }
 0x11c   :  { %388 = vperm.xlu0 %1102, %v378_v19   ;;  %398 = vperm.xlu1 %1103, %v380_v20   ;;  %v1045_v36 = vpack.c.bf16 %v265_v35, %v264_v34  ;;  %v267_v38 = vld [vmem:[#allocation8 + $0xa8] sm:$0xff]  ;;  %v268_v40 = vld [vmem:[#allocation8 + $0xb0] sm:$0xff]  ;;  %v269_v41 = vld [vmem:[#allocation8 + $0xb8] sm:$0xff] }
 0x11d   :  { %v1048_v39 = vpack.c.bf16 %v267_v38, %v266_v37  ;;  %v1051_v42 = vpack.c.bf16 %v269_v41, %v268_v40  ;;  %v270_v43 = vld [vmem:[#allocation8 + $0xc0] sm:$0xff]  ;;  %v271_v44 = vld [vmem:[#allocation8 + $0xc8] sm:$0xff]  ;;  %v241_v47 = vld [vmem:[#allocation2 + $0x18] sm:$0xff] }
 0x11e   :  { %1025 = vmatpush1.bf16.msra.mxu0 %v1024_v10  ;;  %v1054_v45 = vpack.c.bf16 %v271_v44, %v270_v43  ;;  %v238_v46 = vld [vmem:[#allocation2] sm:$0xff]  ;;  %v240_v48 = vld [vmem:[#allocation2 + $0x10] sm:$0xff]  ;;  %v243_v49 = vld [vmem:[#allocation2 + $0x28] sm:$0xff] }
 0x11f   :  { %1026 = vmatprep.subr.bf16.mxu0 %v1509_v0  ;;  %v242_v50 = vld [vmem:[#allocation2 + $0x20] sm:$0xff]  ;;  %v245_v51 = vld [vmem:[#allocation2 + $0x38] sm:$0xff]  ;;  %v244_v52 = vld [vmem:[#allocation2 + $0x30] sm:$0xff] }
 0x120   :  { %v927_v53 = vld [vmem:[#allocation10] ss:$0 sm:$0xff]  ;;  %v405_v58 = vld [vmem:[#allocation5] sm:$0xff]  ;;  %v406_v1 = vld [vmem:[#allocation5 + $0x8] sm:$0xff] }
 0x121   :  { %v407_v9 = vld [vmem:[#allocation5 + $0x10] sm:$0xff]  ;;  %v408_v17 = vld [vmem:[#allocation5 + $0x18] sm:$0xff] }
 0x122   :  { %1028 = vmatpush1.bf16.msra.mxu0 %v1027_v14  ;;  %v490_v43 = vld [vmem:[#allocation14 + $0x8] sm:$0xff] }
 0x123   :  { %1029 = vmatprep.subr.bf16.mxu0 %v1509_v0 }
 0x126   :  { %1031 = vmatpush1.bf16.msra.mxu0 %v1030_v21 }
 0x127   :  { %1032 = vmatprep.subr.bf16.mxu0 %v1509_v0 }
 0x12a   :  { %1034 = vmatpush1.bf16.msra.mxu0 %v1033_v24 }
 0x12b   :  { %1035 = vmatprep.subr.bf16.mxu0 %v1509_v0 }
 0x12e   :  { %1037 = vmatpush1.bf16.msra.mxu0 %v1036_v27 }
 0x12f   :  { %1038 = vmatprep.subr.bf16.mxu0 %v1509_v0 }
 0x132   :  { %1040 = vmatpush1.bf16.msra.mxu0 %v1039_v30 }
 0x133   :  { %1041 = vmatprep.subr.bf16.mxu0 %v1509_v0 }
 0x136   :  { %1043 = vmatpush1.bf16.msra.mxu0 %v1042_v33 }
 0x137   :  { %1044 = vmatprep.subr.bf16.mxu0 %v1509_v0 }
 0x13a   :  { %1046 = vmatpush1.bf16.msra.mxu0 %v1045_v36 }
 0x13b   :  { %1047 = vmatprep.subr.bf16.mxu0 %v1509_v0 }
 0x13e   :  { %1049 = vmatpush1.bf16.msra.mxu0 %v1048_v39 }
 0x13f   :  { %1050 = vmatprep.subr.bf16.mxu0 %v1509_v0 }
 0x142   :  { %1052 = vmatpush1.bf16.msra.mxu0 %v1051_v42  ;;  %v489_v42 = vld [vmem:[#allocation14] sm:$0xff] }
 0x143   :  { %1053 = vmatprep.subr.bf16.mxu0 %v1509_v0  ;;  %v1056_v44 = vpack.c.bf16 %v490_v43, %v489_v42 }
 0x145   :  { %1057 = vmatprep.subr.bf16.mxu1 %v1056_v44 }
 0x146   :  { %1055 = vmatpush1.bf16.msra.mxu0 %v1054_v45  ;;  %v491_v45 = vld [vmem:[#allocation14 + $0x10] sm:$0xff]  ;;  %1059 = vmatpush3.bf16.msra.mxu1 %v1056_v44 }
 0x149   :  { %357 = vmatmul.mubr.f32.vlgmr.msra.gmra.mrb[0].mxu0 %v238_v46  ;;  %v492_v46 = vld [vmem:[#allocation14 + $0x18] sm:$0xff] }
 0x14a   :  { %929 = vmatprep.mubr.msk.f32.mxu0 %vm279_vm0, %v241_v47  ;;  %v1060_v47 = vpack.c.bf16 %v492_v46, %v491_v45 }
 0x14c   :  { %1061 = vmatprep.subr.bf16.mxu1 %v1060_v47 }
 0x14d   :  { %362 = vmatmul.mubr.f32.gmra.mrb[2].mxu0 %v240_v48  ;;  %1063 = vmatpush3.bf16.msra.mxu1 %v1060_v47  ;;  %v601_v48 = vld [vmem:[#allocation17] sm:$0xff] }
 0x14e   :  { %930 = vmatprep.mubr.msk.f32.mxu0 %vm279_vm0, %v243_v49  ;;  %v602_v49 = vld [vmem:[#allocation17 + $0x8] sm:$0xff] }
 0x151   :  { %367 = vmatmul.mubr.f32.gmra.mrb[4].mxu0 %v242_v50  ;;  %v1064_v50 = vpack.c.bf16 %v602_v49, %v601_v48 }
 0x152   :  { %931 = vmatprep.mubr.msk.f32.mxu0 %vm279_vm0, %v245_v51 }
 0x153   :  { %1065 = vmatprep.subr.bf16.mxu1 %v1064_v50 }
 0x155   :  { %372 = vmatmul.mubr.f32.gmra.mrb[6].mxu0 %v244_v52 }
 0x197   :  { %v384_v54 = vpop.permute.xlu0 %383  ;;  %v394_v4 = vpop.permute.xlu1 %393 }
 0x19b   :  { %v389_v61 = vpop.permute.xlu0 %388  ;;  %v399_v16 = vpop.permute.xlu1 %398 }
 0x21c   :  { %v358_v55 = vpop.f32.mrb[0].mxu0 }
 0x21d   :  { %v359_v56 = vadd.f32 %v927_v53, %v358_v55  ;;  %v360_v57 = vpop.f32.mrb[1].mxu0 }
 0x21f   :  { %v401_v59 = vmul.f32 %v384_v54, %v359_v56 }
 0x220   :  { %v363_v60 = vpop.f32.mrb[2].mxu0 }
 0x221   :  { %v364_v62 = vadd.f32 %v927_v53, %v363_v60  ;;  %v365_v63 = vpop.f32.mrb[3].mxu0  ;;  %v409_v0 = vadd.f32 %v405_v58, %v401_v59 }
 0x223   :  { %v402_v2 = vmul.f32 %v389_v61, %v364_v62  ;;  %v414_v3 = vsel %vm413_vm1, %v409_v0, 0.0 }
 0x224   :  { %v368_v5 = vpop.f32.mrb[4].mxu0  ;;  %415 = vadd.xlane.f32.xlu0 %v414_v3 }
 0x225   :  { %v369_v6 = vadd.f32 %v927_v53, %v368_v5  ;;  %v370_v7 = vpop.f32.mrb[5].mxu0  ;;  %v410_v8 = vadd.f32 %v406_v1, %v402_v2  ;;  %v933_v2 = vld [vmem:[#allocation13] ss:$0 sm:$0xff] }
 0x227   :  { %v403_v10 = vmul.f32 %v394_v4, %v369_v6  ;;  %v417_v11 = vsel %vm413_vm1, %v410_v8, 0.0 }
 0x228   :  { %v373_v12 = vpop.f32.mrb[6].mxu0  ;;  %418 = vadd.xlane.f32.xlu1 %v417_v11 }
 0x229   :  { %v374_v13 = vadd.f32 %v927_v53, %v373_v12  ;;  %v375_v14 = vpop.f32.mrb[7].mxu0  ;;  %v411_v15 = vadd.f32 %v407_v9, %v403_v10 }
 0x22b   :  { %v404_v18 = vmul.f32 %v399_v16, %v374_v13  ;;  %v420_v19 = vsel %vm413_vm1, %v411_v15, 0.0 }
 0x22c   :  { %421 = vadd.xlane.f32.xlu0 %v420_v19 }
 0x22d   :  { %v412_v20 = vadd.f32 %v408_v17, %v404_v18  ;;  %v603_v17 = vld [vmem:[#allocation17 + $0x10] sm:$0xff]  ;;  %v604_v18 = vld [vmem:[#allocation17 + $0x18] sm:$0xff] }
 0x22e   :  { %v1068_v19 = vpack.c.bf16 %v604_v18, %v603_v17 }
 0x22f   :  { %v423_v21 = vsel %vm413_vm1, %v412_v20, 0.0 }
 0x230   :  { %424 = vadd.xlane.f32.xlu0 %v423_v21  ;;  %v714_v21 = vld [vmem:[#allocation20 + $0x8] sm:$0xff] }
 0x2b1   :  { %v416_v22 = vpop.xlane.xlu0 %415 }
 0x2b2   :  { %v427_v23 = vmul.f32 0.03125, %v416_v22 }
 0x2b4   :  { %v431_v24 = vsub.f32 %v409_v0, %v427_v23  ;;  %v932_v0 = vld [vmem:[#allocation11] ss:$0 sm:$0xff]  ;;  %v934_v23 = vld [vmem:[#allocation16] ss:$0 sm:$0xff] }
 0x2b5   :  { %v419_v25 = vpop.xlane.xlu1 %418 }
 0x2b6   :  { %v428_v26 = vmul.f32 0.03125, %v419_v25  ;;  %v435_v27 = vmul.f32 %v431_v24, %v431_v24 }
 0x2b8   :  { %v432_v28 = vsub.f32 %v410_v8, %v428_v26  ;;  %v439_v29 = vsel %vm413_vm1, %v435_v27, 0.0 }
 0x2b9   :  { %440 = vadd.xlane.f32.xlu1 %v439_v29  ;;  %v422_v30 = vpop.xlane.xlu0 %421 }
 0x2ba   :  { %v429_v31 = vmul.f32 0.03125, %v422_v30  ;;  %v436_v32 = vmul.f32 %v432_v28, %v432_v28 }
 0x2bc   :  { %v433_v33 = vsub.f32 %v411_v15, %v429_v31  ;;  %v442_v34 = vsel %vm413_vm1, %v436_v32, 0.0 }
 0x2bd   :  { %443 = vadd.xlane.f32.xlu0 %v442_v34  ;;  %v425_v35 = vpop.xlane.xlu0 %424 }
 0x2be   :  { %v430_v36 = vmul.f32 0.03125, %v425_v35  ;;  %v437_v37 = vmul.f32 %v433_v33, %v433_v33 }
 0x2c0   :  { %v434_v38 = vsub.f32 %v412_v20, %v430_v36  ;;  %v445_v39 = vsel %vm413_vm1, %v437_v37, 0.0  ;;  %v713_v20 = vld [vmem:[#allocation20] sm:$0xff]  ;;  %v715_v36 = vld [vmem:[#allocation20 + $0x10] sm:$0xff]  ;;  %v716_v37 = vld [vmem:[#allocation20 + $0x18] sm:$0xff] }
 0x2c1   :  { %446 = vadd.xlane.f32.xlu1 %v445_v39  ;;  %v1072_v22 = vpack.c.bf16 %v714_v21, %v713_v20  ;;  %v939_v39 = vld [vmem:[#allocation19] ss:$0 sm:$0xff] }
 0x2c2   :  { %v438_v40 = vmul.f32 %v434_v38, %v434_v38 }
 0x2c4   :  { %v448_v41 = vsel %vm413_vm1, %v438_v40, 0.0 }
 0x2c5   :  { %449 = vadd.xlane.f32.xlu0 %v448_v41 }
 0x346   :  { %v441_v51 = vpop.xlane.xlu1 %440 }
 0x347   :  { %v451_v52 = vmul.f32 0.03125, %v441_v51 }
 0x349   :  { %v455_v53 = vadd.f32 1e-05, %v451_v52  ;;  %v944_v52 = vld [vmem:[#allocation22] ss:$0 sm:$0xff] }
 0x34a   :  { %v444_v54 = vpop.xlane.xlu0 %443 }
 0x34b   :  { %1104 = vrsqrt.f32 %v455_v53  ;;  %v452_v55 = vmul.f32 0.03125, %v444_v54 }
 0x34d   :  { %v456_v56 = vadd.f32 1e-05, %v452_v55 }
 0x34e   :  { %v447_v57 = vpop.xlane.xlu1 %446 }
 0x34f   :  { %1106 = vrsqrt.f32 %v456_v56  ;;  %v453_v58 = vmul.f32 0.03125, %v447_v57 }
 0x351   :  { %v457_v59 = vadd.f32 1e-05, %v453_v58 }
 0x352   :  { %v450_v60 = vpop.xlane.xlu0 %449 }
 0x353   :  { %1108 = vrsqrt.f32 %v457_v59  ;;  %v454_v61 = vmul.f32 0.03125, %v450_v60 }
 0x355   :  { %v1105_v62 = vpop.eup %1104  ;;  %v458_v63 = vadd.f32 1e-05, %v454_v61 }
 0x356   :  { %v463_v1 = vmul.f32 %v1105_v62, %v431_v24 }
 0x357   :  { %1110 = vrsqrt.f32 %v458_v63 }
 0x358   :  { %v474_v3 = vmul.f32 %v932_v0, %v463_v1 }
 0x359   :  { %v1107_v4 = vpop.eup %1106 }
 0x35a   :  { %v1815_v5 = vadd.f32 %v933_v2, %v474_v3  ;;  %v464_v6 = vmul.f32 %v1107_v4, %v432_v28 }
 0x35c   :  { %983 = vmatprep.mubr.msk.f32.mxu1 %vm413_vm1, %v1815_v5  ;;  %v475_v7 = vmul.f32 %v932_v0, %v464_v6 }
 0x35d   :  { %v1109_v8 = vpop.eup %1108 }
 0x35e   :  { %v1819_v9 = vadd.f32 %v933_v2, %v475_v7  ;;  %v465_v10 = vmul.f32 %v1109_v8, %v433_v33 }
 0x360   :  { %984 = vmatmul.mubr.msk.f32.vlgmr.msra.gmra.mrb[0].mxu1 %vm413_vm1, %v1819_v9  ;;  %v476_v11 = vmul.f32 %v932_v0, %v465_v10 }
 0x361   :  { %v1111_v12 = vpop.eup %1110  ;;  %1067 = vmatpush3.bf16.msra.mxu1 %v1064_v50 }
 0x362   :  { %v1823_v13 = vadd.f32 %v933_v2, %v476_v11  ;;  %v466_v14 = vmul.f32 %v1111_v12, %v434_v38  ;;  %1069 = vmatprep.subr.bf16.mxu1 %v1068_v19  ;;  %v1076_v38 = vpack.c.bf16 %v716_v37, %v715_v36 }
 0x364   :  { %986 = vmatprep.mubr.msk.f32.mxu1 %vm413_vm1, %v1823_v13  ;;  %v477_v15 = vmul.f32 %v932_v0, %v466_v14 }
 0x365   :  { %1071 = vmatpush3.bf16.msra.mxu1 %v1068_v19 }
 0x366   :  { %v1827_v16 = vadd.f32 %v933_v2, %v477_v15  ;;  %1073 = vmatprep.subr.bf16.mxu1 %v1072_v22 }
 0x368   :  { %987 = vmatmul.mubr.msk.f32.gmra.mrb[2].mxu1 %vm413_vm1, %v1827_v16 }
 0x433   :  { %v985_v24 = vpop.f32.mrb[0].mxu1 }
 0x434   :  { %v584_v25 = vadd.f32 %v985_v24, %v934_v23  ;;  %v578_v26 = vpop.f32.mrb[1].mxu1 }
 0x435   :  { %v579_v27 = vadd.f32 %v934_v23, %v578_v26 }
 0x436   :  { %v598_v29 = vmax.f32 %v584_v25, 0.0 }
 0x437   :  { %v597_v28 = vmax.f32 %v579_v27, 0.0 }
 0x439   :  { %997 = vmatprep.mubr.msk.f32.mxu1 %vm413_vm1, %v597_v28 }
 0x43a   :  { %998 = vmatmul.mubr.msk.f32.vlgmr.msra.gmra.mrb[4].mxu1 %vm413_vm1, %v598_v29 }
 0x43b   :  { %v988_v30 = vpop.f32.mrb[2].mxu1  ;;  %1075 = vmatpush3.bf16.msra.mxu1 %v1072_v22 }
 0x43c   :  { %v594_v31 = vadd.f32 %v988_v30, %v934_v23  ;;  %v588_v32 = vpop.f32.mrb[3].mxu1  ;;  %1077 = vmatprep.subr.bf16.mxu1 %v1076_v38 }
 0x43d   :  { %v589_v33 = vadd.f32 %v934_v23, %v588_v32 }
 0x43e   :  { %v600_v35 = vmax.f32 %v594_v31, 0.0 }
 0x43f   :  { %v599_v34 = vmax.f32 %v589_v33, 0.0  ;;  %1079 = vmatpush3.bf16.msra.mxu1 %v1076_v38  ;;  %v949_v38 = vld [vmem:[#allocation23] ss:$0 sm:$0xff] }
 0x441   :  { %1000 = vmatprep.mubr.msk.f32.mxu1 %vm413_vm1, %v599_v34 }
 0x442   :  { %1001 = vmatmul.mubr.msk.f32.gmra.mrb[6].mxu1 %vm413_vm1, %v600_v35 }
 0x50d   :  { %v999_v40 = vpop.f32.mrb[4].mxu1 }
 0x50e   :  { %v696_v41 = vadd.f32 %v999_v40, %v939_v39  ;;  %v690_v42 = vpop.f32.mrb[5].mxu1 }
 0x50f   :  { %v691_v43 = vadd.f32 %v939_v39, %v690_v42  ;;  %v950_v42 = vld [vmem:[#allocation25] ss:$0 sm:$0xff] }
 0x510   :  { %v710_v45 = vmax.f32 %v696_v41, 0.0 }
 0x511   :  { %v709_v44 = vmax.f32 %v691_v43, 0.0 }
 0x513   :  { %1011 = vmatprep.mubr.msk.f32.mxu1 %vm413_vm1, %v709_v44 }
 0x514   :  { %1012 = vmatmul.mubr.msk.f32.vlgmr.msra.gmra.mrb[8].mxu1 %vm413_vm1, %v710_v45 }
 0x515   :  { %v1002_v46 = vpop.f32.mrb[6].mxu1 }
 0x516   :  { %v706_v47 = vadd.f32 %v1002_v46, %v939_v39  ;;  %v700_v48 = vpop.f32.mrb[7].mxu1 }
 0x517   :  { %v701_v49 = vadd.f32 %v939_v39, %v700_v48 }
 0x518   :  { %v712_v51 = vmax.f32 %v706_v47, 0.0 }
 0x519   :  { %v711_v50 = vmax.f32 %v701_v49, 0.0 }
 0x51b   :  { %1014 = vmatprep.mubr.msk.f32.mxu1 %vm413_vm1, %v711_v50 }
 0x51c   :  { %1015 = vmatmul.mubr.msk.f32.gmra.mrb[10].mxu1 %vm413_vm1, %v712_v51 }
 0x5e7   :  { %v1013_v53 = vpop.f32.mrb[8].mxu1 }
 0x5e8   :  { %v808_v54 = vadd.f32 %v1013_v53, %v944_v52  ;;  %v802_v55 = vpop.f32.mrb[9].mxu1 }
 0x5e9   :  { %v803_v56 = vadd.f32 %v944_v52, %v802_v55 }
 0x5ea   :  { %v822_v57 = vadd.f32 %v808_v54, %v1819_v9 }
 0x5eb   :  { %v821_v58 = vadd.f32 %v803_v56, %v1815_v5 }
 0x5ec   :  { %v828_v59 = vsel %vm413_vm1, %v822_v57, 0.0 }
 0x5ed   :  { %829 = vadd.xlane.f32.xlu0 %v828_v59  ;;  %v825_v60 = vsel %vm413_vm1, %v821_v58, 0.0 }
 0x5ee   :  { %826 = vadd.xlane.f32.xlu1 %v825_v60 }
 0x5ef   :  { %v1016_v61 = vpop.f32.mrb[10].mxu1 }
 0x5f0   :  { %v818_v62 = vadd.f32 %v1016_v61, %v944_v52  ;;  %v812_v63 = vpop.f32.mrb[11].mxu1 }
 0x5f1   :  { %v813_v0 = vadd.f32 %v944_v52, %v812_v63 }
 0x5f2   :  { %v824_v1 = vadd.f32 %v818_v62, %v1827_v16 }
 0x5f3   :  { %v823_v2 = vadd.f32 %v813_v0, %v1823_v13 }
 0x5f4   :  { %v834_v3 = vsel %vm413_vm1, %v824_v1, 0.0 }
 0x5f5   :  { %835 = vadd.xlane.f32.xlu0 %v834_v3  ;;  %v831_v4 = vsel %vm413_vm1, %v823_v2, 0.0 }
 0x5f6   :  { %832 = vadd.xlane.f32.xlu1 %v831_v4 }
 0x67a   :  { %v830_v5 = vpop.xlane.xlu0 %829 }
 0x67b   :  { %v838_v6 = vmul.f32 0.03125, %v830_v5  ;;  %v827_v7 = vpop.xlane.xlu1 %826 }
 0x67c   :  { %v837_v8 = vmul.f32 0.03125, %v827_v7 }
 0x67d   :  { %v842_v9 = vsub.f32 %v822_v57, %v838_v6 }
 0x67e   :  { %v841_v10 = vsub.f32 %v821_v58, %v837_v8 }
 0x67f   :  { %v846_v11 = vmul.f32 %v842_v9, %v842_v9 }
 0x680   :  { %v845_v12 = vmul.f32 %v841_v10, %v841_v10 }
 0x681   :  { %v852_v14 = vsel %vm413_vm1, %v846_v11, 0.0 }
 0x682   :  { %853 = vadd.xlane.f32.xlu0 %v852_v14  ;;  %v836_v15 = vpop.xlane.xlu0 %835  ;;  %v849_v13 = vsel %vm413_vm1, %v845_v12, 0.0 }
 0x683   :  { %v840_v16 = vmul.f32 0.03125, %v836_v15  ;;  %850 = vadd.xlane.f32.xlu1 %v849_v13  ;;  %v833_v17 = vpop.xlane.xlu1 %832 }
 0x684   :  { %v839_v18 = vmul.f32 0.03125, %v833_v17 }
 0x685   :  { %v844_v19 = vsub.f32 %v824_v1, %v840_v16 }
 0x686   :  { %v843_v20 = vsub.f32 %v823_v2, %v839_v18 }
 0x687   :  { %v848_v21 = vmul.f32 %v844_v19, %v844_v19 }
 0x688   :  { %v847_v22 = vmul.f32 %v843_v20, %v843_v20 }
 0x689   :  { %v858_v23 = vsel %vm413_vm1, %v848_v21, 0.0 }
 0x68a   :  { %859 = vadd.xlane.f32.xlu0 %v858_v23  ;;  %v855_v24 = vsel %vm413_vm1, %v847_v22, 0.0 }
 0x68b   :  { %856 = vadd.xlane.f32.xlu1 %v855_v24 }
 0x70f   :  { %v854_v25 = vpop.xlane.xlu0 %853 }
 0x710   :  { %v862_v26 = vmul.f32 0.03125, %v854_v25  ;;  %v851_v27 = vpop.xlane.xlu1 %850 }
 0x711   :  { %v861_v28 = vmul.f32 0.03125, %v851_v27 }
 0x712   :  { %v866_v29 = vadd.f32 1e-05, %v862_v26 }
 0x713   :  { %v865_v30 = vadd.f32 1e-05, %v861_v28 }
 0x714   :  { %1112 = vrsqrt.f32 %v866_v29 }
 0x715   :  { %1114 = vrsqrt.f32 %v865_v30 }
 0x717   :  { %v860_v31 = vpop.xlane.xlu0 %859 }
 0x718   :  { %v864_v32 = vmul.f32 0.03125, %v860_v31  ;;  %v857_v33 = vpop.xlane.xlu1 %856 }
 0x719   :  { %v863_v34 = vmul.f32 0.03125, %v857_v33 }
 0x71a   :  { %v868_v35 = vadd.f32 1e-05, %v864_v32 }
 0x71b   :  { %v867_v36 = vadd.f32 1e-05, %v863_v34 }
 0x71c   :  { %1116 = vrsqrt.f32 %v868_v35 }
 0x71d   :  { %1118 = vrsqrt.f32 %v867_v36 }
 0x71e   :  { %v1113_v37 = vpop.eup %1112 }
 0x71f   :  { %v1115_v39 = vpop.eup %1114  ;;  %v874_v40 = vmul.f32 %v1113_v37, %v842_v9 }
 0x720   :  { %v873_v41 = vmul.f32 %v1115_v39, %v841_v10 }
 0x721   :  { %v885_v43 = vmul.f32 %v949_v38, %v874_v40 }
 0x722   :  { %v884_v44 = vmul.f32 %v949_v38, %v873_v41 }
 0x723   :  { %v896_v45 = vadd.f32 %v950_v42, %v885_v43 }
 0x724   :  { %v895_v46 = vadd.f32 %v950_v42, %v884_v44 }
 0x725   :  { %900 = vst.msk [vmem:[#allocation26 + $0x8] sm:$0xff] %vm413_vm1, %v896_v45 }
 0x726   :  { %v1117_v47 = vpop.eup %1116  ;;  %899 = vst.msk [vmem:[#allocation26] sm:$0xff] %vm413_vm1, %v895_v46 }
 0x727   :  { %v1119_v48 = vpop.eup %1118  ;;  %v876_v49 = vmul.f32 %v1117_v47, %v844_v19 }
 0x728   :  { %v875_v50 = vmul.f32 %v1119_v48, %v843_v20 }
 0x729   :  { %v887_v51 = vmul.f32 %v949_v38, %v876_v49 }
 0x72a   :  { %v886_v52 = vmul.f32 %v949_v38, %v875_v50 }
 0x72b   :  { %v898_v53 = vadd.f32 %v950_v42, %v887_v51 }
 0x72c   :  { %v897_v54 = vadd.f32 %v950_v42, %v886_v52 }
 0x72d   :  { %902 = vst.msk [vmem:[#allocation26 + $0x18] sm:$0xff] %vm413_vm1, %v898_v53 }
 0x72e   :  { %901 = vst.msk [vmem:[#allocation26 + $0x10] sm:$0xff] %vm413_vm1, %v897_v54 }
 0x72f   :  { %1461 = shalt.err (!%p1458_p12)
}
 0x730   :  { %s1888_s16 = sld [smem:[#allocation36_spill]] }
 0x736   :  { %s1462_s15 = scalar_lea.hbm %s1888_s16, 512 }
 0x737   :  { %p1463_p13 = scmp.ne.s32.totalorder %s1888_s16, %s1462_s15  ;;  %p1466_p0 = scmp.lt.u32.totalorder %s1462_s15, %s1888_s16 }
 0x739   :  { %p1468_p1 = pnand %p1466_p0, %p1463_p13 }
 0x73b   :  { %1471 = shalt.err (!%p1468_p1)
}
 0x73c   :  { %914 = dma.vmem_to_hbm [thread:$0]  %s909_s8, 512, %s1888_s16, [#allocation4], %s1491_s28, %s1491_s28, %s1492_s29  }
 0x73d   :  { %1488 = dma.done.wait [#allocation4], 512  }
 0x73e   :  { %1489 = vsyncadd [#allocation4], 4294966784 }
 0x73f   :  { %918 = vsyncpa [#allocation3], 1 }
 0x740   :  { %919 = vsyncpa [#allocation6], 1 }
 0x741   :  { %920 = vsyncpa [#allocation9], 1 }
 0x742   :  { %921 = vsyncpa [#allocation12], 1 }
 0x743   :  { %922 = vsyncpa [#allocation15], 1 }
 0x744   :  { %923 = vsyncpa [#allocation18], 1 }
 0x745   :  { %924 = vsyncpa [#allocation21], 1 }
 0x746   :  { %925 = vsyncpa [#allocation24], 1 }
 0x747   :  { %926 = vsyncpa [#allocation4], 1 }

// kernel: respair_block_pallas.2
= control target key start
LH: loop header
LB: loop body
LE: loop exit
PB: predicated region body
PF: predicated region fallthrough
CT: control target
= control target key end

     0   :  { %s10219_s0 = inlined_call_operand.hbm [shape: f32[2,4,16,8], index: 0, kind: input, shape index: {}]   ;;  %s10220_s1 = inlined_call_operand.hbm [shape: f32[2,4,16,8], index: 1, kind: input, shape index: {}]   ;;  %s10221_s2 = inlined_call_operand.hbm [shape: f32[2,4,16,8], index: 2, kind: input, shape index: {}]   ;;  %s10222_s3 = inlined_call_operand.hbm [shape: f32[2,4,16,12], index: 3, kind: input, shape index: {}]   ;;  %s10223_s4 = inlined_call_operand.hbm [shape: f32[2,4,16,12], index: 4, kind: input, shape index: {}]   ;;  %s10224_s5 = inlined_call_operand.hbm [shape: f32[2,4,16,1], index: 5, kind: input, shape index: {}]   ;;  %s10225_s6 = inlined_call_operand.hbm [shape: f32[2,4,1,16], index: 6, kind: input, shape index: {}]   ;;  %s10226_s7 = inlined_call_operand.hbm [shape: f32[2,4,16,12], index: 7, kind: input, shape index: {}]   ;;  %s10227_s8 = inlined_call_operand.hbm [shape: f32[2,16,16,16], index: 8, kind: input, shape index: {}]   ;;  %s10228_s9 = inlined_call_operand.hbm [shape: f32[4,1,16], index: 9, kind: input, shape index: {}]   ;;  %s10229_s10 = inlined_call_operand.hbm [shape: f32[2,16,1], index: 10, kind: input, shape index: {}]   ;;  %s10230_s11 = inlined_call_operand.hbm [shape: f32[2,1,16], index: 11, kind: input, shape index: {}]   ;;  %s10231_s12 = inlined_call_operand.hbm [shape: f32[2,16,32], index: 12, kind: output, shape index: {0}]   ;;  %s10232_s13 = inlined_call_operand.hbm [shape: f32[2,16,64], index: 13, kind: output, shape index: {1}]   ;;  %s10233_s14 = inlined_call_operand.hbm [shape: f32[2,16,48], index: 14, kind: output, shape index: {2}]  }
   0x1   :  { %10286 = sst [smem:[#allocation49_spill]] %s10219_s0 }
   0x2   :  { %10287 = sst [smem:[#allocation50_spill]] %s10220_s1 }
   0x3   :  { %10288 = sst [smem:[#allocation51_spill]] %s10221_s2 }
   0x4   :  { %10289 = sst [smem:[#allocation52_spill]] %s10222_s3 }
   0x5   :  { %10290 = sst [smem:[#allocation53_spill]] %s10223_s4 }
   0x6   :  { %10291 = sst [smem:[#allocation54_spill]] %s10224_s5 }
   0x7   :  { %10292 = sst [smem:[#allocation55_spill]] %s10225_s6 }
   0x8   :  { %10293 = sst [smem:[#allocation56_spill]] %s10226_s7 }
   0x9   :  { %10294 = sst [smem:[#allocation57_spill]] %s10227_s8 }
   0xa   :  { %10295 = sst [smem:[#allocation58_spill]] %s10228_s9 }
   0xb   :  { %10296 = sst [smem:[#allocation59_spill]] %s10229_s10 }
   0xc   :  { %10297 = sst [smem:[#allocation60_spill]] %s10230_s11 }
   0xd   :  { %10298 = sst [smem:[#allocation61_spill]] %s10231_s12 }
   0xe   :  { %10299 = sst [smem:[#allocation62_spill]] %s10232_s13 }
   0xf   :  { %10300 = sst [smem:[#allocation63_spill]] %s10233_s14 }
  0x10   :  { %20 = vsyncpa [#allocation3], 0 }
  0x11   :  { %22 = vsyncpa [#allocation3 + $0x1], 0 }
  0x12   :  { %23 = vsyncpa [#allocation6], 0 }
  0x13   :  { %25 = vsyncpa [#allocation6 + $0x1], 0 }
  0x14   :  { %26 = vsyncpa [#allocation9], 0 }
  0x15   :  { %28 = vsyncpa [#allocation9 + $0x1], 0 }
  0x16   :  { %29 = vsyncpa [#allocation12], 0 }
  0x17   :  { %31 = vsyncpa [#allocation12 + $0x1], 0 }
  0x18   :  { %32 = vsyncpa [#allocation15], 0 }
  0x19   :  { %34 = vsyncpa [#allocation15 + $0x1], 0 }
  0x1a   :  { %35 = vsyncpa [#allocation18], 0 }
  0x1b   :  { %36 = vsyncpa [#allocation4], 0 }
  0x1c   :  { %38 = vsyncpa [#allocation4 + $0x1], 0 }
  0x1d   :  { %39 = vsyncpa [#allocation23], 0 }
  0x1e   :  { %41 = vsyncpa [#allocation23 + $0x1], 0  ;;  %s7275_s29 = smov 0   ;;  %s7277_s30 = smov 0  }
  0x1f   :  { %s7279_s15 = smov 0   ;;  %s7281_s16 = smov 0  }
  0x20   :  { %s7283_s17 = smov 0   ;;  %s7285_s18 = smov 0  }
  0x21 LB: > { %10301 = sst [smem:[#allocation35_spill]] %s7158_s15  ;;  %s59_s19 = sadd.s32 1, %s7166_s17  ;;  %s7170_s18 = sphi %s7285_s18, %s47_s18   ;;  %s7166_s17 = sphi %s7283_s17, %s10392_s17   ;;  %s7162_s16 = sphi %s7281_s16, %s10391_s16   ;;  %s7158_s15 = sphi %s7279_s15, %s10390_s15   ;;  %s7154_s30 = sphi %s7277_s30, %s10394_s30   ;;  %s7150_s29 = sphi %s7275_s29, %s10393_s29  }
  0x22   : > { %10302 = sst [smem:[#allocation36_spill]] %s7162_s16  ;;  %s68_s20 = sadd.s32 1, %s7158_s15 }
  0x23   : > { %10303 = sst [smem:[#allocation37_spill]] %s7166_s17  ;;  %p61_p0 = scmp.ge.s32.totalorder %s59_s19, 2 }
  0x24   : > { %10304 = sst [smem:[#allocation38_spill]] %s7170_s18  ;;  %p10240_p1 = scmp.ne.s32.totalorder %s7158_s15, %s7154_s30 }
  0x25   : > { %p76_p2 = scmp.eq.s32.totalorder %s7170_s18, 0  ;;  %s10396_s19 = smov (%p61_p0, %s59_s19), 0 }
  0x26   : > { %10305 = sst [smem:[#allocation39_spill]] %s10396_s19  ;;  %p6457_p5 = scmp.lt.s32.totalorder %s7170_s18, 2 }
  0x27   : > { %p77_p4 = por %p76_p2, %p10240_p1  ;;  %s63_s21 = ssub.s32 %s7166_s17, %s10396_s19 }
  0x28   : > { %s7320_s22 = sand.u32 1, %s7170_s18   ;;  %p66_p6 = scmp.eq.s32.totalorder %s63_s21, 0 }
  0x29   : > { %s7323_s23 = sand.u32 1, %s7158_s15   ;;  %s7329_s25 = sshll.u32 %s7166_s17, 10 }
  0x2a   : > { %s7326_s24 = sshll.u32 %s7323_s23, 6  ;;  %p7334_p7 = pnand %p6457_p5, %p77_p4 }
  0x2b   : > { %s7332_s26 = scalar_select %p66_p6, %s7158_s15, %s68_s20  }
  0x2c   : > { %s10307_s27 = scalar_select %p7334_p7, 1, 0 }
  0x2d   : > { %10306 = sst [smem:[#allocation40_spill]] %s7332_s26  ;;  %s10308_s1 = sld [smem:[#allocation50_spill]] }
  0x2e   : > { %s518_s14 = scalar_lea.vmem [#allocation5], %s7326_s24  ;;  %s7348_s20 = scalar_lea.sflag [#allocation6], %s7320_s22 }
  0x2f   : > { %s525_s12 = sshll.u32 %s518_s14, 4  ;;  %p7354_p9 = pneg %p7334_p7  ;;  %s7345_s12 = int_to_ptr.vmem [resolvable:$true] %s525_s12 }
  0x31   : > { %s10309_s13 = scalar_select %p7354_p9, 1, 0 }
  0x33   : > { %s7342_s21 = scalar_lea.hbm %s10308_s1, %s7329_s25  ;;  %s6647_s16 = scalar_lea.hbm %s10308_s1, 2048 }
  0x34   : > { %s6642_s26 = scalar_lea.hbm %s7342_s21, 1024  ;;  %p6648_p12 = scmp.lt.u32.totalorder %s7342_s21, %s10308_s1 }
  0x35   : > { %p6643_p8 = scmp.ne.s32.totalorder %s7342_s21, %s6642_s26  ;;  %p6649_p13 = scmp.lt.u32.totalorder %s6647_s16, %s6642_s26 }
  0x36   : > { %p6651_p2 = scmp.lt.u32.totalorder %s6642_s26, %s7342_s21 }
  0x37   : > { %p6645_p10 = pnand %p7354_p9, %p6643_p8  ;;  %p6650_p0 = por %p6649_p13, %p6648_p12 }
  0x39   : > { %p6646_p11 = pneg %p6645_p10  ;;  %p6652_p4 = por %p6651_p2, %p6650_p0 }
  0x3b   : > { %p6653_p5 = pnand %p6652_p4, %p6646_p11 }
  0x3d   : > { %6656 = shalt.err (!%p6653_p5)
}
  0x3e   : > { %s6657_s10 = scalar_lea.vmem %s7345_s12, 1024  ;;  %s7172_s19 = smov [#allocation5]  }
  0x3f   : > { %p6658_p6 = scmp.ne.s32.totalorder %s7345_s12, %s6657_s10  ;;  %s6662_s28 = sshll.u32 %s7172_s19, 4  ;;  %s6663_s28 = int_to_ptr.vmem [resolvable:$false] %s6662_s28 }
  0x40   : > { %s6664_s11 = scalar_lea.vmem %s6663_s28, 2048  ;;  %p6665_p3 = scmp.lt.s32.totalorder %s7345_s12, %s6663_s28 }
  0x41   : > { %p6660_p8 = pnand %p6658_p6, %p7354_p9  ;;  %p6666_p1 = scmp.lt.s32.totalorder %s6664_s11, %s6657_s10 }
  0x43   : > { %p6661_p10 = pneg %p6660_p8  ;;  %p6667_p12 = por %p6666_p1, %p6665_p3 }
  0x45   : > { %p6668_p13 = pnand %p6667_p12, %p6661_p10 }
  0x47   : > { %6671 = shalt.err (!%p6668_p13)
}
  0x48   : > { %s10245_s16 = smov 128   ;;  %s10247_s26 = smov 8  }
  0x49   : > { %6418 = dma.hbm_to_vmem [thread:$0]  (!%p7334_p7), %s7342_s21, 1024, %s7345_s12, %s7348_s20, %s10245_s16, %s10245_s16, %s10247_s26  }
  0x4a   : > { %s10310_s0 = sld [smem:[#allocation49_spill]]  ;;  %s495_s28 = scalar_lea.vmem [#allocation2], %s7326_s24 }
  0x4b   : > { %s504_s11 = sshll.u32 %s495_s28, 4  ;;  %s10311_s2 = sld [smem:[#allocation51_spill]]  ;;  %s7388_s11 = int_to_ptr.vmem [resolvable:$true] %s504_s11 }
  0x4c   : > { %s10249_s17 = scalar_lea.sflag [#allocation3], %s7320_s22 }
  0x50   : > { %s7385_s19 = scalar_lea.hbm %s10310_s0, %s7329_s25  ;;  %s6677_s14 = scalar_lea.hbm %s10310_s0, 2048 }
  0x51   : > { %s7394_s6 = scalar_lea.hbm %s10311_s2, %s7329_s25  ;;  %s6672_s12 = scalar_lea.hbm %s7385_s19, 1024 }
  0x52   : > { %p6673_p1 = scmp.ne.s32.totalorder %s7385_s19, %s6672_s12  ;;  %p6678_p0 = scmp.lt.u32.totalorder %s7385_s19, %s10310_s0 }
  0x53   : > { %p6679_p2 = scmp.lt.u32.totalorder %s6677_s14, %s6672_s12  ;;  %p6681_p5 = scmp.lt.u32.totalorder %s6672_s12, %s7385_s19 }
  0x54   : > { %p6675_p3 = pnand %p6673_p1, %p7354_p9 }
  0x55   : > { %p6680_p4 = por %p6679_p2, %p6678_p0 }
  0x56   : > { %p6676_p11 = pneg %p6675_p3 }
  0x57   : > { %p6682_p6 = por %p6681_p5, %p6680_p4 }
  0x59   : > { %p6683_p8 = pnand %p6682_p6, %p6676_p11 }
  0x5b   : > { %6686 = shalt.err (!%p6683_p8)
}
  0x5c   : > { %s6687_s1 = scalar_lea.vmem %s7388_s11, 1024  ;;  %s7175_s8 = smov [#allocation2]  }
  0x5d   : > { %p6688_p10 = scmp.ne.s32.totalorder %s7388_s11, %s6687_s1  ;;  %s6692_s28 = sshll.u32 %s7175_s8, 4  ;;  %s6693_s28 = int_to_ptr.vmem [resolvable:$false] %s6692_s28 }
  0x5e   : > { %s6694_s16 = scalar_lea.vmem %s6693_s28, 2048  ;;  %p6695_p1 = scmp.lt.s32.totalorder %s7388_s11, %s6693_s28 }
  0x5f   : > { %p6690_p12 = pnand %p6688_p10, %p7354_p9  ;;  %p6696_p3 = scmp.lt.s32.totalorder %s6694_s16, %s6687_s1 }
  0x61   : > { %p6691_p13 = pneg %p6690_p12  ;;  %p6697_p0 = por %p6696_p3, %p6695_p1 }
  0x63   : > { %p6698_p2 = pnand %p6697_p0, %p6691_p13 }
  0x65   : > { %6701 = shalt.err (!%p6698_p2)
}
  0x66   : > { %s10312_s26 = smov 8   ;;  %s10313_s12 = smov 128  }
  0x67   : > { %6415 = dma.hbm_to_vmem [thread:$0]  (!%p7334_p7), %s7385_s19, 1024, %s7388_s11, %s10249_s17, %s10313_s12, %s10313_s12, %s10312_s26  }
  0x68   : > { %s539_s21 = scalar_lea.vmem [#allocation7], %s7326_s24  ;;  %s6702_s14 = scalar_lea.hbm %s7394_s6, 1024 }
  0x69   : > { %s546_s10 = sshll.u32 %s539_s21, 4  ;;  %p6703_p11 = scmp.ne.s32.totalorder %s7394_s6, %s6702_s14  ;;  %s7424_s10 = int_to_ptr.vmem [resolvable:$true] %s546_s10 }
  0x6a   : > { %s6707_s28 = scalar_lea.hbm %s10311_s2, 2048  ;;  %p6708_p6 = scmp.lt.u32.totalorder %s7394_s6, %s10311_s2 }
  0x6b   : > { %p6705_p4 = pnand %p6703_p11, %p7354_p9  ;;  %p6709_p8 = scmp.lt.u32.totalorder %s6707_s28, %s6702_s14 }
  0x6c   : > { %p6711_p12 = scmp.lt.u32.totalorder %s6702_s14, %s7394_s6 }
  0x6d   : > { %p6706_p5 = pneg %p6705_p4  ;;  %p6710_p10 = por %p6709_p8, %p6708_p6 }
  0x6f   : > { %p6712_p13 = por %p6711_p12, %p6710_p10 }
  0x71   : > { %p6713_p1 = pnand %p6712_p13, %p6706_p5 }
  0x73   : > { %6716 = shalt.err (!%p6713_p1)
}
  0x74   : > { %s6717_s19 = scalar_lea.vmem %s7424_s10, 1024  ;;  %s7176_s11 = smov [#allocation7]  }
  0x75   : > { %p6718_p3 = scmp.ne.s32.totalorder %s7424_s10, %s6717_s19  ;;  %s6722_s21 = sshll.u32 %s7176_s11, 4  ;;  %s6723_s21 = int_to_ptr.vmem [resolvable:$false] %s6722_s21 }
  0x76   : > { %s6724_s0 = scalar_lea.vmem %s6723_s21, 2048  ;;  %p6725_p11 = scmp.lt.s32.totalorder %s7424_s10, %s6723_s21 }
  0x77   : > { %p6720_p0 = pnand %p6718_p3, %p7354_p9  ;;  %p6726_p4 = scmp.lt.s32.totalorder %s6724_s0, %s6717_s19 }
  0x79   : > { %p6721_p2 = pneg %p6720_p0  ;;  %p6727_p6 = por %p6726_p4, %p6725_p11 }
  0x7b   : > { %p6728_p8 = pnand %p6727_p6, %p6721_p2 }
  0x7d   : > { %6731 = shalt.err (!%p6728_p8)
}
  0x7e   : > { %6421 = dma.hbm_to_vmem [thread:$0]  (!%p7334_p7), %s7394_s6, 1024, %s7424_s10, %s7348_s20, %s10313_s12, %s10313_s12, %s10312_s26  }
  0x7f   : > { %s10314_s3 = sld [smem:[#allocation52_spill]]  ;;  %s560_s28 = scalar_lea.vmem [#allocation8], %s7326_s24 }
  0x80   : > { %s569_s16 = sshll.u32 %s560_s28, 4  ;;  %s10253_s19 = scalar_lea.sflag [#allocation9], %s7320_s22  ;;  %s7458_s16 = int_to_ptr.vmem [resolvable:$true] %s569_s16 }
  0x85   : > { %s7455_s8 = scalar_lea.hbm %s10314_s3, %s7329_s25  ;;  %s6737_s21 = scalar_lea.hbm %s10314_s3, 2048 }
  0x86   : > { %s6732_s11 = scalar_lea.hbm %s7455_s8, 1024  ;;  %p6738_p13 = scmp.lt.u32.totalorder %s7455_s8, %s10314_s3 }
  0x87   : > { %p6733_p5 = scmp.ne.s32.totalorder %s7455_s8, %s6732_s11  ;;  %p6739_p1 = scmp.lt.u32.totalorder %s6737_s21, %s6732_s11 }
  0x88   : > { %p6741_p0 = scmp.lt.u32.totalorder %s6732_s11, %s7455_s8 }
  0x89   : > { %p6735_p10 = pnand %p6733_p5, %p7354_p9  ;;  %p6740_p3 = por %p6739_p1, %p6738_p13 }
  0x8b   : > { %p6736_p12 = pneg %p6735_p10  ;;  %p6742_p2 = por %p6741_p0, %p6740_p3 }
  0x8d   : > { %p6743_p11 = pnand %p6742_p2, %p6736_p12 }
  0x8f   : > { %6746 = shalt.err (!%p6743_p11)
}
  0x90   : > { %s6747_s1 = scalar_lea.vmem %s7458_s16, 1024  ;;  %s7177_s28 = smov [#allocation8]  }
  0x91   : > { %p6748_p4 = scmp.ne.s32.totalorder %s7458_s16, %s6747_s1  ;;  %s6752_s6 = sshll.u32 %s7177_s28, 4  ;;  %s6753_s6 = int_to_ptr.vmem [resolvable:$false] %s6752_s6 }
  0x92   : > { %s6754_s10 = scalar_lea.vmem %s6753_s6, 2048  ;;  %p6755_p5 = scmp.lt.s32.totalorder %s7458_s16, %s6753_s6 }
  0x93   : > { %p6750_p6 = pnand %p6748_p4, %p7354_p9  ;;  %p6756_p10 = scmp.lt.s32.totalorder %s6754_s10, %s6747_s1 }
  0x95   : > { %p6751_p8 = pneg %p6750_p6  ;;  %p6757_p13 = por %p6756_p10, %p6755_p5 }
  0x97   : > { %p6758_p1 = pnand %p6757_p13, %p6751_p8 }
  0x99   : > { %6761 = shalt.err (!%p6758_p1)
}
  0x9a   : > { %6424 = dma.hbm_to_vmem [thread:$0]  (!%p7334_p7), %s7455_s8, 1024, %s7458_s16, %s10253_s19, %s10313_s12, %s10313_s12, %s10312_s26  }
  0x9b   : > { %s10315_s5 = sld [smem:[#allocation54_spill]]  ;;  %s604_s14 = scalar_lea.vmem [#allocation11], %s7326_s24 }
  0x9c   : > { %s613_s1 = sshll.u32 %s604_s14, 4  ;;  %s10252_s28 = scalar_lea.sflag [#allocation12], %s7320_s22  ;;  %s7494_s1 = int_to_ptr.vmem [resolvable:$true] %s613_s1 }
  0xa1   : > { %s7491_s0 = scalar_lea.hbm %s10315_s5, %s7329_s25  ;;  %s6767_s10 = scalar_lea.hbm %s10315_s5, 2048 }
  0xa2   : > { %s6762_s6 = scalar_lea.hbm %s7491_s0, 1024  ;;  %p6768_p2 = scmp.lt.u32.totalorder %s7491_s0, %s10315_s5 }
  0xa3   : > { %p6763_p12 = scmp.ne.s32.totalorder %s7491_s0, %s6762_s6  ;;  %p6769_p11 = scmp.lt.u32.totalorder %s6767_s10, %s6762_s6 }
  0xa4   : > { %p6771_p6 = scmp.lt.u32.totalorder %s6762_s6, %s7491_s0 }
  0xa5   : > { %p6765_p3 = pnand %p6763_p12, %p7354_p9  ;;  %p6770_p4 = por %p6769_p11, %p6768_p2 }
  0xa7   : > { %p6766_p0 = pneg %p6765_p3  ;;  %p6772_p8 = por %p6771_p6, %p6770_p4 }
  0xa9   : > { %p6773_p5 = pnand %p6772_p8, %p6766_p0 }
  0xab   : > { %6776 = shalt.err (!%p6773_p5)
}
  0xac   : > { %s6777_s14 = scalar_lea.vmem %s7494_s1, 1024  ;;  %s7178_s8 = smov [#allocation11]  }
  0xad   : > { %p6778_p10 = scmp.ne.s32.totalorder %s7494_s1, %s6777_s14  ;;  %s6782_s16 = sshll.u32 %s7178_s8, 4  ;;  %s6783_s16 = int_to_ptr.vmem [resolvable:$false] %s6782_s16 }
  0xae   : > { %s6784_s11 = scalar_lea.vmem %s6783_s16, 2048  ;;  %p6785_p12 = scmp.lt.s32.totalorder %s7494_s1, %s6783_s16 }
  0xaf   : > { %p6780_p13 = pnand %p6778_p10, %p7354_p9  ;;  %p6786_p3 = scmp.lt.s32.totalorder %s6784_s11, %s6777_s14 }
  0xb1   : > { %p6781_p1 = pneg %p6780_p13  ;;  %p6787_p2 = por %p6786_p3, %p6785_p12 }
  0xb3   : > { %p6788_p11 = pnand %p6787_p2, %p6781_p1 }
  0xb5   : > { %6791 = shalt.err (!%p6788_p11)
}
  0xb6   : > { %6430 = dma.hbm_to_vmem [thread:$0]  (!%p7334_p7), %s7491_s0, 1024, %s7494_s1, %s10252_s28, %s10313_s12, %s10313_s12, %s10312_s26  }
  0xb7   : > { %s10316_s7 = sld [smem:[#allocation56_spill]]  ;;  %s648_s14 = scalar_lea.vmem [#allocation14], %s7326_s24 }
  0xb8   : > { %s655_s8 = sshll.u32 %s648_s14, 4  ;;  %s10251_s16 = scalar_lea.sflag [#allocation15], %s7320_s22  ;;  %s7530_s8 = int_to_ptr.vmem [resolvable:$true] %s655_s8 }
  0xbd   : > { %s7527_s21 = scalar_lea.hbm %s10316_s7, %s7329_s25  ;;  %s6797_s6 = scalar_lea.hbm %s10316_s7, 2048 }
  0xbe   : > { %s6792_s11 = scalar_lea.hbm %s7527_s21, 1024  ;;  %p6798_p8 = scmp.lt.u32.totalorder %s7527_s21, %s10316_s7 }
  0xbf   : > { %p6793_p0 = scmp.ne.s32.totalorder %s7527_s21, %s6792_s11  ;;  %p6799_p5 = scmp.lt.u32.totalorder %s6797_s6, %s6792_s11 }
  0xc0   : > { %p6801_p13 = scmp.lt.u32.totalorder %s6792_s11, %s7527_s21 }
  0xc1   : > { %p6795_p4 = pnand %p6793_p0, %p7354_p9  ;;  %p6800_p10 = por %p6799_p5, %p6798_p8 }
  0xc3   : > { %p6796_p6 = pneg %p6795_p4  ;;  %p6802_p1 = por %p6801_p13, %p6800_p10 }
  0xc5   : > { %p6803_p12 = pnand %p6802_p1, %p6796_p6 }
  0xc7   : > { %6806 = shalt.err (!%p6803_p12)
}
  0xc8   : > { %s6807_s14 = scalar_lea.vmem %s7530_s8, 1024  ;;  %s7179_s0 = smov [#allocation14]  }
  0xc9   : > { %p6808_p3 = scmp.ne.s32.totalorder %s7530_s8, %s6807_s14  ;;  %s6812_s1 = sshll.u32 %s7179_s0, 4  ;;  %s6813_s1 = int_to_ptr.vmem [resolvable:$false] %s6812_s1 }
  0xca   : > { %s6814_s17 = scalar_lea.vmem %s6813_s1, 2048  ;;  %p6815_p0 = scmp.lt.s32.totalorder %s7530_s8, %s6813_s1 }
  0xcb   : > { %p6810_p2 = pnand %p6808_p3, %p7354_p9  ;;  %p6816_p4 = scmp.lt.s32.totalorder %s6814_s17, %s6807_s14 }
  0xcd   : > { %p6811_p11 = pneg %p6810_p2  ;;  %p6817_p8 = por %p6816_p4, %p6815_p0 }
  0xcf   : > { %p6818_p5 = pnand %p6817_p8, %p6811_p11 }
  0xd1   : > { %6821 = shalt.err (!%p6818_p5)
}
  0xd2   : > { %6436 = dma.hbm_to_vmem [thread:$0]  (!%p7334_p7), %s7527_s21, 1024, %s7530_s8, %s10251_s16, %s10313_s12, %s10313_s12, %s10312_s26  }
  0xd3   : > { %s7560_s11 = sadd.s32 4294967295, %s7170_s18   ;;  %s10250_s6 = sadd.s32 4294967294, %s7170_s18  }
  0xd4   : > { %p81_p6 = scmp.ne.s32.totalorder %s7154_s30, %s7150_s29  ;;  %p10257_p10 = scmp.eq.s32.totalorder %s7560_s11, 0 }
  0xd5   : > { %p396_p13 = scmp.eq.s32.totalorder %s7560_s11, 1  ;;  %p402_p1 = scmp.eq.s32.totalorder %s10250_s6, 1 }
  0xd6   : > { %p5978_p12 = scmp.ge.s32.totalorder %s7170_s18, 1  ;;  %p7572_p3 = por %p10257_p10, %p81_p6 }
  0xd7   : > { %p10318_p2 = scmp.ne.s32.totalorder %s7158_s15, %s7154_s30  ;;  %p7583_p0 = por %p402_p1, %p81_p6 }
  0xd8   : > { %s10317_s10 = scalar_select %p7572_p3, 1, 0 }
  0xd9   : > { %p7579_p11 = por %p396_p13, %p10318_p2  ;;  %p465_p4 = scmp.lt.s32.totalorder %s7170_s18, 3 }
  0xda   : > { %s10320_s8 = scalar_select %p7583_p0, 1, 0 }
  0xdb   : > { %s10319_s21 = scalar_select %p7579_p11, 1, 0 }
  0xdc   : > { %p7588_p8 = pnand %p5978_p12, %p465_p4  ;;  %s7180_s0 = smov [#allocation17]  }
  0xdd   : > { %s477_s1 = sshll.u32 %s7180_s0, 4  ;;  %s10322_s4 = sld [smem:[#allocation53_spill]]  ;;  %s7592_s1 = int_to_ptr.vmem [resolvable:$true] %s477_s1 }
  0xde   : > { %s10321_s14 = scalar_select %p7588_p8, 1, 0 }
  0xdf   : > { %p6408_p5 = pneg %p7588_p8  ;;  %s583_s19 = scalar_lea.vmem [#allocation10], %s7326_s24 }
  0xe0   : > { %s590_s2 = sshll.u32 %s583_s19, 4  ;;  %s5999_s0 = sshll.u32 %s7323_s23, 2  ;;  %s7609_s2 = int_to_ptr.vmem [resolvable:$true] %s590_s2 }
  0xe1   : > { %p7604_p6 = pnand %p6408_p5, %p10257_p10  ;;  %s10324_s9 = sld [smem:[#allocation58_spill]] }
  0xe3   : > { %s7600_s16 = scalar_lea.hbm %s10322_s4, %s7329_s25  ;;  %p6824_p1 = pneg %p7604_p6 }
  0xe7   : > { %s6822_s7 = scalar_lea.hbm %s10324_s9, 64 }
  0xe8   : > { %p6823_p13 = scmp.ne.s32.totalorder %s10324_s9, %s6822_s7  ;;  %p6829_p4 = scmp.lt.u32.totalorder %s6822_s7, %s10324_s9 }
  0xea   : > { %p6825_p12 = pnand %p6824_p1, %p6823_p13 }
  0xec   : > { %p6826_p2 = pneg %p6825_p12 }
  0xee   : > { %p6831_p5 = pnand %p6829_p4, %p6826_p2 }
  0xf0   : > { %6834 = shalt.err (!%p6831_p5)
}
  0xf1   : > { %s6835_s24 = scalar_lea.vmem %s7592_s1, 64  ;;  %p6843_p3 = scmp.lt.s32.totalorder %s7592_s1, %s7592_s1 }
  0xf2   : > { %p6836_p10 = scmp.ne.s32.totalorder %s7592_s1, %s6835_s24  ;;  %p6844_p8 = scmp.lt.s32.totalorder %s6835_s24, %s6835_s24 }
  0xf4   : > { %p6838_p0 = pnand %p6836_p10, %p6824_p1  ;;  %p6845_p7 = por %p6844_p8, %p6843_p3 }
  0xf6   : > { %p6839_p11 = pneg %p6838_p0 }
  0xf8   : > { %p6846_p9 = pnand %p6845_p7, %p6839_p11 }
  0xfa   : > { %6849 = shalt.err (!%p6846_p9)
}
  0xfb   : > { %s7181_s3 = smov 16   ;;  %s7182_s5 = smov 1  }
  0xfc   : > { %6411 = dma.hbm_to_vmem [thread:$0]  (!%p7604_p6), %s10324_s9, 64, %s7592_s1, [#allocation18], %s7181_s3, %s7181_s3, %s7182_s5  }
  0xfd   : > { %s6850_s18 = scalar_lea.hbm %s7600_s16, 1024  ;;  %p10325_p9 = scmp.ne.s32.totalorder %s10309_s13, 0 }
  0xfe   : > { %p6851_p7 = scmp.ne.s32.totalorder %s7600_s16, %s6850_s18  ;;  %s6855_s25 = scalar_lea.hbm %s10322_s4, 2048 }
  0xff   : > { %p6856_p11 = scmp.lt.u32.totalorder %s7600_s16, %s10322_s4  ;;  %p6857_p0 = scmp.lt.u32.totalorder %s6855_s25, %s6850_s18 }
 0x100   : > { %p6853_p10 = pnand %p6851_p7, %p10325_p9  ;;  %p6859_p13 = scmp.lt.u32.totalorder %s6850_s18, %s7600_s16 }
 0x101   : > { %p6858_p8 = por %p6857_p0, %p6856_p11 }
 0x102   : > { %p6854_p3 = pneg %p6853_p10 }
 0x103   : > { %p6860_p1 = por %p6859_p13, %p6858_p8 }
 0x105   : > { %p6861_p12 = pnand %p6860_p1, %p6854_p3 }
 0x107   : > { %6864 = shalt.err (!%p6861_p12)
}
 0x108   : > { %s6865_s28 = scalar_lea.vmem %s7609_s2, 1024  ;;  %s7183_s1 = smov [#allocation10]  }
 0x109   : > { %p6866_p6 = scmp.ne.s32.totalorder %s7609_s2, %s6865_s28  ;;  %s6870_s7 = sshll.u32 %s7183_s1, 4  ;;  %s6871_s7 = int_to_ptr.vmem [resolvable:$false] %s6870_s7 }
 0x10a   : > { %s6872_s15 = scalar_lea.vmem %s6871_s7, 2048  ;;  %p6873_p5 = scmp.lt.s32.totalorder %s7609_s2, %s6871_s7 }
 0x10b   : > { %p6868_p2 = pnand %p6866_p6, %p10325_p9  ;;  %p6874_p7 = scmp.lt.s32.totalorder %s6872_s15, %s6865_s28 }
 0x10d   : > { %p6869_p4 = pneg %p6868_p2  ;;  %p6875_p10 = por %p6874_p7, %p6873_p5 }
 0x10f   : > { %p6876_p11 = pnand %p6875_p10, %p6869_p4 }
 0x111   : > { %6879 = shalt.err (!%p6876_p11)
}
 0x112   : > { %p10326_p3 = scmp.ne.s32.totalorder %s10307_s27, 0  ;;  %s10327_s18 = scalar_lea.sflag [#allocation9], %s7320_s22 }
 0x113   : > { %s10328_s19 = sld [smem:[#allocation37_spill]]  ;;  %s627_s25 = scalar_lea.vmem [#allocation13], %s5999_s0 }
 0x114   : > { %6427 = dma.hbm_to_vmem [thread:$0]  (!%p10326_p3), %s7600_s16, 1024, %s7609_s2, %s10327_s18, %s10313_s12, %s10313_s12, %s10312_s26  }
 0x115   : > { %s634_s6 = sshll.u32 %s627_s25, 4  ;;  %s10329_s1 = sld [smem:[#allocation55_spill]]  ;;  %s7670_s6 = int_to_ptr.vmem [resolvable:$true] %s634_s6 }
 0x119   : > { %s6113_s17 = sshll.u32 %s10328_s19, 6 }
 0x11b   : > { %s7668_s7 = scalar_lea.hbm %s10329_s1, %s6113_s17  ;;  %s6885_s0 = scalar_lea.hbm %s10329_s1, 128 }
 0x11c   : > { %s6880_s15 = scalar_lea.hbm %s7668_s7, 64  ;;  %p6886_p1 = scmp.lt.u32.totalorder %s7668_s7, %s10329_s1 }
 0x11d   : > { %p6881_p0 = scmp.ne.s32.totalorder %s7668_s7, %s6880_s15  ;;  %p6887_p12 = scmp.lt.u32.totalorder %s6885_s0, %s6880_s15 }
 0x11e   : > { %p6889_p2 = scmp.lt.u32.totalorder %s6880_s15, %s7668_s7 }
 0x11f   : > { %p6883_p8 = pnand %p6881_p0, %p10325_p9  ;;  %p6888_p6 = por %p6887_p12, %p6886_p1 }
 0x121   : > { %p6884_p13 = pneg %p6883_p8  ;;  %p6890_p4 = por %p6889_p2, %p6888_p6 }
 0x123   : > { %p6891_p5 = pnand %p6890_p4, %p6884_p13 }
 0x125   : > { %6894 = shalt.err (!%p6891_p5)
}
 0x126   : > { %s6895_s17 = scalar_lea.vmem %s7670_s6, 64  ;;  %s7184_s24 = smov [#allocation13]  }
 0x127   : > { %p6896_p7 = scmp.ne.s32.totalorder %s7670_s6, %s6895_s17  ;;  %s6900_s28 = sshll.u32 %s7184_s24, 4  ;;  %s6901_s28 = int_to_ptr.vmem [resolvable:$false] %s6900_s28 }
 0x128   : > { %s6902_s2 = scalar_lea.vmem %s6901_s28, 128  ;;  %p6903_p0 = scmp.lt.s32.totalorder %s7670_s6, %s6901_s28 }
 0x129   : > { %p6898_p10 = pnand %p6896_p7, %p10325_p9  ;;  %p6904_p8 = scmp.lt.s32.totalorder %s6902_s2, %s6895_s17 }
 0x12b   : > { %p6899_p11 = pneg %p6898_p10  ;;  %p6905_p1 = por %p6904_p8, %p6903_p0 }
 0x12d   : > { %p6906_p12 = pnand %p6905_p1, %p6899_p11 }
 0x12f   : > { %6909 = shalt.err (!%p6906_p12)
}
 0x130   : > { %s10330_s15 = scalar_lea.sflag [#allocation12], %s7320_s22  ;;  %s6005_s16 = sshll.u32 %s7323_s23, 8 }
 0x131   : > { %6433 = dma.hbm_to_vmem [thread:$0]  (!%p10326_p3), %s7668_s7, 64, %s7670_s6, %s10330_s15, %s7181_s3, %s7181_s3, %s7182_s5  }
 0x132   : > { %s6115_s0 = sshll.u32 %s10328_s19, 12  ;;  %s10331_s17 = sld [smem:[#allocation57_spill]] }
 0x133   : > { %s669_s2 = scalar_lea.vmem [#allocation16], %s6005_s16  ;;  %s6008_s4 = sshll.u32 %s7323_s23, 4 }
 0x134   : > { %s679_s1 = sshll.u32 %s669_s2, 4  ;;  %s7706_s1 = int_to_ptr.vmem [resolvable:$true] %s679_s1 }
 0x138   : > { %s10332_s24 = smov %s10331_s17  ;;  %s7703_s28 = scalar_lea.hbm %s10331_s17, %s6115_s0 }
 0x139   : > { %s6910_s9 = scalar_lea.hbm %s7703_s28, 4096  ;;  %s6915_s6 = scalar_lea.hbm %s10332_s24, 8192 }
 0x13a   : > { %p6911_p13 = scmp.ne.s32.totalorder %s7703_s28, %s6910_s9  ;;  %p6916_p4 = scmp.lt.u32.totalorder %s7703_s28, %s10332_s24 }
 0x13b   : > { %p6917_p5 = scmp.lt.u32.totalorder %s6915_s6, %s6910_s9  ;;  %p6919_p10 = scmp.lt.u32.totalorder %s6910_s9, %s7703_s28 }
 0x13c   : > { %p6913_p6 = pnand %p6911_p13, %p10325_p9 }
 0x13d   : > { %p6918_p7 = por %p6917_p5, %p6916_p4 }
 0x13e   : > { %p6914_p2 = pneg %p6913_p6 }
 0x13f   : > { %p6920_p11 = por %p6919_p10, %p6918_p7 }
 0x141   : > { %p6921_p0 = pnand %p6920_p11, %p6914_p2 }
 0x143   : > { %6924 = shalt.err (!%p6921_p0)
}
 0x144   : > { %s6925_s16 = scalar_lea.vmem %s7706_s1, 4096  ;;  %s7185_s0 = smov [#allocation16]  }
 0x145   : > { %p6926_p8 = scmp.ne.s32.totalorder %s7706_s1, %s6925_s16  ;;  %s6930_s18 = sshll.u32 %s7185_s0, 4  ;;  %s6931_s18 = int_to_ptr.vmem [resolvable:$false] %s6930_s18 }
 0x146   : > { %s6932_s25 = scalar_lea.vmem %s6931_s18, 8192  ;;  %p6933_p13 = scmp.lt.s32.totalorder %s7706_s1, %s6931_s18 }
 0x147   : > { %p6928_p1 = pnand %p6926_p8, %p10325_p9  ;;  %p6934_p6 = scmp.lt.s32.totalorder %s6932_s25, %s6925_s16 }
 0x149   : > { %p6929_p12 = pneg %p6928_p1  ;;  %p6935_p4 = por %p6934_p6, %p6933_p13 }
 0x14b   : > { %p6936_p5 = pnand %p6935_p4, %p6929_p12 }
 0x14d   : > { %6939 = shalt.err (!%p6936_p5)
}
 0x14e   : > { %s10333_s9 = scalar_lea.sflag [#allocation15], %s7320_s22  ;;  %s6116_s17 = sshll.u32 %s10328_s19, 8 }
 0x14f   : > { %6439 = dma.hbm_to_vmem [thread:$0]  (!%p10326_p3), %s7703_s28, 4096, %s7706_s1, %s10333_s9, %s10313_s12, %s10313_s12, %s10312_s26  }
 0x150   : > { %s693_s2 = scalar_lea.vmem [#allocation19], %s6008_s4  ;;  %s10334_s7 = sld [smem:[#allocation59_spill]] }
 0x151   : > { %s702_s3 = sshll.u32 %s693_s2, 4  ;;  %s7742_s3 = int_to_ptr.vmem [resolvable:$true] %s702_s3 }
 0x156   : > { %s7740_s15 = scalar_lea.hbm %s10334_s7, %s6116_s17  ;;  %s6945_s4 = scalar_lea.hbm %s10334_s7, 512 }
 0x157   : > { %s6940_s16 = scalar_lea.hbm %s7740_s15, 256  ;;  %p6946_p11 = scmp.lt.u32.totalorder %s7740_s15, %s10334_s7 }
 0x158   : > { %p6941_p2 = scmp.ne.s32.totalorder %s7740_s15, %s6940_s16  ;;  %p6947_p0 = scmp.lt.u32.totalorder %s6945_s4, %s6940_s16 }
 0x159   : > { %p6949_p1 = scmp.lt.u32.totalorder %s6940_s16, %s7740_s15 }
 0x15a   : > { %p6943_p7 = pnand %p6941_p2, %p10325_p9  ;;  %p6948_p8 = por %p6947_p0, %p6946_p11 }
 0x15c   : > { %p6944_p10 = pneg %p6943_p7  ;;  %p6950_p12 = por %p6949_p1, %p6948_p8 }
 0x15e   : > { %p6951_p13 = pnand %p6950_p12, %p6944_p10 }
 0x160   : > { %6954 = shalt.err (!%p6951_p13)
}
 0x161   : > { %s6955_s25 = scalar_lea.vmem %s7742_s3, 256  ;;  %s7186_s9 = smov [#allocation19]  }
 0x162   : > { %p6956_p6 = scmp.ne.s32.totalorder %s7742_s3, %s6955_s25  ;;  %s6960_s17 = sshll.u32 %s7186_s9, 4  ;;  %s6961_s17 = int_to_ptr.vmem [resolvable:$false] %s6960_s17 }
 0x163   : > { %s6962_s2 = scalar_lea.vmem %s6961_s17, 512  ;;  %p6963_p2 = scmp.lt.s32.totalorder %s7742_s3, %s6961_s17 }
 0x164   : > { %p6958_p4 = pnand %p6956_p6, %p10325_p9  ;;  %p6964_p7 = scmp.lt.s32.totalorder %s6962_s2, %s6955_s25 }
 0x166   : > { %p6959_p5 = pneg %p6958_p4  ;;  %p6965_p11 = por %p6964_p7, %p6963_p2 }
 0x168   : > { %p6966_p0 = pnand %p6965_p11, %p6959_p5 }
 0x16a   : > { %6969 = shalt.err (!%p6966_p0)
}
 0x16b   : > { %s10335_s5 = scalar_lea.sflag [#allocation3], %s7320_s22  ;;  %s6011_s6 = sshll.u32 %s10328_s19, 4 }
 0x16c   : > { %6442 = dma.hbm_to_vmem [thread:$0]  (!%p10326_p3), %s7740_s15, 256, %s7742_s3, %s10335_s5, %s10313_s12, %s10313_s12, %s10312_s26  }
 0x16d   : > { %s10336_s28 = sld [smem:[#allocation60_spill]]  ;;  %s715_s0 = scalar_lea.vmem [#allocation20], %s7323_s23 }
 0x16e   : > { %s722_s18 = sshll.u32 %s715_s0, 4  ;;  %s723_s18 = int_to_ptr.vmem [resolvable:$true] %s722_s18 }
 0x173   : > { %s7774_s4 = scalar_lea.hbm %s10336_s28, %s6011_s6  ;;  %s6975_s12 = scalar_lea.hbm %s10336_s28, 32 }
 0x174   : > { %s6970_s22 = scalar_lea.hbm %s7774_s4, 16  ;;  %p6976_p12 = scmp.lt.u32.totalorder %s7774_s4, %s10336_s28 }
 0x175   : > { %p6971_p10 = scmp.ne.s32.totalorder %s7774_s4, %s6970_s22  ;;  %p6977_p13 = scmp.lt.u32.totalorder %s6975_s12, %s6970_s22 }
 0x176   : > { %p6979_p4 = scmp.lt.u32.totalorder %s6970_s22, %s7774_s4 }
 0x177   : > { %p6973_p8 = pnand %p6971_p10, %p10325_p9  ;;  %p6978_p6 = por %p6977_p13, %p6976_p12 }
 0x179   : > { %p6974_p1 = pneg %p6973_p8  ;;  %p6980_p5 = por %p6979_p4, %p6978_p6 }
 0x17b   : > { %p6981_p2 = pnand %p6980_p5, %p6974_p1 }
 0x17d   : > { %6984 = shalt.err (!%p6981_p2)
}
 0x17e   : > { %s6985_s23 = scalar_lea.vmem %s723_s18, 16  ;;  %s7187_s15 = smov [#allocation20]  }
 0x17f   : > { %p6986_p7 = scmp.ne.s32.totalorder %s723_s18, %s6985_s23  ;;  %s6990_s9 = sshll.u32 %s7187_s15, 4  ;;  %s6991_s9 = int_to_ptr.vmem [resolvable:$false] %s6990_s9 }
 0x180   : > { %s6992_s17 = scalar_lea.vmem %s6991_s9, 32  ;;  %p6993_p10 = scmp.lt.s32.totalorder %s723_s18, %s6991_s9 }
 0x181   : > { %p6988_p11 = pnand %p6986_p7, %p10325_p9  ;;  %p6994_p8 = scmp.lt.s32.totalorder %s6992_s17, %s6985_s23 }
 0x183   : > { %p6989_p0 = pneg %p6988_p11  ;;  %p6995_p3 = por %p6994_p8, %p6993_p10 }
 0x185   : > { %p6996_p12 = pnand %p6995_p3, %p6989_p0 }
 0x187   : > { %6999 = shalt.err (!%p6996_p12)
}
 0x188   : > { %p10337_p13 = scmp.ne.s32.totalorder %s10307_s27, 0  ;;  %p10338_p1 = scmp.ne.s32.totalorder %s10321_s14, 0 }
 0x18a   : > { %6445 = dma.hbm_to_vmem [thread:$0]  (!%p10337_p13), %s7774_s4, 16, %s723_s18, %s7348_s20  }
 0x18b   : > { %731 = sbr.rel (%p10338_p1) target bundleno = 1685 (0x695), region = 68 }
 0x192   : > { %s7798_s13 = sand.u32 1, %s7560_s11   ;;  %s7801_s2 = sand.u32 1, %s7154_s30  }
 0x193   : > { %s6013_s5 = sshll.u32 %s7801_s2, 6  ;;  %s7805_s6 = scalar_lea.sflag [#allocation3], %s7798_s13 }
 0x194   : > { %s7807_s27 = scalar_lea.vmem [#allocation2], %s6013_s5  ;;  %p10339_p9 = scmp.ne.s32.totalorder %s10317_s10, 0 }
 0x196   : > { %7109 = dma.done.wait (%p10339_p9), %s7805_s6, 1024  }
 0x197   : > { %7111 = vsyncadd (%p10339_p9), %s7805_s6, 4294966272  ;;  %s7816_s20 = scalar_lea.sflag [#allocation6], %s7798_s13  ;;  %s7818_s14 = scalar_lea.vmem [#allocation5], %s6013_s5 }
 0x198   : > { %7113 = dma.done.wait (%p10339_p9), %s7816_s20, 2048  }
 0x199   : > { %7115 = vsyncadd (%p10339_p9), %s7816_s20, 4294965248  ;;  %s7826_s16 = scalar_lea.vmem [#allocation7], %s6013_s5  ;;  %s761_s1 = scalar_lea.sflag [#allocation9], %s7798_s13 }
 0x19a   : > { %s7829_s4 = scalar_lea.vmem [#allocation8], %s6013_s5 }
 0x19b   : > { %7117 = dma.done.wait (%p10339_p9), %s761_s1, 2048  }
 0x19c   : > { %7119 = vsyncadd (%p10339_p9), %s761_s1, 4294965248  ;;  %s7835_s0 = scalar_lea.vmem [#allocation10], %s6013_s5  ;;  %s779_s18 = scalar_lea.sflag [#allocation12], %s7798_s13 }
 0x19d   : > { %s7838_s22 = scalar_lea.vmem [#allocation11], %s6013_s5 }
 0x19e   : > { %7121 = dma.done.wait (%p10339_p9), %s779_s18, 1088  }
 0x19f   : > { %7123 = vsyncadd (%p10339_p9), %s779_s18, 4294966208  ;;  %s6019_s25 = sshll.u32 %s7801_s2, 2  ;;  %s797_s12 = scalar_lea.sflag [#allocation15], %s7798_s13 }
 0x1a0   : > { %s7845_s26 = scalar_lea.vmem [#allocation13], %s6019_s25  ;;  %s7848_s19 = scalar_lea.vmem [#allocation14], %s6013_s5 }
 0x1a1   : > { %7125 = dma.done.wait (%p10339_p9), %s797_s12, 5120  }
 0x1a2   : > { %7127 = vsyncadd (%p10339_p9), %s797_s12, 4294962176  ;;  %s6021_s3 = sshll.u32 %s7801_s2, 8  ;;  %p10340_p3 = scmp.eq.s32.totalorder %s7560_s11, 0 }
 0x1a3   : > { %s7855_s23 = scalar_lea.vmem [#allocation16], %s6021_s3 }
 0x1a4   : > { %7129 = dma.done.wait (%p10340_p3), [#allocation18], 64   ;;  %p10341_p6 = pmov %p10340_p3 }
 0x1a5   : > { %s7862_s15 = sshll.u32 %s7801_s2, 4 }
 0x1a6   : > { %7131 = vsyncadd (%p10341_p6), [#allocation18], 4294967232  ;;  %s822_s9 = scalar_lea.vmem [#allocation19], %s7862_s15 }
 0x1a7   : > { %7133 = dma.done.wait (%p10339_p9), %s7805_s6, 256  }
 0x1a8   : > { %7135 = vsyncadd (%p10339_p9), %s7805_s6, 4294967040  ;;  %s830_s17 = scalar_lea.vmem [#allocation20], %s7801_s2 }
 0x1a9   : > { %7137 = dma.done.wait (%p10339_p9), %s7816_s20, 16  }
 0x1aa   : > { %7139 = vsyncadd (%p10339_p9), %s7816_s20, 4294967280  ;;  %v7188_v0 = vmov 0   ;;  %vm974_vm0 = vcmask 97280   ;;  %v966_v2 = vld [vmem:[%s7835_s0] sm:$0xff]  ;;  %v967_v3 = vld [vmem:[%s7835_s0 + $0x8] sm:$0xff]  ;;  %vm1863_vm2 = vcmask 130048  }
 0x1ab   : > { %6523 = vset.pattern.permute.xlu0 %v7188_v0  ;;  %6522 = vset.pattern.permute.xlu1 %v7188_v0  ;;  %vm7880_vm1 = vmpackc.low %vm974_vm0, %vm974_vm0  ;;  %v968_v4 = vld [vmem:[%s7835_s0 + $0x10] sm:$0xff]  ;;  %v6296_v5 = vpack.c.bf16 %v967_v3, %v966_v2  ;;  %v969_v6 = vld [vmem:[%s7835_s0 + $0x18] sm:$0xff]  ;;  %vm1423_vm3 = vcmask 64512   ;;  %vm2003_vm5 = vcmask 130112   ;;  %vm2140_vm6 = vcmask 1041409   ;;  %s9386_s11 = scalar_lea.vmem [#allocation22], %s7862_s15 }
 0x1ac   : > { %v7889_v7 = vld [vmem:[%s7855_s23] sm:$0xff]  ;;  %v6302_v9 = vpack.c.bf16 %v969_v6, %v968_v4  ;;  %v7896_v11 = vld [vmem:[%s7855_s23 + $0x10] sm:$0xff]  ;;  %v958_v12 = vld [vmem:[%s7829_s4] sm:$0xff]  ;;  %vm2142_vm7 = vcmask 1042434   ;;  %vm2144_vm8 = vcmask 1043459   ;;  %vm2146_vm9 = vcmask 1044484  }
 0x1ad   : > { %v7891_v8 = vld [vmem:[#allocation17] ss:$0 sm:$0xff]  ;;  %6298 = vmatprep.subr.msk.bf16.mxu0 %vm7880_vm1, %v6296_v5  ;;  %6188 = vmatprep.mubr.msk.f32.mxu0 %vm974_vm0, %v958_v12  ;;  %v960_v14 = vld [vmem:[%s7829_s4 + $0x10] sm:$0xff]  ;;  %v970_v15 = vld [vmem:[%s7835_s0 + $0x20] sm:$0xff]  ;;  %vm2148_vm10 = vcmask 1045509   ;;  %vm2150_vm11 = vcmask 1046534  }
 0x1ae   : > { %v1831_v10 = vmul.f32 %v7891_v8, %v7889_v7  ;;  %v1833_v13 = vmul.f32 %v7891_v8, %v7896_v11  ;;  %v971_v16 = vld [vmem:[%s7835_s0 + $0x28] sm:$0xff]  ;;  %6304 = vmatprep.subr.msk.bf16.mxu1 %vm7880_vm1, %v6302_v9  ;;  %6301 = vmatpush3.bf16.xpose.msk.msra.mxu0 %vm7880_vm1, %v6296_v5  ;;  %v972_v19 = vld [vmem:[%s7835_s0 + $0x30] sm:$0xff]  ;;  %v973_v20 = vld [vmem:[%s7835_s0 + $0x38] sm:$0xff]  ;;  %vm2152_vm12 = vcmask 1047559   ;;  %s9493_s10 = scalar_lea.vmem [#allocation21], %s7862_s15  ;;  %s9498_s5 = scalar_lea.vmem [#allocation24], %s7862_s15 }
 0x1af   : > { %v6308_v18 = vpack.c.bf16 %v971_v16, %v970_v15  ;;  %v7915_v21 = vld [vmem:[%s7855_s23 + $0x8] sm:$0xff]  ;;  %6307 = vmatpush3.bf16.xpose.msk.msra.mxu1 %vm7880_vm1, %v6302_v9  ;;  %v6314_v22 = vpack.c.bf16 %v973_v20, %v972_v19  ;;  %v7922_v24 = vld [vmem:[%s7855_s23 + $0x18] sm:$0xff]  ;;  %v7925_v25 = vld [vmem:[%s7855_s23 + $0x20] sm:$0xff]  ;;  %6195 = vmatprep.mubr.msk.f32.mxu1 %vm974_vm0, %v960_v14  ;;  %s7189_s6 = smov 16   ;;  %vm3672_vm13 = vcmask 261248   ;;  %s7191_s20 = smov 48  }
 0x1b0   : > { %v1864_v17 = vsel %vm1863_vm2, %v1831_v10, 0.0  ;;  %v1832_v23 = vmul.f32 %v7891_v8, %v7915_v21  ;;  %v1870_v26 = vsel %vm1863_vm2, %v1833_v13, 0.0  ;;  %v1834_v27 = vmul.f32 %v7891_v8, %v7922_v24  ;;  %v959_v28 = vld [vmem:[%s7829_s4 + $0x8] sm:$0xff]  ;;  %v7940_v31 = vld [vmem:[%s7855_s23 + $0x28] sm:$0xff]  ;;  %v961_v32 = vld [vmem:[%s7829_s4 + $0x18] sm:$0xff]  ;;  %s7194_s1 = smov 24  }
 0x1b1   : > { %1865 = vadd.xlane.f32.xlu0 %v1864_v17  ;;  %6310 = vmatprep.subr.msk.bf16.mxu0 %vm7880_vm1, %v6308_v18  ;;  %v1835_v30 = vmul.f32 %v7891_v8, %v7925_v25  ;;  %v950_v33 = vld [vmem:[%s7818_s14] sm:$0xff]  ;;  %v951_v34 = vld [vmem:[%s7818_s14 + $0x8] sm:$0xff]  ;;  %v952_v35 = vld [vmem:[%s7818_s14 + $0x10] sm:$0xff]  ;;  %v1836_v39 = vmul.f32 %v7891_v8, %v7940_v31  ;;  %s7195_s0 = smov 36   ;;  %vm4599_vm14 = vcmask 392448   ;;  %vm5526_vm15 = vcmask 523648  }
 0x1b2   : > { %6316 = vmatprep.subr.msk.bf16.mxu1 %vm7880_vm1, %v6314_v22  ;;  %v1867_v29 = vsel %vm1863_vm2, %v1832_v23, 0.0  ;;  %v953_v36 = vld [vmem:[%s7818_s14 + $0x18] sm:$0xff]  ;;  %v1873_v38 = vsel %vm1863_vm2, %v1834_v27, 0.0  ;;  %v962_v41 = vld [vmem:[%s7829_s4 + $0x20] sm:$0xff]  ;;  %v6320_v42 = vpack.c.bf16 %v951_v34, %v950_v33  ;;  %v964_v45 = vld [vmem:[%s7829_s4 + $0x30] sm:$0xff]  ;;  %s10380_s12 = sld [smem:[#allocation62_spill]] }
 0x1b3   : > { %1868 = vadd.xlane.f32.xlu1 %v1867_v29  ;;  %v7948_v37 = vld [vmem:[%s7855_s23 + $0x30] sm:$0xff]  ;;  %v1876_v40 = vsel %vm1863_vm2, %v1835_v30, 0.0  ;;  %v7959_v44 = vld [vmem:[%s7855_s23 + $0x38] sm:$0xff]  ;;  %vm7967_vm4 = vmpackc.low %vm1423_vm3, %vm1423_vm3  ;;  %v6326_v47 = vpack.c.bf16 %v953_v36, %v952_v35  ;;  %v1879_v49 = vsel %vm1863_vm2, %v1836_v39, 0.0  ;;  %s5535_s3 = scalar_lea.sflag [#allocation23], %s7798_s13  ;;  %p10381_p5 = scmp.ne.s32.totalorder %s10319_s21, 0 }
 0x1b4   : > { %v1837_v43 = vmul.f32 %v7891_v8, %v7948_v37  ;;  %v7972_v48 = vld [vmem:[%s7855_s23 + $0x40] sm:$0xff]  ;;  %v1838_v50 = vmul.f32 %v7891_v8, %v7959_v44  ;;  %v7988_v54 = vld [vmem:[%s7855_s23 + $0x48] sm:$0xff]  ;;  %v954_v55 = vld [vmem:[%s7818_s14 + $0x20] sm:$0xff]  ;;  %s7196_s15 = smov [#allocation22]  }
 0x1b5   : > { %1871 = vadd.xlane.f32.xlu0 %v1870_v26  ;;  %6189 = vmatmul.mubr.msk.f32.vlgmr.msra.gmra.mrb[0].mxu0 %vm974_vm0, %v959_v28  ;;  %v963_v51 = vld [vmem:[%s7829_s4 + $0x28] sm:$0xff]  ;;  %v1839_v53 = vmul.f32 %v7891_v8, %v7972_v48  ;;  %v7995_v57 = vld [vmem:[%s7855_s23 + $0x50] sm:$0xff]  ;;  %v956_v59 = vld [vmem:[%s7818_s14 + $0x30] sm:$0xff]  ;;  %v1840_v62 = vmul.f32 %v7891_v8, %v7988_v54 }
 0x1b6   : > { %6196 = vmatmul.mubr.msk.f32.vlgmr.msra.gmra.mrb[0].mxu1 %vm974_vm0, %v961_v32  ;;  %6313 = vmatpush3.bf16.xpose.msk.msra.mxu0 %vm7880_vm1, %v6308_v18  ;;  %v1882_v52 = vsel %vm1863_vm2, %v1837_v43, 0.0  ;;  %v955_v56 = vld [vmem:[%s7818_s14 + $0x28] sm:$0xff]  ;;  %v965_v58 = vld [vmem:[%s7829_s4 + $0x38] sm:$0xff]  ;;  %v1885_v61 = vsel %vm1863_vm2, %v1838_v50, 0.0  ;;  %v942_v0 = vld [vmem:[%s7807_s27] sm:$0xff]  ;;  %v1841_v2 = vmul.f32 %v7891_v8, %v7995_v57  ;;  %s10379_s4 = sld [smem:[#allocation36_spill]] }
 0x1b7   : > { %6319 = vmatpush3.bf16.xpose.msk.msra.mxu1 %vm7880_vm1, %v6314_v22  ;;  %1877 = vadd.xlane.f32.xlu1 %v1876_v40  ;;  %v957_v60 = vld [vmem:[%s7818_s14 + $0x38] sm:$0xff]  ;;  %v1888_v63 = vsel %vm1863_vm2, %v1839_v53, 0.0  ;;  %v6332_v1 = vpack.c.bf16 %v955_v56, %v954_v55  ;;  %v8009_v3 = vld [vmem:[%s7855_s23 + $0x58] sm:$0xff]  ;;  %v944_v4 = vld [vmem:[%s7807_s27 + $0x10] sm:$0xff]  ;;  %v1891_v9 = vsel %vm1863_vm2, %v1840_v62, 0.0  ;;  %s7192_s14 = smov 8  }
 0x1b8   : > { %6202 = vmatprep.mubr.msk.f32.mxu0 %vm974_vm0, %v962_v41  ;;  %6209 = vmatprep.mubr.msk.f32.mxu1 %vm974_vm0, %v964_v45  ;;  %v6338_v5 = vpack.c.bf16 %v957_v60, %v956_v59  ;;  %v8016_v6 = vld [vmem:[%s7855_s23 + $0x60] sm:$0xff]  ;;  %v1842_v10 = vmul.f32 %v7891_v8, %v8009_v3  ;;  %v1894_v12 = vsel %vm1863_vm2, %v1841_v2, 0.0  ;;  %v8031_v14 = vld [vmem:[%s7855_s23 + $0x68] sm:$0xff]  ;;  %v8037_v16 = vld [vmem:[%s7855_s23 + $0x70] sm:$0xff] }
 0x1b9   : > { %1874 = vadd.xlane.f32.xlu0 %v1873_v38  ;;  %6322 = vmatprep.subr.msk.bf16.mxu0 %vm7967_vm4, %v6320_v42  ;;  %v1843_v13 = vmul.f32 %v7891_v8, %v8016_v6  ;;  %v943_v15 = vld [vmem:[%s7807_s27 + $0x8] sm:$0xff]  ;;  %10346 = vst [vmem:[#allocation41_spill] sm:$0xff] %v8037_v16  ;;  %v945_v17 = vld [vmem:[%s7807_s27 + $0x18] sm:$0xff]  ;;  %v1844_v19 = vmul.f32 %v7891_v8, %v8031_v14  ;;  %v946_v22 = vld [vmem:[%s7807_s27 + $0x20] sm:$0xff] }
 0x1ba   : > { %6328 = vmatprep.subr.msk.bf16.mxu1 %vm7967_vm4, %v6326_v47  ;;  %v1897_v18 = vsel %vm1863_vm2, %v1842_v10, 0.0  ;;  %v1845_v23 = vmul.f32 %v7891_v8, %v8037_v16  ;;  %v8049_v26 = vld [vmem:[%s7855_s23 + $0x78] sm:$0xff]  ;;  %v948_v27 = vld [vmem:[%s7807_s27 + $0x30] sm:$0xff]  ;;  %v8056_v28 = vld [vmem:[%s7855_s23 + $0x80] sm:$0xff] }
 0x1bb   : > { %1883 = vadd.xlane.f32.xlu1 %v1882_v52  ;;  %v1900_v20 = vsel %vm1863_vm2, %v1843_v13, 0.0  ;;  %v1903_v29 = vsel %vm1863_vm2, %v1844_v19, 0.0  ;;  %v1846_v30 = vmul.f32 %v7891_v8, %v8049_v26  ;;  %v1847_v33 = vmul.f32 %v7891_v8, %v8056_v28  ;;  %v8069_v34 = vld [vmem:[%s7855_s23 + $0x88] sm:$0xff]  ;;  %v947_v35 = vld [vmem:[%s7807_s27 + $0x28] sm:$0xff]  ;;  %v8073_v36 = vld [vmem:[%s7855_s23 + $0x90] sm:$0xff] }
 0x1bc   : > { %v1906_v32 = vsel %vm1863_vm2, %v1845_v23, 0.0  ;;  %10347 = vst [vmem:[#allocation42_spill] sm:$0xff] %v8069_v34  ;;  %10348 = vst [vmem:[#allocation43_spill] sm:$0xff] %v8073_v36  ;;  %v949_v38 = vld [vmem:[%s7807_s27 + $0x38] sm:$0xff]  ;;  %v1848_v40 = vmul.f32 %v7891_v8, %v8069_v34  ;;  %v8084_v43 = vld [vmem:[%s7855_s23 + $0x98] sm:$0xff]  ;;  %s7190_s27 = smov 32  }
 0x1bd   : > { %1880 = vadd.xlane.f32.xlu0 %v1879_v49  ;;  %6203 = vmatmul.mubr.msk.f32.vlgmr.msra.gmra.mrb[2].mxu0 %vm974_vm0, %v963_v51  ;;  %v1909_v39 = vsel %vm1863_vm2, %v1846_v30, 0.0  ;;  %v1912_v41 = vsel %vm1863_vm2, %v1847_v33, 0.0  ;;  %10349 = vst [vmem:[#allocation44_spill] sm:$0xff] %v8084_v43  ;;  %v8088_v45 = vld [vmem:[%s7855_s23 + $0xa0] sm:$0xff]  ;;  %v8097_v51 = vld [vmem:[%s7855_s23 + $0xa8] sm:$0xff]  ;;  %v8100_v52 = vld [vmem:[%s7855_s23 + $0xb0] sm:$0xff] }
 0x1be   : > { %6210 = vmatmul.mubr.msk.f32.vlgmr.msra.gmra.mrb[2].mxu1 %vm974_vm0, %v965_v58  ;;  %6325 = vmatpush3.bf16.xpose.msk.msra.mxu0 %vm7967_vm4, %v6320_v42  ;;  %v1849_v42 = vmul.f32 %v7891_v8, %v8073_v36  ;;  %v1915_v46 = vsel %vm1863_vm2, %v1848_v40, 0.0  ;;  %v1851_v50 = vmul.f32 %v7891_v8, %v8088_v45  ;;  %10350 = vst [vmem:[#allocation45_spill] sm:$0xff] %v8100_v52  ;;  %v8109_v59 = vld [vmem:[%s7855_s23 + $0xb8] sm:$0xff]  ;;  %v8112_v60 = vld [vmem:[%s7855_s23 + $0xc0] sm:$0xff]  ;;  %v8124_v2 = vld [vmem:[%s7855_s23 + $0xd0] sm:$0xff]  ;;  %s10063_s18 = sshll.u32 %s10379_s4, 8 }
 0x1bf   : > { %6331 = vmatpush3.bf16.xpose.msk.msra.mxu1 %vm7967_vm4, %v6326_v47  ;;  %1889 = vadd.xlane.f32.xlu1 %v1888_v63  ;;  %v1850_v47 = vmul.f32 %v7891_v8, %v8084_v43  ;;  %v1852_v55 = vmul.f32 %v7891_v8, %v8097_v51  ;;  %v1853_v58 = vmul.f32 %v7891_v8, %v8100_v52  ;;  %v8136_v13 = vld [vmem:[%s7855_s23 + $0xe0] sm:$0xff]  ;;  %v1325_v40 = vld [vmem:[%s7838_s22 + $0x10] sm:$0xff] }
 0x1c0   : > { %6216 = vmatprep.mubr.msk.f32.mxu0 %vm1423_vm3, %v942_v0  ;;  %6223 = vmatprep.mubr.msk.f32.mxu1 %vm1423_vm3, %v944_v4  ;;  %v1918_v49 = vsel %vm1863_vm2, %v1849_v42, 0.0  ;;  %v1924_v56 = vsel %vm1863_vm2, %v1851_v50, 0.0  ;;  %v1854_v62 = vmul.f32 %v7891_v8, %v8109_v59  ;;  %v1855_v0 = vmul.f32 %v7891_v8, %v8112_v60  ;;  %v1323_v42 = vld [vmem:[%s7838_s22] sm:$0xff] }
 0x1c1   : > { %1886 = vadd.xlane.f32.xlu0 %v1885_v61  ;;  %6334 = vmatprep.subr.msk.bf16.mxu0 %vm7967_vm4, %v6332_v1  ;;  %v1921_v53 = vsel %vm1863_vm2, %v1850_v47, 0.0  ;;  %v1927_v61 = vsel %vm1863_vm2, %v1852_v55, 0.0  ;;  %v1930_v63 = vsel %vm1863_vm2, %v1853_v58, 0.0  ;;  %v1857_v10 = vmul.f32 %v7891_v8, %v8124_v2  ;;  %v1330_v47 = vld [vmem:[%s7838_s22 + $0x38] sm:$0xff] }
 0x1c2   : > { %6340 = vmatprep.subr.msk.bf16.mxu1 %vm7967_vm4, %v6338_v5  ;;  %v1933_v4 = vsel %vm1863_vm2, %v1854_v62, 0.0  ;;  %v1859_v19 = vmul.f32 %v7891_v8, %v8136_v13  ;;  %v1823_v50 = vld [vmem:[%s822_s9] sm:$0xff]  ;;  %v1824_v55 = vld [vmem:[%s822_s9 + $0x8] sm:$0xff]  ;;  %s7004_s9 = sshll.u32 %s7196_s15, 4  ;;  %s7005_s9 = int_to_ptr.vmem [resolvable:$false] %s7004_s9 }
 0x1c3   : > { %1895 = vadd.xlane.f32.xlu1 %v1894_v12  ;;  %v8133_v12 = vld [vmem:[%s7855_s23 + $0xd8] sm:$0xff] }
 0x1c4   : > { %10351 = vst [vmem:[#allocation46_spill] sm:$0xff] %v8133_v12 }
 0x1c5   : > { %1892 = vadd.xlane.f32.xlu0 %v1891_v9  ;;  %6217 = vmatmul.mubr.msk.f32.vlgmr.msra.gmra.mrb[4].mxu0 %vm1423_vm3, %v943_v15  ;;  %v1936_v9 = vsel %vm1863_vm2, %v1855_v0, 0.0 }
 0x1c6   : > { %6224 = vmatmul.mubr.msk.f32.vlgmr.msra.gmra.mrb[4].mxu1 %vm1423_vm3, %v945_v17  ;;  %6337 = vmatpush3.bf16.xpose.msk.msra.mxu0 %vm7967_vm4, %v6332_v1  ;;  %v8121_v1 = vld [vmem:[%s7855_s23 + $0xc8] sm:$0xff]  ;;  %v1858_v17 = vmul.f32 %v7891_v8, %v8133_v12 }
 0x1c7   : > { %6343 = vmatpush3.bf16.xpose.msk.msra.mxu1 %vm7967_vm4, %v6338_v5  ;;  %1901 = vadd.xlane.f32.xlu1 %v1900_v20  ;;  %v1856_v5 = vmul.f32 %v7891_v8, %v8121_v1  ;;  %v8145_v20 = vld [vmem:[%s7855_s23 + $0xe8] sm:$0xff] }
 0x1c8   : > { %6230 = vmatprep.mubr.msk.f32.mxu0 %vm1423_vm3, %v946_v22  ;;  %6237 = vmatprep.mubr.msk.f32.mxu1 %vm1423_vm3, %v948_v27  ;;  %v8148_v22 = vld [vmem:[%s7855_s23 + $0xf0] sm:$0xff]  ;;  %v1945_v23 = vsel %vm1863_vm2, %v1858_v17, 0.0  ;;  %v1860_v27 = vmul.f32 %v7891_v8, %v8145_v20 }
 0x1c9   : > { %1898 = vadd.xlane.f32.xlu0 %v1897_v18  ;;  %v1939_v15 = vsel %vm1863_vm2, %v1856_v5, 0.0  ;;  %v1942_v18 = vsel %vm1863_vm2, %v1857_v10, 0.0  ;;  %10352 = vst [vmem:[#allocation47_spill] sm:$0xff] %v8148_v22  ;;  %v1861_v30 = vmul.f32 %v7891_v8, %v8148_v22 }
 0x1ca   : > { %v1951_v33 = vsel %vm1863_vm2, %v1860_v27, 0.0 }
 0x1cb   : > { %1907 = vadd.xlane.f32.xlu1 %v1906_v32  ;;  %v8157_v32 = vld [vmem:[%s7855_s23 + $0xf8] sm:$0xff] }
 0x1cd   : > { %1904 = vadd.xlane.f32.xlu0 %v1903_v29  ;;  %6231 = vmatmul.mubr.msk.f32.vlgmr.msra.gmra.mrb[6].mxu0 %vm1423_vm3, %v947_v35  ;;  %v1948_v29 = vsel %vm1863_vm2, %v1859_v19, 0.0  ;;  %v1862_v35 = vmul.f32 %v7891_v8, %v8157_v32  ;;  %v1324_v8 = vld [vmem:[%s7838_s22 + $0x8] sm:$0xff] }
 0x1ce   : > { %6238 = vmatmul.mubr.msk.f32.vlgmr.msra.gmra.mrb[6].mxu1 %vm1423_vm3, %v949_v38  ;;  %v1954_v38 = vsel %vm1863_vm2, %v1861_v30, 0.0 }
 0x1cf   : > { %1913 = vadd.xlane.f32.xlu1 %v1912_v41  ;;  %v1326_v41 = vld [vmem:[%s7838_s22 + $0x18] sm:$0xff] }
 0x1d1   : > { %1910 = vadd.xlane.f32.xlu0 %v1909_v39  ;;  %v1957_v39 = vsel %vm1863_vm2, %v1862_v35, 0.0 }
 0x1d3   : > { %1919 = vadd.xlane.f32.xlu1 %v1918_v49  ;;  %v1327_v49 = vld [vmem:[%s7838_s22 + $0x20] sm:$0xff] }
 0x1d5   : > { %1916 = vadd.xlane.f32.xlu0 %v1915_v46  ;;  %v1328_v46 = vld [vmem:[%s7838_s22 + $0x28] sm:$0xff] }
 0x1d7   : > { %1925 = vadd.xlane.f32.xlu1 %v1924_v56  ;;  %v8176_v56 = vld [vmem:[#allocation17 + $0x1] ss:$0 sm:$0xff] }
 0x1d8   : > { %v2756_v58 = vmul.f32 %v8176_v56, %v7915_v21  ;;  %v2772_v35 = vmul.f32 %v8176_v56, %v8069_v34 }
 0x1d9   : > { %1922 = vadd.xlane.f32.xlu0 %v1921_v53  ;;  %v1329_v53 = vld [vmem:[%s7838_s22 + $0x30] sm:$0xff]  ;;  %s5573_s22 = sshll.u32 %s9386_s11, 4  ;;  %s10073_s22 = int_to_ptr.vmem [resolvable:$true] %s5573_s22 }
 0x1da   : > { %v2790_v62 = vsel %vm1863_vm2, %v2756_v58, 0.0  ;;  %p7007_p11 = scmp.lt.s32.totalorder %s10073_s22, %s7005_s9 }
 0x1db   : > { %1931 = vadd.xlane.f32.xlu1 %v1930_v63  ;;  %v2759_v63 = vmul.f32 %v8176_v56, %v7925_v25 }
 0x1dd   : > { %1928 = vadd.xlane.f32.xlu0 %v1927_v61  ;;  %v2755_v61 = vmul.f32 %v8176_v56, %v7889_v7  ;;  %v2799_v5 = vsel %vm1863_vm2, %v2759_v63, 0.0 }
 0x1df   : > { %1937 = vadd.xlane.f32.xlu1 %v1936_v9  ;;  %v2787_v0 = vsel %vm1863_vm2, %v2755_v61, 0.0  ;;  %v2771_v9 = vmul.f32 %v8176_v56, %v8056_v28  ;;  %v2777_v61 = vmul.f32 %v8176_v56, %v8100_v52 }
 0x1e1   : > { %1934 = vadd.xlane.f32.xlu0 %v1933_v4  ;;  %v2757_v4 = vmul.f32 %v8176_v56, %v7896_v11  ;;  %v2835_v17 = vsel %vm1863_vm2, %v2771_v9, 0.0  ;;  %v2765_v9 = vmul.f32 %v8176_v56, %v7995_v57 }
 0x1e3   : > { %1943 = vadd.xlane.f32.xlu1 %v1942_v18  ;;  %v2793_v10 = vsel %vm1863_vm2, %v2757_v4, 0.0  ;;  %v2773_v18 = vmul.f32 %v8176_v56, %v8073_v36  ;;  %v2776_v4 = vmul.f32 %v8176_v56, %v8097_v51 }
 0x1e5   : > { %1940 = vadd.xlane.f32.xlu0 %v1939_v15  ;;  %v2758_v15 = vmul.f32 %v8176_v56, %v7922_v24  ;;  %v2841_v27 = vsel %vm1863_vm2, %v2773_v18, 0.0  ;;  %v2764_v18 = vmul.f32 %v8176_v56, %v7988_v54 }
 0x1e7   : > { %1949 = vadd.xlane.f32.xlu1 %v1948_v29  ;;  %v2796_v19 = vsel %vm1863_vm2, %v2758_v15, 0.0  ;;  %v2761_v29 = vmul.f32 %v8176_v56, %v7948_v37 }
 0x1e9   : > { %1946 = vadd.xlane.f32.xlu0 %v1945_v23  ;;  %v2760_v23 = vmul.f32 %v8176_v56, %v7940_v31 }
 0x1eb   : > { %1955 = vadd.xlane.f32.xlu1 %v1954_v38  ;;  %v2805_v38 = vsel %vm1863_vm2, %v2761_v29, 0.0 }
 0x1ed   : > { %1952 = vadd.xlane.f32.xlu0 %v1951_v33  ;;  %v2802_v33 = vsel %vm1863_vm2, %v2760_v23, 0.0  ;;  %v2779_v23 = vmul.f32 %v8176_v56, %v8112_v60 }
 0x1f1   : > { %1958 = vadd.xlane.f32.xlu0 %v1957_v39  ;;  %v2775_v39 = vmul.f32 %v8176_v56, %v8088_v45 }
 0x1fc   : > { %1347 = vperm.xlu1 %6522, %v1325_v40  }
 0x200   : > { %1352 = vperm.xlu1 %6522, %v1326_v41  }
 0x204   : > { %1362 = vperm.xlu1 %6522, %v1328_v46   ;;  %v2774_v46 = vmul.f32 %v8176_v56, %v8084_v43 }
 0x207   : > { %1337 = vperm.xlu0 %6523, %v1323_v42   ;;  %v2838_v42 = vsel %vm1863_vm2, %v2772_v35, 0.0  ;;  %v2814_v35 = vsel %vm1863_vm2, %v2764_v18, 0.0 }
 0x208   : > { %1372 = vperm.xlu1 %6522, %v1330_v47   ;;  %v2763_v47 = vmul.f32 %v8176_v56, %v7972_v48 }
 0x20a   : > { %v2811_v58 = vsel %vm1863_vm2, %v2763_v47, 0.0 }
 0x20b   : > { %1342 = vperm.xlu0 %6523, %v1324_v8   ;;  %v2847_v8 = vsel %vm1863_vm2, %v2775_v39, 0.0  ;;  %v2859_v39 = vsel %vm1863_vm2, %v2779_v23, 0.0 }
 0x20c   : > { %2189 = vperm.xlu1 %6522, %v1823_v50  }
 0x20f   : > { %1357 = vperm.xlu0 %6523, %v1327_v49  }
 0x213   : > { %1367 = vperm.xlu0 %6523, %v1329_v53   ;;  %v2844_v53 = vsel %vm1863_vm2, %v2774_v46, 0.0 }
 0x217   : > { %2194 = vperm.xlu0 %6523, %v1824_v55   ;;  %v2762_v55 = vmul.f32 %v8176_v56, %v7959_v44 }
 0x230   : > { %2791 = vadd.xlane.f32.xlu1 %v2790_v62 }
 0x234   : > { %2800 = vadd.xlane.f32.xlu1 %v2799_v5  ;;  %v2853_v5 = vsel %vm1863_vm2, %v2777_v61, 0.0 }
 0x236   : > { %2788 = vadd.xlane.f32.xlu0 %v2787_v0  ;;  %v2808_v0 = vsel %vm1863_vm2, %v2762_v55, 0.0 }
 0x238   : > { %2836 = vadd.xlane.f32.xlu1 %v2835_v17  ;;  %v2850_v17 = vsel %vm1863_vm2, %v2776_v4, 0.0  ;;  %v2780_v4 = vmul.f32 %v8176_v56, %v8121_v1 }
 0x23a   : > { %2794 = vadd.xlane.f32.xlu0 %v2793_v10  ;;  %v2862_v18 = vsel %vm1863_vm2, %v2780_v4, 0.0  ;;  %v2768_v4 = vmul.f32 %v8176_v56, %v8031_v14 }
 0x23c   : > { %2842 = vadd.xlane.f32.xlu1 %v2841_v27  ;;  %v8251_v27 = vld [vmem:[#allocation17 + $0x2] ss:$0 sm:$0xff] }
 0x23e   : > { %v8203_v30 = vpop.xlane.xlu0 %1865  ;;  %2797 = vadd.xlane.f32.xlu0 %v2796_v19  ;;  %v2817_v19 = vsel %vm1863_vm2, %v2765_v9, 0.0  ;;  %v2767_v9 = vmul.f32 %v8176_v56, %v8016_v6 }
 0x240   : > { %v8211_v40 = vpop.xlane.xlu1 %1868  ;;  %2806 = vadd.xlane.f32.xlu1 %v2805_v38  ;;  %v2778_v38 = vmul.f32 %v8176_v56, %v8109_v59  ;;  %v2823_v23 = vsel %vm1863_vm2, %v2767_v9, 0.0 }
 0x242   : > { %v8213_v41 = vpop.xlane.xlu0 %1871  ;;  %2803 = vadd.xlane.f32.xlu0 %v2802_v33  ;;  %v2856_v47 = vsel %vm1863_vm2, %v2778_v38, 0.0 }
 0x244   : > { %v8223_v50 = vpop.xlane.xlu1 %1877  ;;  %2848 = vadd.xlane.f32.xlu1 %v2847_v8 }
 0x246   : > { %v8221_v49 = vpop.xlane.xlu0 %1874  ;;  %2839 = vadd.xlane.f32.xlu0 %v2838_v42  ;;  %v3681_v42 = vmul.f32 %v8251_v27, %v7889_v7 }
 0x248   : > { %v8233_v63 = vpop.xlane.xlu1 %1883  ;;  %2812 = vadd.xlane.f32.xlu1 %v2811_v58  ;;  %v3713_v55 = vsel %vm1863_vm2, %v3681_v42, 0.0  ;;  %v3683_v58 = vmul.f32 %v8251_v27, %v7896_v11 }
 0x24a   : > { %v8231_v62 = vpop.xlane.xlu0 %1880  ;;  %2845 = vadd.xlane.f32.xlu0 %v2844_v53  ;;  %v2766_v53 = vmul.f32 %v8176_v56, %v8009_v3 }
 0x24c   : > { %v8243_v15 = vpop.xlane.xlu1 %1889  ;;  %2854 = vadd.xlane.f32.xlu1 %v2853_v5  ;;  %v3719_v5 = vsel %vm1863_vm2, %v3683_v58, 0.0 }
 0x24e   : > { %v8241_v10 = vpop.xlane.xlu0 %1886  ;;  %2809 = vadd.xlane.f32.xlu0 %v2808_v0  ;;  %v2820_v0 = vsel %vm1863_vm2, %v2766_v53, 0.0 }
 0x250   : > { %v8255_v33 = vpop.xlane.xlu1 %1895  ;;  %2818 = vadd.xlane.f32.xlu1 %v2817_v19  ;;  %v3682_v19 = vmul.f32 %v8251_v27, %v7915_v21  ;;  %v3685_v21 = vmul.f32 %v8251_v27, %v7925_v25  ;;  %v2826_v25 = vsel %vm1863_vm2, %v2768_v4, 0.0  ;;  %v1992_v4 = vlaneseq }
 0x252   : > { %v8253_v29 = vpop.xlane.xlu0 %1892  ;;  %2851 = vadd.xlane.f32.xlu0 %v2850_v17  ;;  %v3716_v42 = vsel %vm1863_vm2, %v3682_v19, 0.0 }
 0x254   : > { %v8265_v8 = vpop.xlane.xlu1 %1901  ;;  %2860 = vadd.xlane.f32.xlu1 %v2859_v39 }
 0x256   : > { %v8263_v46 = vpop.xlane.xlu0 %1898  ;;  %2815 = vadd.xlane.f32.xlu0 %v2814_v35  ;;  %v2781_v35 = vmul.f32 %v8176_v56, %v8124_v2 }
 0x258   : > { %v8275_v7 = vpop.xlane.xlu1 %1907  ;;  %3714 = vadd.xlane.f32.xlu1 %v3713_v55  ;;  %v2865_v53 = vsel %vm1863_vm2, %v2781_v35, 0.0  ;;  %v3699_v35 = vmul.f32 %v8251_v27, %v8073_v36  ;;  %v8349_v36 = vshrl.u32 %v1992_v4, 7 }
 0x25a   : > { %v8273_v61 = vpop.xlane.xlu0 %1904  ;;  %2857 = vadd.xlane.f32.xlu0 %v2856_v47  ;;  %v3684_v47 = vmul.f32 %v8251_v27, %v7922_v24  ;;  %v3697_v24 = vmul.f32 %v8251_v27, %v8056_v28  ;;  %10353 = vst [vmem:[#allocation48_spill] sm:$0xff] %v8349_v36 }
 0x25c   : > { %v8285_v11 = vpop.xlane.xlu1 %1913  ;;  %3720 = vadd.xlane.f32.xlu1 %v3719_v5  ;;  %v3725_v5 = vsel %vm1863_vm2, %v3685_v21, 0.0  ;;  %v3767_v21 = vsel %vm1863_vm2, %v3699_v35, 0.0  ;;  %v1993_v35 = vand.u32 127, %v1992_v4 }
 0x25e   : > { %v8283_v17 = vpop.xlane.xlu0 %1910  ;;  %2821 = vadd.xlane.f32.xlu0 %v2820_v0  ;;  %v3722_v0 = vsel %vm1863_vm2, %v3684_v47, 0.0 }
 0x260   : > { %v8295_v39 = vpop.xlane.xlu1 %1919  ;;  %2824 = vadd.xlane.f32.xlu1 %v2823_v23  ;;  %v3761_v23 = vsel %vm1863_vm2, %v3697_v24, 0.0 }
 0x262   : > { %v8293_v38 = vpop.xlane.xlu0 %1916  ;;  %2863 = vadd.xlane.f32.xlu0 %v2862_v18  ;;  %v2782_v18 = vmul.f32 %v8176_v56, %v8133_v12 }
 0x264   : > { %v8305_v58 = vpop.xlane.xlu1 %1925  ;;  %2866 = vadd.xlane.f32.xlu1 %v2865_v53  ;;  %v2868_v47 = vsel %vm1863_vm2, %v2782_v18, 0.0  ;;  %v3686_v53 = vmul.f32 %v8251_v27, %v7940_v31 }
 0x266   : > { %v8303_v55 = vpop.xlane.xlu0 %1922  ;;  %3717 = vadd.xlane.f32.xlu0 %v3716_v42  ;;  %v3728_v24 = vsel %vm1863_vm2, %v3686_v53, 0.0 }
 0x268   : > { %3726 = vadd.xlane.f32.xlu1 %v3725_v5  ;;  %v8318_v19 = vpop.xlane.xlu1 %1931 }
 0x26a   : > { %v8313_v9 = vpop.xlane.xlu0 %1928  ;;  %3723 = vadd.xlane.f32.xlu0 %v3722_v0  ;;  %v2769_v0 = vmul.f32 %v8176_v56, %v8037_v16 }
 0x26c   : > { %3762 = vadd.xlane.f32.xlu1 %v3761_v23  ;;  %v8331_v5 = vpop.xlane.xlu1 %1937  ;;  %v2829_v31 = vsel %vm1863_vm2, %v2769_v0, 0.0  ;;  %v2783_v23 = vmul.f32 %v8176_v56, %v8136_v13  ;;  %v1998_v0 = vadd.s32 4294967288, %v1993_v35 }
 0x26e   : > { %v8323_v42 = vpop.xlane.xlu0 %1934  ;;  %2827 = vadd.xlane.f32.xlu0 %v2826_v25  ;;  %v3698_v25 = vmul.f32 %v8251_v27, %v8069_v34  ;;  %v2871_v34 = vsel %vm1863_vm2, %v2783_v23, 0.0  ;;  %v3701_v23 = vmul.f32 %v8251_v27, %v8088_v45 }
 0x270   : > { %3768 = vadd.xlane.f32.xlu1 %v3767_v21  ;;  %v3764_v16 = vsel %vm1863_vm2, %v3698_v25, 0.0  ;;  %v8344_v53 = vpop.xlane.xlu1 %1943  ;;  %v3687_v21 = vmul.f32 %v8251_v27, %v7948_v37  ;;  %v2770_v25 = vmul.f32 %v8176_v56, %v8049_v26  ;;  %v8363_v37 = vsub.s32 %v1998_v0, %v8349_v36 }
 0x272   : > { %2869 = vadd.xlane.f32.xlu0 %v2868_v47  ;;  %v8336_v18 = vpop.xlane.xlu0 %1940  ;;  %v3700_v47 = vmul.f32 %v8251_v27, %v8084_v43  ;;  %v8360_v43 = vsub.s32 %v1993_v35, %v8349_v36  ;;  %v2785_v35 = vmul.f32 %v8176_v56, %v8148_v22 }
 0x274   : > { %2830 = vadd.xlane.f32.xlu1 %v2829_v31  ;;  %v3731_v31 = vsel %vm1863_vm2, %v3687_v21, 0.0  ;;  %v8365_v4 = vpop.xlane.xlu1 %1949  ;;  %v3773_v21 = vsel %vm1863_vm2, %v3701_v23, 0.0  ;;  %v1997_v0 = vrot.slane %v8203_v30, %v8360_v43  ;;  %v2008_v36 = vrot.slane %v8213_v41, %v8360_v43 }
 0x275   : > { %v3688_v23 = vmul.f32 %v8251_v27, %v7959_v44  ;;  %v2877_v30 = vsel %vm1863_vm2, %v2785_v35, 0.0  ;;  %v3689_v41 = vmul.f32 %v8251_v27, %v7972_v48  ;;  %v2071_v44 = vrot.slane %v8285_v11, %v8360_v43 }
 0x276   : > { %3729 = vadd.xlane.f32.xlu0 %v3728_v24  ;;  %v8351_v12 = vpop.xlane.xlu0 %1946  ;;  %v3770_v24 = vsel %vm1863_vm2, %v3700_v47, 0.0  ;;  %v2784_v47 = vmul.f32 %v8176_v56, %v8145_v20  ;;  %v2080_v35 = vrot.slane %v8295_v39, %v8360_v43  ;;  %v2084_v48 = vrot.slane %v8303_v55, %v8363_v37 }
 0x277   : > { %v3737_v55 = vsel %vm1863_vm2, %v3689_v41, 0.0 }
 0x278   : > { %2872 = vadd.xlane.f32.xlu1 %v2871_v34  ;;  %v8386_v22 = vpop.xlane.xlu1 %1955 }
 0x27a   : > { %3765 = vadd.xlane.f32.xlu0 %v3764_v16  ;;  %v2832_v16 = vsel %vm1863_vm2, %v2770_v25, 0.0  ;;  %v8370_v34 = vpop.xlane.xlu0 %1952  ;;  %v2012_v25 = vrot.slane %v8221_v49, %v8363_v37 }
 0x27c   : > { %3732 = vadd.xlane.f32.xlu1 %v3731_v31  ;;  %v2874_v31 = vsel %vm1863_vm2, %v2784_v47, 0.0  ;;  %v2013_v49 = vsel %vm2003_vm5, %v2012_v25, %v2008_v36  ;;  %v2021_v47 = vrot.slane %v8231_v62, %v8363_v37  ;;  %v3734_v36 = vsel %vm1863_vm2, %v3688_v23, 0.0  ;;  %v1348_v39 = vpop.permute.xlu1 %1347 }
 0x27d   : > { %v3703_v62 = vmul.f32 %v8251_v27, %v8100_v52  ;;  %v2030_v25 = vrot.slane %v8241_v10, %v8363_v37  ;;  %v2093_v23 = vrot.slane %v8313_v9, %v8363_v37  ;;  %v2035_v9 = vrot.slane %v8243_v15, %v8360_v43 }
 0x27e   : > { %3771 = vadd.xlane.f32.xlu0 %v3770_v24  ;;  %v2002_v24 = vrot.slane %v8211_v40, %v8363_v37  ;;  %v2107_v15 = vrot.slane %v8331_v5, %v8360_v43  ;;  %v2048_v5 = vrot.slane %v8263_v46, %v8363_v37  ;;  %v6043_v46 = vld [vmem:[%s7845_s26] ss:$0 sm:$0xff] }
 0x27f   : > { %v3779_v10 = vsel %vm1863_vm2, %v3703_v62, 0.0 }
 0x280   : > { %3774 = vadd.xlane.f32.xlu1 %v3773_v21  ;;  %v2004_v40 = vsel %vm2003_vm5, %v2002_v24, %v1997_v0  ;;  %v2075_v21 = vrot.slane %v8293_v38, %v8363_v37  ;;  %v8405_v0 = vpop.xlane.xlu0 %1958  ;;  %v2026_v38 = vrot.slane %v8233_v63, %v8360_v43 }
 0x281   : > { %v2141_v11 = vsel %vm2140_vm6, %v2013_v49, %v2004_v40  ;;  %v2085_v40 = vsel %vm2003_vm5, %v2084_v48, %v2080_v35 }
 0x282   : > { %2833 = vadd.xlane.f32.xlu0 %v2832_v16  ;;  %v2017_v16 = vrot.slane %v8223_v50, %v8360_v43  ;;  %v3702_v50 = vmul.f32 %v8251_v27, %v8097_v51  ;;  %v2031_v48 = vsel %vm2003_vm5, %v2030_v25, %v2026_v38 }
 0x284   : > { %2878 = vadd.xlane.f32.xlu1 %v2877_v30  ;;  %v2022_v24 = vsel %vm2003_vm5, %v2021_v47, %v2017_v16  ;;  %v2076_v30 = vsel %vm2003_vm5, %v2075_v21, %v2071_v44  ;;  %v3776_v16 = vsel %vm1863_vm2, %v3702_v50, 0.0  ;;  %v2098_v44 = vrot.slane %v8318_v19, %v8360_v43 }
 0x285   : > { %v2102_v21 = vrot.slane %v8323_v42, %v8363_v37  ;;  %v2154_v50 = vsel %vm2140_vm6, %v2085_v40, %v2076_v30  ;;  %v2111_v19 = vrot.slane %v8336_v18, %v8363_v37  ;;  %v2044_v42 = vrot.slane %v8255_v33, %v8360_v43 }
 0x286   : > { %2875 = vadd.xlane.f32.xlu0 %v2874_v31  ;;  %v2089_v31 = vrot.slane %v8305_v58, %v8360_v43  ;;  %v1338_v49 = vpop.permute.xlu0 %1337  ;;  %v2143_v58 = vsel %vm2142_vm7, %v2022_v24, %v2141_v11  ;;  %v1353_v11 = vpop.permute.xlu1 %1352  ;;  %v2053_v18 = vrot.slane %v8265_v8, %v8360_v43  ;;  %v2062_v33 = vrot.slane %v8275_v7, %v8360_v43 }
 0x287   : > { %v2066_v30 = vrot.slane %v8283_v17, %v8363_v37  ;;  %v2116_v40 = vrot.slane %v8344_v53, %v8360_v43  ;;  %v2129_v7 = vrot.slane %v8370_v34, %v8363_v37  ;;  %v2134_v53 = vrot.slane %v8386_v22, %v8360_v43 }
 0x288   : > { %v6190_v63 = vpop.f32.mrb[0].mxu0  ;;  %3738 = vadd.xlane.f32.xlu1 %v3737_v55  ;;  %v2094_v62 = vsel %vm2003_vm5, %v2093_v23, %v2089_v31  ;;  %v2103_v55 = vsel %vm2003_vm5, %v2102_v21, %v2098_v44  ;;  %v2057_v31 = vrot.slane %v8273_v61, %v8363_v37  ;;  %v6044_v23 = vld [vmem:[%s7845_s26 + $0x1] ss:$0 sm:$0xff]  ;;  %v2125_v61 = vrot.slane %v8365_v4, %v8360_v43 }
 0x289   : > { %v1053_v41 = vpop.f32.mrb[1].mxu0  ;;  %v6197_v47 = vpop.f32.mrb[0].mxu1  ;;  %v2155_v38 = vsel %vm2142_vm7, %v2094_v62, %v2154_v50  ;;  %v1402_v44 = vadd.f32 %v6044_v23, %v1353_v11  ;;  %v1401_v50 = vadd.f32 %v6044_v23, %v1348_v39  ;;  %v2067_v11 = vsel %vm2003_vm5, %v2066_v30, %v2062_v33 }
 0x28a   : > { %3735 = vadd.xlane.f32.xlu0 %v3734_v36  ;;  %v1140_v35 = vpop.f32.mrb[1].mxu1  ;;  %v2039_v36 = vrot.slane %v8253_v29, %v8363_v37  ;;  %v2145_v29 = vsel %vm2144_vm8, %v2031_v48, %v2143_v58  ;;  %v1343_v24 = vpop.permute.xlu0 %1342  ;;  %v2156_v8 = vsel %vm2144_vm8, %v2103_v55, %v2155_v38  ;;  %v2112_v58 = vsel %vm2003_vm5, %v2111_v19, %v2107_v15 }
 0x28b   : > { %v1410_v21 = vmul.f32 2.0, %v6197_v47  ;;  %v1363_v48 = vpop.permute.xlu1 %1362  ;;  %v1400_v62 = vadd.f32 %v6043_v46, %v1343_v24  ;;  %v1408_v15 = vmul.f32 2.0, %v6190_v63  ;;  %v1409_v4 = vmul.f32 2.0, %v1140_v35 }
 0x28c   : > { %3780 = vadd.xlane.f32.xlu1 %v3779_v10  ;;  %v2040_v25 = vsel %vm2003_vm5, %v2039_v36, %v2035_v9  ;;  %v2049_v19 = vsel %vm2003_vm5, %v2048_v5, %v2044_v42  ;;  %v1399_v38 = vadd.f32 %v6043_v46, %v1338_v49  ;;  %v1407_v55 = vmul.f32 2.0, %v1053_v41  ;;  %v6045_v42 = vld [vmem:[%s7845_s26 + $0x2] ss:$0 sm:$0xff] }
 0x28d   : > { %v2147_v22 = vsel %vm2146_vm9, %v2040_v25, %v2145_v29  ;;  %v2130_v47 = vsel %vm2003_vm5, %v2129_v7, %v2125_v61  ;;  %v2157_v39 = vsel %vm2146_vm9, %v2112_v58, %v2156_v8  ;;  %v1418_v63 = vsub.f32 %v1402_v44, %v1410_v21 }
 0x28e   : > { %3777 = vadd.xlane.f32.xlu0 %v3776_v16  ;;  %v2120_v16 = vrot.slane %v8351_v12, %v8363_v37  ;;  %v2138_v12 = vrot.slane %v8405_v0, %v8363_v37  ;;  %v1358_v52 = vpop.permute.xlu0 %1357  ;;  %v2058_v0 = vsel %vm2003_vm5, %v2057_v31, %v2053_v18  ;;  %v1416_v49 = vsub.f32 %v1400_v62, %v1408_v15  ;;  %v6063_v18 = vld [vmem:[%s830_s17] ss:$0 sm:$0xff]  ;;  %s7006_s17 = scalar_lea.vmem %s7005_s9, 512 }
 0x28f   : > { %v1417_v41 = vsub.f32 %v1401_v50, %v1409_v4  ;;  %v2149_v29 = vsel %vm2148_vm10, %v2049_v19, %v2147_v22  ;;  %v1373_v25 = vpop.permute.xlu1 %1372  ;;  %v1415_v31 = vsub.f32 %v1399_v38, %v1407_v55  ;;  %v2786_v61 = vmul.f32 %v8176_v56, %v8157_v32 }
 0x290   : > { %v6204_v10 = vpop.f32.mrb[2].mxu0  ;;  %v2121_v34 = vsel %vm2003_vm5, %v2120_v16, %v2116_v40  ;;  %v2139_v35 = vsel %vm2003_vm5, %v2138_v12, %v2134_v53  ;;  %v2151_v40 = vsel %vm2150_vm11, %v2058_v0, %v2149_v29  ;;  %v6046_v16 = vld [vmem:[%s7845_s26 + $0x3] ss:$0 sm:$0xff]  ;;  %v1404_v7 = vadd.f32 %v6045_v42, %v1363_v48 }
 0x291   : > { %v6211_v9 = vpop.f32.mrb[2].mxu1  ;;  %v1227_v17 = vpop.f32.mrb[3].mxu0  ;;  %v2158_v24 = vsel %vm2148_vm10, %v2121_v34, %v2157_v39  ;;  %v2153_v58 = vsel %vm2152_vm12, %v2067_v11, %v2151_v40  ;;  %v1406_v12 = vadd.f32 %v6046_v16, %v1373_v25  ;;  %v1403_v62 = vadd.f32 %v6045_v42, %v1358_v52 }
 0x292   : > { %v1314_v36 = vpop.f32.mrb[3].mxu1  ;;  %v2159_v23 = vsel %vm2150_vm11, %v2130_v47, %v2158_v24  ;;  %v1368_v53 = vpop.permute.xlu0 %1367  ;;  %v1412_v15 = vmul.f32 2.0, %v6204_v10  ;;  %v1414_v34 = vmul.f32 2.0, %v6211_v9  ;;  %v1411_v38 = vmul.f32 2.0, %v1227_v17 }
 0x293   : > { %v2160_v30 = vsel %vm2152_vm12, %v2139_v35, %v2159_v23  ;;  %v1405_v0 = vadd.f32 %v6046_v16, %v1368_v53  ;;  %v1413_v47 = vmul.f32 2.0, %v1314_v36  ;;  %v2880_v24 = vsel %vm1863_vm2, %v2786_v61, 0.0 }
 0x294   : > { %v1420_v10 = vsub.f32 %v1404_v7, %v1412_v15  ;;  %v1422_v9 = vsub.f32 %v1406_v12, %v1414_v34  ;;  %v1419_v35 = vsub.f32 %v1403_v62, %v1411_v38  ;;  %v3705_v23 = vmul.f32 %v8251_v27, %v8112_v60  ;;  %v6556_v7 = vld [vmem:[%s7855_s23] sm:$0xff] }
 0x295   : > { %v3706_v62 = vmul.f32 %v8251_v27, %v8121_v1 }
 0x296   : > { %v3785_v61 = vsel %vm1863_vm2, %v3705_v23, 0.0 }
 0x298   : > { %v6218_v5 = vpop.f32.mrb[4].mxu0 }
 0x299   : > { %v1508_v46 = vadd.f32 %v6218_v5, %v1416_v49  ;;  %v1502_v8 = vpop.f32.mrb[5].mxu0  ;;  %v6225_v33 = vpop.f32.mrb[4].mxu1 }
 0x29a   : > { %v1503_v44 = vadd.f32 %v1502_v8, %v1415_v31  ;;  %v1595_v21 = vadd.f32 %v6225_v33, %v1418_v63  ;;  %v1589_v50 = vpop.f32.mrb[5].mxu1  ;;  %v3691_v63 = vmul.f32 %v8251_v27, %v7995_v57  ;;  %v3690_v57 = vmul.f32 %v8251_v27, %v7988_v54 }
 0x29b   : > { %v1780_v4 = vadd.f32 %v6063_v18, %v1508_v46  ;;  %v1590_v19 = vadd.f32 %v1589_v50, %v1417_v41  ;;  %v1421_v41 = vsub.f32 %v1405_v0, %v1413_v47  ;;  %v8517_v46 = vld [vmem:[#allocation17 + $0x3] ss:$0 sm:$0xff]  ;;  %v6559_v0 = vld [vmem:[%s7855_s23 + $0x18] sm:$0xff] }
 0x29c   : > { %v1779_v55 = vadd.f32 %v6063_v18, %v1503_v44  ;;  %v8495_v22 = vadd.f32 %v6063_v18, %v1595_v21  ;;  %v3743_v31 = vsel %vm1863_vm2, %v3691_v63, 0.0  ;;  %v4608_v53 = vmul.f32 %v6556_v7, %v8517_v46  ;;  %v6557_v21 = vld [vmem:[%s7855_s23 + $0x10] sm:$0xff]  ;;  %v6560_v63 = vld [vmem:[%s7855_s23 + $0x20] sm:$0xff] }
 0x29d   : > { %v8497_v39 = vadd.f32 %v6063_v18, %v1590_v19  ;;  %v8499_v56 = vadd.f32 %v2160_v30, %v1780_v4  ;;  %v3740_v30 = vsel %vm1863_vm2, %v3690_v57, 0.0  ;;  %v3692_v44 = vmul.f32 %v8251_v27, %v8009_v3  ;;  %v6558_v19 = vld [vmem:[%s7855_s23 + $0x8] sm:$0xff] }
 0x29e   : > { %v8501_v48 = vadd.f32 %v2153_v58, %v1779_v55  ;;  %v3704_v58 = vmul.f32 %v8251_v27, %v8109_v59  ;;  %v4610_v50 = vmul.f32 %v6557_v21, %v8517_v46  ;;  %v3693_v3 = vmul.f32 %v8251_v27, %v8016_v6  ;;  %v10357_v7 = vld [vmem:[#allocation42_spill] sm:$0xff] }
 0x29f   : > { %v2168_v52 = vsel %vm1863_vm2, %v8499_v56, -inf  ;;  %v3746_v59 = vsel %vm1863_vm2, %v3692_v44, 0.0  ;;  %v3788_v4 = vsel %vm1863_vm2, %v3706_v62, 0.0  ;;  %v4609_v34 = vmul.f32 %v6558_v19, %v8517_v46 }
 0x2a0   : > { %2169 = vmax.xlane.f32.xlu0 %v2168_v52  ;;  %v6232_v17 = vpop.f32.mrb[6].mxu0  ;;  %v2165_v36 = vsel %vm1863_vm2, %v8501_v48, -inf  ;;  %v3782_v12 = vsel %vm1863_vm2, %v3704_v58, 0.0  ;;  %v4646_v15 = vsel %vm1863_vm2, %v4610_v50, 0.0  ;;  %v3749_v38 = vsel %vm1863_vm2, %v3693_v3, 0.0 }
 0x2a1   : > { %v6239_v11 = vpop.f32.mrb[6].mxu1  ;;  %v1682_v42 = vadd.f32 %v6232_v17, %v1420_v10  ;;  %v1676_v49 = vpop.f32.mrb[7].mxu0  ;;  %2166 = vmax.xlane.f32.xlu1 %v2165_v36  ;;  %v3707_v55 = vmul.f32 %v8251_v27, %v8124_v2  ;;  %v4643_v1 = vsel %vm1863_vm2, %v4609_v34, 0.0  ;;  %v4611_v47 = vmul.f32 %v6559_v0, %v8517_v46 }
 0x2a2   : > { %v1769_v29 = vadd.f32 %v6239_v11, %v1422_v9  ;;  %v1677_v25 = vadd.f32 %v1676_v49, %v1419_v35  ;;  %v1763_v5 = vpop.f32.mrb[7].mxu1  ;;  %v4612_v52 = vmul.f32 %v6560_v63, %v8517_v46  ;;  %v3694_v9 = vmul.f32 %v8251_v27, %v8031_v14  ;;  %v8558_v2 = vpop.permute.xlu1 %2189 }
 0x2a3   : > { %v8515_v40 = vadd.f32 %v6063_v18, %v1682_v42  ;;  %v1764_v16 = vadd.f32 %v1763_v5, %v1421_v41  ;;  %v3791_v6 = vsel %vm1863_vm2, %v3707_v55, 0.0  ;;  %v4649_v10 = vsel %vm1863_vm2, %v4611_v47, 0.0  ;;  %v8563_v36 = vpop.permute.xlu0 %2194  ;;  %v10354_v42 = vld [vmem:[#allocation46_spill] sm:$0xff] }
 0x2a4   : > { %v8519_v8 = vadd.f32 %v6063_v18, %v1769_v29  ;;  %v8521_v33 = vadd.f32 %v6063_v18, %v1677_v25  ;;  %2881 = vadd.xlane.f32.xlu0 %v2880_v24  ;;  %v4652_v17 = vsel %vm1863_vm2, %v4612_v52, 0.0  ;;  %v4624_v35 = vmul.f32 %v8517_v46, %v8056_v28  ;;  %v10355_v24 = vld [vmem:[#allocation43_spill] sm:$0xff]  ;;  %v6561_v25 = vld [vmem:[%s7855_s23 + $0x28] sm:$0xff] }
 0x2a5   : > { %v8523_v54 = vadd.f32 %v6063_v18, %v1764_v16  ;;  %3744 = vadd.xlane.f32.xlu1 %v3743_v31  ;;  %v4640_v18 = vsel %vm1863_vm2, %v4608_v53, 0.0  ;;  %v3752_v11 = vsel %vm1863_vm2, %v3694_v9, 0.0  ;;  %v3708_v49 = vmul.f32 %v8251_v27, %v10354_v42  ;;  %v10356_v16 = vld [vmem:[#allocation41_spill] sm:$0xff] }
 0x2a6   : > { %v4688_v14 = vsel %vm1863_vm2, %v4624_v35, 0.0  ;;  %v4626_v57 = vmul.f32 %v8517_v46, %v10355_v24  ;;  %v4613_v5 = vmul.f32 %v6561_v25, %v8517_v46  ;;  %v4625_v53 = vmul.f32 %v8517_v46, %v10357_v7  ;;  %v6563_v35 = vld [vmem:[%s7855_s23 + $0x38] sm:$0xff] }
 0x2a7   : > { %v3794_v28 = vsel %vm1863_vm2, %v3708_v49, 0.0  ;;  %v4628_v0 = vmul.f32 %v8517_v46, %v8088_v45  ;;  %v3710_v63 = vmul.f32 %v8251_v27, %v8145_v20  ;;  %v6564_v49 = vld [vmem:[%s7855_s23 + $0x40] sm:$0xff]  ;;  %v3712_v7 = vmul.f32 %v8251_v27, %v8157_v32 }
 0x2a8   : > { %3741 = vadd.xlane.f32.xlu0 %v3740_v30  ;;  %v4694_v23 = vsel %vm1863_vm2, %v4626_v57, 0.0  ;;  %v3695_v30 = vmul.f32 %v8251_v27, %v10356_v16  ;;  %v4691_v50 = vsel %vm1863_vm2, %v4625_v53, 0.0 }
 0x2a9   : > { %3786 = vadd.xlane.f32.xlu1 %v3785_v61  ;;  %v4655_v61 = vsel %vm1863_vm2, %v4613_v5, 0.0  ;;  %v4700_v52 = vsel %vm1863_vm2, %v4628_v0, 0.0  ;;  %v3800_v45 = vsel %vm1863_vm2, %v3710_v63, 0.0  ;;  %v6568_v63 = vld [vmem:[%s7855_s23 + $0x60] sm:$0xff] }
 0x2aa   : > { %v3755_v44 = vsel %vm1863_vm2, %v3695_v30, 0.0 }
 0x2ac   : > { %3783 = vadd.xlane.f32.xlu0 %v3782_v12 }
 0x2ad   : > { %4641 = vadd.xlane.f32.xlu1 %v4640_v18  ;;  %v3709_v18 = vmul.f32 %v8251_v27, %v8136_v13 }
 0x2af   : > { %v3797_v3 = vsel %vm1863_vm2, %v3709_v18, 0.0 }
 0x2b0   : > { %3747 = vadd.xlane.f32.xlu0 %v3746_v59  ;;  %v10358_v59 = vld [vmem:[#allocation44_spill] sm:$0xff] }
 0x2b1   : > { %4647 = vadd.xlane.f32.xlu1 %v4646_v15  ;;  %v4627_v62 = vmul.f32 %v8517_v46, %v10358_v59  ;;  %v3806_v59 = vsel %vm1863_vm2, %v3712_v7, 0.0 }
 0x2b3   : > { %v4697_v13 = vsel %vm1863_vm2, %v4627_v62, 0.0  ;;  %v6566_v62 = vld [vmem:[%s7855_s23 + $0x48] sm:$0xff] }
 0x2b4   : > { %3789 = vadd.xlane.f32.xlu0 %v3788_v4  ;;  %v6562_v4 = vld [vmem:[%s7855_s23 + $0x30] sm:$0xff] }
 0x2b5   : > { %3750 = vadd.xlane.f32.xlu1 %v3749_v38  ;;  %v4614_v19 = vmul.f32 %v6562_v4, %v8517_v46  ;;  %v3696_v38 = vmul.f32 %v8251_v27, %v8049_v26  ;;  %v4632_v4 = vmul.f32 %v8517_v46, %v8112_v60 }
 0x2b8   : > { %4644 = vadd.xlane.f32.xlu0 %v4643_v1  ;;  %v4658_v1 = vsel %vm1863_vm2, %v4614_v19, 0.0 }
 0x2b9   : > { %3792 = vadd.xlane.f32.xlu1 %v3791_v6  ;;  %v3758_v6 = vsel %vm1863_vm2, %v3696_v38, 0.0  ;;  %v6567_v38 = vld [vmem:[%s7855_s23 + $0xb8] sm:$0xff] }
 0x2bc   : > { %4650 = vadd.xlane.f32.xlu0 %v4649_v10  ;;  %v10359_v10 = vld [vmem:[#allocation47_spill] sm:$0xff] }
 0x2bd   : > { %4653 = vadd.xlane.f32.xlu1 %v4652_v17  ;;  %v8568_v41 = vpop.xlane.xlu1 %2791  ;;  %v3711_v9 = vmul.f32 %v8251_v27, %v10359_v10 }
 0x2bf   : > { %v3803_v20 = vsel %vm1863_vm2, %v3711_v9, 0.0  ;;  %v6569_v9 = vld [vmem:[%s7855_s23 + $0x58] sm:$0xff] }
 0x2c0   : > { %3753 = vadd.xlane.f32.xlu0 %v3752_v11  ;;  %v4615_v11 = vmul.f32 %v6563_v35, %v8517_v46 }
 0x2c1   : > { %4689 = vadd.xlane.f32.xlu1 %v4688_v14  ;;  %v8578_v31 = vpop.xlane.xlu1 %2800  ;;  %v4616_v14 = vmul.f32 %v6564_v49, %v8517_v46 }
 0x2c2   : > { %v4661_v57 = vsel %vm1863_vm2, %v4615_v11, 0.0 }
 0x2c3   : > { %v8573_v29 = vpop.xlane.xlu0 %2788  ;;  %v4664_v5 = vsel %vm1863_vm2, %v4616_v14, 0.0 }
 0x2c4   : > { %3795 = vadd.xlane.f32.xlu0 %v3794_v28  ;;  %v4629_v28 = vmul.f32 %v8517_v46, %v8097_v51 }
 0x2c5   : > { %4695 = vadd.xlane.f32.xlu1 %v4694_v23  ;;  %v8588_v12 = vpop.xlane.xlu1 %2836  ;;  %v10360_v23 = vld [vmem:[#allocation45_spill] sm:$0xff] }
 0x2c6   : > { %v4630_v16 = vmul.f32 %v8517_v46, %v10360_v23 }
 0x2c7   : > { %v8583_v58 = vpop.xlane.xlu0 %2794 }
 0x2c8   : > { %4656 = vadd.xlane.f32.xlu0 %v4655_v61  ;;  %v4703_v61 = vsel %vm1863_vm2, %v4629_v28, 0.0  ;;  %v4706_v51 = vsel %vm1863_vm2, %v4630_v16, 0.0  ;;  %v6571_v28 = vld [vmem:[%s7855_s23 + $0xc8] sm:$0xff] }
 0x2c9   : > { %3756 = vadd.xlane.f32.xlu1 %v3755_v44  ;;  %v8598_v15 = vpop.xlane.xlu1 %2842  ;;  %v6565_v44 = vld [vmem:[%s7855_s23 + $0x50] sm:$0xff] }
 0x2ca   : > { %v4618_v18 = vmul.f32 %v6565_v44, %v8517_v46 }
 0x2cb   : > { %v8593_v21 = vpop.xlane.xlu0 %2797 }
 0x2cc   : > { %4692 = vadd.xlane.f32.xlu0 %v4691_v50  ;;  %v4670_v27 = vsel %vm1863_vm2, %v4618_v18, 0.0  ;;  %v6573_v18 = vld [vmem:[%s7855_s23 + $0x68] sm:$0xff] }
 0x2cd   : > { %3798 = vadd.xlane.f32.xlu1 %v3797_v3  ;;  %v8608_v55 = vpop.xlane.xlu1 %2806  ;;  %v4617_v3 = vmul.f32 %v6566_v62, %v8517_v46 }
 0x2cf   : > { %v8603_v34 = vpop.xlane.xlu0 %2803 }
 0x2d0   : > { %4698 = vadd.xlane.f32.xlu0 %v4697_v13  ;;  %v4667_v13 = vsel %vm1863_vm2, %v4617_v3, 0.0 }
 0x2d1   : > { %4659 = vadd.xlane.f32.xlu1 %v4658_v1  ;;  %v8618_v26 = vpop.xlane.xlu1 %2848  ;;  %v4631_v1 = vmul.f32 %v6567_v38, %v8517_v46 }
 0x2d3   : > { %v8613_v47 = vpop.xlane.xlu0 %2839  ;;  %v4709_v10 = vsel %vm1863_vm2, %v4631_v1, 0.0  ;;  %v6575_v1 = vld [vmem:[%s7855_s23 + $0xd8] sm:$0xff] }
 0x2d4   : > { %3759 = vadd.xlane.f32.xlu0 %v3758_v6  ;;  %v4712_v6 = vsel %vm1863_vm2, %v4632_v4, 0.0 }
 0x2d5   : > { %4701 = vadd.xlane.f32.xlu1 %v4700_v52  ;;  %v8628_v42 = vpop.xlane.xlu1 %2812  ;;  %v4620_v52 = vmul.f32 %v6568_v63, %v8517_v46 }
 0x2d7   : > { %v8623_v17 = vpop.xlane.xlu0 %2845  ;;  %v4676_v11 = vsel %vm1863_vm2, %v4620_v52, 0.0 }
 0x2d8   : > { %3801 = vadd.xlane.f32.xlu0 %v3800_v45  ;;  %v4619_v45 = vmul.f32 %v6569_v9, %v8517_v46 }
 0x2d9   : > { %3804 = vadd.xlane.f32.xlu1 %v3803_v20  ;;  %v8638_v25 = vpop.xlane.xlu1 %2854  ;;  %v6570_v20 = vld [vmem:[%s7855_s23 + $0xd0] sm:$0xff] }
 0x2da   : > { %v4634_v49 = vmul.f32 %v6570_v20, %v8517_v46  ;;  %v6577_v20 = vld [vmem:[%s7855_s23 + $0x78] sm:$0xff] }
 0x2db   : > { %v8633_v24 = vpop.xlane.xlu0 %2809 }
 0x2dc   : > { %4662 = vadd.xlane.f32.xlu0 %v4661_v57  ;;  %v4673_v57 = vsel %vm1863_vm2, %v4619_v45, 0.0  ;;  %v4718_v16 = vsel %vm1863_vm2, %v4634_v49, 0.0  ;;  %v4623_v49 = vmul.f32 %v6577_v20, %v8517_v46 }
 0x2dd   : > { %4665 = vadd.xlane.f32.xlu1 %v4664_v5  ;;  %v8648_v53 = vpop.xlane.xlu1 %2818  ;;  %v4633_v5 = vmul.f32 %v6571_v28, %v8517_v46 }
 0x2de   : > { %v2963_v20 = vrot.slane %v8648_v53, %v8360_v43 }
 0x2df   : > { %v8643_v30 = vpop.xlane.xlu0 %2851  ;;  %v4715_v44 = vsel %vm1863_vm2, %v4633_v5, 0.0 }
 0x2e0   : > { %4704 = vadd.xlane.f32.xlu0 %v4703_v61  ;;  %v6572_v61 = vld [vmem:[%s7855_s23 + $0x70] sm:$0xff] }
 0x2e1   : > { %4707 = vadd.xlane.f32.xlu1 %v4706_v51  ;;  %v8658_v32 = vpop.xlane.xlu1 %2860  ;;  %v4622_v7 = vmul.f32 %v6572_v61, %v8517_v46  ;;  %v6578_v61 = vld [vmem:[%s7855_s23 + $0xe8] sm:$0xff] }
 0x2e3   : > { %v8653_v50 = vpop.xlane.xlu0 %2815  ;;  %v4682_v3 = vsel %vm1863_vm2, %v4622_v7, 0.0  ;;  %v4637_v7 = vmul.f32 %v6578_v61, %v8517_v46 }
 0x2e4   : > { %3807 = vadd.xlane.f32.xlu0 %v3806_v59  ;;  %v4621_v59 = vmul.f32 %v6573_v18, %v8517_v46 }
 0x2e5   : > { %4671 = vadd.xlane.f32.xlu1 %v4670_v27  ;;  %v8668_v0 = vpop.xlane.xlu1 %3714  ;;  %v6574_v27 = vld [vmem:[%s7855_s23 + $0xe0] sm:$0xff] }
 0x2e6   : > { %v4636_v4 = vmul.f32 %v6574_v27, %v8517_v46  ;;  %v4679_v38 = vsel %vm1863_vm2, %v4621_v59, 0.0  ;;  %v4727_v59 = vsel %vm1863_vm2, %v4637_v7, 0.0 }
 0x2e7   : > { %v8663_v19 = vpop.xlane.xlu0 %2857 }
 0x2e8   : > { %4668 = vadd.xlane.f32.xlu0 %v4667_v13  ;;  %v4724_v52 = vsel %vm1863_vm2, %v4636_v4, 0.0  ;;  %v2918_v4 = vrot.slane %v8573_v29, %v8360_v43 }
 0x2e9   : > { %4713 = vadd.xlane.f32.xlu1 %v4712_v6  ;;  %v8678_v35 = vpop.xlane.xlu1 %3720  ;;  %v4635_v6 = vmul.f32 %v6575_v1, %v8517_v46  ;;  %v2922_v1 = vrot.slane %v8568_v41, %v8363_v37  ;;  %v2945_v41 = vrot.slane %v8608_v55, %v8360_v43 }
 0x2eb   : > { %v8673_v60 = vpop.xlane.xlu0 %2821 }
 0x2ec   : > { %4710 = vadd.xlane.f32.xlu0 %v4709_v10  ;;  %v6576_v10 = vld [vmem:[%s7855_s23 + $0xf0] sm:$0xff] }
 0x2ed   : > { %4677 = vadd.xlane.f32.xlu1 %v4676_v11  ;;  %v8688_v23 = vpop.xlane.xlu1 %2824  ;;  %v4638_v9 = vmul.f32 %v6576_v10, %v8517_v46  ;;  %v4721_v11 = vsel %vm1863_vm2, %v4635_v6, 0.0  ;;  %v2931_v6 = vrot.slane %v8593_v21, %v8363_v37  ;;  %v2940_v10 = vrot.slane %v8603_v34, %v8363_v37 }
 0x2ee   : > { %v2949_v21 = vrot.slane %v8633_v24, %v8363_v37  ;;  %v2958_v34 = vrot.slane %v8653_v50, %v8363_v37  ;;  %v2972_v24 = vrot.slane %v8688_v23, %v8360_v43 }
 0x2ef   : > { %v8683_v14 = vpop.xlane.xlu0 %2863  ;;  %v4730_v28 = vsel %vm1863_vm2, %v4638_v9, 0.0  ;;  %v2923_v9 = vsel %vm2003_vm5, %v2922_v1, %v2918_v4 }
 0x2f0   : > { %4674 = vadd.xlane.f32.xlu0 %v4673_v57  ;;  %v2950_v50 = vsel %vm2003_vm5, %v2949_v21, %v2945_v41 }
 0x2f1   : > { %4719 = vadd.xlane.f32.xlu1 %v4718_v16  ;;  %v8698_v62 = vpop.xlane.xlu1 %2866  ;;  %v4685_v16 = vsel %vm1863_vm2, %v4623_v49, 0.0  ;;  %v2967_v49 = vrot.slane %v8673_v60, %v8363_v37 }
 0x2f3   : > { %v8693_v51 = vpop.xlane.xlu0 %3717  ;;  %v2968_v60 = vsel %vm2003_vm5, %v2967_v49, %v2963_v20  ;;  %v2994_v20 = vrot.slane %v8613_v47, %v8363_v37  ;;  %v3003_v49 = vrot.slane %v8623_v17, %v8363_v37  ;;  %v3021_v47 = vrot.slane %v8663_v19, %v8363_v37 }
 0x2f4   : > { %4716 = vadd.xlane.f32.xlu0 %v4715_v44 }
 0x2f5   : > { %4683 = vadd.xlane.f32.xlu1 %v4682_v3  ;;  %v8708_v63 = vpop.xlane.xlu1 %3726  ;;  %v6579_v3 = vld [vmem:[%s7855_s23 + $0xf8] sm:$0xff] }
 0x2f6   : > { %v4639_v27 = vmul.f32 %v6579_v3, %v8517_v46 }
 0x2f7   : > { %v8703_v13 = vpop.xlane.xlu0 %3723 }
 0x2f8   : > { %4680 = vadd.xlane.f32.xlu0 %v4679_v38  ;;  %v2927_v38 = vrot.slane %v8583_v58, %v8360_v43  ;;  %v4733_v29 = vsel %vm1863_vm2, %v4639_v27, 0.0 }
 0x2f9   : > { %4725 = vadd.xlane.f32.xlu1 %v4724_v52  ;;  %v8716_v57 = vpop.xlane.xlu1 %3762  ;;  %v2936_v52 = vrot.slane %v8578_v31, %v8360_v43  ;;  %v2954_v31 = vrot.slane %v8628_v42, %v8360_v43 }
 0x2fa   : > { %v2932_v58 = vsel %vm2003_vm5, %v2931_v6, %v2927_v38 }
 0x2fb   : > { %v2828_v45 = vpop.xlane.xlu0 %2827  ;;  %v2941_v55 = vsel %vm2003_vm5, %v2940_v10, %v2936_v52  ;;  %v2959_v61 = vsel %vm2003_vm5, %v2958_v34, %v2954_v31  ;;  %v2990_v34 = vrot.slane %v8588_v12, %v8360_v43 }
 0x2fc   : > { %4722 = vadd.xlane.f32.xlu0 %v4721_v11 }
 0x2fd   : > { %4731 = vadd.xlane.f32.xlu1 %v4730_v28  ;;  %v8724_v44 = vpop.xlane.xlu1 %3768  ;;  %v3059_v28 = vsel %vm2140_vm6, %v2932_v58, %v2923_v9 }
 0x2fe   : > { %v3060_v53 = vsel %vm2142_vm7, %v2941_v55, %v3059_v28  ;;  %v3008_v28 = vrot.slane %v8618_v26, %v8360_v43  ;;  %v3012_v55 = vrot.slane %v8643_v30, %v8363_v37  ;;  %v3026_v30 = vrot.slane %v8658_v32, %v8360_v43 }
 0x2ff   : > { %v8719_v5 = vpop.xlane.xlu0 %2869  ;;  %v3061_v3 = vsel %vm2144_vm8, %v2950_v50, %v3060_v53  ;;  %v3035_v53 = vrot.slane %v8698_v62, %v8360_v43 }
 0x300   : > { %4686 = vadd.xlane.f32.xlu0 %v4685_v16  ;;  %v2976_v16 = vrot.slane %v2828_v45, %v8363_v37  ;;  %v3062_v45 = vsel %vm2146_vm9, %v2959_v61, %v3061_v3  ;;  %v3013_v26 = vsel %vm2003_vm5, %v3012_v55, %v3008_v28  ;;  %v3030_v61 = vrot.slane %v8683_v14, %v8363_v37 }
 0x301   : > { %v2831_v11 = vpop.xlane.xlu1 %2830  ;;  %v3063_v38 = vsel %vm2148_vm10, %v2968_v60, %v3062_v45  ;;  %v3039_v60 = vrot.slane %v8719_v5, %v8363_v37 }
 0x302   : > { %v2981_v7 = vrot.slane %v2831_v11, %v8360_v43  ;;  %v2977_v27 = vsel %vm2003_vm5, %v2976_v16, %v2972_v24  ;;  %v2995_v24 = vsel %vm2003_vm5, %v2994_v20, %v2990_v34  ;;  %v3031_v14 = vsel %vm2003_vm5, %v3030_v61, %v3026_v30 }
 0x303   : > { %v8726_v18 = vpop.xlane.xlu0 %3729  ;;  %v3064_v6 = vsel %vm2150_vm11, %v2977_v27, %v3063_v38 }
 0x304   : > { %4728 = vadd.xlane.f32.xlu0 %v4727_v59 }
 0x305   : > { %v2873_v59 = vpop.xlane.xlu1 %2872 }
 0x307   : > { %v8743_v46 = vpop.xlane.xlu0 %3765 }
 0x308   : > { %4734 = vadd.xlane.f32.xlu0 %v4733_v29 }
 0x309   : > { %v8780_v10 = vpop.xlane.xlu1 %3732 }
 0x30b   : > { %v8765_v42 = vpop.xlane.xlu0 %3771 }
 0x30d   : > { %v8787_v58 = vpop.xlane.xlu1 %3774 }
 0x30f   : > { %v2834_v23 = vpop.xlane.xlu0 %2833 }
 0x310   : > { %v2985_v4 = vrot.slane %v2834_v23, %v8363_v37  ;;  %v3040_v23 = vsel %vm2003_vm5, %v3039_v60, %v3035_v53 }
 0x311   : > { %v2879_v41 = vpop.xlane.xlu1 %2878 }
 0x312   : > { %v2986_v1 = vsel %vm2003_vm5, %v2985_v4, %v2981_v7  ;;  %v3053_v4 = vrot.slane %v2879_v41, %v8360_v43 }
 0x313   : > { %v3065_v52 = vsel %vm2152_vm12, %v2986_v1, %v3064_v6  ;;  %v2876_v21 = vpop.xlane.xlu0 %2875 }
 0x314   : > { %v8783_v29 = vadd.f32 %v3065_v52, %v8497_v39  ;;  %v2999_v39 = vrot.slane %v8598_v15, %v8360_v43  ;;  %v3017_v15 = vrot.slane %v8638_v25, %v8360_v43  ;;  %v3044_v25 = vrot.slane %v2873_v59, %v8360_v43 }
 0x315   : > { %v8789_v11 = vpop.xlane.xlu1 %3738  ;;  %v3048_v19 = vrot.slane %v2876_v21, %v8363_v37 }
 0x316   : > { %v3077_v9 = vsel %vm1863_vm2, %v8783_v29, -inf  ;;  %v3004_v16 = vsel %vm2003_vm5, %v3003_v49, %v2999_v39  ;;  %v3022_v27 = vsel %vm2003_vm5, %v3021_v47, %v3017_v15 }
 0x317   : > { %3078 = vmax.xlane.f32.xlu1 %v3077_v9  ;;  %v8791_v31 = vpop.xlane.xlu0 %3735  ;;  %v3066_v17 = vsel %vm2140_vm6, %v3004_v16, %v2995_v24  ;;  %v3049_v5 = vsel %vm2003_vm5, %v3048_v19, %v3044_v25  ;;  %v3844_v25 = vrot.slane %v8668_v0, %v8360_v43  ;;  %v3848_v19 = vrot.slane %v8693_v51, %v8363_v37 }
 0x318   : > { %v3067_v3 = vsel %vm2142_vm7, %v3013_v26, %v3066_v17  ;;  %v3866_v0 = vrot.slane %v8726_v18, %v8363_v37  ;;  %v3880_v18 = vrot.slane %v8789_v11, %v8360_v43 }
 0x319   : > { %v8807_v12 = vpop.xlane.xlu1 %3780  ;;  %v3068_v62 = vsel %vm2144_vm8, %v3022_v27, %v3067_v3  ;;  %v3853_v3 = vrot.slane %v8678_v35, %v8360_v43  ;;  %v3857_v27 = vrot.slane %v8703_v13, %v8363_v37  ;;  %v3871_v35 = vrot.slane %v8780_v10, %v8360_v43 }
 0x31a   : > { %v3069_v59 = vsel %vm2146_vm9, %v3031_v14, %v3068_v62  ;;  %v3849_v62 = vsel %vm2003_vm5, %v3848_v19, %v3844_v25  ;;  %v3875_v13 = vrot.slane %v8791_v31, %v8363_v37 }
 0x31b   : > { %v8809_v50 = vpop.xlane.xlu0 %3777  ;;  %v3070_v6 = vsel %vm2148_vm10, %v3040_v23, %v3069_v59 }
 0x31c   : > { %v3071_v9 = vsel %vm2150_vm11, %v3049_v5, %v3070_v6  ;;  %v3858_v5 = vsel %vm2003_vm5, %v3857_v27, %v3853_v3  ;;  %v3876_v31 = vsel %vm2003_vm5, %v3875_v13, %v3871_v35 }
 0x32d   : > { %v8827_v7 = vpop.xlane.xlu0 %2169 }
 0x32e   : > { %v8831_v32 = vpop.xlane.xlu1 %2166 }
 0x331   : > { %v2882_v45 = vpop.xlane.xlu0 %2881 }
 0x332   : > { %v3057_v38 = vrot.slane %v2882_v45, %v8363_v37  ;;  %v3745_v1 = vpop.xlane.xlu1 %3744  ;;  %v3862_v45 = vrot.slane %v8708_v63, %v8360_v43 }
 0x333   : > { %v3889_v63 = vrot.slane %v3745_v1, %v8360_v43 }
 0x334   : > { %v3058_v52 = vsel %vm2003_vm5, %v3057_v38, %v3053_v4  ;;  %v3985_v38 = vsel %vm2140_vm6, %v3858_v5, %v3849_v62 }
 0x335   : > { %v3742_v21 = vpop.xlane.xlu0 %3741  ;;  %v3072_v34 = vsel %vm2152_vm12, %v3058_v52, %v3071_v9  ;;  %v3867_v52 = vsel %vm2003_vm5, %v3866_v0, %v3862_v45 }
 0x336   : > { %v8845_v20 = vadd.f32 %v3072_v34, %v8495_v22  ;;  %v8847_v39 = vpop.xlane.xlu1 %3786  ;;  %v3884_v4 = vrot.slane %v3742_v21, %v8363_v37 }
 0x338   : > { %v3080_v41 = vsel %vm1863_vm2, %v8845_v20, -inf }
 0x339   : > { %3081 = vmax.xlane.f32.xlu0 %v3080_v41  ;;  %v8851_v49 = vpop.xlane.xlu0 %3783  ;;  %v3885_v41 = vsel %vm2003_vm5, %v3884_v4, %v3880_v18  ;;  %v3916_v4 = vrot.slane %v8716_v57, %v8360_v43  ;;  %v3938_v18 = vrot.slane %v8809_v50, %v8363_v37  ;;  %v3943_v50 = vrot.slane %v8807_v12, %v8360_v43 }
 0x33a   : > { %v8853_v28 = vpop.xlane.xlu1 %4641  ;;  %v3947_v57 = vrot.slane %v8851_v49, %v8363_v37 }
 0x33d   : > { %v3748_v55 = vpop.xlane.xlu0 %3747 }
 0x33e   : > { %v8855_v24 = vpop.xlane.xlu1 %4647  ;;  %v3893_v6 = vrot.slane %v3748_v55, %v8363_v37  ;;  %v3986_v55 = vsel %vm2142_vm7, %v3867_v52, %v3985_v38  ;;  %v3920_v38 = vrot.slane %v8743_v46, %v8363_v37 }
 0x33f   : > { %v3987_v11 = vsel %vm2144_vm8, %v3876_v31, %v3986_v55 }
 0x340   : > { %v3894_v1 = vsel %vm2003_vm5, %v3893_v6, %v3889_v63  ;;  %v3925_v6 = vrot.slane %v8724_v44, %v8360_v43  ;;  %v3929_v63 = vrot.slane %v8765_v42, %v8363_v37  ;;  %v3921_v44 = vsel %vm2003_vm5, %v3920_v38, %v3916_v4 }
 0x341   : > { %v8857_v16 = vpop.xlane.xlu0 %3789 }
 0x342   : > { %v3751_v15 = vpop.xlane.xlu1 %3750  ;;  %v3956_v42 = vrot.slane %v8857_v16, %v8363_v37 }
 0x343   : > { %v3898_v10 = vrot.slane %v3751_v15, %v8360_v43  ;;  %v3988_v15 = vsel %vm2146_vm9, %v3885_v41, %v3987_v11 }
 0x344   : > { %v3989_v62 = vsel %vm2148_vm10, %v3894_v1, %v3988_v15 }
 0x345   : > { %v8859_v47 = vpop.xlane.xlu0 %4644 }
 0x346   : > { %v8861_v22 = vpop.xlane.xlu1 %3792 }
 0x347   : > { %v3961_v49 = vrot.slane %v8861_v22, %v8360_v43 }
 0x349   : > { %v8863_v17 = vpop.xlane.xlu0 %4650 }
 0x34a   : > { %v8865_v26 = vpop.xlane.xlu1 %4653 }
 0x34d   : > { %v3754_v30 = vpop.xlane.xlu0 %3753 }
 0x34e   : > { %v8867_v61 = vpop.xlane.xlu1 %4689  ;;  %v3902_v9 = vrot.slane %v3754_v30, %v8363_v37 }
 0x350   : > { %v3903_v30 = vsel %vm2003_vm5, %v3902_v9, %v3898_v10  ;;  %v3952_v10 = vrot.slane %v8847_v39, %v8360_v43  ;;  %v3948_v39 = vsel %vm2003_vm5, %v3947_v57, %v3943_v50  ;;  %v4771_v50 = vrot.slane %v8853_v28, %v8360_v43 }
 0x351   : > { %v8869_v53 = vpop.xlane.xlu0 %3795  ;;  %v3990_v45 = vsel %vm2150_vm11, %v3903_v30, %v3989_v62 }
 0x352   : > { %v8871_v60 = vpop.xlane.xlu1 %4695  ;;  %v3965_v31 = vrot.slane %v8869_v53, %v8363_v37  ;;  %v3957_v11 = vsel %vm2003_vm5, %v3956_v42, %v3952_v10  ;;  %v2171_v42 = vsub.f32 %v8501_v48, %v8831_v32  ;;  %v4780_v10 = vrot.slane %v8855_v24, %v8360_v43 }
 0x353   : > { %v2172_v32 = vsub.f32 %v8499_v56, %v8827_v7 }
 0x354   : > { %v3966_v22 = vsel %vm2003_vm5, %v3965_v31, %v3961_v49  ;;  %v4789_v49 = vrot.slane %v8865_v26, %v8360_v43 }
 0x355   : > { %v8881_v14 = vpop.xlane.xlu0 %4656 }
 0x356   : > { %v3757_v23 = vpop.xlane.xlu1 %3756  ;;  %v4793_v31 = vrot.slane %v8881_v14, %v8363_v37 }
 0x357   : > { %v3907_v25 = vrot.slane %v3757_v23, %v8360_v43 }
 0x358   : > { %v4794_v7 = vsel %vm2003_vm5, %v4793_v31, %v4789_v49 }
 0x359   : > { %v8889_v51 = vpop.xlane.xlu0 %4692 }
 0x35a   : > { %v3799_v59 = vpop.xlane.xlu1 %3798 }
 0x35b   : > { %v3970_v16 = vrot.slane %v3799_v59, %v8360_v43 }
 0x35d   : > { %v8904_v34 = vpop.xlane.xlu0 %4698 }
 0x35e   : > { %v8907_v21 = vpop.xlane.xlu1 %4659 }
 0x361   : > { %v3760_v19 = vpop.xlane.xlu0 %3759 }
 0x362   : > { %v3911_v3 = vrot.slane %v3760_v19, %v8363_v37  ;;  %v8917_v27 = vpop.xlane.xlu1 %4701 }
 0x364   : > { %v3912_v5 = vsel %vm2003_vm5, %v3911_v3, %v3907_v25 }
 0x365   : > { %v3802_v0 = vpop.xlane.xlu0 %3801  ;;  %v3991_v23 = vsel %vm2152_vm12, %v3912_v5, %v3990_v45 }
 0x366   : > { %v8924_v35 = vadd.f32 %v3991_v23, %v8521_v33  ;;  %v3805_v13 = vpop.xlane.xlu1 %3804  ;;  %v3934_v33 = vrot.slane %v8787_v58, %v8360_v43  ;;  %v3930_v58 = vsel %vm2003_vm5, %v3929_v63, %v3925_v6  ;;  %v3974_v55 = vrot.slane %v3802_v0, %v8363_v37 }
 0x367   : > { %v3992_v12 = vsel %vm2140_vm6, %v3930_v58, %v3921_v44  ;;  %v3979_v30 = vrot.slane %v3805_v13, %v8360_v43  ;;  %v4775_v58 = vrot.slane %v8859_v47, %v8363_v37  ;;  %v4798_v47 = vrot.slane %v8907_v21, %v8360_v43 }
 0x368   : > { %v4003_v52 = vsel %vm1863_vm2, %v8924_v35, -inf  ;;  %v3939_v41 = vsel %vm2003_vm5, %v3938_v18, %v3934_v33  ;;  %v3975_v59 = vsel %vm2003_vm5, %v3974_v55, %v3970_v16 }
 0x369   : > { %v8940_v9 = vpop.xlane.xlu0 %4662  ;;  %4004 = vmax.xlane.f32.xlu1 %v4003_v52  ;;  %v3993_v53 = vsel %vm2142_vm7, %v3939_v41, %v3992_v12  ;;  %v4776_v56 = vsel %vm2003_vm5, %v4775_v58, %v4771_v50  ;;  %v2175_v12 = vmul.f32 1.442695, %v2172_v32 }
 0x36a   : > { %v8944_v46 = vpop.xlane.xlu1 %4665  ;;  %v3994_v19 = vsel %vm2144_vm8, %v3948_v39, %v3993_v53  ;;  %v4802_v24 = vrot.slane %v8940_v9, %v8363_v37 }
 0x36b   : > { %v3995_v3 = vsel %vm2146_vm9, %v3957_v11, %v3994_v19  ;;  %v4807_v14 = vrot.slane %v8944_v46, %v8360_v43  ;;  %v4843_v46 = vrot.slane %v8867_v61, %v8360_v43 }
 0x36c   : > { %v3996_v45 = vsel %vm2148_vm10, %v3966_v22, %v3995_v3  ;;  %v4803_v53 = vsel %vm2003_vm5, %v4802_v24, %v4798_v47  ;;  %v4856_v22 = vrot.slane %v8904_v34, %v8363_v37  ;;  %v4847_v3 = vrot.slane %v8889_v51, %v8363_v37 }
 0x36d   : > { %v8961_v1 = vpop.xlane.xlu0 %4704  ;;  %v3997_v23 = vsel %vm2150_vm11, %v3975_v59, %v3996_v45 }
 0x36e   : > { %v8964_v25 = vpop.xlane.xlu1 %4707  ;;  %v4865_v34 = vrot.slane %v8961_v1, %v8363_v37  ;;  %v4848_v31 = vsel %vm2003_vm5, %v4847_v3, %v4843_v46 }
 0x371   : > { %v3808_v15 = vpop.xlane.xlu0 %3807 }
 0x372   : > { %v3983_v62 = vrot.slane %v3808_v15, %v8363_v37  ;;  %v4672_v5 = vpop.xlane.xlu1 %4671 }
 0x373   : > { %v4816_v16 = vrot.slane %v4672_v5, %v8360_v43 }
 0x374   : > { %v3984_v0 = vsel %vm2003_vm5, %v3983_v62, %v3979_v30  ;;  %v4852_v30 = vrot.slane %v8871_v60, %v8360_v43  ;;  %v4861_v60 = vrot.slane %v8917_v27, %v8360_v43 }
 0x375   : > { %v4669_v4 = vpop.xlane.xlu0 %4668  ;;  %v3998_v38 = vsel %vm2152_vm12, %v3984_v0, %v3997_v23 }
 0x376   : > { %v8980_v13 = vadd.f32 %v3998_v38, %v8515_v40  ;;  %v8982_v6 = vpop.xlane.xlu1 %4713  ;;  %v4784_v40 = vrot.slane %v8863_v17, %v8363_v37  ;;  %v2173_v17 = vmul.f32 1.442695, %v2171_v42  ;;  %v4811_v55 = vrot.slane %v4669_v4, %v8363_v37 }
 0x377   : > { %v4870_v4 = vrot.slane %v8964_v25, %v8360_v43 }
 0x378   : > { %v4006_v63 = vsel %vm1863_vm2, %v8980_v13, -inf  ;;  %v4785_v28 = vsel %vm2003_vm5, %v4784_v40, %v4780_v10  ;;  %6524 = vpow2.f32 %v2173_v17  ;;  %v4812_v19 = vsel %vm2003_vm5, %v4811_v55, %v4807_v14 }
 0x379   : > { %v8986_v52 = vpop.xlane.xlu0 %4710  ;;  %4007 = vmax.xlane.f32.xlu0 %v4006_v63  ;;  %v4912_v11 = vsel %vm2140_vm6, %v4785_v28, %v4776_v56  ;;  %v4857_v63 = vsel %vm2003_vm5, %v4856_v22, %v4852_v30  ;;  %v4866_v40 = vsel %vm2003_vm5, %v4865_v34, %v4861_v60  ;;  %6526 = vpow2.f32 %v2175_v12 }
 0x37a   : > { %v4678_v33 = vpop.xlane.xlu1 %4677  ;;  %v4913_v15 = vsel %vm2142_vm7, %v4794_v7, %v4912_v11  ;;  %v4874_v51 = vrot.slane %v8986_v52, %v8363_v37 }
 0x37b   : > { %v4825_v39 = vrot.slane %v4678_v33, %v8360_v43  ;;  %v4914_v61 = vsel %vm2144_vm8, %v4803_v53, %v4913_v15  ;;  %v4879_v33 = vrot.slane %v8982_v6, %v8360_v43  ;;  %v2284_v15 = vld [vmem:[%s7848_s19] sm:$0xff] }
 0x37c   : > { %v4915_v23 = vsel %vm2146_vm9, %v4812_v19, %v4914_v61  ;;  %v4875_v6 = vsel %vm2003_vm5, %v4874_v51, %v4870_v4  ;;  %v2199_v19 = vld [vmem:[%s7826_s16] sm:$0xff]  ;;  %v6074_v51 = vld [vmem:[%s7848_s19 + $0x10] sm:$0xff] }
 0x37d   : > { %v4675_v18 = vpop.xlane.xlu0 %4674 }
 0x37e   : > { %v8988_v57 = vpop.xlane.xlu1 %4719  ;;  %v4820_v26 = vrot.slane %v4675_v18, %v8363_v37 }
 0x37f   : > { %v4888_v52 = vrot.slane %v8988_v57, %v8360_v43 }
 0x380   : > { %v4821_v62 = vsel %vm2003_vm5, %v4820_v26, %v4816_v16 }
 0x381   : > { %v8990_v44 = vpop.xlane.xlu0 %4716  ;;  %v4916_v1 = vsel %vm2148_vm10, %v4821_v62, %v4915_v23  ;;  %v2285_v62 = vld [vmem:[%s7848_s19 + $0x8] sm:$0xff]  ;;  %v6071_v23 = vld [vmem:[%s7826_s16 + $0x18] sm:$0xff] }
 0x382   : > { %v4684_v48 = vpop.xlane.xlu1 %4683  ;;  %v4883_v27 = vrot.slane %v8990_v44, %v8363_v37  ;;  %v9070_v32 = vpop.eup %6524 }
 0x383   : > { %v4834_v5 = vrot.slane %v4684_v48, %v8360_v43 }
 0x384   : > { %v4884_v48 = vsel %vm2003_vm5, %v4883_v27, %v4879_v33 }
 0x385   : > { %v4681_v41 = vpop.xlane.xlu0 %4680 }
 0x386   : > { %v4829_v9 = vrot.slane %v4681_v41, %v8363_v37  ;;  %v4726_v59 = vpop.xlane.xlu1 %4725  ;;  %v4919_v41 = vsel %vm2140_vm6, %v4857_v63, %v4848_v31 }
 0x387   : > { %v4897_v58 = vrot.slane %v4726_v59, %v8360_v43  ;;  %v4920_v17 = vsel %vm2142_vm7, %v4866_v40, %v4919_v41  ;;  %v2200_v59 = vld [vmem:[%s7826_s16 + $0x8] sm:$0xff] }
 0x388   : > { %v4830_v45 = vsel %vm2003_vm5, %v4829_v9, %v4825_v39  ;;  %v4921_v55 = vsel %vm2144_vm8, %v4875_v6, %v4920_v17  ;;  %v2177_v9 = vsel %vm1863_vm2, %v9070_v32, 0.0  ;;  %v6344_v3 = vpack.c.bf16 %v2200_v59, %v2199_v19 }
 0x389   : > { %v4723_v21 = vpop.xlane.xlu0 %4722  ;;  %v4917_v25 = vsel %vm2150_vm11, %v4830_v45, %v4916_v1  ;;  %v4922_v26 = vsel %vm2146_vm9, %v4884_v48, %v4921_v55 }
 0x38a   : > { %v4892_v18 = vrot.slane %v4723_v21, %v8363_v37  ;;  %v4732_v44 = vpop.xlane.xlu1 %4731  ;;  %6345 = vmatprep.subr.bf16.mxu0 %v6344_v3 }
 0x38b   : > { %v4906_v28 = vrot.slane %v4732_v44, %v8360_v43  ;;  %6347 = vmatpush3.bf16.msra.mxu0 %v6344_v3 }
 0x38c   : > { %v4893_v24 = vsel %vm2003_vm5, %v4892_v18, %v4888_v52 }
 0x38d   : > { %v4687_v0 = vpop.xlane.xlu0 %4686  ;;  %v4923_v56 = vsel %vm2148_vm10, %v4893_v24, %v4922_v26  ;;  %v6083_v26 = vld [vmem:[%s7848_s19 + $0x20] sm:$0xff] }
 0x38e   : > { %v4838_v38 = vrot.slane %v4687_v0, %v8363_v37  ;;  %v6070_v0 = vld [vmem:[%s7826_s16 + $0x10] sm:$0xff] }
 0x38f   : > { %v6352_v4 = vpack.c.bf16 %v6071_v23, %v6070_v0 }
 0x390   : > { %v4839_v42 = vsel %vm2003_vm5, %v4838_v38, %v4834_v5  ;;  %v6348_v5 = vpack.c.bf16 %v2285_v62, %v2284_v15  ;;  %v6075_v38 = vld [vmem:[%s7848_s19 + $0x18] sm:$0xff] }
 0x391   : > { %v4729_v10 = vpop.xlane.xlu0 %4728  ;;  %v4918_v50 = vsel %vm2152_vm12, %v4839_v42, %v4917_v25  ;;  %v6356_v63 = vpack.c.bf16 %v6075_v38, %v6074_v51  ;;  %6353 = vmatprep.subr.bf16.mxu0 %v6352_v4  ;;  %v6089_v38 = vld [vmem:[%s7826_s16 + $0x38] sm:$0xff] }
 0x392   : > { %v4901_v49 = vrot.slane %v4729_v10, %v8363_v37  ;;  %v9066_v57 = vadd.f32 %v4918_v50, %v8523_v54  ;;  %6349 = vmatprep.subr.bf16.mxu1 %v6348_v5 }
 0x393   : > { %6351 = vmatpush3.bf16.msra.mxu1 %v6348_v5 }
 0x394   : > { %v4930_v47 = vsel %vm1863_vm2, %v9066_v57, -inf  ;;  %v4902_v54 = vsel %vm2003_vm5, %v4901_v49, %v4897_v58  ;;  %6357 = vmatprep.subr.bf16.mxu1 %v6356_v63 }
 0x395   : > { %v4735_v14 = vpop.xlane.xlu0 %4734  ;;  %4931 = vmax.xlane.f32.xlu1 %v4930_v47  ;;  %v4924_v39 = vsel %vm2150_vm11, %v4902_v54, %v4923_v56  ;;  %v6079_v54 = vld [vmem:[%s7826_s16 + $0x20] sm:$0xff] }
 0x396   : > { %v4910_v16 = vrot.slane %v4735_v14, %v8363_v37  ;;  %v9089_v37 = vpop.eup %6526  ;;  %v6080_v14 = vld [vmem:[%s7826_s16 + $0x28] sm:$0xff] }
 0x397   : > { %v2180_v11 = vsel %vm1863_vm2, %v9089_v37, 0.0 }
 0x398   : > { %v4911_v7 = vsel %vm2003_vm5, %v4910_v16, %v4906_v28  ;;  %v6084_v16 = vld [vmem:[%s7848_s19 + $0x28] sm:$0xff] }
 0x399   : > { %2178 = vadd.xlane.f32.xlu1 %v2177_v9  ;;  %v4925_v43 = vsel %vm2152_vm12, %v4911_v7, %v4924_v39  ;;  %v6360_v7 = vpack.c.bf16 %v6080_v14, %v6079_v54  ;;  %v6364_v9 = vpack.c.bf16 %v6084_v16, %v6083_v26 }
 0x39a   : > { %v4929_v21 = vadd.f32 %v4925_v43, %v8519_v8  ;;  %v10361_v43 = vld [vmem:[#allocation48_spill] sm:$0xff] }
 0x39b   : > { %v9167_v59 = vsub.s32 3, %v10361_v43  ;;  %v9175_v62 = vsub.s32 5, %v10361_v43 }
 0x39c   : > { %v4933_v12 = vsel %vm1863_vm2, %v4929_v21, -inf }
 0x39d   : > { %4934 = vmax.xlane.f32.xlu0 %v4933_v12 }
 0x3a1   : > { %2181 = vadd.xlane.f32.xlu0 %v2180_v11 }
 0x3a4   : > { %v3079_v53 = vpop.xlane.xlu1 %3078 }
 0x3a5   : > { %v3083_v46 = vsub.f32 %v8783_v29, %v3079_v53  ;;  %v9155_v53 = vsub.s32 2, %v10361_v43 }
 0x3a7   : > { %v3085_v22 = vmul.f32 1.442695, %v3083_v46 }
 0x3a9   : > { %6528 = vpow2.f32 %v3085_v22 }
 0x3b3   : > { %v9094_v30 = vpop.eup %6528 }
 0x3b4   : > { %v3089_v8 = vsel %vm1863_vm2, %v9094_v30, 0.0 }
 0x3b5   : > { %3090 = vadd.xlane.f32.xlu1 %v3089_v8 }
 0x3c6   : > { %v3082_v29 = vpop.xlane.xlu0 %3081 }
 0x3c7   : > { %v3084_v61 = vsub.f32 %v8845_v20, %v3082_v29  ;;  %v9179_v29 = vsub.s32 6, %v10361_v43 }
 0x3c9   : > { %v3087_v34 = vmul.f32 1.442695, %v3084_v61 }
 0x3cb   : > { %6530 = vpow2.f32 %v3087_v34  ;;  %v9183_v34 = vsub.s32 7, %v10361_v43 }
 0x3d5   : > { %v9103_v60 = vpop.eup %6530 }
 0x3d6   : > { %v3092_v45 = vsel %vm1863_vm2, %v9103_v60, 0.0 }
 0x3d7   : > { %3093 = vadd.xlane.f32.xlu0 %v3092_v45 }
 0x3f6   : > { %v4005_v1 = vpop.xlane.xlu1 %4004 }
 0x3f7   : > { %v4009_v27 = vsub.f32 %v8924_v35, %v4005_v1  ;;  %v6093_v1 = vld [vmem:[%s7848_s19 + $0x38] sm:$0xff] }
 0x3f9   : > { %v4011_v20 = vmul.f32 1.442695, %v4009_v27 }
 0x3fb   : > { %6532 = vpow2.f32 %v4011_v20 }
 0x405   : > { %v9112_v33 = vpop.eup %6532 }
 0x406   : > { %v4008_v18 = vpop.xlane.xlu0 %4007  ;;  %v4015_v52 = vsel %vm1863_vm2, %v9112_v33, 0.0 }
 0x407   : > { %v4010_v42 = vsub.f32 %v8980_v13, %v4008_v18  ;;  %4016 = vadd.xlane.f32.xlu1 %v4015_v52 }
 0x409   : > { %v4013_v25 = vmul.f32 1.442695, %v4010_v42 }
 0x40b   : > { %6534 = vpow2.f32 %v4013_v25 }
 0x415   : > { %v9117_v40 = vpop.eup %6534 }
 0x416   : > { %v4018_v10 = vsel %vm1863_vm2, %v9117_v40, 0.0 }
 0x417   : > { %4019 = vadd.xlane.f32.xlu0 %v4018_v10 }
 0x422   : > { %v4932_v35 = vpop.xlane.xlu1 %4931 }
 0x423   : > { %v4936_v58 = vsub.f32 %v9066_v57, %v4932_v35 }
 0x425   : > { %v4938_v50 = vmul.f32 1.442695, %v4936_v58 }
 0x426   : > { %v2179_v44 = vpop.xlane.xlu1 %2178 }
 0x427   : > { %6536 = vpow2.f32 %v4938_v50 }
 0x428   : > { %6538 = vrcp.f32 %v2179_v44 }
 0x42a   : > { %v4935_v31 = vpop.xlane.xlu0 %4934 }
 0x42b   : > { %v4937_v6 = vsub.f32 %v4929_v21, %v4935_v31  ;;  %v9147_v21 = vsub.s32 0, %v10361_v43 }
 0x42d   : > { %v4940_v13 = vmul.f32 1.442695, %v4937_v6 }
 0x42e   : > { %v2182_v49 = vpop.xlane.xlu0 %2181 }
 0x42f   : > { %6540 = vpow2.f32 %v4940_v13 }
 0x430   : > { %6542 = vrcp.f32 %v2182_v49 }
 0x431   : > { %v9122_v41 = vpop.eup %6536 }
 0x432   : > { %v6539_v48 = vpop.eup %6538  ;;  %v4942_v57 = vsel %vm1863_vm2, %v9122_v41, 0.0 }
 0x433   : > { %v2185_v17 = vmul.f32 %v6539_v48, %v9070_v32  ;;  %4943 = vadd.xlane.f32.xlu1 %v4942_v57 }
 0x435   : > { %v9128_v24 = vmul.f32 %v8558_v2, %v2185_v17 }
 0x437   : > { %6244 = vmatprep.mubr.msk.f32.mxu0 %vm1863_vm2, %v9128_v24  ;;  %6251 = vmatprep.mubr.msk.f32.mxu1 %vm1863_vm2, %v9128_v24  ;;  %v2366_v6 = vrot.slane %v9128_v24, %v9147_v21  ;;  %v2388_v13 = vrot.slane %v9128_v24, %v9155_v53  ;;  %v2399_v49 = vrot.slane %v9128_v24, %v9167_v59 }
 0x438   : > { %v2421_v54 = vrot.slane %v9128_v24, %v9175_v62  ;;  %v2443_v14 = vrot.slane %v9128_v24, %v9183_v34 }
 0x439   : > { %v9134_v47 = vpop.eup %6540 }
 0x43a   : > { %v6543_v28 = vpop.eup %6542  ;;  %v4945_v55 = vsel %vm1863_vm2, %v9134_v47, 0.0 }
 0x43b   : > { %v2186_v32 = vmul.f32 %v6543_v28, %v9089_v37  ;;  %4946 = vadd.xlane.f32.xlu0 %v4945_v55  ;;  %v9151_v37 = vsub.s32 1, %v10361_v43 }
 0x43d   : > { %v2198_v56 = vmul.f32 %v8563_v36, %v2186_v32  ;;  %v2377_v31 = vrot.slane %v9128_v24, %v9151_v37 }
 0x43f   : > { %6245 = vmatmul.mubr.msk.f32.vlgmr.msra.gmra.mrb[8].mxu0 %vm1863_vm2, %v2198_v56  ;;  %6252 = vmatmul.mubr.msk.f32.vlgmr.msra.gmra.mrb[8].mxu1 %vm1863_vm2, %v2198_v56  ;;  %v2454_v12 = vrot.slane %v2198_v56, %v9147_v21  ;;  %v2465_v11 = vrot.slane %v2198_v56, %v9151_v37  ;;  %v2476_v46 = vrot.slane %v2198_v56, %v9155_v53 }
 0x440   : > { %6355 = vmatpush3.bf16.msra.mxu0 %v6352_v4  ;;  %6359 = vmatpush3.bf16.msra.mxu1 %v6356_v63  ;;  %v2487_v15 = vrot.slane %v2198_v56, %v9167_v59  ;;  %v2509_v5 = vrot.slane %v2198_v56, %v9175_v62  ;;  %v2520_v61 = vrot.slane %v2198_v56, %v9179_v29  ;;  %v6088_v4 = vld [vmem:[%s7826_s16 + $0x30] sm:$0xff]  ;;  %v6092_v63 = vld [vmem:[%s7848_s19 + $0x30] sm:$0xff]  ;;  %s7193_s16 = smov 12   ;;  %s10071_s19 = scalar_lea.hbm %s10380_s12, %s10063_s18 }
 0x441   : > { %6361 = vmatprep.subr.bf16.mxu0 %v6360_v7  ;;  %6365 = vmatprep.subr.bf16.mxu1 %v6364_v9  ;;  %v2531_v45 = vrot.slane %v2198_v56, %v9183_v34  ;;  %v9192_v20 = vpack.c.bf16 %v6089_v38, %v6088_v4  ;;  %v9197_v52 = vpack.c.bf16 %v6093_v1, %v6092_v63  ;;  %v9271_v4 = vld [vmem:[%s7855_s23 + $0x90] sm:$0xff] }
 0x442   : > { %v3091_v39 = vpop.xlane.xlu1 %3090 }
 0x443   : > { %6544 = vrcp.f32 %v3091_v39 }
 0x444   : > { %2460 = vbcast.lane.b32.xlu1 %v2454_v12, 264 }
 0x448   : > { %2467 = vbcast.lane.b32.xlu1 %v2465_v11, 256 }
 0x44c   : > { %2478 = vbcast.lane.b32.xlu1 %v2476_v46, 256 }
 0x44d   : > { %v6545_v22 = vpop.eup %6544 }
 0x44e   : > { %v3097_v8 = vmul.f32 %v6545_v22, %v9094_v30  ;;  %v9171_v30 = vsub.s32 4, %v10361_v43 }
 0x450   : > { %v9160_v19 = vmul.f32 %v3097_v8, %v8558_v2  ;;  %2482 = vbcast.lane.b32.xlu1 %v2476_v46, 264  ;;  %v2498_v3 = vrot.slane %v2198_v56, %v9171_v30  ;;  %v2410_v17 = vrot.slane %v9128_v24, %v9171_v30 }
 0x451   : > { %2456 = vbcast.lane.b32.xlu0 %v2454_v12, 256 }
 0x452   : > { %6258 = vmatprep.mubr.msk.f32.mxu0 %vm1863_vm2, %v9160_v19  ;;  %6265 = vmatprep.mubr.msk.f32.mxu1 %vm1863_vm2, %v9160_v19  ;;  %v3287_v16 = vrot.slane %v9160_v19, %v9147_v21  ;;  %v3331_v39 = vrot.slane %v9160_v19, %v9171_v30  ;;  %v3342_v12 = vrot.slane %v9160_v19, %v9175_v62 }
 0x453   : > { %v3353_v22 = vrot.slane %v9160_v19, %v9179_v29 }
 0x454   : > { %2493 = vbcast.lane.b32.xlu1 %v2487_v15, 264 }
 0x455   : > { %2471 = vbcast.lane.b32.xlu0 %v2465_v11, 264 }
 0x458   : > { %2504 = vbcast.lane.b32.xlu1 %v2498_v3, 264 }
 0x459   : > { %2489 = vbcast.lane.b32.xlu0 %v2487_v15, 256 }
 0x45c   : > { %2515 = vbcast.lane.b32.xlu1 %v2509_v5, 264 }
 0x45d   : > { %2500 = vbcast.lane.b32.xlu0 %v2498_v3, 256 }
 0x460   : > { %2526 = vbcast.lane.b32.xlu1 %v2520_v61, 264 }
 0x461   : > { %2511 = vbcast.lane.b32.xlu0 %v2509_v5, 256 }
 0x464   : > { %v3094_v0 = vpop.xlane.xlu0 %3093  ;;  %2537 = vbcast.lane.b32.xlu1 %v2531_v45, 264 }
 0x465   : > { %6546 = vrcp.f32 %v3094_v0  ;;  %2522 = vbcast.lane.b32.xlu0 %v2520_v61, 256  ;;  %v3364_v61 = vrot.slane %v9160_v19, %v9183_v34 }
 0x469   : > { %2533 = vbcast.lane.b32.xlu0 %v2531_v45, 256  ;;  %v9260_v45 = vld [vmem:[%s7855_s23 + $0x80] sm:$0xff] }
 0x46f   : > { %v6547_v23 = vpop.eup %6546 }
 0x470   : > { %v3098_v51 = vmul.f32 %v6547_v23, %v9103_v60 }
 0x472   : > { %v3100_v27 = vmul.f32 %v3098_v51, %v8563_v36  ;;  %v9267_v51 = vld [vmem:[%s7855_s23 + $0x88] sm:$0xff] }
 0x474   : > { %6259 = vmatmul.mubr.msk.f32.vlgmr.msra.gmra.mrb[10].mxu0 %vm1863_vm2, %v3100_v27  ;;  %6266 = vmatmul.mubr.msk.f32.vlgmr.msra.gmra.mrb[10].mxu1 %vm1863_vm2, %v3100_v27  ;;  %v3375_v18 = vrot.slane %v3100_v27, %v9147_v21  ;;  %v3386_v60 = vrot.slane %v3100_v27, %v9151_v37  ;;  %v3397_v42 = vrot.slane %v3100_v27, %v9155_v53 }
 0x475   : > { %6363 = vmatpush3.bf16.msra.mxu0 %v6360_v7  ;;  %6367 = vmatpush3.bf16.msra.mxu1 %v6364_v9  ;;  %v3408_v25 = vrot.slane %v3100_v27, %v9167_v59  ;;  %v3419_v10 = vrot.slane %v3100_v27, %v9171_v30  ;;  %v3430_v35 = vrot.slane %v3100_v27, %v9175_v62 }
 0x476   : > { %3377 = vbcast.lane.b32.xlu0 %v3375_v18, 256  ;;  %3381 = vbcast.lane.b32.xlu1 %v3375_v18, 264  ;;  %v3441_v58 = vrot.slane %v3100_v27, %v9179_v29  ;;  %v3452_v50 = vrot.slane %v3100_v27, %v9183_v34  ;;  %v3320_v7 = vrot.slane %v9160_v19, %v9167_v59  ;;  %v9286_v18 = vld [vmem:[%s7855_s23 + $0x98] sm:$0xff] }
 0x477   : > { %6369 = vmatprep.subr.bf16.mxu0 %v9192_v20  ;;  %6373 = vmatprep.subr.bf16.mxu1 %v9197_v52 }
 0x47a   : > { %3388 = vbcast.lane.b32.xlu0 %v3386_v60, 256  ;;  %3392 = vbcast.lane.b32.xlu1 %v3386_v60, 264  ;;  %v9290_v60 = vld [vmem:[%s7855_s23 + $0xa8] sm:$0xff] }
 0x47e   : > { %3399 = vbcast.lane.b32.xlu0 %v3397_v42, 256  ;;  %3403 = vbcast.lane.b32.xlu1 %v3397_v42, 264 }
 0x482   : > { %3410 = vbcast.lane.b32.xlu0 %v3408_v25, 256  ;;  %3414 = vbcast.lane.b32.xlu1 %v3408_v25, 264 }
 0x486   : > { %3421 = vbcast.lane.b32.xlu0 %v3419_v10, 256  ;;  %3425 = vbcast.lane.b32.xlu1 %v3419_v10, 264 }
 0x48a   : > { %3432 = vbcast.lane.b32.xlu0 %v3430_v35, 256  ;;  %3436 = vbcast.lane.b32.xlu1 %v3430_v35, 264 }
 0x48e   : > { %3443 = vbcast.lane.b32.xlu0 %v3441_v58, 256  ;;  %3447 = vbcast.lane.b32.xlu1 %v3441_v58, 264 }
 0x492   : > { %3454 = vbcast.lane.b32.xlu0 %v3452_v50, 256  ;;  %3458 = vbcast.lane.b32.xlu1 %v3452_v50, 264 }
 0x494   : > { %v4017_v44 = vpop.xlane.xlu1 %4016 }
 0x495   : > { %6548 = vrcp.f32 %v4017_v44 }
 0x496   : > { %2379 = vbcast.lane.b32.xlu0 %v2377_v31, 256  ;;  %2368 = vbcast.lane.b32.xlu1 %v2366_v6, 256 }
 0x49a   : > { %2390 = vbcast.lane.b32.xlu0 %v2388_v13, 256  ;;  %2372 = vbcast.lane.b32.xlu1 %v2366_v6, 264 }
 0x49e   : > { %2401 = vbcast.lane.b32.xlu0 %v2399_v49, 256  ;;  %2383 = vbcast.lane.b32.xlu1 %v2377_v31, 264 }
 0x49f   : > { %v6549_v48 = vpop.eup %6548 }
 0x4a0   : > { %v4023_v57 = vmul.f32 %v6549_v48, %v9112_v33  ;;  %v2432_v33 = vrot.slane %v9128_v24, %v9179_v29  ;;  %v3298_v24 = vrot.slane %v9160_v19, %v9151_v37 }
 0x4a2   : > { %v9220_v28 = vmul.f32 %v4023_v57, %v8558_v2  ;;  %2412 = vbcast.lane.b32.xlu0 %v2410_v17, 256  ;;  %2394 = vbcast.lane.b32.xlu1 %v2388_v13, 264 }
 0x4a4   : > { %v4020_v55 = vpop.xlane.xlu0 %4019  ;;  %6272 = vmatprep.mubr.msk.f32.mxu0 %vm1863_vm2, %v9220_v28  ;;  %6279 = vmatprep.mubr.msk.f32.mxu1 %vm1863_vm2, %v9220_v28 }
 0x4a5   : > { %6550 = vrcp.f32 %v4020_v55  ;;  %v9302_v55 = vld [vmem:[%s7855_s23 + $0xb0] sm:$0xff] }
 0x4a6   : > { %2423 = vbcast.lane.b32.xlu0 %v2421_v54, 256  ;;  %2405 = vbcast.lane.b32.xlu1 %v2399_v49, 264 }
 0x4aa   : > { %2434 = vbcast.lane.b32.xlu0 %v2432_v33, 256  ;;  %2416 = vbcast.lane.b32.xlu1 %v2410_v17, 264 }
 0x4ae   : > { %2445 = vbcast.lane.b32.xlu0 %v2443_v14, 256  ;;  %2427 = vbcast.lane.b32.xlu1 %v2421_v54, 264 }
 0x4af   : > { %v6551_v32 = vpop.eup %6550 }
 0x4b0   : > { %v4024_v26 = vmul.f32 %v6551_v32, %v9117_v40  ;;  %v3309_v40 = vrot.slane %v9160_v19, %v9155_v53  ;;  %v9275_v19 = vld [vmem:[%s7855_s23 + $0xa0] sm:$0xff] }
 0x4b2   : > { %v9236_v56 = vmul.f32 %v4024_v26, %v8563_v36  ;;  %2438 = vbcast.lane.b32.xlu1 %v2432_v33, 264  ;;  %3289 = vbcast.lane.b32.xlu0 %v3287_v16, 256  ;;  %v9306_v33 = vld [vmem:[%s7855_s23 + $0xb8] sm:$0xff] }
 0x4b4   : > { %6273 = vmatmul.mubr.msk.f32.vlgmr.msra.gmra.mrb[12].mxu0 %vm1863_vm2, %v9236_v56  ;;  %6280 = vmatmul.mubr.msk.f32.vlgmr.msra.gmra.mrb[12].mxu1 %vm1863_vm2, %v9236_v56  ;;  %v4302_v27 = vrot.slane %v9236_v56, %v9147_v21  ;;  %v4313_v25 = vrot.slane %v9236_v56, %v9151_v37 }
 0x4b5   : > { %6371 = vmatpush3.bf16.msra.mxu0 %v9192_v20  ;;  %6375 = vmatpush3.bf16.msra.mxu1 %v9197_v52 }
 0x4b6   : > { %2449 = vbcast.lane.b32.xlu1 %v2443_v14, 264  ;;  %3300 = vbcast.lane.b32.xlu0 %v3298_v24, 256 }
 0x4ba   : > { %3293 = vbcast.lane.b32.xlu1 %v3287_v16, 264  ;;  %3311 = vbcast.lane.b32.xlu0 %v3309_v40, 256 }
 0x4be   : > { %3304 = vbcast.lane.b32.xlu1 %v3298_v24, 264  ;;  %3322 = vbcast.lane.b32.xlu0 %v3320_v7, 256 }
 0x4c0   : > { %v4944_v9 = vpop.xlane.xlu1 %4943 }
 0x4c1   : > { %6552 = vrcp.f32 %v4944_v9 }
 0x4c2   : > { %3315 = vbcast.lane.b32.xlu1 %v3309_v40, 264  ;;  %3333 = vbcast.lane.b32.xlu0 %v3331_v39, 256 }
 0x4c4   : > { %v2461_v43 = vpop.permute.xlu1 %2460 }
 0x4c6   : > { %3326 = vbcast.lane.b32.xlu1 %v3320_v7, 264  ;;  %3344 = vbcast.lane.b32.xlu0 %v3342_v12, 256 }
 0x4c8   : > { %v4947_v11 = vpop.xlane.xlu0 %4946  ;;  %v2468_v46 = vpop.permute.xlu1 %2467 }
 0x4c9   : > { %6554 = vrcp.f32 %v4947_v11  ;;  %v2557_v38 = vmul.f32 %v9271_v4, %v2468_v46  ;;  %v9325_v11 = vld [vmem:[%s7855_s23 + $0xc8] sm:$0xff] }
 0x4ca   : > { %3337 = vbcast.lane.b32.xlu1 %v3331_v39, 264  ;;  %3355 = vbcast.lane.b32.xlu0 %v3353_v22, 256  ;;  %v4324_v39 = vrot.slane %v9236_v56, %v9155_v53 }
 0x4cb   : > { %v6553_v8 = vpop.eup %6552  ;;  %v2652_v58 = vsel %vm1863_vm2, %v2557_v38, 0.0 }
 0x4cc   : > { %v4950_v15 = vmul.f32 %v6553_v8, %v9122_v41  ;;  %v2457_v3 = vpop.permute.xlu0 %2456  ;;  %v2479_v5 = vpop.permute.xlu1 %2478  ;;  %v2556_v41 = vmul.f32 %v9267_v51, %v2461_v43  ;;  %v9319_v43 = vld [vmem:[%s7855_s23 + $0xc0] sm:$0xff] }
 0x4cd   : > { %v2555_v0 = vmul.f32 %v9260_v45, %v2457_v3  ;;  %v2559_v63 = vmul.f32 %v9275_v19, %v2479_v5 }
 0x4ce   : > { %v9264_v23 = vmul.f32 %v4950_v15, %v8558_v2  ;;  %3348 = vbcast.lane.b32.xlu1 %v3342_v12, 264  ;;  %3366 = vbcast.lane.b32.xlu0 %v3364_v61, 256  ;;  %v2644_v35 = vsel %vm1863_vm2, %v2556_v41, 0.0  ;;  %v4335_v41 = vrot.slane %v9236_v56, %v9167_v59 }
 0x4cf   : > { %v2643_v20 = vsel %vm1863_vm2, %v2555_v0, 0.0  ;;  %v2661_v13 = vsel %vm1863_vm2, %v2559_v63, 0.0 }
 0x4d0   : > { %v2472_v1 = vpop.permute.xlu0 %2471  ;;  %6286 = vmatprep.mubr.msk.f32.mxu0 %vm1863_vm2, %v9264_v23  ;;  %6293 = vmatprep.mubr.msk.f32.mxu1 %vm1863_vm2, %v9264_v23  ;;  %v2483_v2 = vpop.permute.xlu1 %2482  ;;  %v2645_v6 = vadd.f32 %v2644_v35, %v2643_v20  ;;  %v9337_v20 = vld [vmem:[%s7855_s23 + $0xd8] sm:$0xff] }
 0x4d1   : > { %v2558_v52 = vmul.f32 %v9286_v18, %v2472_v1  ;;  %v2560_v42 = vmul.f32 %v9290_v60, %v2483_v2  ;;  %v9333_v1 = vld [vmem:[%s7855_s23 + $0xd0] sm:$0xff] }
 0x4d2   : > { %3359 = vbcast.lane.b32.xlu1 %v3353_v22, 264  ;;  %4304 = vbcast.lane.b32.xlu0 %v4302_v27, 256  ;;  %v2646_v24 = vrot.slane %v2645_v6, 4 }
 0x4d3   : > { %v6555_v10 = vpop.eup %6554  ;;  %v2653_v50 = vsel %vm1863_vm2, %v2558_v52, 0.0  ;;  %v2662_v44 = vsel %vm1863_vm2, %v2560_v42, 0.0 }
 0x4d4   : > { %v4951_v31 = vmul.f32 %v6555_v10, %v9134_v47  ;;  %v2654_v49 = vadd.f32 %v2653_v50, %v2652_v58  ;;  %v2490_v48 = vpop.permute.xlu0 %2489  ;;  %v2494_v57 = vpop.permute.xlu1 %2493  ;;  %v2663_v17 = vadd.f32 %v2662_v44, %v2661_v13  ;;  %v2647_v5 = vadd.f32 %v2646_v24, %v2645_v6 }
 0x4d5   : > { %v2561_v54 = vmul.f32 %v9302_v55, %v2490_v48  ;;  %v2562_v14 = vmul.f32 %v9306_v33, %v2494_v57  ;;  %v4214_v13 = vrot.slane %v9220_v28, %v9147_v21  ;;  %v9345_v57 = vld [vmem:[%s7855_s23 + $0xe0] sm:$0xff] }
 0x4d6   : > { %v9310_v32 = vmul.f32 %v4951_v31, %v8563_v36  ;;  %v2655_v47 = vrot.slane %v2654_v49, 4  ;;  %3370 = vbcast.lane.b32.xlu1 %v3364_v61, 264  ;;  %4315 = vbcast.lane.b32.xlu0 %v4313_v25, 256  ;;  %v2664_v36 = vrot.slane %v2663_v17, 4  ;;  %v2648_v50 = vrot.slane %v2647_v5, 2 }
 0x4d7   : > { %v2670_v26 = vsel %vm1863_vm2, %v2561_v54, 0.0  ;;  %v2671_v16 = vsel %vm1863_vm2, %v2562_v14, 0.0 }
 0x4d8   : > { %v2672_v40 = vadd.f32 %v2671_v16, %v2670_v26  ;;  %v2501_v7 = vpop.permute.xlu0 %2500  ;;  %6287 = vmatmul.mubr.msk.f32.vlgmr.msra.gmra.mrb[14].mxu0 %vm1863_vm2, %v9310_v32  ;;  %v2505_v9 = vpop.permute.xlu1 %2504  ;;  %6294 = vmatmul.mubr.msk.f32.vlgmr.msra.gmra.mrb[14].mxu1 %vm1863_vm2, %v9310_v32  ;;  %v2656_v22 = vadd.f32 %v2655_v47, %v2654_v49  ;;  %v2665_v38 = vadd.f32 %v2664_v36, %v2663_v17 }
 0x4d9   : > { %v2563_v12 = vmul.f32 %v9319_v43, %v2501_v7  ;;  %v2564_v46 = vmul.f32 %v9325_v11, %v2505_v9  ;;  %v2649_v7 = vadd.f32 %v2648_v50, %v2647_v5 }
 0x4da   : > { %v2673_v8 = vrot.slane %v2672_v40, 4  ;;  %4308 = vbcast.lane.b32.xlu1 %v4302_v27, 264  ;;  %4326 = vbcast.lane.b32.xlu0 %v4324_v39, 256  ;;  %v2657_v52 = vrot.slane %v2656_v22, 2  ;;  %v2666_v49 = vrot.slane %v2665_v38, 2 }
 0x4db   : > { %v2679_v15 = vsel %vm1863_vm2, %v2563_v12, 0.0  ;;  %v2680_v3 = vsel %vm1863_vm2, %v2564_v46, 0.0 }
 0x4dc   : > { %v2512_v61 = vpop.permute.xlu0 %2511  ;;  %v2516_v0 = vpop.permute.xlu1 %2515  ;;  %v2681_v63 = vadd.f32 %v2680_v3, %v2679_v15  ;;  %v2674_v42 = vadd.f32 %v2673_v8, %v2672_v40  ;;  %v2658_v14 = vadd.f32 %v2657_v52, %v2656_v22  ;;  %v4225_v8 = vrot.slane %v9220_v28, %v9151_v37  ;;  %v9357_v22 = vld [vmem:[%s7855_s23 + $0xf0] sm:$0xff] }
 0x4dd   : > { %v2565_v2 = vmul.f32 %v9333_v1, %v2512_v61  ;;  %v2566_v27 = vmul.f32 %v9337_v20, %v2516_v0  ;;  %v2667_v15 = vadd.f32 %v2666_v49, %v2665_v38  ;;  %v4236_v38 = vrot.slane %v9220_v28, %v9155_v53 }
 0x4de   : > { %4319 = vbcast.lane.b32.xlu1 %v4313_v25, 264  ;;  %4337 = vbcast.lane.b32.xlu0 %v4335_v41, 256  ;;  %v2682_v10 = vrot.slane %v2681_v63, 4  ;;  %v9349_v25 = vld [vmem:[%s7855_s23 + $0xe8] sm:$0xff]  ;;  %v2675_v47 = vrot.slane %v2674_v42, 2  ;;  %v2659_v0 = vrot.slane %v2658_v14, 1 }
 0x4df   : > { %v2688_v35 = vsel %vm1863_vm2, %v2565_v2, 0.0  ;;  %v2689_v58 = vsel %vm1863_vm2, %v2566_v27, 0.0  ;;  %v2668_v49 = vrot.slane %v2667_v15, 1 }
 0x4e0   : > { %v2690_v44 = vadd.f32 %v2689_v58, %v2688_v35  ;;  %v2523_v31 = vpop.permute.xlu0 %2522  ;;  %v2527_v6 = vpop.permute.xlu1 %2526  ;;  %v2683_v48 = vadd.f32 %v2682_v10, %v2681_v63  ;;  %v2676_v63 = vadd.f32 %v2675_v47, %v2674_v42  ;;  %v2650_v35 = vrot.slane %v2649_v7, 1 }
 0x4e1   : > { %v2567_v17 = vmul.f32 %v9345_v57, %v2523_v31  ;;  %v2568_v54 = vmul.f32 %v9349_v25, %v2527_v6  ;;  %v2660_v42 = vadd.f32 %v2659_v0, %v2658_v14  ;;  %v4247_v47 = vrot.slane %v9220_v28, %v9167_v59 }
 0x4e2   : > { %v2691_v26 = vrot.slane %v2690_v44, 4  ;;  %4330 = vbcast.lane.b32.xlu1 %v4324_v39, 264  ;;  %4216 = vbcast.lane.b32.xlu0 %v4214_v13, 256  ;;  %v2684_v16 = vrot.slane %v2683_v48, 2  ;;  %v9361_v39 = vld [vmem:[%s7855_s23 + $0xf8] sm:$0xff] }
 0x4e3   : > { %v2697_v24 = vsel %vm1863_vm2, %v2567_v17, 0.0  ;;  %v2698_v40 = vsel %vm1863_vm2, %v2568_v54, 0.0  ;;  %v2677_v17 = vrot.slane %v2676_v63, 1 }
 0x4e4   : > { %v2692_v9 = vadd.f32 %v2691_v26, %v2690_v44  ;;  %v2699_v36 = vadd.f32 %v2698_v40, %v2697_v24  ;;  %v2534_v12 = vpop.permute.xlu0 %2533  ;;  %v2538_v46 = vpop.permute.xlu1 %2537  ;;  %v2685_v27 = vadd.f32 %v2684_v16, %v2683_v48  ;;  %v2651_v26 = vadd.f32 %v2650_v35, %v2649_v7 }
 0x4e5   : > { %v2569_v3 = vmul.f32 %v9357_v22, %v2534_v12  ;;  %v2570_v61 = vmul.f32 %v9361_v39, %v2538_v46  ;;  %v2669_v12 = vadd.f32 %v2668_v49, %v2667_v15  ;;  %v4258_v7 = vrot.slane %v9220_v28, %v9171_v30 }
 0x4e6   : > { %v2693_v2 = vrot.slane %v2692_v9, 2  ;;  %v2700_v5 = vrot.slane %v2699_v36, 4  ;;  %4341 = vbcast.lane.b32.xlu1 %v4335_v41, 264  ;;  %4227 = vbcast.lane.b32.xlu0 %v4225_v8, 256  ;;  %v2686_v48 = vrot.slane %v2685_v27, 1  ;;  %v2738_v46 = vsel %vm2140_vm6, %v2660_v42, %v2651_v26 }
 0x4e7   : > { %v2706_v52 = vsel %vm1863_vm2, %v2569_v3, 0.0  ;;  %v2707_v10 = vsel %vm1863_vm2, %v2570_v61, 0.0  ;;  %v2678_v3 = vadd.f32 %v2677_v17, %v2676_v63  ;;  %v4269_v49 = vrot.slane %v9220_v28, %v9175_v62 }
 0x4e8   : > { %v2694_v58 = vadd.f32 %v2693_v2, %v2692_v9  ;;  %v2701_v50 = vadd.f32 %v2700_v5, %v2699_v36  ;;  %v2708_v44 = vadd.f32 %v2707_v10, %v2706_v52  ;;  %v3378_v31 = vpop.permute.xlu0 %3377  ;;  %v3382_v6 = vpop.permute.xlu1 %3381  ;;  %v2739_v10 = vsel %vm2142_vm7, %v2669_v12, %v2738_v46 }
 0x4e9   : > { %v2740_v15 = vsel %vm2144_vm8, %v2678_v3, %v2739_v10 }
 0x4ea   : > { %v2702_v54 = vrot.slane %v2701_v50, 2  ;;  %v2709_v41 = vrot.slane %v2708_v44, 4  ;;  %4220 = vbcast.lane.b32.xlu1 %v4214_v13, 264  ;;  %4238 = vbcast.lane.b32.xlu0 %v4236_v38, 256  ;;  %v2695_v16 = vrot.slane %v2694_v58, 1  ;;  %v2687_v13 = vadd.f32 %v2686_v48, %v2685_v27 }
 0x4ec   : > { %v2703_v24 = vadd.f32 %v2702_v54, %v2701_v50  ;;  %v2710_v40 = vadd.f32 %v2709_v41, %v2708_v44  ;;  %v3389_v9 = vpop.permute.xlu0 %3388  ;;  %v3393_v36 = vpop.permute.xlu1 %3392  ;;  %v2696_v0 = vadd.f32 %v2695_v16, %v2694_v58  ;;  %v4280_v41 = vrot.slane %v9220_v28, %v9179_v29 }
 0x4ed   : > { %v3476_v16 = vmul.f32 %v9260_v45, %v3378_v31  ;;  %v3479_v12 = vmul.f32 %v9286_v18, %v3393_v36  ;;  %v5152_v31 = vrot.slane %v9264_v23, %v9151_v37 }
 0x4ee   : > { %v2704_v14 = vrot.slane %v2703_v24, 1  ;;  %v2711_v61 = vrot.slane %v2710_v40, 2  ;;  %4231 = vbcast.lane.b32.xlu1 %v4225_v8, 264  ;;  %4249 = vbcast.lane.b32.xlu0 %v4247_v47, 256  ;;  %v2741_v8 = vsel %vm2146_vm9, %v2687_v13, %v2740_v15 }
 0x4ef   : > { %v2742_v63 = vsel %vm2148_vm10, %v2696_v0, %v2741_v8  ;;  %v5229_v0 = vrot.slane %v9310_v32, %v9147_v21  ;;  %v5240_v8 = vrot.slane %v9310_v32, %v9151_v37  ;;  %v9440_v37 = vrot.slane %v9236_v56, %v9179_v29 }
 0x4f0   : > { %v2712_v2 = vadd.f32 %v2711_v61, %v2710_v40  ;;  %v3400_v5 = vpop.permute.xlu0 %3399  ;;  %v3404_v52 = vpop.permute.xlu1 %3403  ;;  %v2705_v35 = vadd.f32 %v2704_v14, %v2703_v24  ;;  %v3477_v24 = vmul.f32 %v9267_v51, %v3382_v6  ;;  %v3478_v40 = vmul.f32 %v9271_v4, %v3389_v9 }
 0x4f1   : > { %v5141_v14 = vrot.slane %v9264_v23, %v9147_v21  ;;  %v3564_v61 = vsel %vm1863_vm2, %v3476_v16, 0.0  ;;  %v3574_v51 = vsel %vm1863_vm2, %v3479_v12, 0.0  ;;  %v3481_v10 = vmul.f32 %v9290_v60, %v3404_v52 }
 0x4f2   : > { %v2713_v50 = vrot.slane %v2712_v2, 1  ;;  %4242 = vbcast.lane.b32.xlu1 %v4236_v38, 264  ;;  %4260 = vbcast.lane.b32.xlu0 %v4258_v7, 256  ;;  %v2743_v42 = vsel %vm2150_vm11, %v2705_v35, %v2742_v63  ;;  %v3573_v45 = vsel %vm1863_vm2, %v3478_v40, 0.0  ;;  %v9448_v52 = vrot.slane %v9264_v23, %v9167_v59 }
 0x4f3   : > { %v3575_v9 = vadd.f32 %v3574_v51, %v3573_v45  ;;  %v9460_v16 = vrot.slane %v9264_v23, %v9175_v62  ;;  %v9468_v40 = vrot.slane %v9264_v23, %v9183_v34 }
 0x4f4   : > { %v2714_v27 = vadd.f32 %v2713_v50, %v2712_v2  ;;  %v9377_v58 = vpop.permute.xlu0 %3410  ;;  %v9379_v44 = vpop.permute.xlu1 %3414 }
 0x4f5   : > { %v3576_v35 = vrot.slane %v3575_v9, 4  ;;  %10363 = vst [vmem:[#allocation43_spill] sm:$0xff] %v9468_v40  ;;  %v3482_v51 = vmul.f32 %v9302_v55, %v9377_v58 }
 0x4f6   : > { %v2744_v17 = vsel %vm2152_vm12, %v2714_v27, %v2743_v42  ;;  %4253 = vbcast.lane.b32.xlu1 %v4247_v47, 264  ;;  %4271 = vbcast.lane.b32.xlu0 %v4269_v49, 256  ;;  %v4291_v47 = vrot.slane %v9220_v28, %v9183_v34  ;;  %v3565_v28 = vsel %vm1863_vm2, %v3477_v24, 0.0  ;;  %v9430_v27 = vrot.slane %v9236_v56, %v9171_v30 }
 0x4f7   : > { %2748 = vst.msk [vmem:[%s9386_s11 + $0x8] sm:$0xff] %vm1863_vm2, %v2744_v17  ;;  %v3566_v6 = vadd.f32 %v3565_v28, %v3564_v61  ;;  %v3577_v60 = vadd.f32 %v3576_v35, %v3575_v9  ;;  %v9452_v42 = vrot.slane %v9236_v56, %v9183_v34  ;;  %v9464_v24 = vrot.slane %v9264_v23, %v9179_v29  ;;  %v9475_v28 = vld [vmem:[%s7855_s23 + $0x18] sm:$0xff] }
 0x4f8   : > { %v9390_v38 = vpop.permute.xlu0 %3421  ;;  %v9392_v54 = vpop.permute.xlu1 %3425 }
 0x4f9   : > { %v3567_v2 = vrot.slane %v3566_v6, 4  ;;  %10362 = vst [vmem:[#allocation46_spill] sm:$0xff] %v9464_v24 }
 0x4fa   : > { %4264 = vbcast.lane.b32.xlu1 %v4258_v7, 264  ;;  %4282 = vbcast.lane.b32.xlu0 %v4280_v41, 256  ;;  %v3480_v7 = vmul.f32 %v9275_v19, %v3400_v5  ;;  %v9436_v19 = vrot.slane %v9236_v56, %v9175_v62  ;;  %v9444_v5 = vrot.slane %v9264_v23, %v9155_v53 }
 0x4fb   : > { %v3568_v63 = vadd.f32 %v3567_v2, %v3566_v6 }
 0x4fc   : > { %v9396_v48 = vpop.permute.xlu0 %3432  ;;  %v9398_v26 = vpop.permute.xlu1 %3436  ;;  %v3582_v21 = vsel %vm1863_vm2, %v3480_v7, 0.0  ;;  %v9488_v7 = vld [vmem:[%s7855_s23 + $0x20] sm:$0xff] }
 0x4fd   : > { %v3569_v56 = vrot.slane %v3568_v63, 2 }
 0x4fe   : > { %4275 = vbcast.lane.b32.xlu1 %v4269_v49, 264  ;;  %4293 = vbcast.lane.b32.xlu0 %v4291_v47, 256  ;;  %v3583_v49 = vsel %vm1863_vm2, %v3481_v10, 0.0 }
 0x4ff   : > { %v3584_v12 = vadd.f32 %v3583_v49, %v3582_v21  ;;  %v9516_v21 = vrot.slane %v9310_v32, %v9167_v59  ;;  %v9520_v49 = vrot.slane %v9310_v32, %v9171_v30  ;;  %v3591_v59 = vsel %vm1863_vm2, %v3482_v51, 0.0 }
 0x500   : > { %v9406_v46 = vpop.permute.xlu0 %3443  ;;  %v9408_v3 = vpop.permute.xlu1 %3447  ;;  %v3484_v51 = vmul.f32 %v9319_v43, %v9390_v38  ;;  %v9558_v43 = vrot.slane %v9310_v32, %v9183_v34 }
 0x502   : > { %4286 = vbcast.lane.b32.xlu1 %v4280_v41, 264  ;;  %5143 = vbcast.lane.b32.xlu0 %v5141_v14, 256  ;;  %10365 = vst [vmem:[#allocation42_spill] sm:$0xff] %v9558_v43 }
 0x504   : > { %v9416_v4 = vpop.permute.xlu0 %3454  ;;  %v9418_v18 = vpop.permute.xlu1 %3458 }
 0x506   : > { %4297 = vbcast.lane.b32.xlu1 %v4291_v47, 264  ;;  %5154 = vbcast.lane.b32.xlu0 %v5152_v31, 256  ;;  %v9456_v47 = vrot.slane %v9264_v23, %v9171_v30  ;;  %v3483_v23 = vmul.f32 %v9306_v33, %v9379_v44  ;;  %v9504_v44 = vrot.slane %v9310_v32, %v9155_v53 }
 0x507   : > { %v9524_v53 = vrot.slane %v9310_v32, %v9175_v62 }
 0x508   : > { %v2380_v36 = vpop.permute.xlu0 %2379  ;;  %v2369_v13 = vpop.permute.xlu1 %2368 }
 0x50a   : > { %5147 = vbcast.lane.b32.xlu1 %v5141_v14, 264  ;;  %5231 = vbcast.lane.b32.xlu0 %v5229_v0, 256  ;;  %v9471_v14 = vld [vmem:[%s7855_s23 + $0x10] sm:$0xff] }
 0x50b   : > { %v2541_v61 = vmul.f32 %v9471_v14, %v2380_v36  ;;  %v3578_v36 = vrot.slane %v3577_v60, 2 }
 0x50c   : > { %v2391_v15 = vpop.permute.xlu0 %2390  ;;  %v2373_v50 = vpop.permute.xlu1 %2372 }
 0x50d   : > { %v2543_v10 = vmul.f32 %v9488_v7, %v2391_v15  ;;  %v3579_v62 = vadd.f32 %v3578_v36, %v3577_v60  ;;  %v3485_v60 = vmul.f32 %v9325_v11, %v9392_v54  ;;  %v9567_v54 = vld [vmem:[%s7855_s23 + $0x40] sm:$0xff] }
 0x50e   : > { %5158 = vbcast.lane.b32.xlu1 %v5152_v31, 264  ;;  %5242 = vbcast.lane.b32.xlu0 %v5240_v8, 256  ;;  %v9483_v31 = vld [vmem:[%s7855_s23 + $0x8] sm:$0xff] }
 0x50f   : > { %v2540_v6 = vmul.f32 %v9483_v31, %v2373_v50 }
 0x510   : > { %v2402_v17 = vpop.permute.xlu0 %2401  ;;  %v2384_v41 = vpop.permute.xlu1 %2383 }
 0x511   : > { %v2542_v45 = vmul.f32 %v9475_v28, %v2384_v41  ;;  %v3585_v41 = vrot.slane %v3584_v12, 4  ;;  %v2572_v30 = vsel %vm1863_vm2, %v2540_v6, 0.0 }
 0x512   : > { %v6246_v9 = vpop.f32.mrb[8].mxu0  ;;  %v6253_v2 = vpop.f32.mrb[8].mxu1  ;;  %5235 = vbcast.lane.b32.xlu1 %v5229_v0, 264  ;;  %5165 = vbcast.lane.b32.xlu0 %v9444_v5, 256  ;;  %v9507_v0 = vld [vmem:[%s7855_s23] sm:$0xff] }
 0x513   : > { %v2581_v55 = vsel %vm1863_vm2, %v2542_v45, 0.0  ;;  %2283 = vst.msk [vmem:[%s9493_s10 + $0x8] sm:$0xff] %vm1423_vm3, %v6246_v9  ;;  %v2273_v33 = vpop.f32.mrb[9].mxu0  ;;  %v2352_v58 = vpop.f32.mrb[9].mxu1  ;;  %v2539_v35 = vmul.f32 %v9507_v0, %v2369_v13  ;;  %v9526_v13 = vadd.f32 %v3569_v56, %v3568_v63  ;;  %v2580_v45 = vsel %vm1863_vm2, %v2541_v61, 0.0  ;;  %v9530_v9 = vld [vmem:[%s7855_s23 + $0x28] sm:$0xff] }
 0x514   : > { %2362 = vst.msk [vmem:[%s9498_s5 + $0x8] sm:$0xff] %vm974_vm0, %v6253_v2  ;;  %2361 = vst.msk [vmem:[%s9498_s5] sm:$0xff] %vm974_vm0, %v2352_v58  ;;  %v2413_v15 = vpop.permute.xlu0 %2412  ;;  %v2395_v50 = vpop.permute.xlu1 %2394  ;;  %v2582_v58 = vadd.f32 %v2581_v55, %v2580_v45  ;;  %v2589_v63 = vsel %vm1863_vm2, %v2543_v10, 0.0  ;;  %v9539_v56 = vld [vmem:[%s7855_s23 + $0x30] sm:$0xff]  ;;  %vm3281_vm0 = vcmask 195680  }
 0x515   : > { %2282 = vst.msk [vmem:[%s9493_s10] sm:$0xff] %vm1423_vm3, %v2273_v33  ;;  %v2544_v2 = vmul.f32 %v9530_v9, %v2395_v50  ;;  %v3592_v33 = vsel %vm1863_vm2, %v3483_v23, 0.0  ;;  %v2545_v61 = vmul.f32 %v9539_v56, %v2402_v17  ;;  %v2571_v23 = vsel %vm1863_vm2, %v2539_v35, 0.0  ;;  %v9553_v17 = vld [vmem:[%s7855_s23 + $0x38] sm:$0xff] }
 0x516   : > { %5253 = vbcast.lane.b32.xlu0 %v9504_v44, 256  ;;  %5246 = vbcast.lane.b32.xlu1 %v5240_v8, 264  ;;  %v9548_v8 = vrot.slane %v9310_v32, %v9179_v29  ;;  %v2573_v36 = vadd.f32 %v2572_v30, %v2571_v23  ;;  %v3586_v35 = vadd.f32 %v3585_v41, %v3584_v12  ;;  %v3580_v29 = vrot.slane %v3579_v62, 1 }
 0x517   : > { %v2590_v50 = vsel %vm1863_vm2, %v2544_v2, 0.0  ;;  %v9561_v2 = vadd.f32 %v3592_v33, %v3591_v59  ;;  %v2598_v11 = vsel %vm1863_vm2, %v2545_v61, 0.0  ;;  %v2547_v30 = vmul.f32 %v9567_v54, %v2413_v15 }
 0x518   : > { %v2591_v6 = vadd.f32 %v2590_v50, %v2589_v63  ;;  %v2424_v55 = vpop.permute.xlu0 %2423  ;;  %v2406_v45 = vpop.permute.xlu1 %2405  ;;  %10364 = vst [vmem:[#allocation41_spill] sm:$0xff] %v9548_v8  ;;  %v2583_v63 = vrot.slane %v2582_v58, 4  ;;  %v3600_v32 = vsel %vm1863_vm2, %v3484_v51, 0.0  ;;  %v3486_v12 = vmul.f32 %v9333_v1, %v9396_v48 }
 0x519   : > { %v2546_v10 = vmul.f32 %v9553_v17, %v2406_v45  ;;  %v3487_v61 = vmul.f32 %v9337_v20, %v9398_v26  ;;  %v2574_v23 = vrot.slane %v2573_v36, 4  ;;  %v9578_v45 = vld [vmem:[%s7855_s23 + $0x48] sm:$0xff]  ;;  %v3594_v51 = vrot.slane %v9561_v2, 4  ;;  %v9588_v20 = vld [vmem:[%s7855_s23 + $0x50] sm:$0xff] }
 0x51a   : > { %4348 = vbcast.lane.b32.xlu0 %v9430_v27, 256  ;;  %5169 = vbcast.lane.b32.xlu1 %v9444_v5, 264  ;;  %v2592_v41 = vrot.slane %v2591_v6, 4  ;;  %v3601_v5 = vsel %vm1863_vm2, %v3485_v60, 0.0  ;;  %v2584_v38 = vadd.f32 %v2583_v63, %v2582_v58  ;;  %v9584_v48 = vadd.f32 %v3580_v29, %v3579_v62 }
 0x51b   : > { %v2599_v34 = vsel %vm1863_vm2, %v2546_v10, 0.0  ;;  %v3587_v10 = vrot.slane %v3586_v35, 2  ;;  %v2607_v60 = vsel %vm1863_vm2, %v2547_v30, 0.0  ;;  %v2549_v26 = vmul.f32 %v9588_v20, %v2424_v55  ;;  %v9597_v30 = vld [vmem:[%s7855_s23 + $0x58] sm:$0xff] }
 0x51c   : > { %v2600_v59 = vadd.f32 %v2599_v34, %v2598_v11  ;;  %v2435_v33 = vpop.permute.xlu0 %2434  ;;  %v2417_v50 = vpop.permute.xlu1 %2416  ;;  %v3602_v34 = vadd.f32 %v3601_v5, %v3600_v32  ;;  %v2593_v58 = vadd.f32 %v2592_v41, %v2591_v6  ;;  %v3488_v62 = vmul.f32 %v9345_v57, %v9406_v46  ;;  %v9608_v46 = vld [vmem:[%s7855_s23 + $0x60] sm:$0xff] }
 0x51d   : > { %v2548_v15 = vmul.f32 %v9578_v45, %v2417_v50  ;;  %v3609_v50 = vsel %vm1863_vm2, %v3486_v12, 0.0  ;;  %v2575_v29 = vadd.f32 %v2574_v23, %v2573_v36  ;;  %v3489_v32 = vmul.f32 %v9349_v25, %v9408_v3  ;;  %10366 = vst [vmem:[#allocation44_spill] sm:$0xff] %v9608_v46 }
 0x51e   : > { %v2601_v1 = vrot.slane %v2600_v59, 4  ;;  %5176 = vbcast.lane.b32.xlu0 %v9448_v52, 256  ;;  %5257 = vbcast.lane.b32.xlu1 %v9504_v44, 264  ;;  %v3610_v44 = vsel %vm1863_vm2, %v3487_v61, 0.0  ;;  %v2585_v5 = vrot.slane %v2584_v38, 2  ;;  %v9604_v41 = vadd.f32 %v3587_v10, %v3586_v35  ;;  %v9616_v10 = vld [vmem:[%s7855_s23 + $0x68] sm:$0xff] }
 0x51f   : > { %v2608_v11 = vsel %vm1863_vm2, %v2548_v15, 0.0  ;;  %v2616_v57 = vsel %vm1863_vm2, %v2549_v26, 0.0  ;;  %v2551_v36 = vmul.f32 %v9608_v46, %v2435_v33  ;;  %v3603_v61 = vrot.slane %v3602_v34, 4  ;;  %10367 = vst [vmem:[#allocation47_spill] sm:$0xff] %v9616_v10 }
 0x520   : > { %v2609_v63 = vadd.f32 %v2608_v11, %v2607_v60  ;;  %v2446_v43 = vpop.permute.xlu0 %2445  ;;  %v2428_v40 = vpop.permute.xlu1 %2427  ;;  %v2602_v12 = vadd.f32 %v2601_v1, %v2600_v59  ;;  %v2594_v25 = vrot.slane %v2593_v58, 2  ;;  %v3611_v1 = vadd.f32 %v3610_v44, %v3609_v50  ;;  %v9624_v44 = vld [vmem:[%s7855_s23 + $0x70] sm:$0xff] }
 0x521   : > { %v2550_v55 = vmul.f32 %v9597_v30, %v2428_v40  ;;  %v2576_v35 = vrot.slane %v2575_v29, 2  ;;  %v3619_v33 = vsel %vm1863_vm2, %v3489_v32, 0.0  ;;  %v2586_v26 = vadd.f32 %v2585_v5, %v2584_v38  ;;  %10368 = vst [vmem:[#allocation45_spill] sm:$0xff] %v9624_v44 }
 0x522   : > { %v2610_v6 = vrot.slane %v2609_v63, 4  ;;  %5264 = vbcast.lane.b32.xlu0 %v9516_v21, 256  ;;  %4352 = vbcast.lane.b32.xlu1 %v9430_v27, 264  ;;  %v3618_v27 = vsel %vm1863_vm2, %v3488_v62, 0.0  ;;  %v2603_v11 = vrot.slane %v2602_v12, 2  ;;  %v2553_v62 = vmul.f32 %v9624_v44, %v2446_v43 }
 0x523   : > { %v2617_v40 = vsel %vm1863_vm2, %v2550_v55, 0.0  ;;  %v2595_v38 = vadd.f32 %v2594_v25, %v2593_v58  ;;  %v9631_v8 = vadd.f32 %v3603_v61, %v3602_v34  ;;  %v9637_v24 = vadd.f32 %v3619_v33, %v3618_v27 }
 0x524   : > { %v2611_v3 = vadd.f32 %v2610_v6, %v2609_v63  ;;  %v2618_v59 = vadd.f32 %v2617_v40, %v2616_v57  ;;  %v9612_v23 = vpop.permute.xlu0 %3289  ;;  %v2439_v15 = vpop.permute.xlu1 %2438  ;;  %v2625_v63 = vsel %vm1863_vm2, %v2551_v36, 0.0  ;;  %v9629_v57 = vadd.f32 %v3594_v51, %v9561_v2  ;;  %v9634_v36 = vld [vmem:[%s7855_s23 + $0x78] sm:$0xff] }
 0x525   : > { %v2552_v60 = vmul.f32 %v9616_v10, %v2439_v15  ;;  %v2577_v10 = vadd.f32 %v2576_v35, %v2575_v29  ;;  %v2604_v43 = vadd.f32 %v2603_v11, %v2602_v12  ;;  %v2587_v2 = vrot.slane %v2586_v26, 1 }
 0x526   : > { %v2619_v55 = vrot.slane %v2618_v59, 4  ;;  %4359 = vbcast.lane.b32.xlu0 %v9436_v19, 256  ;;  %5180 = vbcast.lane.b32.xlu1 %v9448_v52, 264  ;;  %v2612_v50 = vrot.slane %v2611_v3, 2  ;;  %v3612_v52 = vrot.slane %v3611_v1, 4  ;;  %v2634_v34 = vsel %vm1863_vm2, %v2553_v62, 0.0 }
 0x527   : > { %v2626_v6 = vsel %vm1863_vm2, %v2552_v60, 0.0  ;;  %v2596_v29 = vrot.slane %v2595_v38, 1  ;;  %v3490_v11 = vmul.f32 %v9357_v22, %v9416_v4  ;;  %v2588_v62 = vadd.f32 %v2587_v2, %v2586_v26 }
 0x528   : > { %v2620_v32 = vadd.f32 %v2619_v55, %v2618_v59  ;;  %v2627_v5 = vadd.f32 %v2626_v6, %v2625_v63  ;;  %v3301_v40 = vpop.permute.xlu0 %3300  ;;  %v2450_v15 = vpop.permute.xlu1 %2449  ;;  %v2613_v51 = vadd.f32 %v2612_v50, %v2611_v3  ;;  %v9647_v55 = vadd.f32 %v3612_v52, %v3611_v1 }
 0x529   : > { %v2554_v46 = vmul.f32 %v9634_v36, %v2450_v15  ;;  %v2605_v3 = vrot.slane %v2604_v43, 1  ;;  %v3627_v52 = vsel %vm1863_vm2, %v3490_v11, 0.0 }
 0x52a   : > { %v2621_v60 = vrot.slane %v2620_v32, 2  ;;  %v2628_v44 = vrot.slane %v2627_v5, 4  ;;  %5187 = vbcast.lane.b32.xlu0 %v9456_v47, 256  ;;  %5268 = vbcast.lane.b32.xlu1 %v9516_v21, 264  ;;  %v2578_v21 = vrot.slane %v2577_v10, 1  ;;  %v2614_v6 = vrot.slane %v2613_v51, 1 }
 0x52b   : > { %v2635_v58 = vsel %vm1863_vm2, %v2554_v46, 0.0  ;;  %v3621_v46 = vrot.slane %v9637_v24, 4 }
 0x52c   : > { %v2622_v61 = vadd.f32 %v2621_v60, %v2620_v32  ;;  %v2629_v25 = vadd.f32 %v2628_v44, %v2627_v5  ;;  %v2636_v59 = vadd.f32 %v2635_v58, %v2634_v34  ;;  %v3312_v35 = vpop.permute.xlu0 %3311  ;;  %v3294_v27 = vpop.permute.xlu1 %3293  ;;  %v3491_v44 = vmul.f32 %v9361_v39, %v9418_v18 }
 0x52d   : > { %v2597_v32 = vadd.f32 %v2596_v29, %v2595_v38  ;;  %v2579_v60 = vadd.f32 %v2578_v21, %v2577_v10  ;;  %v3462_v34 = vmul.f32 %v9471_v14, %v3301_v40  ;;  %v2606_v58 = vadd.f32 %v2605_v3, %v2604_v43 }
 0x52e   : > { %v2630_v63 = vrot.slane %v2629_v25, 2  ;;  %v2637_v50 = vrot.slane %v2636_v59, 4  ;;  %5275 = vbcast.lane.b32.xlu0 %v9520_v49, 256  ;;  %4363 = vbcast.lane.b32.xlu1 %v9436_v19, 264  ;;  %v2623_v5 = vrot.slane %v2622_v61, 1  ;;  %v3461_v39 = vmul.f32 %v9483_v31, %v3294_v27 }
 0x52f   : > { %v3628_v18 = vsel %vm1863_vm2, %v3491_v44, 0.0  ;;  %v2731_v26 = vsel %vm2140_vm6, %v2588_v62, %v2579_v60  ;;  %v2615_v38 = vadd.f32 %v2614_v6, %v2613_v51  ;;  %v3460_v43 = vmul.f32 %v9507_v0, %v9612_v23 }
 0x530   : > { %v2631_v22 = vadd.f32 %v2630_v63, %v2629_v25  ;;  %v2638_v4 = vadd.f32 %v2637_v50, %v2636_v59  ;;  %v3323_v1 = vpop.permute.xlu0 %3322  ;;  %v3305_v15 = vpop.permute.xlu1 %3304  ;;  %v2732_v40 = vsel %vm2142_vm7, %v2597_v32, %v2731_v26  ;;  %v2624_v2 = vadd.f32 %v2623_v5, %v2622_v61 }
 0x531   : > { %v3463_v19 = vmul.f32 %v9475_v28, %v3305_v15  ;;  %v3501_v11 = vsel %vm1863_vm2, %v3462_v34, 0.0  ;;  %v2733_v51 = vsel %vm2144_vm8, %v2606_v58, %v2732_v40  ;;  %v3493_v63 = vsel %vm1863_vm2, %v3461_v39, 0.0 }
 0x532   : > { %v2632_v33 = vrot.slane %v2631_v22, 1  ;;  %v2639_v12 = vrot.slane %v2638_v4, 2  ;;  %4370 = vbcast.lane.b32.xlu0 %v9440_v37, 256  ;;  %5191 = vbcast.lane.b32.xlu1 %v9456_v47, 264  ;;  %v3464_v47 = vmul.f32 %v9488_v7, %v3312_v35  ;;  %v3614_v23 = vrot.slane %v9647_v55, 2 }
 0x533   : > { %v3502_v10 = vsel %vm1863_vm2, %v3463_v19, 0.0  ;;  %v2734_v61 = vsel %vm2146_vm9, %v2615_v38, %v2733_v51  ;;  %v3492_v62 = vsel %vm1863_vm2, %v3460_v43, 0.0  ;;  %v10369_v19 = vrot.slane %v9526_v13, 1 }
 0x534   : > { %v2640_v29 = vadd.f32 %v2639_v12, %v2638_v4  ;;  %v3334_v25 = vpop.permute.xlu0 %3333  ;;  %v3316_v59 = vpop.permute.xlu1 %3315  ;;  %v2633_v27 = vadd.f32 %v2632_v33, %v2631_v22  ;;  %v3503_v50 = vadd.f32 %v3502_v10, %v3501_v11  ;;  %v3466_v12 = vmul.f32 %v9539_v56, %v3323_v1 }
 0x535   : > { %v3465_v21 = vmul.f32 %v9530_v9, %v3316_v59  ;;  %v3629_v33 = vadd.f32 %v3628_v18, %v3627_v52  ;;  %v2735_v44 = vsel %vm2148_vm10, %v2624_v2, %v2734_v61  ;;  %v3494_v4 = vadd.f32 %v3493_v63, %v3492_v62 }
 0x536   : > { %v2641_v3 = vrot.slane %v2640_v29, 1  ;;  %5198 = vbcast.lane.b32.xlu0 %v9460_v16, 256  ;;  %5279 = vbcast.lane.b32.xlu1 %v9520_v49, 264  ;;  %v2736_v22 = vsel %vm2150_vm11, %v2633_v27, %v2735_v44  ;;  %v3510_v49 = vsel %vm1863_vm2, %v3464_v47, 0.0  ;;  %v3622_v1 = vadd.f32 %v3621_v46, %v9637_v24 }
 0x537   : > { %v3511_v35 = vsel %vm1863_vm2, %v3465_v21, 0.0  ;;  %v3504_v52 = vrot.slane %v3503_v50, 4  ;;  %v3572_v58 = vadd.f32 %v10369_v19, %v9526_v13  ;;  %v3519_v39 = vsel %vm1863_vm2, %v3466_v12, 0.0 }
 0x538   : > { %v2642_v6 = vadd.f32 %v2641_v3, %v2640_v29  ;;  %v3345_v32 = vpop.permute.xlu0 %3344  ;;  %v3327_v5 = vpop.permute.xlu1 %3326  ;;  %v3512_v34 = vadd.f32 %v3511_v35, %v3510_v49  ;;  %v3468_v18 = vmul.f32 %v9567_v54, %v3334_v25  ;;  %v3589_v24 = vrot.slane %v9604_v41, 1 }
 0x539   : > { %v3467_v15 = vmul.f32 %v9553_v17, %v3327_v5  ;;  %v10370_v46 = vrot.slane %v9629_v57, 2  ;;  %v3615_v43 = vadd.f32 %v3614_v23, %v9647_v55  ;;  %v3630_v29 = vrot.slane %v3629_v33, 4 }
 0x53a   : > { %v2737_v60 = vsel %vm2152_vm12, %v2642_v6, %v2736_v22  ;;  %5286 = vbcast.lane.b32.xlu0 %v9524_v53, 256  ;;  %4374 = vbcast.lane.b32.xlu1 %v9440_v37, 264  ;;  %v10371_v37 = vrot.slane %v9631_v8, 2  ;;  %v3495_v25 = vrot.slane %v3494_v4, 4  ;;  %v3659_v27 = vsel %vm2140_vm6, %v9584_v48, %v3572_v58 }
 0x53b   : > { %v3520_v26 = vsel %vm1863_vm2, %v3467_v15, 0.0  ;;  %2747 = vst.msk [vmem:[%s9386_s11] sm:$0xff] %vm1863_vm2, %v2737_v60  ;;  %v3597_v38 = vadd.f32 %v10370_v46, %v9629_v57  ;;  %v3623_v11 = vrot.slane %v3622_v1, 2  ;;  %v3505_v47 = vadd.f32 %v3504_v52, %v3503_v50  ;;  %v10373_v15 = vld [vmem:[#allocation44_spill] sm:$0xff] }
 0x53c   : > { %v3606_v10 = vadd.f32 %v10371_v37, %v9631_v8  ;;  %v3521_v40 = vadd.f32 %v3520_v26, %v3519_v39  ;;  %v3356_v13 = vpop.permute.xlu0 %3355  ;;  %v3338_v2 = vpop.permute.xlu1 %3337  ;;  %v3513_v21 = vrot.slane %v3512_v34, 4  ;;  %v3528_v8 = vsel %vm1863_vm2, %v3468_v18, 0.0 }
 0x53d   : > { %v3469_v59 = vmul.f32 %v9578_v45, %v3338_v2  ;;  %v3470_v57 = vmul.f32 %v9588_v20, %v3345_v32  ;;  %v3590_v3 = vadd.f32 %v3589_v24, %v9604_v41  ;;  %v3598_v63 = vrot.slane %v3597_v38, 1  ;;  %v10372_v32 = vld [vmem:[#allocation46_spill] sm:$0xff]  ;;  %v10374_v24 = vld [vmem:[#allocation47_spill] sm:$0xff] }
 0x53e   : > { %4381 = vbcast.lane.b32.xlu0 %v9452_v42, 256  ;;  %5202 = vbcast.lane.b32.xlu1 %v9460_v16, 264  ;;  %v3522_v51 = vrot.slane %v3521_v40, 4  ;;  %v3607_v23 = vrot.slane %v3606_v10, 1  ;;  %v3616_v50 = vrot.slane %v3615_v43, 1  ;;  %v3631_v35 = vadd.f32 %v3630_v29, %v3629_v33  ;;  %v10375_v29 = vld [vmem:[#allocation41_spill] sm:$0xff] }
 0x53f   : > { %v3529_v55 = vsel %vm1863_vm2, %v3469_v59, 0.0  ;;  %v3496_v44 = vadd.f32 %v3495_v25, %v3494_v4  ;;  %v3624_v16 = vadd.f32 %v3623_v11, %v3622_v1  ;;  %v3506_v6 = vrot.slane %v3505_v47, 2  ;;  %v10376_v11 = vld [vmem:[#allocation45_spill] sm:$0xff] }
 0x540   : > { %v3530_v61 = vadd.f32 %v3529_v55, %v3528_v8  ;;  %v3367_v48 = vpop.permute.xlu0 %3366  ;;  %v3349_v12 = vpop.permute.xlu1 %3348  ;;  %v3514_v5 = vadd.f32 %v3513_v21, %v3512_v34  ;;  %v3537_v41 = vsel %vm1863_vm2, %v3470_v57, 0.0  ;;  %v3523_v49 = vadd.f32 %v3522_v51, %v3521_v40 }
 0x541   : > { %v3471_v62 = vmul.f32 %v9597_v30, %v3349_v12  ;;  %v3472_v60 = vmul.f32 %v10373_v15, %v3356_v13  ;;  %v3599_v19 = vadd.f32 %v3598_v63, %v3597_v38  ;;  %v3608_v33 = vadd.f32 %v3607_v23, %v3606_v10 }
 0x542   : > { %v3531_v22 = vrot.slane %v3530_v61, 4  ;;  %5209 = vbcast.lane.b32.xlu0 %v10372_v32, 256  ;;  %5290 = vbcast.lane.b32.xlu1 %v9524_v53, 264  ;;  %v3660_v1 = vsel %vm2142_vm7, %v3590_v3, %v3659_v27  ;;  %v3632_v34 = vrot.slane %v3631_v35, 2  ;;  %v3497_v18 = vrot.slane %v3496_v44, 2 }
 0x543   : > { %v3538_v52 = vsel %vm1863_vm2, %v3471_v62, 0.0  ;;  %v3617_v53 = vadd.f32 %v3616_v50, %v3615_v43  ;;  %v3625_v37 = vrot.slane %v3624_v16, 1  ;;  %v3515_v2 = vrot.slane %v3514_v5, 2 }
 0x544   : > { %v3539_v4 = vadd.f32 %v3538_v52, %v3537_v41  ;;  %v4305_v58 = vpop.permute.xlu0 %4304  ;;  %v3360_v39 = vpop.permute.xlu1 %3359  ;;  %v3532_v26 = vadd.f32 %v3531_v22, %v3530_v61  ;;  %v3507_v38 = vadd.f32 %v3506_v6, %v3505_v47  ;;  %v3524_v10 = vrot.slane %v3523_v49, 2  ;;  %v10377_v6 = vld [vmem:[#allocation43_spill] sm:$0xff]  ;;  %v9740_v52 = vld [vmem:[%s7855_s23 + $0x80] sm:$0xff] }
 0x545   : > { %v3473_v46 = vmul.f32 %v10374_v24, %v3360_v39  ;;  %v3546_v13 = vsel %vm1863_vm2, %v3472_v60, 0.0  ;;  %v3474_v21 = vmul.f32 %v10376_v11, %v3367_v48  ;;  %v3661_v55 = vsel %vm2144_vm8, %v3599_v19, %v3660_v1 }
 0x546   : > { %v3540_v40 = vrot.slane %v3539_v4, 4  ;;  %5297 = vbcast.lane.b32.xlu0 %v10375_v29, 256  ;;  %4385 = vbcast.lane.b32.xlu1 %v9452_v42, 264  ;;  %v3633_v42 = vadd.f32 %v3632_v34, %v3631_v35  ;;  %v3498_v47 = vadd.f32 %v3497_v18, %v3496_v44  ;;  %v3533_v3 = vrot.slane %v3532_v26, 2 }
 0x547   : > { %v3547_v25 = vsel %vm1863_vm2, %v3473_v46, 0.0  ;;  %v9723_v59 = vpop.f32.mrb[10].mxu0  ;;  %v9725_v27 = vpop.f32.mrb[10].mxu1  ;;  %v3662_v61 = vsel %vm2146_vm9, %v3608_v33, %v3661_v55  ;;  %v3516_v12 = vadd.f32 %v3515_v2, %v3514_v5  ;;  %v3508_v22 = vrot.slane %v3507_v38, 1  ;;  %v10378_v2 = vld [vmem:[#allocation42_spill] sm:$0xff] }
 0x548   : > { %v3541_v43 = vadd.f32 %v3540_v40, %v3539_v4  ;;  %v3548_v8 = vadd.f32 %v3547_v25, %v3546_v13  ;;  %v4316_v57 = vpop.permute.xlu0 %4315  ;;  %v9728_v51 = vpop.f32.mrb[11].mxu0  ;;  %v3525_v41 = vadd.f32 %v3524_v10, %v3523_v49  ;;  %v3626_v35 = vadd.f32 %v3625_v37, %v3624_v16 }
 0x549   : > { %v9731_v63 = vpop.f32.mrb[11].mxu1  ;;  %v3371_v23 = vpop.permute.xlu1 %3370  ;;  %v3663_v44 = vsel %vm2148_vm10, %v3617_v53, %v3662_v61  ;;  %v3555_v60 = vsel %vm1863_vm2, %v3474_v21, 0.0  ;;  %v4403_v5 = vmul.f32 %v9740_v52, %v4305_v58  ;;  %v3499_v39 = vrot.slane %v3498_v47, 1  ;;  %v9745_v53 = vld [vmem:[%s7855_s23 + $0x88] sm:$0xff]  ;;  %v9753_v21 = vld [vmem:[%s7855_s23 + $0x90] sm:$0xff] }
 0x54a   : > { %v3542_v50 = vrot.slane %v3541_v43, 2  ;;  %v3549_v62 = vrot.slane %v3548_v8, 4  ;;  %v3475_v48 = vmul.f32 %v9634_v36, %v3371_v23  ;;  %5220 = vbcast.lane.b32.xlu0 %v10377_v6, 256  ;;  %5213 = vbcast.lane.b32.xlu1 %v10372_v32, 264  ;;  %v3534_v1 = vadd.f32 %v3533_v3, %v3532_v26 }
 0x54b   : > { %v3634_v49 = vrot.slane %v3633_v42, 1  ;;  %v3517_v16 = vrot.slane %v3516_v12, 1  ;;  %v3509_v58 = vadd.f32 %v3508_v22, %v3507_v38  ;;  %v3526_v40 = vrot.slane %v3525_v41, 1 }
 0x54c   : > { %v3550_v19 = vadd.f32 %v3549_v62, %v3548_v8  ;;  %v3556_v33 = vsel %vm1863_vm2, %v3475_v48, 0.0  ;;  %v4327_v4 = vpop.permute.xlu0 %4326  ;;  %v3543_v18 = vadd.f32 %v3542_v50, %v3541_v43  ;;  %v3664_v26 = vsel %vm2150_vm11, %v3626_v35, %v3663_v44  ;;  %v9758_v48 = vld [vmem:[%s7855_s23 + $0x98] sm:$0xff] }
 0x54d   : > { %v3557_v34 = vadd.f32 %v3556_v33, %v3555_v60  ;;  %v4309_v32 = vpop.permute.xlu1 %4308  ;;  %v4491_v13 = vsel %vm1863_vm2, %v4403_v5, 0.0  ;;  %v4405_v43 = vmul.f32 %v9753_v21, %v4316_v57  ;;  %v3500_v3 = vadd.f32 %v3499_v39, %v3498_v47  ;;  %v9765_v33 = vld [vmem:[%s7855_s23 + $0xa0] sm:$0xff] }
 0x54e   : > { %v3551_v46 = vrot.slane %v3550_v19, 2  ;;  %v4404_v37 = vmul.f32 %v9745_v53, %v4309_v32  ;;  %5308 = vbcast.lane.b32.xlu0 %v10378_v2, 256  ;;  %5301 = vbcast.lane.b32.xlu1 %v10375_v29, 264  ;;  %v3535_v23 = vrot.slane %v3534_v1, 1  ;;  %v3518_v50 = vadd.f32 %v3517_v16, %v3516_v12 }
 0x54f   : > { %v3558_v10 = vrot.slane %v3557_v34, 4  ;;  %v3544_v62 = vrot.slane %v3543_v18, 1  ;;  %v3635_v35 = vadd.f32 %v3634_v49, %v3633_v42  ;;  %v3652_v57 = vsel %vm2140_vm6, %v3509_v58, %v3500_v3 }
 0x550   : > { %v3552_v25 = vadd.f32 %v3551_v46, %v3550_v19  ;;  %v4492_v8 = vsel %vm1863_vm2, %v4404_v37, 0.0  ;;  %v4338_v55 = vpop.permute.xlu0 %4337  ;;  %v3527_v5 = vadd.f32 %v3526_v40, %v3525_v41  ;;  %v4500_v19 = vsel %vm1863_vm2, %v4405_v43, 0.0  ;;  %v9773_v41 = vld [vmem:[%s7855_s23 + $0xa8] sm:$0xff] }
 0x551   : > { %v3559_v29 = vadd.f32 %v3558_v10, %v3557_v34  ;;  %v4493_v38 = vadd.f32 %v4492_v8, %v4491_v13  ;;  %v4320_v61 = vpop.permute.xlu1 %4319  ;;  %v4407_v12 = vmul.f32 %v9765_v33, %v4327_v4  ;;  %v3536_v32 = vadd.f32 %v3535_v23, %v3534_v1  ;;  %v9780_v8 = vld [vmem:[%s7855_s23 + $0xb0] sm:$0xff] }
 0x552   : > { %v4406_v22 = vmul.f32 %v9758_v48, %v4320_v61  ;;  %5224 = vbcast.lane.b32.xlu1 %v10377_v6, 264  ;;  %v3553_v44 = vrot.slane %v3552_v25, 1  ;;  %v3653_v46 = vsel %vm2142_vm7, %v3518_v50, %v3652_v57  ;;  %v3545_v37 = vadd.f32 %v3544_v62, %v3543_v18  ;;  %v9787_v50 = vld [vmem:[%s7855_s23 + $0xb8] sm:$0xff] }
 0x553   : > { %v3560_v60 = vrot.slane %v3559_v29, 2  ;;  %v4494_v47 = vrot.slane %v4493_v38, 4  ;;  %v3665_v4 = vsel %vm2152_vm12, %v3635_v35, %v3664_v26  ;;  %v4509_v43 = vsel %vm1863_vm2, %v4407_v12, 0.0 }
 0x554   : > { %v4501_v39 = vsel %vm1863_vm2, %v4406_v22, 0.0  ;;  %v9769_v34 = vpop.permute.xlu0 %4216  ;;  %v3554_v40 = vadd.f32 %v3553_v44, %v3552_v25  ;;  %v4409_v3 = vmul.f32 %v9780_v8, %v4338_v55 }
 0x555   : > { %v3561_v42 = vadd.f32 %v3560_v60, %v3559_v29  ;;  %v4495_v6 = vadd.f32 %v4494_v47, %v4493_v38  ;;  %v4502_v49 = vadd.f32 %v4501_v39, %v4500_v19  ;;  %v4331_v16 = vpop.permute.xlu1 %4330  ;;  %v3654_v29 = vsel %vm2144_vm8, %v3527_v5, %v3653_v46 }
 0x556   : > { %v4408_v58 = vmul.f32 %v9773_v41, %v4331_v16  ;;  %5312 = vbcast.lane.b32.xlu1 %v10378_v2, 264  ;;  %v3655_v25 = vsel %vm2146_vm9, %v3536_v32, %v3654_v29  ;;  %v4518_v60 = vsel %vm1863_vm2, %v4409_v3, 0.0 }
 0x557   : > { %v3562_v10 = vrot.slane %v3561_v42, 1  ;;  %v4496_v1 = vrot.slane %v4495_v6, 2  ;;  %v4503_v13 = vrot.slane %v4502_v49, 4  ;;  %v3656_v55 = vsel %vm2148_vm10, %v3545_v37, %v3655_v25 }
 0x558   : > { %v4510_v18 = vsel %vm1863_vm2, %v4408_v58, 0.0  ;;  %v4228_v23 = vpop.permute.xlu0 %4227  ;;  %v3657_v44 = vsel %vm2150_vm11, %v3554_v40, %v3656_v55 }
 0x559   : > { %v4497_v38 = vadd.f32 %v4496_v1, %v4495_v6  ;;  %v4504_v2 = vadd.f32 %v4503_v13, %v4502_v49  ;;  %v4511_v61 = vadd.f32 %v4510_v18, %v4509_v43  ;;  %v4342_v26 = vpop.permute.xlu1 %4341  ;;  %v3563_v22 = vadd.f32 %v3562_v10, %v3561_v42 }
 0x55a   : > { %v4410_v62 = vmul.f32 %v9787_v50, %v4342_v26  ;;  %3668 = vrot.lane.b32.xlu1 %v3665_v4, %s7189_s6  ;;  %v4389_v13 = vmul.f32 %v9471_v14, %v4228_v23 }
 0x55b   : > { %v4505_v35 = vrot.slane %v4504_v2, 2  ;;  %v4512_v57 = vrot.slane %v4511_v61, 4  ;;  %v3658_v5 = vsel %vm2152_vm12, %v3563_v22, %v3657_v44  ;;  %v4498_v12 = vrot.slane %v4497_v38, 1 }
 0x55c   : > { %v4519_v47 = vsel %vm1863_vm2, %v4410_v62, 0.0  ;;  %v4239_v19 = vpop.permute.xlu0 %4238  ;;  %3666 = vrot.lane.b32.xlu0 %v3658_v5, %s7189_s6  ;;  %v4428_v14 = vsel %vm1863_vm2, %v4389_v13, 0.0 }
 0x55d   : > { %v4506_v39 = vadd.f32 %v4505_v35, %v4504_v2  ;;  %v4513_v32 = vadd.f32 %v4512_v57, %v4511_v61  ;;  %v4520_v6 = vadd.f32 %v4519_v47, %v4518_v60  ;;  %v4221_v42 = vpop.permute.xlu1 %4220  ;;  %v4499_v58 = vadd.f32 %v4498_v12, %v4497_v38 }
 0x55e   : > { %v4388_v2 = vmul.f32 %v9483_v31, %v4221_v42  ;;  %v4387_v38 = vmul.f32 %v9507_v0, %v9769_v34  ;;  %v4391_v22 = vmul.f32 %v9488_v7, %v4239_v19 }
 0x55f   : > { %v4507_v49 = vrot.slane %v4506_v39, 1  ;;  %v4514_v16 = vrot.slane %v4513_v32, 2  ;;  %v4521_v46 = vrot.slane %v4520_v6, 4 }
 0x560   : > { %v4250_v37 = vpop.permute.xlu0 %4249  ;;  %v4420_v57 = vsel %vm1863_vm2, %v4388_v2, 0.0  ;;  %v4419_v5 = vsel %vm1863_vm2, %v4387_v38, 0.0  ;;  %v4437_v7 = vsel %vm1863_vm2, %v4391_v22, 0.0 }
 0x561   : > { %v4508_v4 = vadd.f32 %v4507_v49, %v4506_v39  ;;  %v4515_v40 = vadd.f32 %v4514_v16, %v4513_v32  ;;  %v4522_v10 = vadd.f32 %v4521_v46, %v4520_v6  ;;  %v4232_v1 = vpop.permute.xlu1 %4231  ;;  %v4393_v60 = vmul.f32 %v9539_v56, %v4250_v37 }
 0x562   : > { %v4390_v43 = vmul.f32 %v9475_v28, %v4232_v1  ;;  %v4421_v39 = vadd.f32 %v4420_v57, %v4419_v5 }
 0x563   : > { %v4586_v3 = vsel %vm2140_vm6, %v4508_v4, %v4499_v58  ;;  %v4516_v18 = vrot.slane %v4515_v40, 1  ;;  %v4523_v29 = vrot.slane %v4522_v10, 2  ;;  %v4446_v49 = vsel %vm1863_vm2, %v4393_v60, 0.0 }
 0x564   : > { %v4429_v61 = vsel %vm1863_vm2, %v4390_v43, 0.0  ;;  %v4261_v26 = vpop.permute.xlu0 %4260  ;;  %v4422_v4 = vrot.slane %v4421_v39, 4 }
 0x565   : > { %v4517_v25 = vadd.f32 %v4516_v18, %v4515_v40  ;;  %v4524_v62 = vadd.f32 %v4523_v29, %v4522_v10  ;;  %v4243_v55 = vpop.permute.xlu1 %4242  ;;  %v4430_v44 = vadd.f32 %v4429_v61, %v4428_v14  ;;  %v4395_v56 = vmul.f32 %v9567_v54, %v4261_v26 }
 0x566   : > { %v4392_v28 = vmul.f32 %v9530_v9, %v4243_v55  ;;  %v4423_v2 = vadd.f32 %v4422_v4, %v4421_v39 }
 0x567   : > { %v4587_v23 = vsel %vm2142_vm7, %v4517_v25, %v4586_v3  ;;  %v4525_v35 = vrot.slane %v4524_v62, 1  ;;  %v4431_v6 = vrot.slane %v4430_v44, 4 }
 0x568   : > { %v4438_v47 = vsel %vm1863_vm2, %v4392_v28, 0.0  ;;  %v4272_v34 = vpop.permute.xlu0 %4271 }
 0x569   : > { %v4526_v12 = vadd.f32 %v4525_v35, %v4524_v62  ;;  %v4254_v19 = vpop.permute.xlu1 %4253  ;;  %v4439_v32 = vadd.f32 %v4438_v47, %v4437_v7  ;;  %v4432_v1 = vadd.f32 %v4431_v6, %v4430_v44  ;;  %v4397_v43 = vmul.f32 %v9588_v20, %v4272_v34 }
 0x56a   : > { %v4394_v9 = vmul.f32 %v9553_v17, %v4254_v19  ;;  %v4455_v17 = vsel %vm1863_vm2, %v4395_v56, 0.0  ;;  %v4424_v35 = vrot.slane %v4423_v2, 2 }
 0x56b   : > { %v9815_v42 = vsel %vm2144_vm8, %v4526_v12, %v4587_v23  ;;  %v4440_v40 = vrot.slane %v4439_v32, 4  ;;  %v4433_v38 = vrot.slane %v4432_v1, 2 }
 0x56c   : > { %v4447_v16 = vsel %vm1863_vm2, %v4394_v9, 0.0  ;;  %v4283_v46 = vpop.permute.xlu0 %4282  ;;  %v4425_v9 = vadd.f32 %v4424_v35, %v4423_v2 }
 0x56d   : > { %v4448_v37 = vadd.f32 %v4447_v16, %v4446_v49  ;;  %v4265_v58 = vpop.permute.xlu1 %4264  ;;  %v4441_v61 = vadd.f32 %v4440_v40, %v4439_v32  ;;  %v4399_v22 = vmul.f32 %v10373_v15, %v4283_v46  ;;  %v4434_v60 = vadd.f32 %v4433_v38, %v4432_v1 }
 0x56e   : > { %v4396_v10 = vmul.f32 %v9578_v45, %v4265_v58  ;;  %v4464_v45 = vsel %vm1863_vm2, %v4397_v43, 0.0 }
 0x56f   : > { %v4449_v13 = vrot.slane %v4448_v37, 4  ;;  %v4442_v57 = vrot.slane %v4441_v61, 2  ;;  %v4473_v34 = vsel %vm1863_vm2, %v4399_v22, 0.0 }
 0x570   : > { %v4456_v3 = vsel %vm1863_vm2, %v4396_v10, 0.0  ;;  %v4294_v18 = vpop.permute.xlu0 %4293 }
 0x571   : > { %v4457_v29 = vadd.f32 %v4456_v3, %v4455_v17  ;;  %v4276_v54 = vpop.permute.xlu1 %4275  ;;  %v4450_v25 = vadd.f32 %v4449_v13, %v4448_v37  ;;  %v4401_v12 = vmul.f32 %v10376_v11, %v4294_v18  ;;  %v4443_v6 = vadd.f32 %v4442_v57, %v4441_v61 }
 0x572   : > { %v4398_v26 = vmul.f32 %v9597_v30, %v4276_v54  ;;  %v4426_v3 = vrot.slane %v4425_v9, 1 }
 0x573   : > { %v4458_v62 = vrot.slane %v4457_v29, 4  ;;  %v4451_v47 = vrot.slane %v4450_v25, 2  ;;  %v4482_v58 = vsel %vm1863_vm2, %v4401_v12, 0.0  ;;  %v4444_v43 = vrot.slane %v4443_v6, 1 }
 0x574   : > { %v4465_v55 = vsel %vm1863_vm2, %v4398_v26, 0.0  ;;  %v5144_v14 = vpop.permute.xlu0 %5143 }
 0x575   : > { %v4459_v20 = vadd.f32 %v4458_v62, %v4457_v29  ;;  %v4466_v28 = vadd.f32 %v4465_v55, %v4464_v45  ;;  %v4287_v23 = vpop.permute.xlu1 %4286  ;;  %v4452_v56 = vadd.f32 %v4451_v47, %v4450_v25  ;;  %v5314_v11 = vmul.f32 %v9507_v0, %v5144_v14 }
 0x576   : > { %v4400_v44 = vmul.f32 %v10374_v24, %v4287_v23  ;;  %v4435_v24 = vrot.slane %v4434_v60, 1  ;;  %v4445_v14 = vadd.f32 %v4444_v43, %v4443_v6 }
 0x577   : > { %v4467_v30 = vrot.slane %v4466_v28, 4  ;;  %v4460_v5 = vrot.slane %v4459_v20, 2  ;;  %v4453_v18 = vrot.slane %v4452_v56, 1  ;;  %v5346_v26 = vsel %vm1863_vm2, %v5314_v11, 0.0 }
 0x578   : > { %v4474_v15 = vsel %vm1863_vm2, %v4400_v44, 0.0  ;;  %v9832_v7 = vpop.permute.xlu0 %5154  ;;  %v4436_v2 = vadd.f32 %v4435_v24, %v4434_v60 }
 0x579   : > { %v4468_v19 = vadd.f32 %v4467_v30, %v4466_v28  ;;  %v4475_v39 = vadd.f32 %v4474_v15, %v4473_v34  ;;  %v4298_v32 = vpop.permute.xlu1 %4297  ;;  %v4461_v37 = vadd.f32 %v4460_v5, %v4459_v20  ;;  %v4427_v20 = vadd.f32 %v4426_v3, %v4425_v9 }
 0x57a   : > { %v4402_v49 = vmul.f32 %v9634_v36, %v4298_v32  ;;  %v4454_v28 = vadd.f32 %v4453_v18, %v4452_v56 }
 0x57b   : > { %v4469_v16 = vrot.slane %v4468_v19, 2  ;;  %v4476_v46 = vrot.slane %v4475_v39, 4  ;;  %v4462_v61 = vrot.slane %v4461_v37, 1  ;;  %v4579_v44 = vsel %vm2140_vm6, %v4436_v2, %v4427_v20 }
 0x57c   : > { %v4483_v4 = vsel %vm1863_vm2, %v4402_v49, 0.0  ;;  %v9838_v40 = vpop.permute.xlu0 %5231  ;;  %v4580_v34 = vsel %vm2142_vm7, %v4445_v14, %v4579_v44 }
 0x57d   : > { %v4470_v10 = vadd.f32 %v4469_v16, %v4468_v19  ;;  %v4477_v1 = vadd.f32 %v4476_v46, %v4475_v39  ;;  %v4484_v13 = vadd.f32 %v4483_v4, %v4482_v58  ;;  %v5148_v17 = vpop.permute.xlu1 %5147  ;;  %v4463_v35 = vadd.f32 %v4462_v61, %v4461_v37  ;;  %v6620_v58 = vld [vmem:[%s7855_s23 + $0x18] sm:$0xff] }
 0x57e   : > { %v5315_v36 = vmul.f32 %v9483_v31, %v5148_v17  ;;  %v4581_v39 = vsel %vm2144_vm8, %v4454_v28, %v4580_v34  ;;  %v5330_v61 = vmul.f32 %v9740_v52, %v9838_v40  ;;  %v9890_v34 = vld [vmem:[%s7855_s23 + $0xc0] sm:$0xff] }
 0x57f   : > { %v4478_v29 = vrot.slane %v4477_v1, 2  ;;  %v4485_v54 = vrot.slane %v4484_v13, 4  ;;  %v4471_v25 = vrot.slane %v4470_v10, 1  ;;  %v4582_v6 = vsel %vm2146_vm9, %v4463_v35, %v4581_v39  ;;  %v6623_v35 = vld [vmem:[%s7855_s23 + $0x20] sm:$0xff] }
 0x580   : > { %v5347_v0 = vsel %vm1863_vm2, %v5315_v36, 0.0  ;;  %v5243_v38 = vpop.permute.xlu0 %5242 }
 0x581   : > { %v4479_v62 = vadd.f32 %v4478_v29, %v4477_v1  ;;  %v4486_v45 = vadd.f32 %v4485_v54, %v4484_v13  ;;  %v5348_v22 = vadd.f32 %v5347_v0, %v5346_v26  ;;  %v5159_v55 = vpop.permute.xlu1 %5158  ;;  %v4472_v60 = vadd.f32 %v4471_v25, %v4470_v10  ;;  %v6621_v1 = vld [vmem:[%s7855_s23 + $0x10] sm:$0xff] }
 0x582   : > { %v5317_v11 = vmul.f32 %v6620_v58, %v5159_v55  ;;  %v5316_v13 = vmul.f32 %v6621_v1, %v9832_v7  ;;  %v5418_v55 = vsel %vm1863_vm2, %v5330_v61, 0.0  ;;  %v5332_v14 = vmul.f32 %v9753_v21, %v5243_v38 }
 0x583   : > { %v4480_v31 = vrot.slane %v4479_v62, 1  ;;  %v4487_v23 = vrot.slane %v4486_v45, 2  ;;  %v4583_v16 = vsel %vm2148_vm10, %v4472_v60, %v4582_v6  ;;  %v5349_v7 = vrot.slane %v5348_v22, 4 }
 0x584   : > { %v5166_v57 = vpop.permute.xlu0 %5165  ;;  %v5356_v17 = vsel %vm1863_vm2, %v5317_v11, 0.0  ;;  %v5355_v3 = vsel %vm1863_vm2, %v5316_v13, 0.0  ;;  %v5427_v21 = vsel %vm1863_vm2, %v5332_v14, 0.0 }
 0x585   : > { %v4488_v47 = vadd.f32 %v4487_v23, %v4486_v45  ;;  %v5236_v30 = vpop.permute.xlu1 %5235  ;;  %v4481_v5 = vadd.f32 %v4480_v31, %v4479_v62  ;;  %v5357_v18 = vadd.f32 %v5356_v17, %v5355_v3  ;;  %v6622_v31 = vld [vmem:[%s7855_s23 + $0x28] sm:$0xff]  ;;  %v5318_v44 = vmul.f32 %v6623_v35, %v5166_v57 }
 0x586   : > { %v5331_v2 = vmul.f32 %v9745_v53, %v5236_v30  ;;  %v5350_v53 = vadd.f32 %v5349_v7, %v5348_v22 }
 0x587   : > { %v4489_v12 = vrot.slane %v4488_v47, 1  ;;  %v9845_v15 = vpop.f32.mrb[12].mxu0  ;;  %v9847_v19 = vpop.f32.mrb[12].mxu1  ;;  %v4584_v46 = vsel %vm2150_vm11, %v4481_v5, %v4583_v16  ;;  %v5358_v26 = vrot.slane %v5357_v18, 4 }
 0x588   : > { %v9850_v32 = vpop.f32.mrb[13].mxu0  ;;  %v9852_v9 = vpop.f32.mrb[13].mxu1  ;;  %v5419_v62 = vsel %vm1863_vm2, %v5331_v2, 0.0  ;;  %v5351_v22 = vrot.slane %v5350_v53, 2  ;;  %v9907_v2 = vld [vmem:[%s7855_s23 + $0xd0] sm:$0xff] }
 0x589   : > { %v9855_v49 = vpop.permute.xlu0 %5253  ;;  %v5247_v24 = vpop.permute.xlu1 %5246  ;;  %v4490_v56 = vadd.f32 %v4489_v12, %v4488_v47  ;;  %v5359_v20 = vadd.f32 %v5358_v26, %v5357_v18  ;;  %v5420_v28 = vadd.f32 %v5419_v62, %v5418_v55  ;;  %v9885_v47 = vld [vmem:[%s7855_s23 + $0xc8] sm:$0xff]  ;;  %v6628_v62 = vld [vmem:[%s7855_s23 + $0x38] sm:$0xff] }
 0x58a   : > { %v5333_v45 = vmul.f32 %v9758_v48, %v5247_v24  ;;  %v5364_v24 = vsel %vm1863_vm2, %v5318_v44, 0.0 }
 0x58b   : > { %v4585_v37 = vsel %vm2152_vm12, %v4490_v56, %v4584_v46  ;;  %v5360_v38 = vrot.slane %v5359_v20, 2  ;;  %v5421_v30 = vrot.slane %v5420_v28, 4 }
 0x58c   : > { %4593 = vrot.lane.b32.xlu0 %v4585_v37, %s7190_s27  ;;  %v5428_v60 = vsel %vm1863_vm2, %v5333_v45, 0.0  ;;  %v5352_v37 = vadd.f32 %v5351_v22, %v5350_v53 }
 0x58d   : > { %v4349_v4 = vpop.permute.xlu0 %4348  ;;  %v5170_v10 = vpop.permute.xlu1 %5169  ;;  %v5429_v6 = vadd.f32 %v5428_v60, %v5427_v21  ;;  %v5361_v16 = vadd.f32 %v5360_v38, %v5359_v20  ;;  %v5422_v58 = vadd.f32 %v5421_v30, %v5420_v28  ;;  %v9925_v30 = vld [vmem:[%s7855_s23 + $0xe0] sm:$0xff] }
 0x58e   : > { %v5319_v52 = vmul.f32 %v6622_v31, %v5170_v10  ;;  %v4411_v5 = vmul.f32 %v9890_v34, %v4349_v4  ;;  %v9900_v10 = vld [vmem:[%s7855_s23 + $0xd8] sm:$0xff]  ;;  %v5353_v55 = vrot.slane %v5352_v37, 1 }
 0x58f   : > { %v5430_v17 = vrot.slane %v5429_v6, 4  ;;  %v5362_v26 = vrot.slane %v5361_v16, 1  ;;  %v5423_v14 = vrot.slane %v5422_v58, 2 }
 0x590   : > { %v5365_v12 = vsel %vm1863_vm2, %v5319_v52, 0.0  ;;  %v4527_v11 = vsel %vm1863_vm2, %v4411_v5, 0.0 }
 0x591   : > { %v9865_v43 = vpop.permute.xlu0 %5176  ;;  %v5258_v36 = vpop.permute.xlu1 %5257  ;;  %v5366_v46 = vadd.f32 %v5365_v12, %v5364_v24  ;;  %v5431_v31 = vadd.f32 %v5430_v17, %v5429_v6  ;;  %v9930_v6 = vadd.f32 %v5423_v14, %v5422_v58 }
 0x592   : > { %v5335_v3 = vmul.f32 %v9773_v41, %v5258_v36  ;;  %v6629_v41 = vld [vmem:[%s7855_s23 + $0x30] sm:$0xff] }
 0x593   : > { %v5367_v7 = vrot.slane %v5366_v46, 4  ;;  %v5320_v36 = vmul.f32 %v6629_v41, %v9865_v43  ;;  %v5354_v43 = vadd.f32 %v5353_v55, %v5352_v37  ;;  %v5432_v24 = vrot.slane %v5431_v31, 2 }
 0x595   : > { %v9868_v29 = vpop.permute.xlu0 %5264  ;;  %v4353_v54 = vpop.permute.xlu1 %4352  ;;  %v5368_v44 = vadd.f32 %v5367_v7, %v5366_v46  ;;  %v6633_v7 = vld [vmem:[%s7855_s23 + $0x40] sm:$0xff]  ;;  %v9950_v55 = vadd.f32 %v5432_v24, %v5431_v31 }
 0x596   : > { %v4412_v48 = vmul.f32 %v9885_v47, %v4353_v54  ;;  %v5334_v54 = vmul.f32 %v9765_v33, %v9855_v49  ;;  %v5437_v33 = vsel %vm1863_vm2, %v5335_v3, 0.0  ;;  %v9937_v3 = vld [vmem:[%s7855_s23 + $0xe8] sm:$0xff] }
 0x597   : > { %v5369_v58 = vrot.slane %v5368_v44, 2 }
 0x598   : > { %v4528_v56 = vsel %vm1863_vm2, %v4412_v48, 0.0 }
 0x599   : > { %v4360_v0 = vpop.permute.xlu0 %4359  ;;  %v5181_v25 = vpop.permute.xlu1 %5180  ;;  %v4529_v18 = vadd.f32 %v4528_v56, %v4527_v11  ;;  %v5373_v56 = vsel %vm1863_vm2, %v5320_v36, 0.0 }
 0x59a   : > { %v4413_v61 = vmul.f32 %v9907_v2, %v4360_v0  ;;  %v5321_v45 = vmul.f32 %v6628_v62, %v5181_v25  ;;  %v5436_v0 = vsel %vm1863_vm2, %v5334_v54, 0.0  ;;  %v5363_v25 = vadd.f32 %v5362_v26, %v5361_v16 }
 0x59b   : > { %v4530_v49 = vrot.slane %v4529_v18, 4  ;;  %v5438_v22 = vadd.f32 %v5437_v33, %v5436_v0  ;;  %v6634_v33 = vld [vmem:[%s7855_s23 + $0x58] sm:$0xff]  ;;  %v6635_v0 = vld [vmem:[%s7855_s23 + $0x50] sm:$0xff] }
 0x59c   : > { %v4536_v52 = vsel %vm1863_vm2, %v4413_v61, 0.0  ;;  %v5374_v60 = vsel %vm1863_vm2, %v5321_v45, 0.0  ;;  %v9941_v54 = vsel %vm2140_vm6, %v5363_v25, %v5354_v43  ;;  %v5336_v61 = vmul.f32 %v9780_v8, %v9868_v29 }
 0x59d   : > { %v9878_v40 = vpop.permute.xlu0 %5187  ;;  %v9880_v23 = vpop.permute.xlu1 %5268  ;;  %v4531_v16 = vadd.f32 %v4530_v49, %v4529_v18  ;;  %v5375_v11 = vadd.f32 %v5374_v60, %v5373_v56  ;;  %v5439_v26 = vrot.slane %v5438_v22, 4  ;;  %v5425_v45 = vrot.slane %v9930_v6, 1 }
 0x59e   : > { %v5337_v37 = vmul.f32 %v9787_v50, %v9880_v23  ;;  %v5322_v50 = vmul.f32 %v6633_v7, %v9878_v40  ;;  %v9957_v43 = vadd.f32 %v5369_v58, %v5368_v44 }
 0x59f   : > { %v4532_v14 = vrot.slane %v4531_v16, 2  ;;  %v5376_v8 = vrot.slane %v5375_v11, 4  ;;  %v5440_v31 = vadd.f32 %v5439_v26, %v5438_v22 }
 0x5a0   : > { %v5446_v29 = vsel %vm1863_vm2, %v5337_v37, 0.0  ;;  %v5382_v24 = vsel %vm1863_vm2, %v5322_v50, 0.0 }
 0x5a1   : > { %v9894_v39 = vpop.permute.xlu0 %5275  ;;  %v4364_v57 = vpop.permute.xlu1 %4363  ;;  %v5441_v26 = vrot.slane %v5440_v31, 2 }
 0x5a2   : > { %v4414_v4 = vmul.f32 %v9900_v10, %v4364_v57  ;;  %v5338_v37 = vmul.f32 %v9890_v34, %v9894_v39  ;;  %v5371_v34 = vrot.slane %v9957_v43, 1  ;;  %v9971_v39 = vld [vmem:[%s7855_s23 + $0xf0] sm:$0xff] }
 0x5a4   : > { %v4537_v20 = vsel %vm1863_vm2, %v4414_v4, 0.0  ;;  %v6631_v4 = vld [vmem:[%s7855_s23 + $0x48] sm:$0xff] }
 0x5a5   : > { %v4371_v1 = vpop.permute.xlu0 %4370  ;;  %v5192_v13 = vpop.permute.xlu1 %5191  ;;  %v4538_v48 = vadd.f32 %v4537_v20, %v4536_v52 }
 0x5a6   : > { %v4415_v5 = vmul.f32 %v9925_v30, %v4371_v1  ;;  %v5323_v17 = vmul.f32 %v6631_v4, %v5192_v13 }
 0x5a7   : > { %v4539_v18 = vrot.slane %v4538_v48, 4 }
 0x5a8   : > { %v4545_v23 = vsel %vm1863_vm2, %v4415_v5, 0.0  ;;  %v5383_v36 = vsel %vm1863_vm2, %v5323_v17, 0.0  ;;  %v5445_v5 = vsel %vm1863_vm2, %v5336_v61, 0.0  ;;  %v4533_v17 = vadd.f32 %v4532_v14, %v4531_v16 }
 0x5a9   : > { %v5199_v53 = vpop.permute.xlu0 %5198  ;;  %v5280_v28 = vpop.permute.xlu1 %5279  ;;  %v4540_v40 = vadd.f32 %v4539_v18, %v4538_v48  ;;  %v5384_v4 = vadd.f32 %v5383_v36, %v5382_v24  ;;  %v5434_v18 = vrot.slane %v9950_v55, 1 }
 0x5aa   : > { %v5324_v52 = vmul.f32 %v6635_v0, %v5199_v53  ;;  %v5339_v25 = vmul.f32 %v9885_v47, %v5280_v28  ;;  %v5377_v47 = vadd.f32 %v5376_v8, %v5375_v11  ;;  %v4534_v8 = vrot.slane %v4533_v17, 1  ;;  %v6638_v0 = vld [vmem:[%s7855_s23 + $0x60] sm:$0xff] }
 0x5ab   : > { %v9917_v35 = vpop.f32.mrb[14].mxu0  ;;  %v9920_v21 = vpop.f32.mrb[14].mxu1  ;;  %v4541_v22 = vrot.slane %v4540_v40, 2  ;;  %v5385_v50 = vrot.slane %v5384_v4, 4 }
 0x5ac   : > { %v9922_v38 = vpop.f32.mrb[15].mxu0  ;;  %v9928_v57 = vpop.f32.mrb[15].mxu1  ;;  %v5455_v58 = vsel %vm1863_vm2, %v5339_v25, 0.0 }
 0x5ad   : > { %v5287_v12 = vpop.permute.xlu0 %5286  ;;  %v4375_v46 = vpop.permute.xlu1 %4374 }
 0x5ae   : > { %v4416_v1 = vmul.f32 %v9937_v3, %v4375_v46  ;;  %v5447_v46 = vadd.f32 %v5446_v29, %v5445_v5  ;;  %v5340_v61 = vmul.f32 %v9907_v2, %v5287_v12  ;;  %v9977_v12 = vld [vmem:[%s7855_s23 + $0xf8] sm:$0xff]  ;;  %v5378_v29 = vrot.slane %v5377_v47, 2 }
 0x5b0   : > { %v4546_v13 = vsel %vm1863_vm2, %v4416_v1, 0.0  ;;  %v5391_v1 = vsel %vm1863_vm2, %v5324_v52, 0.0  ;;  %v5448_v7 = vrot.slane %v5447_v46, 4  ;;  %v5463_v36 = vsel %vm1863_vm2, %v5340_v61, 0.0 }
 0x5b1   : > { %v4382_v62 = vpop.permute.xlu0 %4381  ;;  %v4547_v20 = vadd.f32 %v4546_v13, %v4545_v23  ;;  %v5203_v41 = vpop.permute.xlu1 %5202  ;;  %v9989_v61 = vadd.f32 %v5378_v29, %v5377_v47 }
 0x5b2   : > { %v5325_v49 = vmul.f32 %v6634_v33, %v5203_v41  ;;  %v4417_v16 = vmul.f32 %v9971_v39, %v4382_v62  ;;  %v4542_v62 = vadd.f32 %v4541_v22, %v4540_v40  ;;  %v9986_v5 = vadd.f32 %v5448_v7, %v5447_v46  ;;  %v6639_v40 = vld [vmem:[%s7855_s23 + $0x68] sm:$0xff] }
 0x5b3   : > { %v4548_v60 = vrot.slane %v4547_v20, 4 }
 0x5b4   : > { %v5392_v48 = vsel %vm1863_vm2, %v5325_v49, 0.0  ;;  %v4554_v33 = vsel %vm1863_vm2, %v4417_v16, 0.0  ;;  %v4543_v16 = vrot.slane %v4542_v62, 1  ;;  %v5450_v7 = vrot.slane %v9986_v5, 2 }
 0x5b5   : > { %v5210_v56 = vpop.permute.xlu0 %5209  ;;  %v5291_v53 = vpop.permute.xlu1 %5290  ;;  %v4549_v28 = vadd.f32 %v4548_v60, %v4547_v20  ;;  %v5393_v11 = vadd.f32 %v5392_v48, %v5391_v1  ;;  %v9984_v60 = vadd.f32 %v5441_v26, %v5440_v31 }
 0x5b6   : > { %v5341_v44 = vmul.f32 %v9900_v10, %v5291_v53  ;;  %v5454_v10 = vsel %vm1863_vm2, %v5338_v37, 0.0  ;;  %v5326_v52 = vmul.f32 %v6638_v0, %v5210_v56  ;;  %v5386_v53 = vadd.f32 %v5385_v50, %v5384_v4 }
 0x5b7   : > { %v5456_v14 = vadd.f32 %v5455_v58, %v5454_v10  ;;  %v4550_v20 = vrot.slane %v4549_v28, 2  ;;  %v5394_v49 = vrot.slane %v5393_v11, 4  ;;  %v4535_v58 = vadd.f32 %v4534_v8, %v4533_v17 }
 0x5b8   : > { %v5464_v2 = vsel %vm1863_vm2, %v5341_v44, 0.0  ;;  %v5400_v31 = vsel %vm1863_vm2, %v5326_v52, 0.0  ;;  %v5387_v17 = vrot.slane %v5386_v53, 2  ;;  %v4544_v8 = vadd.f32 %v4543_v16, %v4542_v62 }
 0x5b9   : > { %v5298_v23 = vpop.permute.xlu0 %5297  ;;  %v4386_v13 = vpop.permute.xlu1 %4385  ;;  %v5465_v24 = vadd.f32 %v5464_v2, %v5463_v36  ;;  %v5457_v44 = vrot.slane %v5456_v14, 4  ;;  %v4551_v1 = vadd.f32 %v4550_v20, %v4549_v28 }
 0x5ba   : > { %v4418_v41 = vmul.f32 %v9977_v12, %v4386_v13  ;;  %v5395_v13 = vadd.f32 %v5394_v49, %v5393_v11  ;;  %v5342_v46 = vmul.f32 %v9925_v30, %v5298_v23  ;;  %v4589_v30 = vsel %vm2146_vm9, %v4535_v58, %v9815_v42 }
 0x5bb   : > { %v5466_v4 = vrot.slane %v5465_v24, 4  ;;  %v5458_v47 = vadd.f32 %v5457_v44, %v5456_v14  ;;  %v4552_v2 = vrot.slane %v4551_v1, 1 }
 0x5bc   : > { %v4555_v25 = vsel %vm1863_vm2, %v4418_v41, 0.0  ;;  %v5396_v23 = vrot.slane %v5395_v13, 2  ;;  %v5472_v36 = vsel %vm1863_vm2, %v5342_v46, 0.0 }
 0x5bd   : > { %v4556_v37 = vadd.f32 %v4555_v25, %v4554_v33  ;;  %v5214_v48 = vpop.permute.xlu1 %5213  ;;  %v5221_v56 = vpop.permute.xlu0 %5220  ;;  %v6640_v33 = vld [vmem:[%s7855_s23 + $0x70] sm:$0xff]  ;;  %v5467_v52 = vadd.f32 %v5466_v4, %v5465_v24  ;;  %v5459_v44 = vrot.slane %v5458_v47, 2 }
 0x5be   : > { %v5327_v22 = vmul.f32 %v6639_v40, %v5214_v48  ;;  %v5328_v49 = vmul.f32 %v6640_v33, %v5221_v56  ;;  %v5388_v48 = vadd.f32 %v5387_v17, %v5386_v53  ;;  %v4553_v40 = vadd.f32 %v4552_v2, %v4551_v1 }
 0x5bf   : > { %v4557_v10 = vrot.slane %v4556_v37, 4  ;;  %v5397_v46 = vadd.f32 %v5396_v23, %v5395_v13  ;;  %v5468_v4 = vrot.slane %v5467_v52, 2  ;;  %v5380_v1 = vrot.slane %v9989_v61, 1 }
 0x5c0   : > { %v5401_v26 = vsel %vm1863_vm2, %v5327_v22, 0.0  ;;  %v6641_v22 = vld [vmem:[%s7855_s23 + $0x78] sm:$0xff]  ;;  %v5409_v56 = vsel %vm1863_vm2, %v5328_v49, 0.0  ;;  %v5451_v13 = vadd.f32 %v5450_v7, %v9986_v5  ;;  %v5372_v5 = vadd.f32 %v5371_v34, %v9957_v43  ;;  %s7000_s23 = scalar_lea.vmem %s10073_s22, 256 }
 0x5c1   : > { %v4558_v28 = vadd.f32 %v4557_v10, %v4556_v37  ;;  %v5402_v50 = vadd.f32 %v5401_v26, %v5400_v31  ;;  %v5302_v20 = vpop.permute.xlu1 %5301  ;;  %v5309_v37 = vpop.permute.xlu0 %5308  ;;  %v4590_v31 = vsel %vm2148_vm10, %v4544_v8, %v4589_v30  ;;  %v5460_v30 = vadd.f32 %v5459_v44, %v5458_v47  ;;  %p7001_p4 = scmp.ne.s32.totalorder %s10073_s22, %s7000_s23  ;;  %p7008_p0 = scmp.lt.s32.totalorder %s7006_s17, %s7000_s23 }
 0x5c2   : > { %v5343_v41 = vmul.f32 %v9937_v3, %v5302_v20  ;;  %v5344_v24 = vmul.f32 %v9971_v39, %v5309_v37  ;;  %v5398_v33 = vrot.slane %v5397_v46, 1  ;;  %v5443_v7 = vrot.slane %v9984_v60, 1 }
 0x5c3   : > { %v4559_v11 = vrot.slane %v4558_v28, 2  ;;  %v5403_v29 = vrot.slane %v5402_v50, 4  ;;  %v5435_v43 = vadd.f32 %v5434_v18, %v9950_v55  ;;  %p7002_p2 = pnand %p7001_p4, %p10381_p5  ;;  %p7009_p10 = por %p7008_p0, %p7007_p11 }
 0x5c4   : > { %v5473_v0 = vsel %vm1863_vm2, %v5343_v41, 0.0  ;;  %v4591_v41 = vsel %vm2150_vm11, %v4553_v40, %v4590_v31  ;;  %v5481_v23 = vsel %vm1863_vm2, %v5344_v24, 0.0  ;;  %v5444_v31 = vadd.f32 %v5443_v7, %v9984_v60 }
 0x5c5   : > { %v4560_v14 = vadd.f32 %v4559_v11, %v4558_v28  ;;  %v5404_v25 = vadd.f32 %v5403_v29, %v5402_v50  ;;  %v5474_v3 = vadd.f32 %v5473_v0, %v5472_v36  ;;  %v5225_v62 = vpop.permute.xlu1 %5224  ;;  %v5389_v29 = vrot.slane %v5388_v48, 1  ;;  %p7003_p7 = pneg %p7002_p2 }
 0x5c6   : > { %v5329_v42 = vmul.f32 %v6641_v22, %v5225_v62  ;;  %v5452_v62 = vrot.slane %v5451_v13, 1  ;;  %v5461_v22 = vrot.slane %v5460_v30, 1 }
 0x5c7   : > { %v4561_v58 = vrot.slane %v4560_v14, 1  ;;  %v5405_v16 = vrot.slane %v5404_v25, 2  ;;  %v5475_v10 = vrot.slane %v5474_v3, 4  ;;  %v5390_v34 = vadd.f32 %v5389_v29, %v5388_v48  ;;  %p7010_p8 = pnand %p7009_p10, %p7003_p7 }
 0x5c8   : > { %v5410_v26 = vsel %vm1863_vm2, %v5329_v42, 0.0  ;;  %v5399_v42 = vadd.f32 %v5398_v33, %v5397_v46  ;;  %v5462_v18 = vadd.f32 %v5461_v22, %v5460_v30 }
 0x5c9   : > { %v5476_v28 = vadd.f32 %v5475_v10, %v5474_v3  ;;  %v5411_v50 = vadd.f32 %v5410_v26, %v5409_v56  ;;  %v5313_v53 = vpop.permute.xlu1 %5312  ;;  %v4562_v20 = vadd.f32 %v4561_v58, %v4560_v14  ;;  %v5406_v17 = vadd.f32 %v5405_v16, %v5404_v25 }
 0x5ca   : > { %v5345_v2 = vmul.f32 %v9977_v12, %v5313_v53  ;;  %v5469_v12 = vadd.f32 %v5468_v4, %v5467_v52  ;;  %v5381_v3 = vadd.f32 %v5380_v1, %v9989_v61  ;;  %v5426_v52 = vadd.f32 %v5425_v45, %v9930_v6 }
 0x5cb   : > { %v5477_v8 = vrot.slane %v5476_v28, 2  ;;  %v5412_v11 = vrot.slane %v5411_v50, 4  ;;  %v4592_v39 = vsel %vm2152_vm12, %v4562_v20, %v4591_v41  ;;  %v5407_v25 = vrot.slane %v5406_v17, 1 }
 0x5cc   : > { %v5482_v36 = vsel %vm1863_vm2, %v5345_v2, 0.0  ;;  %4595 = vrot.lane.b32.xlu1 %v4592_v39, %s7190_s27  ;;  %v5470_v58 = vrot.slane %v5469_v12, 1  ;;  %v5507_v61 = vsel %vm2142_vm7, %v5372_v5, %v9941_v54  ;;  %v5453_v26 = vadd.f32 %v5452_v62, %v5451_v13 }
 0x5cd   : > { %v5413_v49 = vadd.f32 %v5412_v11, %v5411_v50  ;;  %v5483_v0 = vadd.f32 %v5482_v36, %v5481_v23  ;;  %v3669_v14 = vpop.permute.xlu1 %3668  ;;  %v5478_v47 = vadd.f32 %v5477_v8, %v5476_v28  ;;  %v5408_v56 = vadd.f32 %v5407_v25, %v5406_v17 }
 0x5ce   : > { %3674 = vst.msk [vmem:[%s9386_s11 + $0x8] sm:$0xff] %vm3672_vm13, %v3669_v14  ;;  %v3667_v37 = vpop.permute.xlu0 %3666  ;;  %v5508_v45 = vsel %vm2144_vm8, %v5381_v3, %v5507_v61  ;;  %v5513_v55 = vsel %vm2140_vm6, %v5435_v43, %v5426_v52  ;;  %v5471_v46 = vadd.f32 %v5470_v58, %v5469_v12 }
 0x5cf   : > { %v5414_v44 = vrot.slane %v5413_v49, 2  ;;  %v5484_v40 = vrot.slane %v5483_v0, 4  ;;  %3673 = vst.msk [vmem:[%s9386_s11] sm:$0xff] %vm3672_vm13, %v3667_v37  ;;  %v5479_v24 = vrot.slane %v5478_v47, 1  ;;  %v5509_v48 = vsel %vm2146_vm9, %v5390_v34, %v5508_v45 }
 0x5d0   : > { %v5510_v53 = vsel %vm2148_vm10, %v5399_v42, %v5509_v48  ;;  %v5514_v54 = vsel %vm2142_vm7, %v5444_v31, %v5513_v55 }
 0x5d1   : > { %v5415_v16 = vadd.f32 %v5414_v44, %v5413_v49  ;;  %v5485_v10 = vadd.f32 %v5484_v40, %v5483_v0  ;;  %v5480_v60 = vadd.f32 %v5479_v24, %v5478_v47  ;;  %v5511_v20 = vsel %vm2150_vm11, %v5408_v56, %v5510_v53 }
 0x5d2   : > { %v5515_v2 = vsel %vm2144_vm8, %v5453_v26, %v5514_v54 }
 0x5d3   : > { %v5416_v4 = vrot.slane %v5415_v16, 1  ;;  %v5486_v6 = vrot.slane %v5485_v10, 2  ;;  %v5516_v41 = vsel %vm2146_vm9, %v5462_v18, %v5515_v2 }
 0x5d4   : > { %v5517_v8 = vsel %vm2148_vm10, %v5471_v46, %v5516_v41 }
 0x5d5   : > { %v5487_v28 = vadd.f32 %v5486_v6, %v5485_v10  ;;  %v5417_v50 = vadd.f32 %v5416_v4, %v5415_v16  ;;  %v5518_v11 = vsel %vm2150_vm11, %v5480_v60, %v5517_v8 }
 0x5d7   : > { %v5488_v1 = vrot.slane %v5487_v28, 1  ;;  %v5512_v17 = vsel %vm2152_vm12, %v5417_v50, %v5511_v20 }
 0x5d8   : > { %5520 = vrot.lane.b32.xlu0 %v5512_v17, %s7191_s20 }
 0x5d9   : > { %v5489_v13 = vadd.f32 %v5488_v1, %v5487_v28 }
 0x5db   : > { %v5519_v39 = vsel %vm2152_vm12, %v5489_v13, %v5518_v11 }
 0x5dc   : > { %3187 = vrot.lane.b32.xlu0 %v9728_v51, %s7192_s14  ;;  %5522 = vrot.lane.b32.xlu1 %v5519_v39, %s7191_s20 }
 0x5e0   : > { %3275 = vrot.lane.b32.xlu0 %v9731_v63, %s7193_s16  ;;  %3189 = vrot.lane.b32.xlu1 %v9723_v59, %s7192_s14 }
 0x5e4   : > { %4113 = vrot.lane.b32.xlu0 %v9850_v32, %s7189_s6  ;;  %3277 = vrot.lane.b32.xlu1 %v9725_v27, %s7193_s16 }
 0x5e8   : > { %4202 = vrot.lane.b32.xlu0 %v9852_v9, %s7194_s1  ;;  %4115 = vrot.lane.b32.xlu1 %v9845_v15, %s7189_s6 }
 0x5ec   : > { %5040 = vrot.lane.b32.xlu0 %v9922_v38, %s7194_s1  ;;  %4204 = vrot.lane.b32.xlu1 %v9847_v19, %s7194_s1 }
 0x5f0   : > { %5129 = vrot.lane.b32.xlu0 %v9928_v57, %s7195_s0  ;;  %5042 = vrot.lane.b32.xlu1 %v9917_v35, %s7194_s1 }
 0x5f4   : > { %5131 = vrot.lane.b32.xlu1 %v9920_v21, %s7195_s0 }
 0x5fe   : > { %v4594_v59 = vpop.permute.xlu0 %4593 }
 0x5ff   : > { %4600 = vst.msk [vmem:[%s9386_s11] sm:$0xff] %vm4599_vm14, %v4594_v59 }
 0x63e   : > { %v4596_v27 = vpop.permute.xlu1 %4595 }
 0x63f   : > { %4601 = vst.msk [vmem:[%s9386_s11 + $0x8] sm:$0xff] %vm4599_vm14, %v4596_v27 }
 0x64a   : > { %v5521_v51 = vpop.permute.xlu0 %5520 }
 0x64b   : > { %5527 = vst.msk [vmem:[%s9386_s11] sm:$0xff] %vm5526_vm15, %v5521_v51 }
 0x64e   : > { %v3188_v63 = vpop.permute.xlu0 %3187  ;;  %v5523_v15 = vpop.permute.xlu1 %5522 }
 0x64f   : > { %3193 = vst.msk [vmem:[%s9493_s10] sm:$0xff] %vm2003_vm5, %v3188_v63 }
 0x650   : > { %5528 = vst.msk [vmem:[%s9386_s11 + $0x8] sm:$0xff] %vm5526_vm15, %v5523_v15 }
 0x651   : > { %7013 = shalt.err (!%p7010_p8)
}
 0x652   : > { %s7014_s11 = scalar_lea.hbm %s10071_s19, 256  ;;  %s7018_s20 = scalar_lea.hbm %s10380_s12, 512 }
 0x653   : > { %p7015_p12 = scmp.ne.s32.totalorder %s10071_s19, %s7014_s11  ;;  %p7019_p9 = scmp.lt.u32.totalorder %s10071_s19, %s10380_s12 }
 0x654   : > { %p7020_p3 = scmp.lt.u32.totalorder %s7018_s20, %s7014_s11  ;;  %p7022_p4 = scmp.lt.u32.totalorder %s7014_s11, %s10071_s19 }
 0x655   : > { %p7016_p13 = pnand %p7015_p12, %p10381_p5 }
 0x656   : > { %p7021_p6 = por %p7020_p3, %p7019_p9 }
 0x657   : > { %p7017_p1 = pneg %p7016_p13 }
 0x658   : > { %p7023_p2 = por %p7022_p4, %p7021_p6 }
 0x65a   : > { %p7024_p7 = pnand %p7023_p2, %p7017_p1 }
 0x65c   : > { %7027 = shalt.err (!%p7024_p7)
}
 0x65d   : > { %s7197_s4 = smov 128   ;;  %v3276_v19 = vpop.permute.xlu0 %3275  ;;  %v3190_v32 = vpop.permute.xlu1 %3189  ;;  %vm4119_vm1 = vcmask 195712   ;;  %vm4208_vm2 = vcmask 294080   ;;  %vm5046_vm3 = vcmask 261312   ;;  %s5555_s0 = sshll.u32 %s9493_s10, 4  ;;  %vm5135_vm4 = vcmask 392480   ;;  %s10123_s0 = int_to_ptr.vmem [resolvable:$true] %s5555_s0 }
 0x65e   : > { %6403 = dma.vmem_to_hbm [thread:$0]  (%p10381_p5), %s10073_s22, 256, %s10071_s19, %s5535_s3, %s7197_s4, %s7197_s4, %s7192_s14  }
 0x65f   : > { %3282 = vst.msk [vmem:[%s9498_s5] sm:$0xff] %vm3281_vm0, %v3276_v19  ;;  %s10382_s26 = sld [smem:[#allocation61_spill]]  ;;  %s5591_s23 = sshll.u32 %s9498_s5, 4  ;;  %s10164_s23 = int_to_ptr.vmem [resolvable:$true] %s5591_s23 }
 0x660   : > { %3194 = vst.msk [vmem:[%s9493_s10 + $0x8] sm:$0xff] %vm2003_vm5, %v3190_v32  ;;  %s5530_s15 = scalar_lea.sflag [#allocation4], %s7801_s2  ;;  %s7028_s9 = scalar_lea.vmem %s10123_s0, 256 }
 0x661   : > { %v4114_v9 = vpop.permute.xlu0 %4113  ;;  %v3278_v35 = vpop.permute.xlu1 %3277  ;;  %p7029_p11 = scmp.ne.s32.totalorder %s10123_s0, %s7028_s9  ;;  %s7198_s17 = smov [#allocation21]  }
 0x662   : > { %4120 = vst.msk [vmem:[%s9493_s10] sm:$0xff] %vm4119_vm1, %v4114_v9  ;;  %s7032_s11 = sshll.u32 %s7198_s17, 4  ;;  %s7033_s11 = int_to_ptr.vmem [resolvable:$false] %s7032_s11 }
 0x663   : > { %3283 = vst.msk [vmem:[%s9498_s5 + $0x8] sm:$0xff] %vm3281_vm0, %v3278_v35  ;;  %p7030_p0 = pnand %p7029_p11, %p10381_p5  ;;  %s7034_s6 = scalar_lea.vmem %s7033_s11, 512 }
 0x664   : > { %p7035_p8 = scmp.lt.s32.totalorder %s10123_s0, %s7033_s11  ;;  %p7036_p12 = scmp.lt.s32.totalorder %s7034_s6, %s7028_s9 }
 0x665   : > { %v4203_v21 = vpop.permute.xlu0 %4202  ;;  %v4116_v38 = vpop.permute.xlu1 %4115  ;;  %s10121_s19 = scalar_lea.hbm %s10382_s26, %s10063_s18  ;;  %p7031_p10 = pneg %p7030_p0 }
 0x666   : > { %4209 = vst.msk [vmem:[%s9498_s5] sm:$0xff] %vm4208_vm2, %v4203_v21  ;;  %p7037_p13 = por %p7036_p12, %p7035_p8 }
 0x667   : > { %4121 = vst.msk [vmem:[%s9493_s10 + $0x8] sm:$0xff] %vm4119_vm1, %v4116_v38 }
 0x668   : > { %p7038_p1 = pnand %p7037_p13, %p7031_p10 }
 0x669   : > { %v5041_v57 = vpop.permute.xlu0 %5040  ;;  %v4205_v29 = vpop.permute.xlu1 %4204 }
 0x66a   : > { %5047 = vst.msk [vmem:[%s9493_s10] sm:$0xff] %vm5046_vm3, %v5041_v57 }
 0x66b   : > { %4210 = vst.msk [vmem:[%s9498_s5 + $0x8] sm:$0xff] %vm4208_vm2, %v4205_v29 }
 0x66d   : > { %v5130_v30 = vpop.permute.xlu0 %5129  ;;  %v5043_v23 = vpop.permute.xlu1 %5042 }
 0x66e   : > { %5136 = vst.msk [vmem:[%s9498_s5] sm:$0xff] %vm5135_vm4, %v5130_v30 }
 0x66f   : > { %5048 = vst.msk [vmem:[%s9493_s10 + $0x8] sm:$0xff] %vm5046_vm3, %v5043_v23 }
 0x670   : > { %7041 = shalt.err (!%p7038_p1)
}
 0x671   : > { %s7042_s10 = scalar_lea.hbm %s10121_s19, 256  ;;  %s7046_s16 = scalar_lea.hbm %s10382_s26, 512 }
 0x672   : > { %p7043_p9 = scmp.ne.s32.totalorder %s10121_s19, %s7042_s10  ;;  %p7047_p4 = scmp.lt.u32.totalorder %s10121_s19, %s10382_s26 }
 0x673   : > { %p7048_p2 = scmp.lt.u32.totalorder %s7046_s16, %s7042_s10  ;;  %p7050_p11 = scmp.lt.u32.totalorder %s7042_s10, %s10121_s19 }
 0x674   : > { %p7044_p3 = pnand %p7043_p9, %p10381_p5 }
 0x675   : > { %p7049_p7 = por %p7048_p2, %p7047_p4 }
 0x676   : > { %p7045_p6 = pneg %p7044_p3 }
 0x677   : > { %p7051_p0 = por %p7050_p11, %p7049_p7 }
 0x679   : > { %p7052_p10 = pnand %p7051_p0, %p7045_p6 }
 0x67b   : > { %7055 = shalt.err (!%p7052_p10)
}
 0x67c   : > { %6402 = dma.vmem_to_hbm [thread:$0]  (%p10381_p5), %s10123_s0, 256, %s10121_s19, %s5530_s15, %s7197_s4, %s7197_s4, %s7192_s14   ;;  %v5132_v36 = vpop.permute.xlu1 %5131 }
 0x67d   : > { %s10383_s17 = sld [smem:[#allocation63_spill]]  ;;  %5137 = vst.msk [vmem:[%s9498_s5 + $0x8] sm:$0xff] %vm5135_vm4, %v5132_v36  ;;  %s7056_s2 = scalar_lea.vmem %s10164_s23, 256 }
 0x67e   : > { %p7057_p8 = scmp.ne.s32.totalorder %s10164_s23, %s7056_s2  ;;  %s7199_s0 = smov [#allocation24]  }
 0x67f   : > { %s7060_s19 = sshll.u32 %s7199_s0, 4  ;;  %s7061_s19 = int_to_ptr.vmem [resolvable:$false] %s7060_s19 }
 0x680   : > { %p7058_p12 = pnand %p7057_p8, %p10381_p5  ;;  %s7062_s15 = scalar_lea.vmem %s7061_s19, 512 }
 0x681   : > { %p7063_p1 = scmp.lt.s32.totalorder %s10164_s23, %s7061_s19  ;;  %p7064_p9 = scmp.lt.s32.totalorder %s7062_s15, %s7056_s2 }
 0x682   : > { %p7059_p13 = pneg %p7058_p12 }
 0x683   : > { %s10384_s11 = smov %s10383_s17  ;;  %s10160_s6 = scalar_lea.hbm %s10383_s17, %s10063_s18 }
 0x684   : > { %p7065_p3 = por %p7064_p9, %p7063_p1 }
 0x686   : > { %p7066_p6 = pnand %p7065_p3, %p7059_p13 }
 0x688   : > { %7069 = shalt.err (!%p7066_p6)
}
 0x689   : > { %s7070_s5 = scalar_lea.hbm %s10160_s6, 256  ;;  %s7074_s27 = scalar_lea.hbm %s10384_s11, 512 }
 0x68a   : > { %p7071_p4 = scmp.ne.s32.totalorder %s10160_s6, %s7070_s5  ;;  %p7075_p11 = scmp.lt.u32.totalorder %s10160_s6, %s10384_s11 }
 0x68b   : > { %p7076_p0 = scmp.lt.u32.totalorder %s7074_s27, %s7070_s5  ;;  %p7078_p8 = scmp.lt.u32.totalorder %s7070_s5, %s10160_s6 }
 0x68c   : > { %p7072_p2 = pnand %p7071_p4, %p10381_p5 }
 0x68d   : > { %p7077_p10 = por %p7076_p0, %p7075_p11 }
 0x68e   : > { %p7073_p7 = pneg %p7072_p2 }
 0x68f   : > { %p7079_p12 = por %p7078_p8, %p7077_p10 }
 0x691   : > { %p7080_p13 = pnand %p7079_p12, %p7073_p7 }
 0x693   : > { %7083 = shalt.err (!%p7080_p13)
}
 0x694   : > { %6404 = dma.vmem_to_hbm [thread:$0]  (%p10381_p5), %s10164_s23, 256, %s10160_s6, %s5535_s3, %s7197_s4, %s7197_s4, %s7192_s14  }
 0x695 PF: > { %s10385_s1 = sld [smem:[#allocation38_spill]]  ;;  %s5606_s22 = sand.u32 1, %s7150_s29  }
 0x696   : > { %p10386_p1 = scmp.ne.s32.totalorder %s10320_s8, 0  ;;  %s5607_s25 = scalar_lea.sflag [#allocation4], %s5606_s22 }
 0x69b   : > { %p10387_p9 = scmp.ge.s32.totalorder %s10385_s1, 2 }
 0x69d   : > { %p6447_p3 = pnand %p10387_p9, %p10386_p1 }
 0x69f   : > { %7141 = dma.done.wait (!%p6447_p3), %s5607_s25, 256  }
 0x6a0   : > { %7143 = vsyncadd (!%p6447_p3), %s5607_s25, 4294967040  ;;  %s10388_s21 = sadd.s32 4294967294, %s10385_s1  }
 0x6a1   : > { %s5615_s9 = sand.u32 1, %s10388_s21  }
 0x6a2   : > { %s5616_s17 = scalar_lea.sflag [#allocation23], %s5615_s9 }
 0x6a3   : > { %7145 = dma.done.wait (!%p6447_p3), %s5616_s17, 512  }
 0x6a4   : > { %7147 = vsyncadd (!%p6447_p3), %s5616_s17, 4294966784  ;;  %s47_s18 = sadd.s32 1, %s10385_s1   ;;  %s10389_s13 = sld [smem:[#allocation35_spill]] }
 0x6a5   : > { %p44_p5 = scmp.ge.s32.totalorder %s47_s18, 4   ;;  %s10390_s15 = sld [smem:[#allocation40_spill]] }
 0x6a6   : > { %s10391_s16 = sld [smem:[#allocation37_spill]]  ;;  %s10392_s17 = sld [smem:[#allocation39_spill]] }
 0x6a7   : > { %s10393_s29 = smov %s7154_s30  ;;  %46 = sbr.rel (!%p44_p5) target bundleno = 33 (0x21), region = 273 }
 0x6aa   : > { %s10394_s30 = smov %s10389_s13 }
 0x6ae   :  { %5630 = vsyncpa [#allocation3], 1 }
 0x6af   :  { %5632 = vsyncpa [#allocation3 + $0x1], 1 }
 0x6b0   :  { %5633 = vsyncpa [#allocation6], 1 }
 0x6b1   :  { %5635 = vsyncpa [#allocation6 + $0x1], 1 }
 0x6b2   :  { %5636 = vsyncpa [#allocation9], 1 }
 0x6b3   :  { %5638 = vsyncpa [#allocation9 + $0x1], 1 }
 0x6b4   :  { %5639 = vsyncpa [#allocation12], 1 }
 0x6b5   :  { %5641 = vsyncpa [#allocation12 + $0x1], 1 }
 0x6b6   :  { %5642 = vsyncpa [#allocation15], 1 }
 0x6b7   :  { %5644 = vsyncpa [#allocation15 + $0x1], 1 }
 0x6b8   :  { %5645 = vsyncpa [#allocation18], 1 }
 0x6b9   :  { %5646 = vsyncpa [#allocation4], 1 }
 0x6ba   :  { %5648 = vsyncpa [#allocation4 + $0x1], 1 }
 0x6bb   :  { %5649 = vsyncpa [#allocation23], 1 }
 0x6bc   :  { %5651 = vsyncpa [#allocation23 + $0x1], 1 }

</bundles_post_ra>
